<compile_context>
chip_gen: v7x
topology: tpu7x:2x2x1
jax: 0.10.0
libtpu: 0.0.40
codegen_flags: <defaults>
</compile_context>

<pallas_src>
import functools

import jax
import jax.numpy as jnp
from jax.experimental import pallas as pl
from jax.experimental.pallas import tpu as pltpu


def _pick_vmem_limit():
    """Generation-aware scoped-VMEM request (bytes)."""
    try:
        phys = int(pltpu.get_tpu_info().vmem_capacity_bytes)
    except Exception:
        phys = 0
    if phys <= 0:
        return 32 << 20                      # safe default on every generation
    # v7x (64 MiB physical) -> 32 MiB; v5e/v6e (128 MiB physical) -> 64 MiB.
    return max(24 << 20, min(phys // 2, 96 << 20))


def _spatial_attention_kernel(x_ref, w_ref, o_ref, *, C, K, H, Ws_out):
    """One lane-packed slab per grid step.

    x_ref : (1, C, Hp, Ws_in)  VMEM  pre-padded, lane-packed input (wrapper-built)
    w_ref : (C*K*K,)           SMEM  folded C x K x K -> 1 conv weights
    o_ref : (1, H, Ws_out)     VMEM  lane-dense (Ws_out % 128 == 0) output slab
    """
    # K independent per-dh accumulators over the full slab height: breaks the
    # 196-deep serial add chain into K parallel chains for the 4 VALU slots.
    parts = [None] * K
    for ci in range(C):
        # One VMEM load per channel; all shifted views below are slices of this
        # register-resident value (no per-tap ref loads).
        slab = x_ref[0, ci, :, :]                        # (Hp, Ws_in)
        for dw in range(K):
            # Lane shift computed once per (ci, dw), reused across all K dh
            # taps.  Wrap-free: the wrapper appended an extra zero lane-tile.
            shifted = slab[:, dw:dw + Ws_out]            # (Hp, Ws_out)
            for dh in range(K):
                wv = w_ref[ci * K * K + dh * K + dw]     # SMEM scalar (hidden under VALU)
                term = wv * shifted
                parts[dh] = term if parts[dh] is None else parts[dh] + term
    # Combine per-dh partials: out[h, :] = sum_dh parts[dh][h + dh, :].
    acc = parts[0][:H, :]
    for dh in range(1, K):
        acc = acc + parts[dh][dh:dh + H, :]
    # Lane-dense, unmasked full-row store; tail columns (beyond the packed
    # content) are garbage and cropped by the wrapper unpack.
    o_ref[...] = jax.nn.sigmoid(acc)[None, :, :]


def spatial_attention_pallas(x, w1a, w1b, w2a, w2b, w3):
    """x: (N, C, H, W).  Weights in PyTorch OIHW layout (all bias-free)."""
    N, C, H, W = x.shape
    k1 = w1a.shape[-1]
    k2 = w2a.shape[-1]
    K = max(k1, k2)
    pad = K // 2
    Hp, Wp = H + 2 * pad, W + 2 * pad
    f32 = jnp.float32

    # ---- fold 3x3->1x1, 7x7->1x1 and the final 2->1 conv into one (C,K,K) ----
    def center_pad(w, k):
        p = (K - k) // 2
        return jnp.pad(w, ((0, 0), (p, K - k - p), (p, K - k - p)))

    w_eff1 = jnp.einsum('o,oihw->ihw', w1b.reshape(-1).astype(f32),
                        w1a.astype(f32))                    # (C, k1, k1)
    w_eff2 = jnp.einsum('o,oihw->ihw', w2b.reshape(-1).astype(f32),
                        w2a.astype(f32))                    # (C, k2, k2)
    w3v = w3.reshape(-1).astype(f32)
    w_total = w3v[0] * center_pad(w_eff1, k1) + w3v[1] * center_pad(w_eff2, k2)
    w_flat = w_total.reshape(-1)                            # (C*K*K,) for SMEM

    vmem_limit = _pick_vmem_limit()
    budget = vmem_limit // 2

    # ---- choose how many images to lane-pack per grid step -------------------
    # Packed width capped at 128 lanes to keep the K per-dh accumulators in
    # vregs; ensure >= 2 grid steps when N >= 2 so v7x can use both TCs.
    Nb = max(1, min(N, 128 // Wp))
    if N >= 2:
        Nb = min(Nb, (N + 1) // 2)

    def blk_bytes(nb):
        ws_out = 128 * (-(-(nb * Wp) // 128))
        ws_in = ws_out + 128
        return 4 * (2 * C * Hp * ws_in + 2 * H * ws_out)   # double-buffered in/out

    while Nb > 1 and blk_bytes(Nb) > budget:
        Nb -= 1

    G = -(-N // Nb)
    Npad = G * Nb
    Wpack = Nb * Wp
    Ws_out = 128 * (-(-Wpack // 128))        # lane-dense output width
    Ws_in = Ws_out + 128                     # extra zero lane-tile: wrap-free dw shifts

    # ---- pre-pad + lane-pack in the wrapper (no in-kernel scatter work) -------
    xpk = jnp.pad(x.astype(f32),
                  ((0, Npad - N), (0, 0), (pad, pad), (pad, pad)))   # (Npad,C,Hp,Wp)
    xpk = xpk.reshape(G, Nb, C, Hp, Wp).transpose(0, 2, 3, 1, 4)
    xpk = xpk.reshape(G, C, Hp, Wpack)
    xpk = jnp.pad(xpk, ((0, 0), (0, 0), (0, 0), (0, Ws_in - Wpack)))

    kern = functools.partial(_spatial_attention_kernel, C=C, K=K, H=H, Ws_out=Ws_out)

    out_packed = pl.pallas_call(
        kern,
        out_shape=jax.ShapeDtypeStruct((G, H, Ws_out), f32),
        grid=(G,),
        in_specs=[
            pl.BlockSpec((1, C, Hp, Ws_in), lambda g: (g, 0, 0, 0)),
            pl.BlockSpec(memory_space=pltpu.MemorySpace.SMEM),
        ],
        out_specs=pl.BlockSpec((1, H, Ws_out), lambda g: (g, 0, 0)),
        compiler_params=pltpu.CompilerParams(
            dimension_semantics=("parallel",),       # independent steps -> v7x 2 TCs
            vmem_limit_bytes=vmem_limit),
    )(xpk, w_flat)

    # ---- un-pack the lane-packed slabs back to NCHW ---------------------------
    out = out_packed[:, :, :Wpack].reshape(G, H, Nb, Wp)[:, :, :, :W]
    out = out.transpose(0, 2, 1, 3).reshape(Npad, H, W)[:N]
    return out[:, None, :, :]


def spatial_attention_ref(x, w1a, w1b, w2a, w2b, w3):
    """Pure-JAX reference matching the PyTorch forward."""
    dn = ("NCHW", "OIHW", "NCHW")
    hp = jax.lax.Precision.HIGHEST
    conv = functools.partial(jax.lax.conv_general_dilated,
                             window_strides=(1, 1), dimension_numbers=dn,
                             precision=hp)
    c1 = conv(x, w1a, padding=((1, 1), (1, 1)))
    mask1 = conv(c1, w1b, padding=((0, 0), (0, 0)))
    c2 = conv(x, w2a, padding=((3, 3), (3, 3)))
    mask2 = conv(c2, w2b, padding=((0, 0), (0, 0)))
    cat = jnp.concatenate([mask1, mask2], axis=1)
    z = conv(cat, w3, padding=((0, 0), (0, 0)))
    return jax.nn.sigmoid(z)


if __name__ == "__main__":
    N, C, H, W = 2, 4, 16, 16
    key = jax.random.PRNGKey(0)
    kx, k1a, k1b, k2a, k2b, k3 = jax.random.split(key, 6)

    x = jax.random.normal(kx, (N, C, H, W), jnp.float32)
    # Deterministic synthetic weights (PyTorch OIHW layout, no bias anywhere).
    w1a = 0.2 * jax.random.normal(k1a, (C, C, 3, 3), jnp.float32)   # conv1[0]
    w1b = 0.2 * jax.random.normal(k1b, (1, C, 1, 1), jnp.float32)   # conv1[1]
    w2a = 0.2 * jax.random.normal(k2a, (C, C, 7, 7), jnp.float32)   # conv2[0]
    w2b = 0.2 * jax.random.normal(k2b, (1, C, 1, 1), jnp.float32)   # conv2[1]
    w3 = 0.2 * jax.random.normal(k3, (1, 2, 1, 1), jnp.float32)     # conv3

    out = jax.block_until_ready(
        spatial_attention_pallas(x, w1a, w1b, w2a, w2b, w3))
    ref = jax.block_until_ready(
        spatial_attention_ref(x, w1a, w1b, w2a, w2b, w3))

    assert out.shape == (N, 1, H, W), out.shape
    assert jnp.allclose(out, ref, rtol=1e-5, atol=2e-5), (
        float(jnp.max(jnp.abs(out - ref))))
    print("KERNEL_OK")
</pallas_src>

<mosaic_0001>
module attributes {stable_mosaic.version = 11 : i64} {
  func.func @_spatial_attention_kernel(%arg0: i32, %arg1: memref<1x4x22x256xf32, #tpu.memory_space<vmem>>, %arg2: memref<196xf32, #tpu.memory_space<smem>>, %arg3: memref<1x16x128xf32, #tpu.memory_space<vmem>>) attributes {dimension_semantics = [#tpu.dimension_semantics<parallel>], iteration_bounds = array<i64: 2>, scalar_prefetch = 0 : i64, scratch_operands = 0 : i64, tpu.core_type = #tpu.core_type<tc>, window_params = [{transform_indices = @transform_0, window_bounds = array<i64: 1, 4, 22, 256>}, {transform_indices = @transform_1, window_bounds = array<i64: 196>}, {transform_indices = @transform_2, window_bounds = array<i64: 1, 16, 128>}]} {
    %c0 = arith.constant 0 : index
    %c0_0 = arith.constant 0 : index
    %c0_1 = arith.constant 0 : index
    %c0_2 = arith.constant 0 : index
    %0 = vector.load %arg1[%c0, %c0_0, %c0_1, %c0_2] : memref<1x4x22x256xf32, #tpu.memory_space<vmem>>, vector<1x1x22x256xf32>
    %1 = vector.shape_cast %0 : vector<1x1x22x256xf32> to vector<22x256xf32>
    %2 = vector.extract_strided_slice %1 {offsets = [0, 0], sizes = [22, 128], strides = [1, 1]} : vector<22x256xf32> to vector<22x128xf32>
    %c0_3 = arith.constant 0 : index
    %3 = memref.load %arg2[%c0_3] : memref<196xf32, #tpu.memory_space<smem>>
    %4 = vector.broadcast %3 : f32 to vector<22x128xf32>
    %5 = arith.mulf %4, %2 : vector<22x128xf32>
    %c7 = arith.constant 7 : index
    %6 = memref.load %arg2[%c7] : memref<196xf32, #tpu.memory_space<smem>>
    %7 = vector.broadcast %6 : f32 to vector<22x128xf32>
    %8 = arith.mulf %7, %2 : vector<22x128xf32>
    %c14 = arith.constant 14 : index
    %9 = memref.load %arg2[%c14] : memref<196xf32, #tpu.memory_space<smem>>
    %10 = vector.broadcast %9 : f32 to vector<22x128xf32>
    %11 = arith.mulf %10, %2 : vector<22x128xf32>
    %c21 = arith.constant 21 : index
    %12 = memref.load %arg2[%c21] : memref<196xf32, #tpu.memory_space<smem>>
    %13 = vector.broadcast %12 : f32 to vector<22x128xf32>
    %14 = arith.mulf %13, %2 : vector<22x128xf32>
    %c28 = arith.constant 28 : index
    %15 = memref.load %arg2[%c28] : memref<196xf32, #tpu.memory_space<smem>>
    %16 = vector.broadcast %15 : f32 to vector<22x128xf32>
    %17 = arith.mulf %16, %2 : vector<22x128xf32>
    %c35 = arith.constant 35 : index
    %18 = memref.load %arg2[%c35] : memref<196xf32, #tpu.memory_space<smem>>
    %19 = vector.broadcast %18 : f32 to vector<22x128xf32>
    %20 = arith.mulf %19, %2 : vector<22x128xf32>
    %c42 = arith.constant 42 : index
    %21 = memref.load %arg2[%c42] : memref<196xf32, #tpu.memory_space<smem>>
    %22 = vector.broadcast %21 : f32 to vector<22x128xf32>
    %23 = arith.mulf %22, %2 : vector<22x128xf32>
    %24 = vector.extract_strided_slice %1 {offsets = [0, 1], sizes = [22, 128], strides = [1, 1]} : vector<22x256xf32> to vector<22x128xf32>
    %c1 = arith.constant 1 : index
    %25 = memref.load %arg2[%c1] : memref<196xf32, #tpu.memory_space<smem>>
    %26 = vector.broadcast %25 : f32 to vector<22x128xf32>
    %27 = arith.mulf %26, %24 : vector<22x128xf32>
    %28 = arith.addf %5, %27 : vector<22x128xf32>
    %c8 = arith.constant 8 : index
    %29 = memref.load %arg2[%c8] : memref<196xf32, #tpu.memory_space<smem>>
    %30 = vector.broadcast %29 : f32 to vector<22x128xf32>
    %31 = arith.mulf %30, %24 : vector<22x128xf32>
    %32 = arith.addf %8, %31 : vector<22x128xf32>
    %c15 = arith.constant 15 : index
    %33 = memref.load %arg2[%c15] : memref<196xf32, #tpu.memory_space<smem>>
    %34 = vector.broadcast %33 : f32 to vector<22x128xf32>
    %35 = arith.mulf %34, %24 : vector<22x128xf32>
    %36 = arith.addf %11, %35 : vector<22x128xf32>
    %c22 = arith.constant 22 : index
    %37 = memref.load %arg2[%c22] : memref<196xf32, #tpu.memory_space<smem>>
    %38 = vector.broadcast %37 : f32 to vector<22x128xf32>
    %39 = arith.mulf %38, %24 : vector<22x128xf32>
    %40 = arith.addf %14, %39 : vector<22x128xf32>
    %c29 = arith.constant 29 : index
    %41 = memref.load %arg2[%c29] : memref<196xf32, #tpu.memory_space<smem>>
    %42 = vector.broadcast %41 : f32 to vector<22x128xf32>
    %43 = arith.mulf %42, %24 : vector<22x128xf32>
    %44 = arith.addf %17, %43 : vector<22x128xf32>
    %c36 = arith.constant 36 : index
    %45 = memref.load %arg2[%c36] : memref<196xf32, #tpu.memory_space<smem>>
    %46 = vector.broadcast %45 : f32 to vector<22x128xf32>
    %47 = arith.mulf %46, %24 : vector<22x128xf32>
    %48 = arith.addf %20, %47 : vector<22x128xf32>
    %c43 = arith.constant 43 : index
    %49 = memref.load %arg2[%c43] : memref<196xf32, #tpu.memory_space<smem>>
    %50 = vector.broadcast %49 : f32 to vector<22x128xf32>
    %51 = arith.mulf %50, %24 : vector<22x128xf32>
    %52 = arith.addf %23, %51 : vector<22x128xf32>
    %53 = vector.extract_strided_slice %1 {offsets = [0, 2], sizes = [22, 128], strides = [1, 1]} : vector<22x256xf32> to vector<22x128xf32>
    %c2 = arith.constant 2 : index
    %54 = memref.load %arg2[%c2] : memref<196xf32, #tpu.memory_space<smem>>
    %55 = vector.broadcast %54 : f32 to vector<22x128xf32>
    %56 = arith.mulf %55, %53 : vector<22x128xf32>
    %57 = arith.addf %28, %56 : vector<22x128xf32>
    %c9 = arith.constant 9 : index
    %58 = memref.load %arg2[%c9] : memref<196xf32, #tpu.memory_space<smem>>
    %59 = vector.broadcast %58 : f32 to vector<22x128xf32>
    %60 = arith.mulf %59, %53 : vector<22x128xf32>
    %61 = arith.addf %32, %60 : vector<22x128xf32>
    %c16 = arith.constant 16 : index
    %62 = memref.load %arg2[%c16] : memref<196xf32, #tpu.memory_space<smem>>
    %63 = vector.broadcast %62 : f32 to vector<22x128xf32>
    %64 = arith.mulf %63, %53 : vector<22x128xf32>
    %65 = arith.addf %36, %64 : vector<22x128xf32>
    %c23 = arith.constant 23 : index
    %66 = memref.load %arg2[%c23] : memref<196xf32, #tpu.memory_space<smem>>
    %67 = vector.broadcast %66 : f32 to vector<22x128xf32>
    %68 = arith.mulf %67, %53 : vector<22x128xf32>
    %69 = arith.addf %40, %68 : vector<22x128xf32>
    %c30 = arith.constant 30 : index
    %70 = memref.load %arg2[%c30] : memref<196xf32, #tpu.memory_space<smem>>
    %71 = vector.broadcast %70 : f32 to vector<22x128xf32>
    %72 = arith.mulf %71, %53 : vector<22x128xf32>
    %73 = arith.addf %44, %72 : vector<22x128xf32>
    %c37 = arith.constant 37 : index
    %74 = memref.load %arg2[%c37] : memref<196xf32, #tpu.memory_space<smem>>
    %75 = vector.broadcast %74 : f32 to vector<22x128xf32>
    %76 = arith.mulf %75, %53 : vector<22x128xf32>
    %77 = arith.addf %48, %76 : vector<22x128xf32>
    %c44 = arith.constant 44 : index
    %78 = memref.load %arg2[%c44] : memref<196xf32, #tpu.memory_space<smem>>
    %79 = vector.broadcast %78 : f32 to vector<22x128xf32>
    %80 = arith.mulf %79, %53 : vector<22x128xf32>
    %81 = arith.addf %52, %80 : vector<22x128xf32>
    %82 = vector.extract_strided_slice %1 {offsets = [0, 3], sizes = [22, 128], strides = [1, 1]} : vector<22x256xf32> to vector<22x128xf32>
    %c3 = arith.constant 3 : index
    %83 = memref.load %arg2[%c3] : memref<196xf32, #tpu.memory_space<smem>>
    %84 = vector.broadcast %83 : f32 to vector<22x128xf32>
    %85 = arith.mulf %84, %82 : vector<22x128xf32>
    %86 = arith.addf %57, %85 : vector<22x128xf32>
    %c10 = arith.constant 10 : index
    %87 = memref.load %arg2[%c10] : memref<196xf32, #tpu.memory_space<smem>>
    %88 = vector.broadcast %87 : f32 to vector<22x128xf32>
    %89 = arith.mulf %88, %82 : vector<22x128xf32>
    %90 = arith.addf %61, %89 : vector<22x128xf32>
    %c17 = arith.constant 17 : index
    %91 = memref.load %arg2[%c17] : memref<196xf32, #tpu.memory_space<smem>>
    %92 = vector.broadcast %91 : f32 to vector<22x128xf32>
    %93 = arith.mulf %92, %82 : vector<22x128xf32>
    %94 = arith.addf %65, %93 : vector<22x128xf32>
    %c24 = arith.constant 24 : index
    %95 = memref.load %arg2[%c24] : memref<196xf32, #tpu.memory_space<smem>>
    %96 = vector.broadcast %95 : f32 to vector<22x128xf32>
    %97 = arith.mulf %96, %82 : vector<22x128xf32>
    %98 = arith.addf %69, %97 : vector<22x128xf32>
    %c31 = arith.constant 31 : index
    %99 = memref.load %arg2[%c31] : memref<196xf32, #tpu.memory_space<smem>>
    %100 = vector.broadcast %99 : f32 to vector<22x128xf32>
    %101 = arith.mulf %100, %82 : vector<22x128xf32>
    %102 = arith.addf %73, %101 : vector<22x128xf32>
    %c38 = arith.constant 38 : index
    %103 = memref.load %arg2[%c38] : memref<196xf32, #tpu.memory_space<smem>>
    %104 = vector.broadcast %103 : f32 to vector<22x128xf32>
    %105 = arith.mulf %104, %82 : vector<22x128xf32>
    %106 = arith.addf %77, %105 : vector<22x128xf32>
    %c45 = arith.constant 45 : index
    %107 = memref.load %arg2[%c45] : memref<196xf32, #tpu.memory_space<smem>>
    %108 = vector.broadcast %107 : f32 to vector<22x128xf32>
    %109 = arith.mulf %108, %82 : vector<22x128xf32>
    %110 = arith.addf %81, %109 : vector<22x128xf32>
    %111 = vector.extract_strided_slice %1 {offsets = [0, 4], sizes = [22, 128], strides = [1, 1]} : vector<22x256xf32> to vector<22x128xf32>
    %c4 = arith.constant 4 : index
    %112 = memref.load %arg2[%c4] : memref<196xf32, #tpu.memory_space<smem>>
    %113 = vector.broadcast %112 : f32 to vector<22x128xf32>
    %114 = arith.mulf %113, %111 : vector<22x128xf32>
    %115 = arith.addf %86, %114 : vector<22x128xf32>
    %c11 = arith.constant 11 : index
    %116 = memref.load %arg2[%c11] : memref<196xf32, #tpu.memory_space<smem>>
    %117 = vector.broadcast %116 : f32 to vector<22x128xf32>
    %118 = arith.mulf %117, %111 : vector<22x128xf32>
    %119 = arith.addf %90, %118 : vector<22x128xf32>
    %c18 = arith.constant 18 : index
    %120 = memref.load %arg2[%c18] : memref<196xf32, #tpu.memory_space<smem>>
    %121 = vector.broadcast %120 : f32 to vector<22x128xf32>
    %122 = arith.mulf %121, %111 : vector<22x128xf32>
    %123 = arith.addf %94, %122 : vector<22x128xf32>
    %c25 = arith.constant 25 : index
    %124 = memref.load %arg2[%c25] : memref<196xf32, #tpu.memory_space<smem>>
    %125 = vector.broadcast %124 : f32 to vector<22x128xf32>
    %126 = arith.mulf %125, %111 : vector<22x128xf32>
    %127 = arith.addf %98, %126 : vector<22x128xf32>
    %c32 = arith.constant 32 : index
    %128 = memref.load %arg2[%c32] : memref<196xf32, #tpu.memory_space<smem>>
    %129 = vector.broadcast %128 : f32 to vector<22x128xf32>
    %130 = arith.mulf %129, %111 : vector<22x128xf32>
    %131 = arith.addf %102, %130 : vector<22x128xf32>
    %c39 = arith.constant 39 : index
    %132 = memref.load %arg2[%c39] : memref<196xf32, #tpu.memory_space<smem>>
    %133 = vector.broadcast %132 : f32 to vector<22x128xf32>
    %134 = arith.mulf %133, %111 : vector<22x128xf32>
    %135 = arith.addf %106, %134 : vector<22x128xf32>
    %c46 = arith.constant 46 : index
    %136 = memref.load %arg2[%c46] : memref<196xf32, #tpu.memory_space<smem>>
    %137 = vector.broadcast %136 : f32 to vector<22x128xf32>
    %138 = arith.mulf %137, %111 : vector<22x128xf32>
    %139 = arith.addf %110, %138 : vector<22x128xf32>
    %140 = vector.extract_strided_slice %1 {offsets = [0, 5], sizes = [22, 128], strides = [1, 1]} : vector<22x256xf32> to vector<22x128xf32>
    %c5 = arith.constant 5 : index
    %141 = memref.load %arg2[%c5] : memref<196xf32, #tpu.memory_space<smem>>
    %142 = vector.broadcast %141 : f32 to vector<22x128xf32>
    %143 = arith.mulf %142, %140 : vector<22x128xf32>
    %144 = arith.addf %115, %143 : vector<22x128xf32>
    %c12 = arith.constant 12 : index
    %145 = memref.load %arg2[%c12] : memref<196xf32, #tpu.memory_space<smem>>
    %146 = vector.broadcast %145 : f32 to vector<22x128xf32>
    %147 = arith.mulf %146, %140 : vector<22x128xf32>
    %148 = arith.addf %119, %147 : vector<22x128xf32>
    %c19 = arith.constant 19 : index
    %149 = memref.load %arg2[%c19] : memref<196xf32, #tpu.memory_space<smem>>
    %150 = vector.broadcast %149 : f32 to vector<22x128xf32>
    %151 = arith.mulf %150, %140 : vector<22x128xf32>
    %152 = arith.addf %123, %151 : vector<22x128xf32>
    %c26 = arith.constant 26 : index
    %153 = memref.load %arg2[%c26] : memref<196xf32, #tpu.memory_space<smem>>
    %154 = vector.broadcast %153 : f32 to vector<22x128xf32>
    %155 = arith.mulf %154, %140 : vector<22x128xf32>
    %156 = arith.addf %127, %155 : vector<22x128xf32>
    %c33 = arith.constant 33 : index
    %157 = memref.load %arg2[%c33] : memref<196xf32, #tpu.memory_space<smem>>
    %158 = vector.broadcast %157 : f32 to vector<22x128xf32>
    %159 = arith.mulf %158, %140 : vector<22x128xf32>
    %160 = arith.addf %131, %159 : vector<22x128xf32>
    %c40 = arith.constant 40 : index
    %161 = memref.load %arg2[%c40] : memref<196xf32, #tpu.memory_space<smem>>
    %162 = vector.broadcast %161 : f32 to vector<22x128xf32>
    %163 = arith.mulf %162, %140 : vector<22x128xf32>
    %164 = arith.addf %135, %163 : vector<22x128xf32>
    %c47 = arith.constant 47 : index
    %165 = memref.load %arg2[%c47] : memref<196xf32, #tpu.memory_space<smem>>
    %166 = vector.broadcast %165 : f32 to vector<22x128xf32>
    %167 = arith.mulf %166, %140 : vector<22x128xf32>
    %168 = arith.addf %139, %167 : vector<22x128xf32>
    %169 = vector.extract_strided_slice %1 {offsets = [0, 6], sizes = [22, 128], strides = [1, 1]} : vector<22x256xf32> to vector<22x128xf32>
    %c6 = arith.constant 6 : index
    %170 = memref.load %arg2[%c6] : memref<196xf32, #tpu.memory_space<smem>>
    %171 = vector.broadcast %170 : f32 to vector<22x128xf32>
    %172 = arith.mulf %171, %169 : vector<22x128xf32>
    %173 = arith.addf %144, %172 : vector<22x128xf32>
    %c13 = arith.constant 13 : index
    %174 = memref.load %arg2[%c13] : memref<196xf32, #tpu.memory_space<smem>>
    %175 = vector.broadcast %174 : f32 to vector<22x128xf32>
    %176 = arith.mulf %175, %169 : vector<22x128xf32>
    %177 = arith.addf %148, %176 : vector<22x128xf32>
    %c20 = arith.constant 20 : index
    %178 = memref.load %arg2[%c20] : memref<196xf32, #tpu.memory_space<smem>>
    %179 = vector.broadcast %178 : f32 to vector<22x128xf32>
    %180 = arith.mulf %179, %169 : vector<22x128xf32>
    %181 = arith.addf %152, %180 : vector<22x128xf32>
    %c27 = arith.constant 27 : index
    %182 = memref.load %arg2[%c27] : memref<196xf32, #tpu.memory_space<smem>>
    %183 = vector.broadcast %182 : f32 to vector<22x128xf32>
    %184 = arith.mulf %183, %169 : vector<22x128xf32>
    %185 = arith.addf %156, %184 : vector<22x128xf32>
    %c34 = arith.constant 34 : index
    %186 = memref.load %arg2[%c34] : memref<196xf32, #tpu.memory_space<smem>>
    %187 = vector.broadcast %186 : f32 to vector<22x128xf32>
    %188 = arith.mulf %187, %169 : vector<22x128xf32>
    %189 = arith.addf %160, %188 : vector<22x128xf32>
    %c41 = arith.constant 41 : index
    %190 = memref.load %arg2[%c41] : memref<196xf32, #tpu.memory_space<smem>>
    %191 = vector.broadcast %190 : f32 to vector<22x128xf32>
    %192 = arith.mulf %191, %169 : vector<22x128xf32>
    %193 = arith.addf %164, %192 : vector<22x128xf32>
    %c48 = arith.constant 48 : index
    %194 = memref.load %arg2[%c48] : memref<196xf32, #tpu.memory_space<smem>>
    %195 = vector.broadcast %194 : f32 to vector<22x128xf32>
    %196 = arith.mulf %195, %169 : vector<22x128xf32>
    %197 = arith.addf %168, %196 : vector<22x128xf32>
    %c0_4 = arith.constant 0 : index
    %c1_5 = arith.constant 1 : index
    %c0_6 = arith.constant 0 : index
    %c0_7 = arith.constant 0 : index
    %198 = vector.load %arg1[%c0_4, %c1_5, %c0_6, %c0_7] : memref<1x4x22x256xf32, #tpu.memory_space<vmem>>, vector<1x1x22x256xf32>
    %199 = vector.shape_cast %198 : vector<1x1x22x256xf32> to vector<22x256xf32>
    %200 = vector.extract_strided_slice %199 {offsets = [0, 0], sizes = [22, 128], strides = [1, 1]} : vector<22x256xf32> to vector<22x128xf32>
    %c49 = arith.constant 49 : index
    %201 = memref.load %arg2[%c49] : memref<196xf32, #tpu.memory_space<smem>>
    %202 = vector.broadcast %201 : f32 to vector<22x128xf32>
    %203 = arith.mulf %202, %200 : vector<22x128xf32>
    %204 = arith.addf %173, %203 : vector<22x128xf32>
    %c56 = arith.constant 56 : index
    %205 = memref.load %arg2[%c56] : memref<196xf32, #tpu.memory_space<smem>>
    %206 = vector.broadcast %205 : f32 to vector<22x128xf32>
    %207 = arith.mulf %206, %200 : vector<22x128xf32>
    %208 = arith.addf %177, %207 : vector<22x128xf32>
    %c63 = arith.constant 63 : index
    %209 = memref.load %arg2[%c63] : memref<196xf32, #tpu.memory_space<smem>>
    %210 = vector.broadcast %209 : f32 to vector<22x128xf32>
    %211 = arith.mulf %210, %200 : vector<22x128xf32>
    %212 = arith.addf %181, %211 : vector<22x128xf32>
    %c70 = arith.constant 70 : index
    %213 = memref.load %arg2[%c70] : memref<196xf32, #tpu.memory_space<smem>>
    %214 = vector.broadcast %213 : f32 to vector<22x128xf32>
    %215 = arith.mulf %214, %200 : vector<22x128xf32>
    %216 = arith.addf %185, %215 : vector<22x128xf32>
    %c77 = arith.constant 77 : index
    %217 = memref.load %arg2[%c77] : memref<196xf32, #tpu.memory_space<smem>>
    %218 = vector.broadcast %217 : f32 to vector<22x128xf32>
    %219 = arith.mulf %218, %200 : vector<22x128xf32>
    %220 = arith.addf %189, %219 : vector<22x128xf32>
    %c84 = arith.constant 84 : index
    %221 = memref.load %arg2[%c84] : memref<196xf32, #tpu.memory_space<smem>>
    %222 = vector.broadcast %221 : f32 to vector<22x128xf32>
    %223 = arith.mulf %222, %200 : vector<22x128xf32>
    %224 = arith.addf %193, %223 : vector<22x128xf32>
    %c91 = arith.constant 91 : index
    %225 = memref.load %arg2[%c91] : memref<196xf32, #tpu.memory_space<smem>>
    %226 = vector.broadcast %225 : f32 to vector<22x128xf32>
    %227 = arith.mulf %226, %200 : vector<22x128xf32>
    %228 = arith.addf %197, %227 : vector<22x128xf32>
    %229 = vector.extract_strided_slice %199 {offsets = [0, 1], sizes = [22, 128], strides = [1, 1]} : vector<22x256xf32> to vector<22x128xf32>
    %c50 = arith.constant 50 : index
    %230 = memref.load %arg2[%c50] : memref<196xf32, #tpu.memory_space<smem>>
    %231 = vector.broadcast %230 : f32 to vector<22x128xf32>
    %232 = arith.mulf %231, %229 : vector<22x128xf32>
    %233 = arith.addf %204, %232 : vector<22x128xf32>
    %c57 = arith.constant 57 : index
    %234 = memref.load %arg2[%c57] : memref<196xf32, #tpu.memory_space<smem>>
    %235 = vector.broadcast %234 : f32 to vector<22x128xf32>
    %236 = arith.mulf %235, %229 : vector<22x128xf32>
    %237 = arith.addf %208, %236 : vector<22x128xf32>
    %c64 = arith.constant 64 : index
    %238 = memref.load %arg2[%c64] : memref<196xf32, #tpu.memory_space<smem>>
    %239 = vector.broadcast %238 : f32 to vector<22x128xf32>
    %240 = arith.mulf %239, %229 : vector<22x128xf32>
    %241 = arith.addf %212, %240 : vector<22x128xf32>
    %c71 = arith.constant 71 : index
    %242 = memref.load %arg2[%c71] : memref<196xf32, #tpu.memory_space<smem>>
    %243 = vector.broadcast %242 : f32 to vector<22x128xf32>
    %244 = arith.mulf %243, %229 : vector<22x128xf32>
    %245 = arith.addf %216, %244 : vector<22x128xf32>
    %c78 = arith.constant 78 : index
    %246 = memref.load %arg2[%c78] : memref<196xf32, #tpu.memory_space<smem>>
    %247 = vector.broadcast %246 : f32 to vector<22x128xf32>
    %248 = arith.mulf %247, %229 : vector<22x128xf32>
    %249 = arith.addf %220, %248 : vector<22x128xf32>
    %c85 = arith.constant 85 : index
    %250 = memref.load %arg2[%c85] : memref<196xf32, #tpu.memory_space<smem>>
    %251 = vector.broadcast %250 : f32 to vector<22x128xf32>
    %252 = arith.mulf %251, %229 : vector<22x128xf32>
    %253 = arith.addf %224, %252 : vector<22x128xf32>
    %c92 = arith.constant 92 : index
    %254 = memref.load %arg2[%c92] : memref<196xf32, #tpu.memory_space<smem>>
    %255 = vector.broadcast %254 : f32 to vector<22x128xf32>
    %256 = arith.mulf %255, %229 : vector<22x128xf32>
    %257 = arith.addf %228, %256 : vector<22x128xf32>
    %258 = vector.extract_strided_slice %199 {offsets = [0, 2], sizes = [22, 128], strides = [1, 1]} : vector<22x256xf32> to vector<22x128xf32>
    %c51 = arith.constant 51 : index
    %259 = memref.load %arg2[%c51] : memref<196xf32, #tpu.memory_space<smem>>
    %260 = vector.broadcast %259 : f32 to vector<22x128xf32>
    %261 = arith.mulf %260, %258 : vector<22x128xf32>
    %262 = arith.addf %233, %261 : vector<22x128xf32>
    %c58 = arith.constant 58 : index
    %263 = memref.load %arg2[%c58] : memref<196xf32, #tpu.memory_space<smem>>
    %264 = vector.broadcast %263 : f32 to vector<22x128xf32>
    %265 = arith.mulf %264, %258 : vector<22x128xf32>
    %266 = arith.addf %237, %265 : vector<22x128xf32>
    %c65 = arith.constant 65 : index
    %267 = memref.load %arg2[%c65] : memref<196xf32, #tpu.memory_space<smem>>
    %268 = vector.broadcast %267 : f32 to vector<22x128xf32>
    %269 = arith.mulf %268, %258 : vector<22x128xf32>
    %270 = arith.addf %241, %269 : vector<22x128xf32>
    %c72 = arith.constant 72 : index
    %271 = memref.load %arg2[%c72] : memref<196xf32, #tpu.memory_space<smem>>
    %272 = vector.broadcast %271 : f32 to vector<22x128xf32>
    %273 = arith.mulf %272, %258 : vector<22x128xf32>
    %274 = arith.addf %245, %273 : vector<22x128xf32>
    %c79 = arith.constant 79 : index
    %275 = memref.load %arg2[%c79] : memref<196xf32, #tpu.memory_space<smem>>
    %276 = vector.broadcast %275 : f32 to vector<22x128xf32>
    %277 = arith.mulf %276, %258 : vector<22x128xf32>
    %278 = arith.addf %249, %277 : vector<22x128xf32>
    %c86 = arith.constant 86 : index
    %279 = memref.load %arg2[%c86] : memref<196xf32, #tpu.memory_space<smem>>
    %280 = vector.broadcast %279 : f32 to vector<22x128xf32>
    %281 = arith.mulf %280, %258 : vector<22x128xf32>
    %282 = arith.addf %253, %281 : vector<22x128xf32>
    %c93 = arith.constant 93 : index
    %283 = memref.load %arg2[%c93] : memref<196xf32, #tpu.memory_space<smem>>
    %284 = vector.broadcast %283 : f32 to vector<22x128xf32>
    %285 = arith.mulf %284, %258 : vector<22x128xf32>
    %286 = arith.addf %257, %285 : vector<22x128xf32>
    %287 = vector.extract_strided_slice %199 {offsets = [0, 3], sizes = [22, 128], strides = [1, 1]} : vector<22x256xf32> to vector<22x128xf32>
    %c52 = arith.constant 52 : index
    %288 = memref.load %arg2[%c52] : memref<196xf32, #tpu.memory_space<smem>>
    %289 = vector.broadcast %288 : f32 to vector<22x128xf32>
    %290 = arith.mulf %289, %287 : vector<22x128xf32>
    %291 = arith.addf %262, %290 : vector<22x128xf32>
    %c59 = arith.constant 59 : index
    %292 = memref.load %arg2[%c59] : memref<196xf32, #tpu.memory_space<smem>>
    %293 = vector.broadcast %292 : f32 to vector<22x128xf32>
    %294 = arith.mulf %293, %287 : vector<22x128xf32>
    %295 = arith.addf %266, %294 : vector<22x128xf32>
    %c66 = arith.constant 66 : index
    %296 = memref.load %arg2[%c66] : memref<196xf32, #tpu.memory_space<smem>>
    %297 = vector.broadcast %296 : f32 to vector<22x128xf32>
    %298 = arith.mulf %297, %287 : vector<22x128xf32>
    %299 = arith.addf %270, %298 : vector<22x128xf32>
    %c73 = arith.constant 73 : index
    %300 = memref.load %arg2[%c73] : memref<196xf32, #tpu.memory_space<smem>>
    %301 = vector.broadcast %300 : f32 to vector<22x128xf32>
    %302 = arith.mulf %301, %287 : vector<22x128xf32>
    %303 = arith.addf %274, %302 : vector<22x128xf32>
    %c80 = arith.constant 80 : index
    %304 = memref.load %arg2[%c80] : memref<196xf32, #tpu.memory_space<smem>>
    %305 = vector.broadcast %304 : f32 to vector<22x128xf32>
    %306 = arith.mulf %305, %287 : vector<22x128xf32>
    %307 = arith.addf %278, %306 : vector<22x128xf32>
    %c87 = arith.constant 87 : index
    %308 = memref.load %arg2[%c87] : memref<196xf32, #tpu.memory_space<smem>>
    %309 = vector.broadcast %308 : f32 to vector<22x128xf32>
    %310 = arith.mulf %309, %287 : vector<22x128xf32>
    %311 = arith.addf %282, %310 : vector<22x128xf32>
    %c94 = arith.constant 94 : index
    %312 = memref.load %arg2[%c94] : memref<196xf32, #tpu.memory_space<smem>>
    %313 = vector.broadcast %312 : f32 to vector<22x128xf32>
    %314 = arith.mulf %313, %287 : vector<22x128xf32>
    %315 = arith.addf %286, %314 : vector<22x128xf32>
    %316 = vector.extract_strided_slice %199 {offsets = [0, 4], sizes = [22, 128], strides = [1, 1]} : vector<22x256xf32> to vector<22x128xf32>
    %c53 = arith.constant 53 : index
    %317 = memref.load %arg2[%c53] : memref<196xf32, #tpu.memory_space<smem>>
    %318 = vector.broadcast %317 : f32 to vector<22x128xf32>
    %319 = arith.mulf %318, %316 : vector<22x128xf32>
    %320 = arith.addf %291, %319 : vector<22x128xf32>
    %c60 = arith.constant 60 : index
    %321 = memref.load %arg2[%c60] : memref<196xf32, #tpu.memory_space<smem>>
    %322 = vector.broadcast %321 : f32 to vector<22x128xf32>
    %323 = arith.mulf %322, %316 : vector<22x128xf32>
    %324 = arith.addf %295, %323 : vector<22x128xf32>
    %c67 = arith.constant 67 : index
    %325 = memref.load %arg2[%c67] : memref<196xf32, #tpu.memory_space<smem>>
    %326 = vector.broadcast %325 : f32 to vector<22x128xf32>
    %327 = arith.mulf %326, %316 : vector<22x128xf32>
    %328 = arith.addf %299, %327 : vector<22x128xf32>
    %c74 = arith.constant 74 : index
    %329 = memref.load %arg2[%c74] : memref<196xf32, #tpu.memory_space<smem>>
    %330 = vector.broadcast %329 : f32 to vector<22x128xf32>
    %331 = arith.mulf %330, %316 : vector<22x128xf32>
    %332 = arith.addf %303, %331 : vector<22x128xf32>
    %c81 = arith.constant 81 : index
    %333 = memref.load %arg2[%c81] : memref<196xf32, #tpu.memory_space<smem>>
    %334 = vector.broadcast %333 : f32 to vector<22x128xf32>
    %335 = arith.mulf %334, %316 : vector<22x128xf32>
    %336 = arith.addf %307, %335 : vector<22x128xf32>
    %c88 = arith.constant 88 : index
    %337 = memref.load %arg2[%c88] : memref<196xf32, #tpu.memory_space<smem>>
    %338 = vector.broadcast %337 : f32 to vector<22x128xf32>
    %339 = arith.mulf %338, %316 : vector<22x128xf32>
    %340 = arith.addf %311, %339 : vector<22x128xf32>
    %c95 = arith.constant 95 : index
    %341 = memref.load %arg2[%c95] : memref<196xf32, #tpu.memory_space<smem>>
    %342 = vector.broadcast %341 : f32 to vector<22x128xf32>
    %343 = arith.mulf %342, %316 : vector<22x128xf32>
    %344 = arith.addf %315, %343 : vector<22x128xf32>
    %345 = vector.extract_strided_slice %199 {offsets = [0, 5], sizes = [22, 128], strides = [1, 1]} : vector<22x256xf32> to vector<22x128xf32>
    %c54 = arith.constant 54 : index
    %346 = memref.load %arg2[%c54] : memref<196xf32, #tpu.memory_space<smem>>
    %347 = vector.broadcast %346 : f32 to vector<22x128xf32>
    %348 = arith.mulf %347, %345 : vector<22x128xf32>
    %349 = arith.addf %320, %348 : vector<22x128xf32>
    %c61 = arith.constant 61 : index
    %350 = memref.load %arg2[%c61] : memref<196xf32, #tpu.memory_space<smem>>
    %351 = vector.broadcast %350 : f32 to vector<22x128xf32>
    %352 = arith.mulf %351, %345 : vector<22x128xf32>
    %353 = arith.addf %324, %352 : vector<22x128xf32>
    %c68 = arith.constant 68 : index
    %354 = memref.load %arg2[%c68] : memref<196xf32, #tpu.memory_space<smem>>
    %355 = vector.broadcast %354 : f32 to vector<22x128xf32>
    %356 = arith.mulf %355, %345 : vector<22x128xf32>
    %357 = arith.addf %328, %356 : vector<22x128xf32>
    %c75 = arith.constant 75 : index
    %358 = memref.load %arg2[%c75] : memref<196xf32, #tpu.memory_space<smem>>
    %359 = vector.broadcast %358 : f32 to vector<22x128xf32>
    %360 = arith.mulf %359, %345 : vector<22x128xf32>
    %361 = arith.addf %332, %360 : vector<22x128xf32>
    %c82 = arith.constant 82 : index
    %362 = memref.load %arg2[%c82] : memref<196xf32, #tpu.memory_space<smem>>
    %363 = vector.broadcast %362 : f32 to vector<22x128xf32>
    %364 = arith.mulf %363, %345 : vector<22x128xf32>
    %365 = arith.addf %336, %364 : vector<22x128xf32>
    %c89 = arith.constant 89 : index
    %366 = memref.load %arg2[%c89] : memref<196xf32, #tpu.memory_space<smem>>
    %367 = vector.broadcast %366 : f32 to vector<22x128xf32>
    %368 = arith.mulf %367, %345 : vector<22x128xf32>
    %369 = arith.addf %340, %368 : vector<22x128xf32>
    %c96 = arith.constant 96 : index
    %370 = memref.load %arg2[%c96] : memref<196xf32, #tpu.memory_space<smem>>
    %371 = vector.broadcast %370 : f32 to vector<22x128xf32>
    %372 = arith.mulf %371, %345 : vector<22x128xf32>
    %373 = arith.addf %344, %372 : vector<22x128xf32>
    %374 = vector.extract_strided_slice %199 {offsets = [0, 6], sizes = [22, 128], strides = [1, 1]} : vector<22x256xf32> to vector<22x128xf32>
    %c55 = arith.constant 55 : index
    %375 = memref.load %arg2[%c55] : memref<196xf32, #tpu.memory_space<smem>>
    %376 = vector.broadcast %375 : f32 to vector<22x128xf32>
    %377 = arith.mulf %376, %374 : vector<22x128xf32>
    %378 = arith.addf %349, %377 : vector<22x128xf32>
    %c62 = arith.constant 62 : index
    %379 = memref.load %arg2[%c62] : memref<196xf32, #tpu.memory_space<smem>>
    %380 = vector.broadcast %379 : f32 to vector<22x128xf32>
    %381 = arith.mulf %380, %374 : vector<22x128xf32>
    %382 = arith.addf %353, %381 : vector<22x128xf32>
    %c69 = arith.constant 69 : index
    %383 = memref.load %arg2[%c69] : memref<196xf32, #tpu.memory_space<smem>>
    %384 = vector.broadcast %383 : f32 to vector<22x128xf32>
    %385 = arith.mulf %384, %374 : vector<22x128xf32>
    %386 = arith.addf %357, %385 : vector<22x128xf32>
    %c76 = arith.constant 76 : index
    %387 = memref.load %arg2[%c76] : memref<196xf32, #tpu.memory_space<smem>>
    %388 = vector.broadcast %387 : f32 to vector<22x128xf32>
    %389 = arith.mulf %388, %374 : vector<22x128xf32>
    %390 = arith.addf %361, %389 : vector<22x128xf32>
    %c83 = arith.constant 83 : index
    %391 = memref.load %arg2[%c83] : memref<196xf32, #tpu.memory_space<smem>>
    %392 = vector.broadcast %391 : f32 to vector<22x128xf32>
    %393 = arith.mulf %392, %374 : vector<22x128xf32>
    %394 = arith.addf %365, %393 : vector<22x128xf32>
    %c90 = arith.constant 90 : index
    %395 = memref.load %arg2[%c90] : memref<196xf32, #tpu.memory_space<smem>>
    %396 = vector.broadcast %395 : f32 to vector<22x128xf32>
    %397 = arith.mulf %396, %374 : vector<22x128xf32>
    %398 = arith.addf %369, %397 : vector<22x128xf32>
    %c97 = arith.constant 97 : index
    %399 = memref.load %arg2[%c97] : memref<196xf32, #tpu.memory_space<smem>>
    %400 = vector.broadcast %399 : f32 to vector<22x128xf32>
    %401 = arith.mulf %400, %374 : vector<22x128xf32>
    %402 = arith.addf %373, %401 : vector<22x128xf32>
    %c0_8 = arith.constant 0 : index
    %c2_9 = arith.constant 2 : index
    %c0_10 = arith.constant 0 : index
    %c0_11 = arith.constant 0 : index
    %403 = vector.load %arg1[%c0_8, %c2_9, %c0_10, %c0_11] : memref<1x4x22x256xf32, #tpu.memory_space<vmem>>, vector<1x1x22x256xf32>
    %404 = vector.shape_cast %403 : vector<1x1x22x256xf32> to vector<22x256xf32>
    %405 = vector.extract_strided_slice %404 {offsets = [0, 0], sizes = [22, 128], strides = [1, 1]} : vector<22x256xf32> to vector<22x128xf32>
    %c98 = arith.constant 98 : index
    %406 = memref.load %arg2[%c98] : memref<196xf32, #tpu.memory_space<smem>>
    %407 = vector.broadcast %406 : f32 to vector<22x128xf32>
    %408 = arith.mulf %407, %405 : vector<22x128xf32>
    %409 = arith.addf %378, %408 : vector<22x128xf32>
    %c105 = arith.constant 105 : index
    %410 = memref.load %arg2[%c105] : memref<196xf32, #tpu.memory_space<smem>>
    %411 = vector.broadcast %410 : f32 to vector<22x128xf32>
    %412 = arith.mulf %411, %405 : vector<22x128xf32>
    %413 = arith.addf %382, %412 : vector<22x128xf32>
    %c112 = arith.constant 112 : index
    %414 = memref.load %arg2[%c112] : memref<196xf32, #tpu.memory_space<smem>>
    %415 = vector.broadcast %414 : f32 to vector<22x128xf32>
    %416 = arith.mulf %415, %405 : vector<22x128xf32>
    %417 = arith.addf %386, %416 : vector<22x128xf32>
    %c119 = arith.constant 119 : index
    %418 = memref.load %arg2[%c119] : memref<196xf32, #tpu.memory_space<smem>>
    %419 = vector.broadcast %418 : f32 to vector<22x128xf32>
    %420 = arith.mulf %419, %405 : vector<22x128xf32>
    %421 = arith.addf %390, %420 : vector<22x128xf32>
    %c126 = arith.constant 126 : index
    %422 = memref.load %arg2[%c126] : memref<196xf32, #tpu.memory_space<smem>>
    %423 = vector.broadcast %422 : f32 to vector<22x128xf32>
    %424 = arith.mulf %423, %405 : vector<22x128xf32>
    %425 = arith.addf %394, %424 : vector<22x128xf32>
    %c133 = arith.constant 133 : index
    %426 = memref.load %arg2[%c133] : memref<196xf32, #tpu.memory_space<smem>>
    %427 = vector.broadcast %426 : f32 to vector<22x128xf32>
    %428 = arith.mulf %427, %405 : vector<22x128xf32>
    %429 = arith.addf %398, %428 : vector<22x128xf32>
    %c140 = arith.constant 140 : index
    %430 = memref.load %arg2[%c140] : memref<196xf32, #tpu.memory_space<smem>>
    %431 = vector.broadcast %430 : f32 to vector<22x128xf32>
    %432 = arith.mulf %431, %405 : vector<22x128xf32>
    %433 = arith.addf %402, %432 : vector<22x128xf32>
    %434 = vector.extract_strided_slice %404 {offsets = [0, 1], sizes = [22, 128], strides = [1, 1]} : vector<22x256xf32> to vector<22x128xf32>
    %c99 = arith.constant 99 : index
    %435 = memref.load %arg2[%c99] : memref<196xf32, #tpu.memory_space<smem>>
    %436 = vector.broadcast %435 : f32 to vector<22x128xf32>
    %437 = arith.mulf %436, %434 : vector<22x128xf32>
    %438 = arith.addf %409, %437 : vector<22x128xf32>
    %c106 = arith.constant 106 : index
    %439 = memref.load %arg2[%c106] : memref<196xf32, #tpu.memory_space<smem>>
    %440 = vector.broadcast %439 : f32 to vector<22x128xf32>
    %441 = arith.mulf %440, %434 : vector<22x128xf32>
    %442 = arith.addf %413, %441 : vector<22x128xf32>
    %c113 = arith.constant 113 : index
    %443 = memref.load %arg2[%c113] : memref<196xf32, #tpu.memory_space<smem>>
    %444 = vector.broadcast %443 : f32 to vector<22x128xf32>
    %445 = arith.mulf %444, %434 : vector<22x128xf32>
    %446 = arith.addf %417, %445 : vector<22x128xf32>
    %c120 = arith.constant 120 : index
    %447 = memref.load %arg2[%c120] : memref<196xf32, #tpu.memory_space<smem>>
    %448 = vector.broadcast %447 : f32 to vector<22x128xf32>
    %449 = arith.mulf %448, %434 : vector<22x128xf32>
    %450 = arith.addf %421, %449 : vector<22x128xf32>
    %c127 = arith.constant 127 : index
    %451 = memref.load %arg2[%c127] : memref<196xf32, #tpu.memory_space<smem>>
    %452 = vector.broadcast %451 : f32 to vector<22x128xf32>
    %453 = arith.mulf %452, %434 : vector<22x128xf32>
    %454 = arith.addf %425, %453 : vector<22x128xf32>
    %c134 = arith.constant 134 : index
    %455 = memref.load %arg2[%c134] : memref<196xf32, #tpu.memory_space<smem>>
    %456 = vector.broadcast %455 : f32 to vector<22x128xf32>
    %457 = arith.mulf %456, %434 : vector<22x128xf32>
    %458 = arith.addf %429, %457 : vector<22x128xf32>
    %c141 = arith.constant 141 : index
    %459 = memref.load %arg2[%c141] : memref<196xf32, #tpu.memory_space<smem>>
    %460 = vector.broadcast %459 : f32 to vector<22x128xf32>
    %461 = arith.mulf %460, %434 : vector<22x128xf32>
    %462 = arith.addf %433, %461 : vector<22x128xf32>
    %463 = vector.extract_strided_slice %404 {offsets = [0, 2], sizes = [22, 128], strides = [1, 1]} : vector<22x256xf32> to vector<22x128xf32>
    %c100 = arith.constant 100 : index
    %464 = memref.load %arg2[%c100] : memref<196xf32, #tpu.memory_space<smem>>
    %465 = vector.broadcast %464 : f32 to vector<22x128xf32>
    %466 = arith.mulf %465, %463 : vector<22x128xf32>
    %467 = arith.addf %438, %466 : vector<22x128xf32>
    %c107 = arith.constant 107 : index
    %468 = memref.load %arg2[%c107] : memref<196xf32, #tpu.memory_space<smem>>
    %469 = vector.broadcast %468 : f32 to vector<22x128xf32>
    %470 = arith.mulf %469, %463 : vector<22x128xf32>
    %471 = arith.addf %442, %470 : vector<22x128xf32>
    %c114 = arith.constant 114 : index
    %472 = memref.load %arg2[%c114] : memref<196xf32, #tpu.memory_space<smem>>
    %473 = vector.broadcast %472 : f32 to vector<22x128xf32>
    %474 = arith.mulf %473, %463 : vector<22x128xf32>
    %475 = arith.addf %446, %474 : vector<22x128xf32>
    %c121 = arith.constant 121 : index
    %476 = memref.load %arg2[%c121] : memref<196xf32, #tpu.memory_space<smem>>
    %477 = vector.broadcast %476 : f32 to vector<22x128xf32>
    %478 = arith.mulf %477, %463 : vector<22x128xf32>
    %479 = arith.addf %450, %478 : vector<22x128xf32>
    %c128 = arith.constant 128 : index
    %480 = memref.load %arg2[%c128] : memref<196xf32, #tpu.memory_space<smem>>
    %481 = vector.broadcast %480 : f32 to vector<22x128xf32>
    %482 = arith.mulf %481, %463 : vector<22x128xf32>
    %483 = arith.addf %454, %482 : vector<22x128xf32>
    %c135 = arith.constant 135 : index
    %484 = memref.load %arg2[%c135] : memref<196xf32, #tpu.memory_space<smem>>
    %485 = vector.broadcast %484 : f32 to vector<22x128xf32>
    %486 = arith.mulf %485, %463 : vector<22x128xf32>
    %487 = arith.addf %458, %486 : vector<22x128xf32>
    %c142 = arith.constant 142 : index
    %488 = memref.load %arg2[%c142] : memref<196xf32, #tpu.memory_space<smem>>
    %489 = vector.broadcast %488 : f32 to vector<22x128xf32>
    %490 = arith.mulf %489, %463 : vector<22x128xf32>
    %491 = arith.addf %462, %490 : vector<22x128xf32>
    %492 = vector.extract_strided_slice %404 {offsets = [0, 3], sizes = [22, 128], strides = [1, 1]} : vector<22x256xf32> to vector<22x128xf32>
    %c101 = arith.constant 101 : index
    %493 = memref.load %arg2[%c101] : memref<196xf32, #tpu.memory_space<smem>>
    %494 = vector.broadcast %493 : f32 to vector<22x128xf32>
    %495 = arith.mulf %494, %492 : vector<22x128xf32>
    %496 = arith.addf %467, %495 : vector<22x128xf32>
    %c108 = arith.constant 108 : index
    %497 = memref.load %arg2[%c108] : memref<196xf32, #tpu.memory_space<smem>>
    %498 = vector.broadcast %497 : f32 to vector<22x128xf32>
    %499 = arith.mulf %498, %492 : vector<22x128xf32>
    %500 = arith.addf %471, %499 : vector<22x128xf32>
    %c115 = arith.constant 115 : index
    %501 = memref.load %arg2[%c115] : memref<196xf32, #tpu.memory_space<smem>>
    %502 = vector.broadcast %501 : f32 to vector<22x128xf32>
    %503 = arith.mulf %502, %492 : vector<22x128xf32>
    %504 = arith.addf %475, %503 : vector<22x128xf32>
    %c122 = arith.constant 122 : index
    %505 = memref.load %arg2[%c122] : memref<196xf32, #tpu.memory_space<smem>>
    %506 = vector.broadcast %505 : f32 to vector<22x128xf32>
    %507 = arith.mulf %506, %492 : vector<22x128xf32>
    %508 = arith.addf %479, %507 : vector<22x128xf32>
    %c129 = arith.constant 129 : index
    %509 = memref.load %arg2[%c129] : memref<196xf32, #tpu.memory_space<smem>>
    %510 = vector.broadcast %509 : f32 to vector<22x128xf32>
    %511 = arith.mulf %510, %492 : vector<22x128xf32>
    %512 = arith.addf %483, %511 : vector<22x128xf32>
    %c136 = arith.constant 136 : index
    %513 = memref.load %arg2[%c136] : memref<196xf32, #tpu.memory_space<smem>>
    %514 = vector.broadcast %513 : f32 to vector<22x128xf32>
    %515 = arith.mulf %514, %492 : vector<22x128xf32>
    %516 = arith.addf %487, %515 : vector<22x128xf32>
    %c143 = arith.constant 143 : index
    %517 = memref.load %arg2[%c143] : memref<196xf32, #tpu.memory_space<smem>>
    %518 = vector.broadcast %517 : f32 to vector<22x128xf32>
    %519 = arith.mulf %518, %492 : vector<22x128xf32>
    %520 = arith.addf %491, %519 : vector<22x128xf32>
    %521 = vector.extract_strided_slice %404 {offsets = [0, 4], sizes = [22, 128], strides = [1, 1]} : vector<22x256xf32> to vector<22x128xf32>
    %c102 = arith.constant 102 : index
    %522 = memref.load %arg2[%c102] : memref<196xf32, #tpu.memory_space<smem>>
    %523 = vector.broadcast %522 : f32 to vector<22x128xf32>
    %524 = arith.mulf %523, %521 : vector<22x128xf32>
    %525 = arith.addf %496, %524 : vector<22x128xf32>
    %c109 = arith.constant 109 : index
    %526 = memref.load %arg2[%c109] : memref<196xf32, #tpu.memory_space<smem>>
    %527 = vector.broadcast %526 : f32 to vector<22x128xf32>
    %528 = arith.mulf %527, %521 : vector<22x128xf32>
    %529 = arith.addf %500, %528 : vector<22x128xf32>
    %c116 = arith.constant 116 : index
    %530 = memref.load %arg2[%c116] : memref<196xf32, #tpu.memory_space<smem>>
    %531 = vector.broadcast %530 : f32 to vector<22x128xf32>
    %532 = arith.mulf %531, %521 : vector<22x128xf32>
    %533 = arith.addf %504, %532 : vector<22x128xf32>
    %c123 = arith.constant 123 : index
    %534 = memref.load %arg2[%c123] : memref<196xf32, #tpu.memory_space<smem>>
    %535 = vector.broadcast %534 : f32 to vector<22x128xf32>
    %536 = arith.mulf %535, %521 : vector<22x128xf32>
    %537 = arith.addf %508, %536 : vector<22x128xf32>
    %c130 = arith.constant 130 : index
    %538 = memref.load %arg2[%c130] : memref<196xf32, #tpu.memory_space<smem>>
    %539 = vector.broadcast %538 : f32 to vector<22x128xf32>
    %540 = arith.mulf %539, %521 : vector<22x128xf32>
    %541 = arith.addf %512, %540 : vector<22x128xf32>
    %c137 = arith.constant 137 : index
    %542 = memref.load %arg2[%c137] : memref<196xf32, #tpu.memory_space<smem>>
    %543 = vector.broadcast %542 : f32 to vector<22x128xf32>
    %544 = arith.mulf %543, %521 : vector<22x128xf32>
    %545 = arith.addf %516, %544 : vector<22x128xf32>
    %c144 = arith.constant 144 : index
    %546 = memref.load %arg2[%c144] : memref<196xf32, #tpu.memory_space<smem>>
    %547 = vector.broadcast %546 : f32 to vector<22x128xf32>
    %548 = arith.mulf %547, %521 : vector<22x128xf32>
    %549 = arith.addf %520, %548 : vector<22x128xf32>
    %550 = vector.extract_strided_slice %404 {offsets = [0, 5], sizes = [22, 128], strides = [1, 1]} : vector<22x256xf32> to vector<22x128xf32>
    %c103 = arith.constant 103 : index
    %551 = memref.load %arg2[%c103] : memref<196xf32, #tpu.memory_space<smem>>
    %552 = vector.broadcast %551 : f32 to vector<22x128xf32>
    %553 = arith.mulf %552, %550 : vector<22x128xf32>
    %554 = arith.addf %525, %553 : vector<22x128xf32>
    %c110 = arith.constant 110 : index
    %555 = memref.load %arg2[%c110] : memref<196xf32, #tpu.memory_space<smem>>
    %556 = vector.broadcast %555 : f32 to vector<22x128xf32>
    %557 = arith.mulf %556, %550 : vector<22x128xf32>
    %558 = arith.addf %529, %557 : vector<22x128xf32>
    %c117 = arith.constant 117 : index
    %559 = memref.load %arg2[%c117] : memref<196xf32, #tpu.memory_space<smem>>
    %560 = vector.broadcast %559 : f32 to vector<22x128xf32>
    %561 = arith.mulf %560, %550 : vector<22x128xf32>
    %562 = arith.addf %533, %561 : vector<22x128xf32>
    %c124 = arith.constant 124 : index
    %563 = memref.load %arg2[%c124] : memref<196xf32, #tpu.memory_space<smem>>
    %564 = vector.broadcast %563 : f32 to vector<22x128xf32>
    %565 = arith.mulf %564, %550 : vector<22x128xf32>
    %566 = arith.addf %537, %565 : vector<22x128xf32>
    %c131 = arith.constant 131 : index
    %567 = memref.load %arg2[%c131] : memref<196xf32, #tpu.memory_space<smem>>
    %568 = vector.broadcast %567 : f32 to vector<22x128xf32>
    %569 = arith.mulf %568, %550 : vector<22x128xf32>
    %570 = arith.addf %541, %569 : vector<22x128xf32>
    %c138 = arith.constant 138 : index
    %571 = memref.load %arg2[%c138] : memref<196xf32, #tpu.memory_space<smem>>
    %572 = vector.broadcast %571 : f32 to vector<22x128xf32>
    %573 = arith.mulf %572, %550 : vector<22x128xf32>
    %574 = arith.addf %545, %573 : vector<22x128xf32>
    %c145 = arith.constant 145 : index
    %575 = memref.load %arg2[%c145] : memref<196xf32, #tpu.memory_space<smem>>
    %576 = vector.broadcast %575 : f32 to vector<22x128xf32>
    %577 = arith.mulf %576, %550 : vector<22x128xf32>
    %578 = arith.addf %549, %577 : vector<22x128xf32>
    %579 = vector.extract_strided_slice %404 {offsets = [0, 6], sizes = [22, 128], strides = [1, 1]} : vector<22x256xf32> to vector<22x128xf32>
    %c104 = arith.constant 104 : index
    %580 = memref.load %arg2[%c104] : memref<196xf32, #tpu.memory_space<smem>>
    %581 = vector.broadcast %580 : f32 to vector<22x128xf32>
    %582 = arith.mulf %581, %579 : vector<22x128xf32>
    %583 = arith.addf %554, %582 : vector<22x128xf32>
    %c111 = arith.constant 111 : index
    %584 = memref.load %arg2[%c111] : memref<196xf32, #tpu.memory_space<smem>>
    %585 = vector.broadcast %584 : f32 to vector<22x128xf32>
    %586 = arith.mulf %585, %579 : vector<22x128xf32>
    %587 = arith.addf %558, %586 : vector<22x128xf32>
    %c118 = arith.constant 118 : index
    %588 = memref.load %arg2[%c118] : memref<196xf32, #tpu.memory_space<smem>>
    %589 = vector.broadcast %588 : f32 to vector<22x128xf32>
    %590 = arith.mulf %589, %579 : vector<22x128xf32>
    %591 = arith.addf %562, %590 : vector<22x128xf32>
    %c125 = arith.constant 125 : index
    %592 = memref.load %arg2[%c125] : memref<196xf32, #tpu.memory_space<smem>>
    %593 = vector.broadcast %592 : f32 to vector<22x128xf32>
    %594 = arith.mulf %593, %579 : vector<22x128xf32>
    %595 = arith.addf %566, %594 : vector<22x128xf32>
    %c132 = arith.constant 132 : index
    %596 = memref.load %arg2[%c132] : memref<196xf32, #tpu.memory_space<smem>>
    %597 = vector.broadcast %596 : f32 to vector<22x128xf32>
    %598 = arith.mulf %597, %579 : vector<22x128xf32>
    %599 = arith.addf %570, %598 : vector<22x128xf32>
    %c139 = arith.constant 139 : index
    %600 = memref.load %arg2[%c139] : memref<196xf32, #tpu.memory_space<smem>>
    %601 = vector.broadcast %600 : f32 to vector<22x128xf32>
    %602 = arith.mulf %601, %579 : vector<22x128xf32>
    %603 = arith.addf %574, %602 : vector<22x128xf32>
    %c146 = arith.constant 146 : index
    %604 = memref.load %arg2[%c146] : memref<196xf32, #tpu.memory_space<smem>>
    %605 = vector.broadcast %604 : f32 to vector<22x128xf32>
    %606 = arith.mulf %605, %579 : vector<22x128xf32>
    %607 = arith.addf %578, %606 : vector<22x128xf32>
    %c0_12 = arith.constant 0 : index
    %c3_13 = arith.constant 3 : index
    %c0_14 = arith.constant 0 : index
    %c0_15 = arith.constant 0 : index
    %608 = vector.load %arg1[%c0_12, %c3_13, %c0_14, %c0_15] : memref<1x4x22x256xf32, #tpu.memory_space<vmem>>, vector<1x1x22x256xf32>
    %609 = vector.shape_cast %608 : vector<1x1x22x256xf32> to vector<22x256xf32>
    %610 = vector.extract_strided_slice %609 {offsets = [0, 0], sizes = [22, 128], strides = [1, 1]} : vector<22x256xf32> to vector<22x128xf32>
    %c147 = arith.constant 147 : index
    %611 = memref.load %arg2[%c147] : memref<196xf32, #tpu.memory_space<smem>>
    %612 = vector.broadcast %611 : f32 to vector<22x128xf32>
    %613 = arith.mulf %612, %610 : vector<22x128xf32>
    %614 = arith.addf %583, %613 : vector<22x128xf32>
    %c154 = arith.constant 154 : index
    %615 = memref.load %arg2[%c154] : memref<196xf32, #tpu.memory_space<smem>>
    %616 = vector.broadcast %615 : f32 to vector<22x128xf32>
    %617 = arith.mulf %616, %610 : vector<22x128xf32>
    %618 = arith.addf %587, %617 : vector<22x128xf32>
    %c161 = arith.constant 161 : index
    %619 = memref.load %arg2[%c161] : memref<196xf32, #tpu.memory_space<smem>>
    %620 = vector.broadcast %619 : f32 to vector<22x128xf32>
    %621 = arith.mulf %620, %610 : vector<22x128xf32>
    %622 = arith.addf %591, %621 : vector<22x128xf32>
    %c168 = arith.constant 168 : index
    %623 = memref.load %arg2[%c168] : memref<196xf32, #tpu.memory_space<smem>>
    %624 = vector.broadcast %623 : f32 to vector<22x128xf32>
    %625 = arith.mulf %624, %610 : vector<22x128xf32>
    %626 = arith.addf %595, %625 : vector<22x128xf32>
    %c175 = arith.constant 175 : index
    %627 = memref.load %arg2[%c175] : memref<196xf32, #tpu.memory_space<smem>>
    %628 = vector.broadcast %627 : f32 to vector<22x128xf32>
    %629 = arith.mulf %628, %610 : vector<22x128xf32>
    %630 = arith.addf %599, %629 : vector<22x128xf32>
    %c182 = arith.constant 182 : index
    %631 = memref.load %arg2[%c182] : memref<196xf32, #tpu.memory_space<smem>>
    %632 = vector.broadcast %631 : f32 to vector<22x128xf32>
    %633 = arith.mulf %632, %610 : vector<22x128xf32>
    %634 = arith.addf %603, %633 : vector<22x128xf32>
    %c189 = arith.constant 189 : index
    %635 = memref.load %arg2[%c189] : memref<196xf32, #tpu.memory_space<smem>>
    %636 = vector.broadcast %635 : f32 to vector<22x128xf32>
    %637 = arith.mulf %636, %610 : vector<22x128xf32>
    %638 = arith.addf %607, %637 : vector<22x128xf32>
    %639 = vector.extract_strided_slice %609 {offsets = [0, 1], sizes = [22, 128], strides = [1, 1]} : vector<22x256xf32> to vector<22x128xf32>
    %c148 = arith.constant 148 : index
    %640 = memref.load %arg2[%c148] : memref<196xf32, #tpu.memory_space<smem>>
    %641 = vector.broadcast %640 : f32 to vector<22x128xf32>
    %642 = arith.mulf %641, %639 : vector<22x128xf32>
    %643 = arith.addf %614, %642 : vector<22x128xf32>
    %c155 = arith.constant 155 : index
    %644 = memref.load %arg2[%c155] : memref<196xf32, #tpu.memory_space<smem>>
    %645 = vector.broadcast %644 : f32 to vector<22x128xf32>
    %646 = arith.mulf %645, %639 : vector<22x128xf32>
    %647 = arith.addf %618, %646 : vector<22x128xf32>
    %c162 = arith.constant 162 : index
    %648 = memref.load %arg2[%c162] : memref<196xf32, #tpu.memory_space<smem>>
    %649 = vector.broadcast %648 : f32 to vector<22x128xf32>
    %650 = arith.mulf %649, %639 : vector<22x128xf32>
    %651 = arith.addf %622, %650 : vector<22x128xf32>
    %c169 = arith.constant 169 : index
    %652 = memref.load %arg2[%c169] : memref<196xf32, #tpu.memory_space<smem>>
    %653 = vector.broadcast %652 : f32 to vector<22x128xf32>
    %654 = arith.mulf %653, %639 : vector<22x128xf32>
    %655 = arith.addf %626, %654 : vector<22x128xf32>
    %c176 = arith.constant 176 : index
    %656 = memref.load %arg2[%c176] : memref<196xf32, #tpu.memory_space<smem>>
    %657 = vector.broadcast %656 : f32 to vector<22x128xf32>
    %658 = arith.mulf %657, %639 : vector<22x128xf32>
    %659 = arith.addf %630, %658 : vector<22x128xf32>
    %c183 = arith.constant 183 : index
    %660 = memref.load %arg2[%c183] : memref<196xf32, #tpu.memory_space<smem>>
    %661 = vector.broadcast %660 : f32 to vector<22x128xf32>
    %662 = arith.mulf %661, %639 : vector<22x128xf32>
    %663 = arith.addf %634, %662 : vector<22x128xf32>
    %c190 = arith.constant 190 : index
    %664 = memref.load %arg2[%c190] : memref<196xf32, #tpu.memory_space<smem>>
    %665 = vector.broadcast %664 : f32 to vector<22x128xf32>
    %666 = arith.mulf %665, %639 : vector<22x128xf32>
    %667 = arith.addf %638, %666 : vector<22x128xf32>
    %668 = vector.extract_strided_slice %609 {offsets = [0, 2], sizes = [22, 128], strides = [1, 1]} : vector<22x256xf32> to vector<22x128xf32>
    %c149 = arith.constant 149 : index
    %669 = memref.load %arg2[%c149] : memref<196xf32, #tpu.memory_space<smem>>
    %670 = vector.broadcast %669 : f32 to vector<22x128xf32>
    %671 = arith.mulf %670, %668 : vector<22x128xf32>
    %672 = arith.addf %643, %671 : vector<22x128xf32>
    %c156 = arith.constant 156 : index
    %673 = memref.load %arg2[%c156] : memref<196xf32, #tpu.memory_space<smem>>
    %674 = vector.broadcast %673 : f32 to vector<22x128xf32>
    %675 = arith.mulf %674, %668 : vector<22x128xf32>
    %676 = arith.addf %647, %675 : vector<22x128xf32>
    %c163 = arith.constant 163 : index
    %677 = memref.load %arg2[%c163] : memref<196xf32, #tpu.memory_space<smem>>
    %678 = vector.broadcast %677 : f32 to vector<22x128xf32>
    %679 = arith.mulf %678, %668 : vector<22x128xf32>
    %680 = arith.addf %651, %679 : vector<22x128xf32>
    %c170 = arith.constant 170 : index
    %681 = memref.load %arg2[%c170] : memref<196xf32, #tpu.memory_space<smem>>
    %682 = vector.broadcast %681 : f32 to vector<22x128xf32>
    %683 = arith.mulf %682, %668 : vector<22x128xf32>
    %684 = arith.addf %655, %683 : vector<22x128xf32>
    %c177 = arith.constant 177 : index
    %685 = memref.load %arg2[%c177] : memref<196xf32, #tpu.memory_space<smem>>
    %686 = vector.broadcast %685 : f32 to vector<22x128xf32>
    %687 = arith.mulf %686, %668 : vector<22x128xf32>
    %688 = arith.addf %659, %687 : vector<22x128xf32>
    %c184 = arith.constant 184 : index
    %689 = memref.load %arg2[%c184] : memref<196xf32, #tpu.memory_space<smem>>
    %690 = vector.broadcast %689 : f32 to vector<22x128xf32>
    %691 = arith.mulf %690, %668 : vector<22x128xf32>
    %692 = arith.addf %663, %691 : vector<22x128xf32>
    %c191 = arith.constant 191 : index
    %693 = memref.load %arg2[%c191] : memref<196xf32, #tpu.memory_space<smem>>
    %694 = vector.broadcast %693 : f32 to vector<22x128xf32>
    %695 = arith.mulf %694, %668 : vector<22x128xf32>
    %696 = arith.addf %667, %695 : vector<22x128xf32>
    %697 = vector.extract_strided_slice %609 {offsets = [0, 3], sizes = [22, 128], strides = [1, 1]} : vector<22x256xf32> to vector<22x128xf32>
    %c150 = arith.constant 150 : index
    %698 = memref.load %arg2[%c150] : memref<196xf32, #tpu.memory_space<smem>>
    %699 = vector.broadcast %698 : f32 to vector<22x128xf32>
    %700 = arith.mulf %699, %697 : vector<22x128xf32>
    %701 = arith.addf %672, %700 : vector<22x128xf32>
    %c157 = arith.constant 157 : index
    %702 = memref.load %arg2[%c157] : memref<196xf32, #tpu.memory_space<smem>>
    %703 = vector.broadcast %702 : f32 to vector<22x128xf32>
    %704 = arith.mulf %703, %697 : vector<22x128xf32>
    %705 = arith.addf %676, %704 : vector<22x128xf32>
    %c164 = arith.constant 164 : index
    %706 = memref.load %arg2[%c164] : memref<196xf32, #tpu.memory_space<smem>>
    %707 = vector.broadcast %706 : f32 to vector<22x128xf32>
    %708 = arith.mulf %707, %697 : vector<22x128xf32>
    %709 = arith.addf %680, %708 : vector<22x128xf32>
    %c171 = arith.constant 171 : index
    %710 = memref.load %arg2[%c171] : memref<196xf32, #tpu.memory_space<smem>>
    %711 = vector.broadcast %710 : f32 to vector<22x128xf32>
    %712 = arith.mulf %711, %697 : vector<22x128xf32>
    %713 = arith.addf %684, %712 : vector<22x128xf32>
    %c178 = arith.constant 178 : index
    %714 = memref.load %arg2[%c178] : memref<196xf32, #tpu.memory_space<smem>>
    %715 = vector.broadcast %714 : f32 to vector<22x128xf32>
    %716 = arith.mulf %715, %697 : vector<22x128xf32>
    %717 = arith.addf %688, %716 : vector<22x128xf32>
    %c185 = arith.constant 185 : index
    %718 = memref.load %arg2[%c185] : memref<196xf32, #tpu.memory_space<smem>>
    %719 = vector.broadcast %718 : f32 to vector<22x128xf32>
    %720 = arith.mulf %719, %697 : vector<22x128xf32>
    %721 = arith.addf %692, %720 : vector<22x128xf32>
    %c192 = arith.constant 192 : index
    %722 = memref.load %arg2[%c192] : memref<196xf32, #tpu.memory_space<smem>>
    %723 = vector.broadcast %722 : f32 to vector<22x128xf32>
    %724 = arith.mulf %723, %697 : vector<22x128xf32>
    %725 = arith.addf %696, %724 : vector<22x128xf32>
    %726 = vector.extract_strided_slice %609 {offsets = [0, 4], sizes = [22, 128], strides = [1, 1]} : vector<22x256xf32> to vector<22x128xf32>
    %c151 = arith.constant 151 : index
    %727 = memref.load %arg2[%c151] : memref<196xf32, #tpu.memory_space<smem>>
    %728 = vector.broadcast %727 : f32 to vector<22x128xf32>
    %729 = arith.mulf %728, %726 : vector<22x128xf32>
    %730 = arith.addf %701, %729 : vector<22x128xf32>
    %c158 = arith.constant 158 : index
    %731 = memref.load %arg2[%c158] : memref<196xf32, #tpu.memory_space<smem>>
    %732 = vector.broadcast %731 : f32 to vector<22x128xf32>
    %733 = arith.mulf %732, %726 : vector<22x128xf32>
    %734 = arith.addf %705, %733 : vector<22x128xf32>
    %c165 = arith.constant 165 : index
    %735 = memref.load %arg2[%c165] : memref<196xf32, #tpu.memory_space<smem>>
    %736 = vector.broadcast %735 : f32 to vector<22x128xf32>
    %737 = arith.mulf %736, %726 : vector<22x128xf32>
    %738 = arith.addf %709, %737 : vector<22x128xf32>
    %c172 = arith.constant 172 : index
    %739 = memref.load %arg2[%c172] : memref<196xf32, #tpu.memory_space<smem>>
    %740 = vector.broadcast %739 : f32 to vector<22x128xf32>
    %741 = arith.mulf %740, %726 : vector<22x128xf32>
    %742 = arith.addf %713, %741 : vector<22x128xf32>
    %c179 = arith.constant 179 : index
    %743 = memref.load %arg2[%c179] : memref<196xf32, #tpu.memory_space<smem>>
    %744 = vector.broadcast %743 : f32 to vector<22x128xf32>
    %745 = arith.mulf %744, %726 : vector<22x128xf32>
    %746 = arith.addf %717, %745 : vector<22x128xf32>
    %c186 = arith.constant 186 : index
    %747 = memref.load %arg2[%c186] : memref<196xf32, #tpu.memory_space<smem>>
    %748 = vector.broadcast %747 : f32 to vector<22x128xf32>
    %749 = arith.mulf %748, %726 : vector<22x128xf32>
    %750 = arith.addf %721, %749 : vector<22x128xf32>
    %c193 = arith.constant 193 : index
    %751 = memref.load %arg2[%c193] : memref<196xf32, #tpu.memory_space<smem>>
    %752 = vector.broadcast %751 : f32 to vector<22x128xf32>
    %753 = arith.mulf %752, %726 : vector<22x128xf32>
    %754 = arith.addf %725, %753 : vector<22x128xf32>
    %755 = vector.extract_strided_slice %609 {offsets = [0, 5], sizes = [22, 128], strides = [1, 1]} : vector<22x256xf32> to vector<22x128xf32>
    %c152 = arith.constant 152 : index
    %756 = memref.load %arg2[%c152] : memref<196xf32, #tpu.memory_space<smem>>
    %757 = vector.broadcast %756 : f32 to vector<22x128xf32>
    %758 = arith.mulf %757, %755 : vector<22x128xf32>
    %759 = arith.addf %730, %758 : vector<22x128xf32>
    %c159 = arith.constant 159 : index
    %760 = memref.load %arg2[%c159] : memref<196xf32, #tpu.memory_space<smem>>
    %761 = vector.broadcast %760 : f32 to vector<22x128xf32>
    %762 = arith.mulf %761, %755 : vector<22x128xf32>
    %763 = arith.addf %734, %762 : vector<22x128xf32>
    %c166 = arith.constant 166 : index
    %764 = memref.load %arg2[%c166] : memref<196xf32, #tpu.memory_space<smem>>
    %765 = vector.broadcast %764 : f32 to vector<22x128xf32>
    %766 = arith.mulf %765, %755 : vector<22x128xf32>
    %767 = arith.addf %738, %766 : vector<22x128xf32>
    %c173 = arith.constant 173 : index
    %768 = memref.load %arg2[%c173] : memref<196xf32, #tpu.memory_space<smem>>
    %769 = vector.broadcast %768 : f32 to vector<22x128xf32>
    %770 = arith.mulf %769, %755 : vector<22x128xf32>
    %771 = arith.addf %742, %770 : vector<22x128xf32>
    %c180 = arith.constant 180 : index
    %772 = memref.load %arg2[%c180] : memref<196xf32, #tpu.memory_space<smem>>
    %773 = vector.broadcast %772 : f32 to vector<22x128xf32>
    %774 = arith.mulf %773, %755 : vector<22x128xf32>
    %775 = arith.addf %746, %774 : vector<22x128xf32>
    %c187 = arith.constant 187 : index
    %776 = memref.load %arg2[%c187] : memref<196xf32, #tpu.memory_space<smem>>
    %777 = vector.broadcast %776 : f32 to vector<22x128xf32>
    %778 = arith.mulf %777, %755 : vector<22x128xf32>
    %779 = arith.addf %750, %778 : vector<22x128xf32>
    %c194 = arith.constant 194 : index
    %780 = memref.load %arg2[%c194] : memref<196xf32, #tpu.memory_space<smem>>
    %781 = vector.broadcast %780 : f32 to vector<22x128xf32>
    %782 = arith.mulf %781, %755 : vector<22x128xf32>
    %783 = arith.addf %754, %782 : vector<22x128xf32>
    %784 = vector.extract_strided_slice %609 {offsets = [0, 6], sizes = [22, 128], strides = [1, 1]} : vector<22x256xf32> to vector<22x128xf32>
    %c153 = arith.constant 153 : index
    %785 = memref.load %arg2[%c153] : memref<196xf32, #tpu.memory_space<smem>>
    %786 = vector.broadcast %785 : f32 to vector<22x128xf32>
    %787 = arith.mulf %786, %784 : vector<22x128xf32>
    %788 = arith.addf %759, %787 : vector<22x128xf32>
    %c160 = arith.constant 160 : index
    %789 = memref.load %arg2[%c160] : memref<196xf32, #tpu.memory_space<smem>>
    %790 = vector.broadcast %789 : f32 to vector<22x128xf32>
    %791 = arith.mulf %790, %784 : vector<22x128xf32>
    %792 = arith.addf %763, %791 : vector<22x128xf32>
    %c167 = arith.constant 167 : index
    %793 = memref.load %arg2[%c167] : memref<196xf32, #tpu.memory_space<smem>>
    %794 = vector.broadcast %793 : f32 to vector<22x128xf32>
    %795 = arith.mulf %794, %784 : vector<22x128xf32>
    %796 = arith.addf %767, %795 : vector<22x128xf32>
    %c174 = arith.constant 174 : index
    %797 = memref.load %arg2[%c174] : memref<196xf32, #tpu.memory_space<smem>>
    %798 = vector.broadcast %797 : f32 to vector<22x128xf32>
    %799 = arith.mulf %798, %784 : vector<22x128xf32>
    %800 = arith.addf %771, %799 : vector<22x128xf32>
    %c181 = arith.constant 181 : index
    %801 = memref.load %arg2[%c181] : memref<196xf32, #tpu.memory_space<smem>>
    %802 = vector.broadcast %801 : f32 to vector<22x128xf32>
    %803 = arith.mulf %802, %784 : vector<22x128xf32>
    %804 = arith.addf %775, %803 : vector<22x128xf32>
    %c188 = arith.constant 188 : index
    %805 = memref.load %arg2[%c188] : memref<196xf32, #tpu.memory_space<smem>>
    %806 = vector.broadcast %805 : f32 to vector<22x128xf32>
    %807 = arith.mulf %806, %784 : vector<22x128xf32>
    %808 = arith.addf %779, %807 : vector<22x128xf32>
    %c195 = arith.constant 195 : index
    %809 = memref.load %arg2[%c195] : memref<196xf32, #tpu.memory_space<smem>>
    %810 = vector.broadcast %809 : f32 to vector<22x128xf32>
    %811 = arith.mulf %810, %784 : vector<22x128xf32>
    %812 = arith.addf %783, %811 : vector<22x128xf32>
    %813 = vector.extract_strided_slice %788 {offsets = [0, 0], sizes = [16, 128], strides = [1, 1]} : vector<22x128xf32> to vector<16x128xf32>
    %814 = vector.extract_strided_slice %792 {offsets = [1, 0], sizes = [16, 128], strides = [1, 1]} : vector<22x128xf32> to vector<16x128xf32>
    %815 = arith.addf %813, %814 : vector<16x128xf32>
    %816 = vector.extract_strided_slice %796 {offsets = [2, 0], sizes = [16, 128], strides = [1, 1]} : vector<22x128xf32> to vector<16x128xf32>
    %817 = arith.addf %815, %816 : vector<16x128xf32>
    %818 = vector.extract_strided_slice %800 {offsets = [3, 0], sizes = [16, 128], strides = [1, 1]} : vector<22x128xf32> to vector<16x128xf32>
    %819 = arith.addf %817, %818 : vector<16x128xf32>
    %820 = vector.extract_strided_slice %804 {offsets = [4, 0], sizes = [16, 128], strides = [1, 1]} : vector<22x128xf32> to vector<16x128xf32>
    %821 = arith.addf %819, %820 : vector<16x128xf32>
    %822 = vector.extract_strided_slice %808 {offsets = [5, 0], sizes = [16, 128], strides = [1, 1]} : vector<22x128xf32> to vector<16x128xf32>
    %823 = arith.addf %821, %822 : vector<16x128xf32>
    %824 = vector.extract_strided_slice %812 {offsets = [6, 0], sizes = [16, 128], strides = [1, 1]} : vector<22x128xf32> to vector<16x128xf32>
    %825 = arith.addf %823, %824 : vector<16x128xf32>
    %826 = arith.negf %825 : vector<16x128xf32>
    %827 = math.exp %826 : vector<16x128xf32>
    %cst = arith.constant 1.000000e+00 : f32
    %828 = vector.broadcast %cst : f32 to vector<16x128xf32>
    %829 = arith.addf %828, %827 : vector<16x128xf32>
    %830 = arith.divf %828, %829 : vector<16x128xf32>
    %831 = vector.shape_cast %830 : vector<16x128xf32> to vector<1x16x128xf32>
    %c0_16 = arith.constant 0 : index
    %c0_17 = arith.constant 0 : index
    %c0_18 = arith.constant 0 : index
    %832 = vector.load %arg3[%c0_16, %c0_17, %c0_18] : memref<1x16x128xf32, #tpu.memory_space<vmem>>, vector<1x16x128xf32>
    tpu.vector_store %arg3[%c0_16, %c0_17, %c0_18], %831 {strides = array<i32>} : memref<1x16x128xf32, #tpu.memory_space<vmem>>, vector<1x16x128xf32>,
    return
  }
  func.func @transform_0(%arg0: i32) -> (i32, i32, i32, i32) {
    %c0_i32 = arith.constant 0 : i32
    %c0_i32_0 = arith.constant 0 : i32
    %c0_i32_1 = arith.constant 0 : i32
    %c0_i32_2 = arith.constant 0 : i32
    return %arg0, %c0_i32, %c0_i32_0, %c0_i32_1 : i32, i32, i32, i32
  }
  func.func @transform_1(%arg0: i32) -> i32 {
    %c0_i32 = arith.constant 0 : i32
    %c0_i32_0 = arith.constant 0 : i32
    return %c0_i32 : i32
  }
  func.func @transform_2(%arg0: i32) -> (i32, i32, i32) {
    %c0_i32 = arith.constant 0 : i32
    %c0_i32_0 = arith.constant 0 : i32
    %c0_i32_1 = arith.constant 0 : i32
    return %arg0, %c0_i32, %c0_i32_0 : i32, i32, i32
  }
}

</mosaic_0001>

<bundles_post_ra>
// kernel: tpu_custom_call.1
= control target key start
LH: loop header
LB: loop body
LE: loop exit
PB: predicated region body
PF: predicated region fallthrough
CT: control target
= control target key end

     0   :  { %7 = vsyncpa [#allocation4], 0  ;;  %s12881_s0 = inlined_call_operand.vmem [shape: f32[2,4,22,256], index: 0, kind: input, shape index: {}]   ;;  %s12882_s1 = inlined_call_operand.vmem [shape: f32[196], index: 1, kind: input, shape index: {}]   ;;  %s12883_s2 = inlined_call_operand.hbm [shape: f32[2,16,128], index: 2, kind: output, shape index: {}]  }
   0x1   :  { %8 = vsyncpa [#allocation3], 0 }
   0x2   :  { %10 = vsyncpa [#allocation3 + $0x1], 0  ;;  %s6630_s9 = smov 0   ;;  %s6632_s10 = smov 0  }
   0x3   :  { %s6634_s11 = smov 0   ;;  %s6636_s12 = smov 0  }
   0x4 LB: > { %s6651_s13 = sadd.s32 4294967295, %s6603_s12   ;;  %s6181_s14 = sadd.s32 4294967294, %s6603_s12   ;;  %s6603_s12 = sphi %s6636_s12, %s14614_s12   ;;  %s6599_s11 = sphi %s6634_s11, %s14613_s11   ;;  %s6595_s10 = sphi %s6632_s10, %s14612_s10   ;;  %s6591_s9 = sphi %s6630_s9, %s14611_s9  }
   0x5   : > { %s6655_s15 = sadd.s32 1, %s6603_s12   ;;  %s70_s16 = sadd.s32 1, %s6599_s11 }
   0x6   : > { %s67_s17 = ssub.s32 %s6603_s12, %s6655_s15  ;;  %p80_p0 = scmp.ne.s32.totalorder %s6599_s11, %s6595_s10 }
   0x7   : > { %p68_p1 = scmp.eq.s32.totalorder %s67_s17, 0  ;;  %p81_p2 = scmp.eq.s32.totalorder %s6651_s13, 1 }
   0x8   : > { %p86_p3 = scmp.ne.s32.totalorder %s6595_s10, %s6591_s9  ;;  %p87_p4 = scmp.eq.s32.totalorder %s6181_s14, 1 }
   0x9   : > { %s6666_s18 = scalar_select %p68_p1, %s6599_s11, %s70_s16  }
   0xa   : > { %p6668_p5 = por %p81_p2, %p80_p0  ;;  %p6672_p6 = por %p87_p4, %p86_p3 }
   0xb   : > { %p6182_p7 = scmp.ge.s32.totalorder %s6603_s12, 1  ;;  %p94_p8 = scmp.lt.s32.totalorder %s6603_s12, 3 }
   0xc   : > { %p6425_p9 = scmp.eq.s32.totalorder %s6651_s13, 0  ;;  %s107_s24 = sshll.u32 %s12882_s1, 4  ;;  %s108_s24 = int_to_ptr.vmem [resolvable:$true] %s107_s24 }
   0xd   : > { %p6679_p10 = pnand %p6182_p7, %p94_p8  ;;  %s6522_s25 = scalar_lea.vmem %s108_s24, 32 }
   0xe   : > { %p6523_p13 = scmp.ne.s32.totalorder %s108_s24, %s6522_s25  ;;  %p6530_p3 = scmp.lt.s32.totalorder %s108_s24, %s108_s24 }
   0xf   : > { %p6417_p11 = pneg %p6679_p10  ;;  %p6531_p4 = scmp.lt.s32.totalorder %s6522_s25, %s6522_s25 }
  0x11   : > { %p6418_p12 = pnand %p6425_p9, %p6417_p11  ;;  %p6532_p7 = por %p6531_p4, %p6530_p3 }
  0x13   : > { %p6524_p0 = pneg %p6418_p12 }
  0x15   : > { %p6525_p1 = pnand %p6524_p0, %p6523_p13 }
  0x17   : > { %p6526_p2 = pneg %p6525_p1 }
  0x19   : > { %p6533_p8 = pnand %p6532_p7, %p6526_p2 }
  0x1b   : > { %6536 = shalt.err (!%p6533_p8)
}
  0x1c   : > { %s6605_s26 = smov [#allocation2]   ;;  %128 = sbr.rel (%p6679_p10) target bundleno = 2133 (0x855), region = 28 }
  0x1d   : > { %6420 = dma.vmem_to_smem (!%p6418_p12), %s108_s24, 32, %s6605_s26, [#allocation4]  }
  0x23   : > { %6582 = dma.done.wait (%p6425_p9), [#allocation4], 32  }
  0x24   : > { %6584 = vsyncadd (%p6425_p9), [#allocation4], 4294967264 }
  0x25   : > { %134 = sfence }
  0x26   : > { %p151_p11 = scmp.lt.s32.totalorder %s6651_s13, 1  ;;  %s6195_s27 = sld [smem:[#allocation2 + $0x1]]  ;;  %vm214_vm0 = vcmask 1039360   ;;  %vm449_vm1 = vcmask 1031168   ;;  %vm684_vm2 = vcmask 1022976   ;;  %vm919_vm3 = vcmask 1014784  }
  0x27   : > { %s6196_s29 = sld [smem:[#allocation2 + $0x8]]  ;;  %s6606_s6 = smov 127   ;;  %vm1154_vm4 = vcmask 1006592   ;;  %vm1389_vm5 = vcmask 998400   ;;  %vm6004_vm6 = vcmask 1046528   ;;  %vm6017_vm7 = vcmask 1045504  }
  0x28   : > { %s152_s28 = scalar_select %p151_p11, %s6651_s13, 1  ;;  %vm6030_vm8 = vcmask 1044480   ;;  %vm6043_vm9 = vcmask 1043456   ;;  %vm6056_vm10 = vcmask 1042432   ;;  %vm6069_vm11 = vcmask 1041408  }
  0x29   : > { %s6197_s7 = sld [smem:[#allocation2 + $0xf]]  ;;  %s6198_s8 = sld [smem:[#allocation2 + $0x16]] }
  0x2a   : > { %s6410_s30 = smul.u32 192, %s152_s28  ;;  %s6199_s14 = sld [smem:[#allocation2 + $0x1d]] }
  0x2b   : > { %s6200_s16 = sld [smem:[#allocation2 + $0x24]]  ;;  %s6201_s17 = sld [smem:[#allocation2 + $0x2b]] }
  0x2c   : > { %s6701_s5 = scalar_lea.vmem %s12881_s0, %s6410_s30  ;;  %v197_v0 = vstv %s6195_s27  ;;  %s6202_s21 = sld [smem:[#allocation2 + $0x2]] }
  0x2d   : > { %v6704_v1 = vld [vmem:[%s6701_s5 + $0x10] sm:$0xff]  ;;  %v6707_v2 = vld [vmem:[%s6701_s5] sm:$0xff]  ;;  %v6710_v3 = vld [vmem:[%s6701_s5 + $0x18] sm:$0xff]  ;;  %v222_v9 = vstv %s6196_s29  ;;  %s6203_s22 = sld [smem:[#allocation2 + $0x9]]  ;;  %s6607_s23 = smov 126  }
  0x2e   : > { %v200_v4 = vmul.f32 %v197_v0, %v6704_v1  ;;  %v198_v5 = vmul.f32 %v197_v0, %v6707_v2  ;;  %v6715_v6 = vld [vmem:[%s6701_s5 + $0x8] sm:$0xff]  ;;  %v201_v7 = vmul.f32 %v197_v0, %v6710_v3  ;;  %v223_v11 = vmul.f32 %v222_v9, %v6707_v2  ;;  %v6733_v15 = vld [vmem:[%s6701_s5 + $0x20] sm:$0x3f]  ;;  %s6204_s24 = sld [smem:[#allocation2 + $0x10]]  ;;  %s6205_s25 = sld [smem:[#allocation2 + $0x17]] }
  0x2f   : > { %v199_v8 = vmul.f32 %v197_v0, %v6715_v6  ;;  %v224_v10 = vmul.f32 %v222_v9, %v6715_v6  ;;  %v226_v12 = vmul.f32 %v222_v9, %v6710_v3  ;;  %v225_v13 = vmul.f32 %v222_v9, %v6704_v1  ;;  %v6730_v14 = vld [vmem:[%s6701_s5 + $0x28] sm:$0x3f]  ;;  %s6206_s26 = sld [smem:[#allocation2 + $0x1e]]  ;;  %s6207_s27 = sld [smem:[#allocation2 + $0x25]] }
  0x30   : > { %210 = vrot.lane.b32.xlu1 %v200_v4, %s6606_s6  ;;  %206 = vrot.lane.b32.xlu0 %v198_v5, %s6606_s6  ;;  %v228_v16 = vmul.f32 %v222_v9, %v6730_v14  ;;  %v227_v17 = vmul.f32 %v222_v9, %v6733_v15  ;;  %v257_v18 = vstv %s6197_s7  ;;  %v292_v25 = vstv %s6198_s8  ;;  %s6208_s28 = sld [smem:[#allocation2 + $0x2c]]  ;;  %s6209_s29 = sld [smem:[#allocation2 + $0x3]] }
  0x31   : > { %v259_v19 = vmul.f32 %v257_v18, %v6715_v6  ;;  %v258_v20 = vmul.f32 %v257_v18, %v6707_v2  ;;  %v261_v21 = vmul.f32 %v257_v18, %v6710_v3  ;;  %v260_v22 = vmul.f32 %v257_v18, %v6704_v1  ;;  %s6210_s30 = sld [smem:[#allocation2 + $0xa]]  ;;  %s6608_s3 = smov 125  }
  0x32   : > { %v263_v23 = vmul.f32 %v257_v18, %v6730_v14  ;;  %v262_v24 = vmul.f32 %v257_v18, %v6733_v15  ;;  %v294_v26 = vmul.f32 %v292_v25, %v6715_v6  ;;  %v293_v27 = vmul.f32 %v292_v25, %v6707_v2  ;;  %s6211_s4 = sld [smem:[#allocation2 + $0x11]]  ;;  %s6212_s7 = sld [smem:[#allocation2 + $0x18]] }
  0x33   : > { %v296_v28 = vmul.f32 %v292_v25, %v6710_v3  ;;  %v295_v29 = vmul.f32 %v292_v25, %v6704_v1  ;;  %v298_v30 = vmul.f32 %v292_v25, %v6730_v14  ;;  %v297_v31 = vmul.f32 %v292_v25, %v6733_v15  ;;  %s6213_s8 = sld [smem:[#allocation2 + $0x1f]] }
  0x34   : > { %212 = vrot.lane.b32.xlu1 %v201_v7, %s6606_s6  ;;  %208 = vrot.lane.b32.xlu0 %v199_v8, %s6606_s6  ;;  %v327_v32 = vstv %s6199_s14  ;;  %v362_v39 = vstv %s6200_s16  ;;  %s6214_s14 = sld [smem:[#allocation2 + $0x26]]  ;;  %s6215_s16 = sld [smem:[#allocation2 + $0x2d]] }
  0x35   : > { %v329_v33 = vmul.f32 %v327_v32, %v6715_v6  ;;  %v328_v34 = vmul.f32 %v327_v32, %v6707_v2  ;;  %v331_v35 = vmul.f32 %v327_v32, %v6710_v3  ;;  %v330_v36 = vmul.f32 %v327_v32, %v6704_v1 }
  0x36   : > { %v333_v37 = vmul.f32 %v327_v32, %v6730_v14  ;;  %v332_v38 = vmul.f32 %v327_v32, %v6733_v15  ;;  %v364_v40 = vmul.f32 %v362_v39, %v6715_v6  ;;  %v363_v41 = vmul.f32 %v362_v39, %v6707_v2 }
  0x37   : > { %v366_v42 = vmul.f32 %v362_v39, %v6710_v3  ;;  %v365_v43 = vmul.f32 %v362_v39, %v6704_v1  ;;  %v368_v44 = vmul.f32 %v362_v39, %v6730_v14  ;;  %v367_v45 = vmul.f32 %v362_v39, %v6733_v15 }
  0x38   : > { %237 = vrot.lane.b32.xlu1 %v224_v10, %s6606_s6  ;;  %235 = vrot.lane.b32.xlu0 %v223_v11, %s6606_s6  ;;  %v397_v46 = vstv %s6201_s17  ;;  %v432_v53 = vstv %s6202_s21  ;;  %s6216_s17 = sld [smem:[#allocation2 + $0x4]]  ;;  %s6217_s21 = sld [smem:[#allocation2 + $0xb]] }
  0x39   : > { %v399_v47 = vmul.f32 %v397_v46, %v6715_v6  ;;  %v398_v48 = vmul.f32 %v397_v46, %v6707_v2  ;;  %v401_v49 = vmul.f32 %v397_v46, %v6710_v3  ;;  %v400_v50 = vmul.f32 %v397_v46, %v6704_v1 }
  0x3a   : > { %v403_v51 = vmul.f32 %v397_v46, %v6730_v14  ;;  %v402_v52 = vmul.f32 %v397_v46, %v6733_v15  ;;  %v434_v54 = vmul.f32 %v432_v53, %v6715_v6  ;;  %v433_v55 = vmul.f32 %v432_v53, %v6707_v2 }
  0x3b   : > { %v436_v56 = vmul.f32 %v432_v53, %v6710_v3  ;;  %v435_v57 = vmul.f32 %v432_v53, %v6704_v1  ;;  %v457_v58 = vstv %s6203_s22  ;;  %v492_v4 = vstv %s6204_s24  ;;  %s6609_s22 = smov 124   ;;  %s6218_s24 = sld [smem:[#allocation2 + $0x12]] }
  0x3c   : > { %241 = vrot.lane.b32.xlu1 %v226_v12, %s6606_s6  ;;  %239 = vrot.lane.b32.xlu0 %v225_v13, %s6606_s6  ;;  %v459_v59 = vmul.f32 %v457_v58, %v6715_v6  ;;  %v458_v60 = vmul.f32 %v457_v58, %v6707_v2  ;;  %v461_v61 = vmul.f32 %v457_v58, %v6710_v3  ;;  %v527_v12 = vstv %s6205_s25  ;;  %s6219_s25 = sld [smem:[#allocation2 + $0x19]] }
  0x3d   : > { %v460_v62 = vmul.f32 %v457_v58, %v6704_v1  ;;  %v463_v63 = vmul.f32 %v457_v58, %v6730_v14  ;;  %v462_v0 = vmul.f32 %v457_v58, %v6733_v15  ;;  %v494_v5 = vmul.f32 %v492_v4, %v6715_v6 }
  0x3e   : > { %v493_v7 = vmul.f32 %v492_v4, %v6707_v2  ;;  %v496_v8 = vmul.f32 %v492_v4, %v6710_v3  ;;  %v495_v9 = vmul.f32 %v492_v4, %v6704_v1  ;;  %v498_v10 = vmul.f32 %v492_v4, %v6730_v14 }
  0x3f   : > { %v497_v11 = vmul.f32 %v492_v4, %v6733_v15  ;;  %v529_v13 = vmul.f32 %v527_v12, %v6715_v6  ;;  %v530_v18 = vmul.f32 %v527_v12, %v6704_v1 }
  0x40   : > { %245 = vrot.lane.b32.xlu1 %v228_v16, %s6606_s6  ;;  %243 = vrot.lane.b32.xlu0 %v227_v17, %s6606_s6  ;;  %v528_v16 = vmul.f32 %v527_v12, %v6707_v2  ;;  %v531_v17 = vmul.f32 %v527_v12, %v6710_v3 }
  0x44   : > { %272 = vrot.lane.b32.xlu1 %v259_v19, %s6606_s6  ;;  %270 = vrot.lane.b32.xlu0 %v258_v20, %s6606_s6 }
  0x48   : > { %276 = vrot.lane.b32.xlu1 %v261_v21, %s6606_s6  ;;  %274 = vrot.lane.b32.xlu0 %v260_v22, %s6606_s6  ;;  %v533_v21 = vmul.f32 %v527_v12, %v6730_v14  ;;  %v532_v22 = vmul.f32 %v527_v12, %v6733_v15 }
  0x4c   : > { %280 = vrot.lane.b32.xlu1 %v263_v23, %s6606_s6  ;;  %278 = vrot.lane.b32.xlu0 %v262_v24, %s6606_s6  ;;  %v562_v23 = vstv %s6206_s26  ;;  %s6220_s26 = sld [smem:[#allocation2 + $0x20]] }
  0x50   : > { %307 = vrot.lane.b32.xlu1 %v294_v26, %s6606_s6  ;;  %305 = vrot.lane.b32.xlu0 %v293_v27, %s6606_s6  ;;  %v564_v26 = vmul.f32 %v562_v23, %v6715_v6  ;;  %v563_v27 = vmul.f32 %v562_v23, %v6707_v2 }
  0x54   : > { %311 = vrot.lane.b32.xlu1 %v296_v28, %s6606_s6  ;;  %309 = vrot.lane.b32.xlu0 %v295_v29, %s6606_s6 }
  0x58   : > { %315 = vrot.lane.b32.xlu1 %v298_v30, %s6606_s6  ;;  %313 = vrot.lane.b32.xlu0 %v297_v31, %s6606_s6  ;;  %v566_v30 = vmul.f32 %v562_v23, %v6710_v3  ;;  %v565_v31 = vmul.f32 %v562_v23, %v6704_v1 }
  0x5c   : > { %342 = vrot.lane.b32.xlu1 %v329_v33, %s6606_s6  ;;  %340 = vrot.lane.b32.xlu0 %v328_v34, %s6606_s6  ;;  %v568_v34 = vmul.f32 %v562_v23, %v6730_v14 }
  0x60   : > { %346 = vrot.lane.b32.xlu1 %v331_v35, %s6606_s6  ;;  %344 = vrot.lane.b32.xlu0 %v330_v36, %s6606_s6  ;;  %v567_v35 = vmul.f32 %v562_v23, %v6733_v15  ;;  %v597_v36 = vstv %s6207_s27  ;;  %s6221_s27 = sld [smem:[#allocation2 + $0x27]] }
  0x61   : > { %v599_v39 = vmul.f32 %v597_v36, %v6715_v6 }
  0x64   : > { %350 = vrot.lane.b32.xlu1 %v333_v37, %s6606_s6  ;;  %348 = vrot.lane.b32.xlu0 %v332_v38, %s6606_s6 }
  0x68   : > { %377 = vrot.lane.b32.xlu1 %v364_v40, %s6606_s6  ;;  %375 = vrot.lane.b32.xlu0 %v363_v41, %s6606_s6  ;;  %v598_v40 = vmul.f32 %v597_v36, %v6707_v2 }
  0x6c   : > { %381 = vrot.lane.b32.xlu1 %v366_v42, %s6606_s6  ;;  %379 = vrot.lane.b32.xlu0 %v365_v43, %s6606_s6  ;;  %v601_v43 = vmul.f32 %v597_v36, %v6710_v3 }
  0x70   : > { %385 = vrot.lane.b32.xlu1 %v368_v44, %s6606_s6  ;;  %383 = vrot.lane.b32.xlu0 %v367_v45, %s6606_s6  ;;  %v600_v44 = vmul.f32 %v597_v36, %v6704_v1 }
  0x74   : > { %412 = vrot.lane.b32.xlu1 %v399_v47, %s6606_s6  ;;  %410 = vrot.lane.b32.xlu0 %v398_v48, %s6606_s6  ;;  %v603_v47 = vmul.f32 %v597_v36, %v6730_v14  ;;  %v602_v48 = vmul.f32 %v597_v36, %v6733_v15 }
  0x78   : > { %416 = vrot.lane.b32.xlu1 %v401_v49, %s6606_s6  ;;  %414 = vrot.lane.b32.xlu0 %v400_v50, %s6606_s6  ;;  %v632_v49 = vstv %s6208_s28  ;;  %s6222_s28 = sld [smem:[#allocation2 + $0x2e]] }
  0x79   : > { %v633_v53 = vmul.f32 %v632_v49, %v6707_v2 }
  0x7c   : > { %420 = vrot.lane.b32.xlu1 %v403_v51, %s6606_s6  ;;  %418 = vrot.lane.b32.xlu0 %v402_v52, %s6606_s6  ;;  %v634_v52 = vmul.f32 %v632_v49, %v6715_v6 }
  0x80   : > { %443 = vrot.lane.b32.xlu1 %v434_v54, %s6607_s23  ;;  %441 = vrot.lane.b32.xlu0 %v433_v55, %s6607_s23 }
  0x84   : > { %447 = vrot.lane.b32.xlu1 %v436_v56, %s6607_s23  ;;  %445 = vrot.lane.b32.xlu0 %v435_v57, %s6607_s23  ;;  %v636_v56 = vmul.f32 %v632_v49, %v6710_v3  ;;  %v635_v57 = vmul.f32 %v632_v49, %v6704_v1 }
  0x88   : > { %472 = vrot.lane.b32.xlu1 %v459_v59, %s6607_s23  ;;  %470 = vrot.lane.b32.xlu0 %v458_v60, %s6607_s23  ;;  %v638_v60 = vmul.f32 %v632_v49, %v6730_v14 }
  0x8c   : > { %476 = vrot.lane.b32.xlu1 %v461_v61, %s6607_s23  ;;  %474 = vrot.lane.b32.xlu0 %v460_v62, %s6607_s23  ;;  %v637_v61 = vmul.f32 %v632_v49, %v6733_v15  ;;  %v667_v62 = vstv %s6209_s29  ;;  %s6223_s29 = sld [smem:[#allocation2 + $0x5]] }
  0x8d   : > { %v669_v4 = vmul.f32 %v667_v62, %v6715_v6 }
  0x90   : > { %480 = vrot.lane.b32.xlu1 %v463_v63, %s6607_s23  ;;  %478 = vrot.lane.b32.xlu0 %v462_v0, %s6607_s23 }
  0x94   : > { %507 = vrot.lane.b32.xlu1 %v494_v5, %s6607_s23  ;;  %505 = vrot.lane.b32.xlu0 %v493_v7, %s6607_s23  ;;  %v668_v5 = vmul.f32 %v667_v62, %v6707_v2 }
  0x98   : > { %511 = vrot.lane.b32.xlu1 %v496_v8, %s6607_s23  ;;  %509 = vrot.lane.b32.xlu0 %v495_v9, %s6607_s23  ;;  %v671_v9 = vmul.f32 %v667_v62, %v6710_v3 }
  0x9c   : > { %515 = vrot.lane.b32.xlu1 %v498_v10, %s6607_s23  ;;  %513 = vrot.lane.b32.xlu0 %v497_v11, %s6607_s23  ;;  %v670_v10 = vmul.f32 %v667_v62, %v6704_v1  ;;  %v692_v11 = vstv %s6210_s30  ;;  %s6224_s30 = sld [smem:[#allocation2 + $0xc]] }
  0x9d   : > { %v695_v23 = vmul.f32 %v692_v11, %v6704_v1 }
  0xa0   : > { %542 = vrot.lane.b32.xlu1 %v529_v13, %s6607_s23  ;;  %540 = vrot.lane.b32.xlu0 %v528_v16, %s6607_s23  ;;  %v694_v16 = vmul.f32 %v692_v11, %v6715_v6 }
  0xa2   : > { %v6839_v19 = vpop.permute.xlu1 %210  ;;  %v6841_v20 = vpop.permute.xlu0 %206 }
  0xa4   : > { %546 = vrot.lane.b32.xlu1 %v531_v17, %s6607_s23  ;;  %544 = vrot.lane.b32.xlu0 %v530_v18, %s6607_s23  ;;  %v693_v17 = vmul.f32 %v692_v11, %v6707_v2 }
  0xa6   : > { %v6847_v24 = vpop.permute.xlu1 %212  ;;  %v6849_v25 = vpop.permute.xlu0 %208 }
  0xa8   : > { %550 = vrot.lane.b32.xlu1 %v533_v21, %s6607_s23  ;;  %548 = vrot.lane.b32.xlu0 %v532_v22, %s6607_s23  ;;  %v696_v22 = vmul.f32 %v692_v11, %v6710_v3 }
  0xaa   : > { %v6855_v28 = vpop.permute.xlu1 %237  ;;  %v6857_v29 = vpop.permute.xlu0 %235 }
  0xac   : > { %577 = vrot.lane.b32.xlu1 %v564_v26, %s6607_s23  ;;  %575 = vrot.lane.b32.xlu0 %v563_v27, %s6607_s23 }
  0xae   : > { %v6863_v32 = vpop.permute.xlu1 %241  ;;  %v6865_v33 = vpop.permute.xlu0 %239 }
  0xb0   : > { %581 = vrot.lane.b32.xlu1 %v566_v30, %s6607_s23  ;;  %579 = vrot.lane.b32.xlu0 %v565_v31, %s6607_s23  ;;  %v698_v30 = vmul.f32 %v692_v11, %v6730_v14  ;;  %v697_v31 = vmul.f32 %v692_v11, %v6733_v15 }
  0xb2   : > { %v6871_v37 = vpop.permute.xlu1 %245  ;;  %v6873_v38 = vpop.permute.xlu0 %243 }
  0xb4   : > { %585 = vrot.lane.b32.xlu1 %v568_v34, %s6607_s23  ;;  %583 = vrot.lane.b32.xlu0 %v567_v35, %s6607_s23  ;;  %v727_v34 = vstv %s6211_s4  ;;  %s6610_s4 = smov 123  }
  0xb6   : > { %v6879_v41 = vpop.permute.xlu1 %272  ;;  %v6881_v42 = vpop.permute.xlu0 %270 }
  0xb8   : > { %612 = vrot.lane.b32.xlu1 %v599_v39, %s6607_s23  ;;  %610 = vrot.lane.b32.xlu0 %v598_v40, %s6607_s23  ;;  %v729_v39 = vmul.f32 %v727_v34, %v6715_v6  ;;  %v728_v40 = vmul.f32 %v727_v34, %v6707_v2 }
  0xba   : > { %v6887_v45 = vpop.permute.xlu1 %276  ;;  %v6889_v46 = vpop.permute.xlu0 %274 }
  0xbc   : > { %616 = vrot.lane.b32.xlu1 %v601_v43, %s6607_s23  ;;  %614 = vrot.lane.b32.xlu0 %v600_v44, %s6607_s23 }
  0xbe   : > { %v6895_v50 = vpop.permute.xlu1 %280  ;;  %v6897_v51 = vpop.permute.xlu0 %278 }
  0xc0   : > { %620 = vrot.lane.b32.xlu1 %v603_v47, %s6607_s23  ;;  %618 = vrot.lane.b32.xlu0 %v602_v48, %s6607_s23  ;;  %v731_v47 = vmul.f32 %v727_v34, %v6710_v3  ;;  %v730_v48 = vmul.f32 %v727_v34, %v6704_v1 }
  0xc2   : > { %v6903_v54 = vpop.permute.xlu1 %307  ;;  %v6905_v55 = vpop.permute.xlu0 %305 }
  0xc4   : > { %647 = vrot.lane.b32.xlu1 %v634_v52, %s6607_s23  ;;  %645 = vrot.lane.b32.xlu0 %v633_v53, %s6607_s23  ;;  %v733_v53 = vmul.f32 %v727_v34, %v6730_v14 }
  0xc6   : > { %v6911_v58 = vpop.permute.xlu1 %311  ;;  %v6913_v59 = vpop.permute.xlu0 %309 }
  0xc8   : > { %651 = vrot.lane.b32.xlu1 %v636_v56, %s6607_s23  ;;  %649 = vrot.lane.b32.xlu0 %v635_v57, %s6607_s23  ;;  %v732_v56 = vmul.f32 %v727_v34, %v6733_v15  ;;  %v762_v57 = vstv %s6212_s7  ;;  %s6225_s7 = sld [smem:[#allocation2 + $0x13]] }
  0xc9   : > { %v764_v62 = vmul.f32 %v762_v57, %v6715_v6  ;;  %v765_v11 = vmul.f32 %v762_v57, %v6704_v1 }
  0xca   : > { %v6919_v63 = vpop.permute.xlu1 %315  ;;  %v6921_v0 = vpop.permute.xlu0 %313 }
  0xcc   : > { %655 = vrot.lane.b32.xlu1 %v638_v60, %s6607_s23  ;;  %653 = vrot.lane.b32.xlu0 %v637_v61, %s6607_s23 }
  0xce   : > { %v6927_v7 = vpop.permute.xlu1 %342  ;;  %v6929_v8 = vpop.permute.xlu0 %340 }
  0xd0   : > { %678 = vrot.lane.b32.xlu1 %v669_v4, %s6608_s3  ;;  %676 = vrot.lane.b32.xlu0 %v668_v5, %s6608_s3  ;;  %v763_v4 = vmul.f32 %v762_v57, %v6707_v2 }
  0xd2   : > { %v6935_v12 = vpop.permute.xlu1 %346  ;;  %v6937_v13 = vpop.permute.xlu0 %344 }
  0xd4   : > { %682 = vrot.lane.b32.xlu1 %v671_v9, %s6608_s3  ;;  %680 = vrot.lane.b32.xlu0 %v670_v10, %s6608_s3  ;;  %v766_v10 = vmul.f32 %v762_v57, %v6710_v3 }
  0xd6   : > { %v6943_v18 = vpop.permute.xlu1 %350  ;;  %v6945_v21 = vpop.permute.xlu0 %348 }
  0xd8   : > { %707 = vrot.lane.b32.xlu1 %v694_v16, %s6608_s3  ;;  %705 = vrot.lane.b32.xlu0 %v693_v17, %s6608_s3 }
  0xda   : > { %v6951_v26 = vpop.permute.xlu1 %377  ;;  %v6953_v27 = vpop.permute.xlu0 %375 }
  0xdb   : > { %12891 = vst [vmem:[#allocation8_spill] sm:$0xff] %v6953_v27 }
  0xdc   : > { %711 = vrot.lane.b32.xlu1 %v696_v22, %s6608_s3  ;;  %709 = vrot.lane.b32.xlu0 %v695_v23, %s6608_s3  ;;  %v768_v22 = vmul.f32 %v762_v57, %v6730_v14  ;;  %v767_v23 = vmul.f32 %v762_v57, %v6733_v15 }
  0xde   : > { %v6959_v35 = vpop.permute.xlu1 %381  ;;  %v6961_v36 = vpop.permute.xlu0 %379 }
  0xdf   : > { %12892 = vst [vmem:[#allocation9_spill] sm:$0xff] %v6959_v35  ;;  %12893 = vst [vmem:[#allocation10_spill] sm:$0xff] %v6961_v36 }
  0xe0   : > { %715 = vrot.lane.b32.xlu1 %v698_v30, %s6608_s3  ;;  %713 = vrot.lane.b32.xlu0 %v697_v31, %s6608_s3  ;;  %v797_v30 = vstv %s6213_s8  ;;  %s6226_s8 = sld [smem:[#allocation2 + $0x1a]] }
  0xe2   : > { %v6967_v43 = vpop.permute.xlu1 %385  ;;  %v6969_v44 = vpop.permute.xlu0 %383 }
  0xe3   : > { %12894 = vst [vmem:[#allocation11_spill] sm:$0xff] %v6967_v43  ;;  %12895 = vst [vmem:[#allocation12_spill] sm:$0xff] %v6969_v44 }
  0xe4   : > { %742 = vrot.lane.b32.xlu1 %v729_v39, %s6608_s3  ;;  %740 = vrot.lane.b32.xlu0 %v728_v40, %s6608_s3  ;;  %v799_v39 = vmul.f32 %v797_v30, %v6715_v6  ;;  %v798_v40 = vmul.f32 %v797_v30, %v6707_v2 }
  0xe6   : > { %v6975_v49 = vpop.permute.xlu1 %412  ;;  %v6977_v52 = vpop.permute.xlu0 %410 }
  0xe7   : > { %12896 = vst [vmem:[#allocation13_spill] sm:$0xff] %v6975_v49  ;;  %12897 = vst [vmem:[#allocation14_spill] sm:$0xff] %v6977_v52 }
  0xe8   : > { %746 = vrot.lane.b32.xlu1 %v731_v47, %s6608_s3  ;;  %744 = vrot.lane.b32.xlu0 %v730_v48, %s6608_s3 }
  0xea   : > { %v6983_v60 = vpop.permute.xlu1 %416  ;;  %v6985_v61 = vpop.permute.xlu0 %414 }
  0xeb   : > { %12898 = vst [vmem:[#allocation15_spill] sm:$0xff] %v6983_v60  ;;  %12899 = vst [vmem:[#allocation16_spill] sm:$0xff] %v6985_v61 }
  0xec   : > { %750 = vrot.lane.b32.xlu1 %v733_v53, %s6608_s3  ;;  %748 = vrot.lane.b32.xlu0 %v732_v56, %s6608_s3  ;;  %v801_v53 = vmul.f32 %v797_v30, %v6710_v3  ;;  %v800_v56 = vmul.f32 %v797_v30, %v6704_v1 }
  0xee   : > { %v6991_v5 = vpop.permute.xlu1 %420  ;;  %v6993_v9 = vpop.permute.xlu0 %418 }
  0xef   : > { %12900 = vst [vmem:[#allocation17_spill] sm:$0xff] %v6991_v5  ;;  %12901 = vst [vmem:[#allocation18_spill] sm:$0xff] %v6993_v9 }
  0xf0   : > { %777 = vrot.lane.b32.xlu1 %v764_v62, %s6608_s3  ;;  %775 = vrot.lane.b32.xlu0 %v763_v4, %s6608_s3  ;;  %v803_v4 = vmul.f32 %v797_v30, %v6730_v14 }
  0xf2   : > { %v6999_v16 = vpop.permute.xlu1 %443  ;;  %v7001_v17 = vpop.permute.xlu0 %441 }
  0xf3   : > { %12902 = vst [vmem:[#allocation19_spill] sm:$0xff] %v6999_v16  ;;  %12903 = vst [vmem:[#allocation20_spill] sm:$0xff] %v7001_v17  ;;  %v6497_v17 = vld [vmem:[%s6701_s5 + $0x20] sm:$0x3f] }
  0xf4   : > { %781 = vrot.lane.b32.xlu1 %v766_v10, %s6608_s3  ;;  %779 = vrot.lane.b32.xlu0 %v765_v11, %s6608_s3  ;;  %v802_v10 = vmul.f32 %v797_v30, %v6733_v15  ;;  %v832_v11 = vstv %s6214_s14  ;;  %s6227_s14 = sld [smem:[#allocation2 + $0x21]] }
  0xf5   : > { %v836_v30 = vmul.f32 %v832_v11, %v6710_v3 }
  0xf6   : > { %v7007_v31 = vpop.permute.xlu1 %447  ;;  %v7009_v34 = vpop.permute.xlu0 %445 }
  0xf7   : > { %12904 = vst [vmem:[#allocation21_spill] sm:$0xff] %v7007_v31  ;;  %12905 = vst [vmem:[#allocation22_spill] sm:$0xff] %v7009_v34 }
  0xf8   : > { %785 = vrot.lane.b32.xlu1 %v768_v22, %s6608_s3  ;;  %783 = vrot.lane.b32.xlu0 %v767_v23, %s6608_s3 }
  0xfa   : > { %v7015_v47 = vpop.permute.xlu1 %472  ;;  %v7017_v48 = vpop.permute.xlu0 %470 }
  0xfb   : > { %12906 = vst [vmem:[#allocation23_spill] sm:$0xff] %v7015_v47  ;;  %12907 = vst [vmem:[#allocation24_spill] sm:$0xff] %v7017_v48  ;;  %v6496_v47 = vld [vmem:[%s6701_s5] sm:$0xff] }
  0xfc   : > { %812 = vrot.lane.b32.xlu1 %v799_v39, %s6608_s3  ;;  %810 = vrot.lane.b32.xlu0 %v798_v40, %s6608_s3  ;;  %v834_v39 = vmul.f32 %v832_v11, %v6715_v6  ;;  %v833_v40 = vmul.f32 %v832_v11, %v6707_v2 }
  0xfe   : > { %v7023_v57 = vpop.permute.xlu1 %476  ;;  %v7025_v62 = vpop.permute.xlu0 %474 }
  0xff   : > { %12908 = vst [vmem:[#allocation25_spill] sm:$0xff] %v7023_v57  ;;  %12909 = vst [vmem:[#allocation26_spill] sm:$0xff] %v7025_v62  ;;  %v6495_v57 = vld [vmem:[%s6701_s5 + $0x10] sm:$0xff] }
 0x100   : > { %816 = vrot.lane.b32.xlu1 %v801_v53, %s6608_s3  ;;  %814 = vrot.lane.b32.xlu0 %v800_v56, %s6608_s3 }
 0x102   : > { %v7031_v22 = vpop.permute.xlu1 %480  ;;  %v7033_v23 = vpop.permute.xlu0 %478 }
 0x103   : > { %12910 = vst [vmem:[#allocation27_spill] sm:$0xff] %v7031_v22  ;;  %12911 = vst [vmem:[#allocation28_spill] sm:$0xff] %v7033_v23  ;;  %v835_v23 = vmul.f32 %v832_v11, %v6704_v1  ;;  %v867_v22 = vstv %s6215_s16  ;;  %s6228_s16 = sld [smem:[#allocation2 + $0x28]] }
 0x104   : > { %820 = vrot.lane.b32.xlu1 %v803_v4, %s6608_s3  ;;  %818 = vrot.lane.b32.xlu0 %v802_v10, %s6608_s3 }
 0x106   : > { %v7039_v53 = vpop.permute.xlu1 %507  ;;  %v7041_v56 = vpop.permute.xlu0 %505 }
 0x107   : > { %12912 = vst [vmem:[#allocation29_spill] sm:$0xff] %v7039_v53  ;;  %12913 = vst [vmem:[#allocation30_spill] sm:$0xff] %v7041_v56  ;;  %v838_v53 = vmul.f32 %v832_v11, %v6730_v14  ;;  %v837_v56 = vmul.f32 %v832_v11, %v6733_v15  ;;  %v871_v11 = vmul.f32 %v867_v22, %v6710_v3 }
 0x108   : > { %847 = vrot.lane.b32.xlu1 %v834_v39, %s6608_s3  ;;  %845 = vrot.lane.b32.xlu0 %v833_v40, %s6608_s3 }
 0x10a   : > { %v7047_v4 = vpop.permute.xlu1 %511  ;;  %v7049_v10 = vpop.permute.xlu0 %509 }
 0x10b   : > { %12914 = vst [vmem:[#allocation31_spill] sm:$0xff] %v7047_v4  ;;  %12915 = vst [vmem:[#allocation32_spill] sm:$0xff] %v7049_v10  ;;  %v869_v4 = vmul.f32 %v867_v22, %v6715_v6  ;;  %v868_v10 = vmul.f32 %v867_v22, %v6707_v2 }
 0x10c   : > { %851 = vrot.lane.b32.xlu1 %v836_v30, %s6608_s3  ;;  %849 = vrot.lane.b32.xlu0 %v835_v23, %s6608_s3 }
 0x10e   : > { %v7055_v39 = vpop.permute.xlu1 %515  ;;  %v7057_v40 = vpop.permute.xlu0 %513 }
 0x10f   : > { %12916 = vst [vmem:[#allocation33_spill] sm:$0xff] %v7055_v39  ;;  %12917 = vst [vmem:[#allocation34_spill] sm:$0xff] %v7057_v40  ;;  %v870_v40 = vmul.f32 %v867_v22, %v6704_v1  ;;  %v902_v39 = vstv %s6216_s17  ;;  %s6229_s17 = sld [smem:[#allocation2 + $0x2f]] }
 0x110   : > { %855 = vrot.lane.b32.xlu1 %v838_v53, %s6608_s3  ;;  %853 = vrot.lane.b32.xlu0 %v837_v56, %s6608_s3 }
 0x112   : > { %v7063_v30 = vpop.permute.xlu1 %542  ;;  %v7065_v23 = vpop.permute.xlu0 %540 }
 0x113   : > { %12918 = vst [vmem:[#allocation35_spill] sm:$0xff] %v7063_v30  ;;  %12919 = vst [vmem:[#allocation36_spill] sm:$0xff] %v7065_v23  ;;  %v873_v30 = vmul.f32 %v867_v22, %v6730_v14  ;;  %v872_v23 = vmul.f32 %v867_v22, %v6733_v15  ;;  %v906_v22 = vmul.f32 %v902_v39, %v6710_v3 }
 0x114   : > { %882 = vrot.lane.b32.xlu1 %v869_v4, %s6608_s3  ;;  %880 = vrot.lane.b32.xlu0 %v868_v10, %s6608_s3 }
 0x116   : > { %v7071_v53 = vpop.permute.xlu1 %546  ;;  %v7073_v56 = vpop.permute.xlu0 %544 }
 0x117   : > { %12920 = vst [vmem:[#allocation37_spill] sm:$0xff] %v7071_v53  ;;  %12921 = vst [vmem:[#allocation38_spill] sm:$0xff] %v7073_v56  ;;  %v904_v56 = vmul.f32 %v902_v39, %v6715_v6 }
 0x118   : > { %886 = vrot.lane.b32.xlu1 %v871_v11, %s6608_s3  ;;  %884 = vrot.lane.b32.xlu0 %v870_v40, %s6608_s3  ;;  %v903_v11 = vmul.f32 %v902_v39, %v6707_v2 }
 0x11a   : > { %v7079_v4 = vpop.permute.xlu1 %550  ;;  %v7081_v10 = vpop.permute.xlu0 %548 }
 0x11b   : > { %12922 = vst [vmem:[#allocation39_spill] sm:$0xff] %v7079_v4  ;;  %12923 = vst [vmem:[#allocation40_spill] sm:$0xff] %v7081_v10  ;;  %v905_v10 = vmul.f32 %v902_v39, %v6704_v1 }
 0x11c   : > { %890 = vrot.lane.b32.xlu1 %v873_v30, %s6608_s3  ;;  %888 = vrot.lane.b32.xlu0 %v872_v23, %s6608_s3  ;;  %v927_v30 = vstv %s6217_s21  ;;  %s6230_s21 = sld [smem:[#allocation2 + $0x6]] }
 0x11d   : > { %v931_v39 = vmul.f32 %v927_v30, %v6710_v3 }
 0x11e   : > { %v7087_v53 = vpop.permute.xlu1 %577  ;;  %v7089_v40 = vpop.permute.xlu0 %575 }
 0x11f   : > { %12924 = vst [vmem:[#allocation41_spill] sm:$0xff] %v7087_v53  ;;  %12925 = vst [vmem:[#allocation42_spill] sm:$0xff] %v7089_v40  ;;  %v929_v40 = vmul.f32 %v927_v30, %v6715_v6  ;;  %v928_v53 = vmul.f32 %v927_v30, %v6707_v2 }
 0x120   : > { %913 = vrot.lane.b32.xlu1 %v904_v56, %s6609_s22  ;;  %911 = vrot.lane.b32.xlu0 %v903_v11, %s6609_s22 }
 0x122   : > { %v7095_v4 = vpop.permute.xlu1 %581  ;;  %v7097_v23 = vpop.permute.xlu0 %579 }
 0x123   : > { %12926 = vst [vmem:[#allocation43_spill] sm:$0xff] %v7095_v4  ;;  %12927 = vst [vmem:[#allocation44_spill] sm:$0xff] %v7097_v23  ;;  %v930_v23 = vmul.f32 %v927_v30, %v6704_v1  ;;  %v962_v4 = vstv %s6218_s24  ;;  %s6231_s24 = sld [smem:[#allocation2 + $0xd]] }
 0x124   : > { %917 = vrot.lane.b32.xlu1 %v906_v22, %s6609_s22  ;;  %915 = vrot.lane.b32.xlu0 %v905_v10, %s6609_s22 }
 0x126   : > { %v7103_v56 = vpop.permute.xlu1 %585  ;;  %v7105_v11 = vpop.permute.xlu0 %583 }
 0x127   : > { %12928 = vst [vmem:[#allocation45_spill] sm:$0xff] %v7103_v56  ;;  %12929 = vst [vmem:[#allocation46_spill] sm:$0xff] %v7105_v11  ;;  %v933_v56 = vmul.f32 %v927_v30, %v6730_v14  ;;  %v932_v11 = vmul.f32 %v927_v30, %v6733_v15  ;;  %v966_v30 = vmul.f32 %v962_v4, %v6710_v3 }
 0x128   : > { %942 = vrot.lane.b32.xlu1 %v929_v40, %s6609_s22  ;;  %940 = vrot.lane.b32.xlu0 %v928_v53, %s6609_s22 }
 0x12a   : > { %v7111_v22 = vpop.permute.xlu1 %612  ;;  %v7113_v10 = vpop.permute.xlu0 %610 }
 0x12b   : > { %12930 = vst [vmem:[#allocation47_spill] sm:$0xff] %v7111_v22  ;;  %12931 = vst [vmem:[#allocation48_spill] sm:$0xff] %v7113_v10  ;;  %v964_v22 = vmul.f32 %v962_v4, %v6715_v6  ;;  %v963_v10 = vmul.f32 %v962_v4, %v6707_v2 }
 0x12c   : > { %946 = vrot.lane.b32.xlu1 %v931_v39, %s6609_s22  ;;  %944 = vrot.lane.b32.xlu0 %v930_v23, %s6609_s22 }
 0x12e   : > { %v7119_v40 = vpop.permute.xlu1 %616  ;;  %v7121_v53 = vpop.permute.xlu0 %614 }
 0x12f   : > { %12932 = vst [vmem:[#allocation49_spill] sm:$0xff] %v7119_v40  ;;  %12933 = vst [vmem:[#allocation50_spill] sm:$0xff] %v7121_v53  ;;  %v965_v53 = vmul.f32 %v962_v4, %v6704_v1  ;;  %v997_v40 = vstv %s6219_s25  ;;  %s6611_s25 = smov 122  }
 0x130   : > { %950 = vrot.lane.b32.xlu1 %v933_v56, %s6609_s22  ;;  %948 = vrot.lane.b32.xlu0 %v932_v11, %s6609_s22 }
 0x132   : > { %v7127_v39 = vpop.permute.xlu1 %620  ;;  %v7129_v23 = vpop.permute.xlu0 %618 }
 0x133   : > { %12934 = vst [vmem:[#allocation51_spill] sm:$0xff] %v7127_v39  ;;  %12935 = vst [vmem:[#allocation52_spill] sm:$0xff] %v7129_v23  ;;  %v968_v39 = vmul.f32 %v962_v4, %v6730_v14  ;;  %v967_v23 = vmul.f32 %v962_v4, %v6733_v15  ;;  %v1001_v4 = vmul.f32 %v997_v40, %v6710_v3 }
 0x134   : > { %977 = vrot.lane.b32.xlu1 %v964_v22, %s6609_s22  ;;  %975 = vrot.lane.b32.xlu0 %v963_v10, %s6609_s22 }
 0x136   : > { %v7135_v56 = vpop.permute.xlu1 %647  ;;  %v7137_v11 = vpop.permute.xlu0 %645 }
 0x137   : > { %12936 = vst [vmem:[#allocation53_spill] sm:$0xff] %v7135_v56  ;;  %12937 = vst [vmem:[#allocation54_spill] sm:$0xff] %v7137_v11  ;;  %v999_v56 = vmul.f32 %v997_v40, %v6715_v6  ;;  %v998_v11 = vmul.f32 %v997_v40, %v6707_v2 }
 0x138   : > { %981 = vrot.lane.b32.xlu1 %v966_v30, %s6609_s22  ;;  %979 = vrot.lane.b32.xlu0 %v965_v53, %s6609_s22 }
 0x13a   : > { %v7143_v22 = vpop.permute.xlu1 %651  ;;  %v7145_v10 = vpop.permute.xlu0 %649 }
 0x13b   : > { %12938 = vst [vmem:[#allocation55_spill] sm:$0xff] %v7143_v22  ;;  %12939 = vst [vmem:[#allocation56_spill] sm:$0xff] %v7145_v10  ;;  %v1000_v10 = vmul.f32 %v997_v40, %v6704_v1  ;;  %v1032_v22 = vstv %s6220_s26  ;;  %s6232_s26 = sld [smem:[#allocation2 + $0x14]] }
 0x13c   : > { %985 = vrot.lane.b32.xlu1 %v968_v39, %s6609_s22  ;;  %983 = vrot.lane.b32.xlu0 %v967_v23, %s6609_s22 }
 0x13e   : > { %v7151_v30 = vpop.permute.xlu1 %655  ;;  %v7153_v53 = vpop.permute.xlu0 %653 }
 0x13f   : > { %12940 = vst [vmem:[#allocation57_spill] sm:$0xff] %v7151_v30  ;;  %12941 = vst [vmem:[#allocation58_spill] sm:$0xff] %v7153_v53  ;;  %v1003_v30 = vmul.f32 %v997_v40, %v6730_v14  ;;  %v1002_v53 = vmul.f32 %v997_v40, %v6733_v15  ;;  %v1036_v40 = vmul.f32 %v1032_v22, %v6710_v3 }
 0x140   : > { %1012 = vrot.lane.b32.xlu1 %v999_v56, %s6609_s22  ;;  %1010 = vrot.lane.b32.xlu0 %v998_v11, %s6609_s22 }
 0x142   : > { %v7159_v39 = vpop.permute.xlu1 %678  ;;  %v7161_v23 = vpop.permute.xlu0 %676 }
 0x143   : > { %12942 = vst [vmem:[#allocation59_spill] sm:$0xff] %v7159_v39  ;;  %12943 = vst [vmem:[#allocation60_spill] sm:$0xff] %v7161_v23  ;;  %v1034_v39 = vmul.f32 %v1032_v22, %v6715_v6  ;;  %v1033_v23 = vmul.f32 %v1032_v22, %v6707_v2 }
 0x144   : > { %1016 = vrot.lane.b32.xlu1 %v1001_v4, %s6609_s22  ;;  %1014 = vrot.lane.b32.xlu0 %v1000_v10, %s6609_s22 }
 0x146   : > { %v7167_v56 = vpop.permute.xlu1 %682  ;;  %v7169_v11 = vpop.permute.xlu0 %680 }
 0x147   : > { %12944 = vst [vmem:[#allocation61_spill] sm:$0xff] %v7167_v56  ;;  %12945 = vst [vmem:[#allocation62_spill] sm:$0xff] %v7169_v11  ;;  %v1035_v11 = vmul.f32 %v1032_v22, %v6704_v1  ;;  %v1067_v56 = vstv %s6221_s27  ;;  %s6233_s27 = sld [smem:[#allocation2 + $0x1b]] }
 0x148   : > { %1020 = vrot.lane.b32.xlu1 %v1003_v30, %s6609_s22  ;;  %1018 = vrot.lane.b32.xlu0 %v1002_v53, %s6609_s22 }
 0x14a   : > { %v7175_v4 = vpop.permute.xlu1 %707  ;;  %v7177_v10 = vpop.permute.xlu0 %705 }
 0x14b   : > { %12946 = vst [vmem:[#allocation63_spill] sm:$0xff] %v7175_v4  ;;  %12947 = vst [vmem:[#allocation64_spill] sm:$0xff] %v7177_v10  ;;  %v1038_v4 = vmul.f32 %v1032_v22, %v6730_v14  ;;  %v1037_v10 = vmul.f32 %v1032_v22, %v6733_v15  ;;  %v1071_v22 = vmul.f32 %v1067_v56, %v6710_v3 }
 0x14c   : > { %1047 = vrot.lane.b32.xlu1 %v1034_v39, %s6609_s22  ;;  %1045 = vrot.lane.b32.xlu0 %v1033_v23, %s6609_s22 }
 0x14e   : > { %v7183_v30 = vpop.permute.xlu1 %711  ;;  %v7185_v53 = vpop.permute.xlu0 %709 }
 0x14f   : > { %12948 = vst [vmem:[#allocation65_spill] sm:$0xff] %v7183_v30  ;;  %12949 = vst [vmem:[#allocation66_spill] sm:$0xff] %v7185_v53  ;;  %v1069_v30 = vmul.f32 %v1067_v56, %v6715_v6  ;;  %v1068_v53 = vmul.f32 %v1067_v56, %v6707_v2 }
 0x150   : > { %1051 = vrot.lane.b32.xlu1 %v1036_v40, %s6609_s22  ;;  %1049 = vrot.lane.b32.xlu0 %v1035_v11, %s6609_s22 }
 0x152   : > { %v7191_v39 = vpop.permute.xlu1 %715  ;;  %v7193_v23 = vpop.permute.xlu0 %713 }
 0x153   : > { %12950 = vst [vmem:[#allocation67_spill] sm:$0xff] %v7191_v39  ;;  %12951 = vst [vmem:[#allocation68_spill] sm:$0xff] %v7193_v23  ;;  %v1070_v23 = vmul.f32 %v1067_v56, %v6704_v1  ;;  %v1102_v39 = vstv %s6222_s28  ;;  %s6234_s28 = sld [smem:[#allocation2 + $0x22]] }
 0x154   : > { %1055 = vrot.lane.b32.xlu1 %v1038_v4, %s6609_s22  ;;  %1053 = vrot.lane.b32.xlu0 %v1037_v10, %s6609_s22 }
 0x156   : > { %v7199_v40 = vpop.permute.xlu1 %742  ;;  %v7201_v11 = vpop.permute.xlu0 %740 }
 0x157   : > { %12952 = vst [vmem:[#allocation69_spill] sm:$0xff] %v7199_v40  ;;  %12953 = vst [vmem:[#allocation70_spill] sm:$0xff] %v7201_v11  ;;  %v1073_v40 = vmul.f32 %v1067_v56, %v6730_v14  ;;  %v1072_v11 = vmul.f32 %v1067_v56, %v6733_v15  ;;  %v1106_v56 = vmul.f32 %v1102_v39, %v6710_v3 }
 0x158   : > { %1082 = vrot.lane.b32.xlu1 %v1069_v30, %s6609_s22  ;;  %1080 = vrot.lane.b32.xlu0 %v1068_v53, %s6609_s22 }
 0x15a   : > { %v7207_v4 = vpop.permute.xlu1 %746  ;;  %v7209_v10 = vpop.permute.xlu0 %744 }
 0x15b   : > { %12954 = vst [vmem:[#allocation71_spill] sm:$0xff] %v7207_v4  ;;  %12955 = vst [vmem:[#allocation72_spill] sm:$0xff] %v7209_v10  ;;  %v1104_v4 = vmul.f32 %v1102_v39, %v6715_v6  ;;  %v1103_v10 = vmul.f32 %v1102_v39, %v6707_v2 }
 0x15c   : > { %1086 = vrot.lane.b32.xlu1 %v1071_v22, %s6609_s22  ;;  %1084 = vrot.lane.b32.xlu0 %v1070_v23, %s6609_s22 }
 0x15e   : > { %v7215_v30 = vpop.permute.xlu1 %750  ;;  %v7217_v53 = vpop.permute.xlu0 %748 }
 0x15f   : > { %12956 = vst [vmem:[#allocation73_spill] sm:$0xff] %v7215_v30  ;;  %12957 = vst [vmem:[#allocation74_spill] sm:$0xff] %v7217_v53  ;;  %v1105_v53 = vmul.f32 %v1102_v39, %v6704_v1  ;;  %v1137_v30 = vstv %s6223_s29  ;;  %s6235_s29 = sld [smem:[#allocation2 + $0x29]] }
 0x160   : > { %1090 = vrot.lane.b32.xlu1 %v1073_v40, %s6609_s22  ;;  %1088 = vrot.lane.b32.xlu0 %v1072_v11, %s6609_s22 }
 0x162   : > { %v7223_v22 = vpop.permute.xlu1 %777  ;;  %v7225_v23 = vpop.permute.xlu0 %775 }
 0x163   : > { %12958 = vst [vmem:[#allocation75_spill] sm:$0xff] %v7223_v22  ;;  %12959 = vst [vmem:[#allocation76_spill] sm:$0xff] %v7225_v23  ;;  %v1108_v22 = vmul.f32 %v1102_v39, %v6730_v14  ;;  %v1107_v23 = vmul.f32 %v1102_v39, %v6733_v15  ;;  %v1141_v39 = vmul.f32 %v1137_v30, %v6710_v3 }
 0x164   : > { %1117 = vrot.lane.b32.xlu1 %v1104_v4, %s6609_s22  ;;  %1115 = vrot.lane.b32.xlu0 %v1103_v10, %s6609_s22 }
 0x166   : > { %v7231_v40 = vpop.permute.xlu1 %781  ;;  %v7233_v11 = vpop.permute.xlu0 %779 }
 0x167   : > { %12960 = vst [vmem:[#allocation77_spill] sm:$0xff] %v7231_v40  ;;  %12961 = vst [vmem:[#allocation78_spill] sm:$0xff] %v7233_v11  ;;  %v1139_v11 = vmul.f32 %v1137_v30, %v6715_v6 }
 0x168   : > { %1121 = vrot.lane.b32.xlu1 %v1106_v56, %s6609_s22  ;;  %1119 = vrot.lane.b32.xlu0 %v1105_v53, %s6609_s22  ;;  %v1138_v56 = vmul.f32 %v1137_v30, %v6707_v2 }
 0x16a   : > { %v7239_v4 = vpop.permute.xlu1 %785  ;;  %v7241_v10 = vpop.permute.xlu0 %783 }
 0x16b   : > { %12962 = vst [vmem:[#allocation79_spill] sm:$0xff] %v7239_v4  ;;  %12963 = vst [vmem:[#allocation80_spill] sm:$0xff] %v7241_v10  ;;  %v1140_v10 = vmul.f32 %v1137_v30, %v6704_v1 }
 0x16c   : > { %1125 = vrot.lane.b32.xlu1 %v1108_v22, %s6609_s22  ;;  %1123 = vrot.lane.b32.xlu0 %v1107_v23, %s6609_s22  ;;  %v1162_v22 = vstv %s6224_s30  ;;  %s6236_s30 = sld [smem:[#allocation2 + $0x30]] }
 0x16d   : > { %v1166_v30 = vmul.f32 %v1162_v22, %v6710_v3 }
 0x16e   : > { %v7247_v40 = vpop.permute.xlu1 %812  ;;  %v7249_v53 = vpop.permute.xlu0 %810 }
 0x16f   : > { %12964 = vst [vmem:[#allocation81_spill] sm:$0xff] %v7247_v40  ;;  %12965 = vst [vmem:[#allocation82_spill] sm:$0xff] %v7249_v53  ;;  %v1164_v53 = vmul.f32 %v1162_v22, %v6715_v6  ;;  %v1163_v40 = vmul.f32 %v1162_v22, %v6707_v2  ;;  %v1168_v2 = vmul.f32 %v1162_v22, %v6730_v14 }
 0x170   : > { %1148 = vrot.lane.b32.xlu1 %v1139_v11, %s6610_s4  ;;  %1146 = vrot.lane.b32.xlu0 %v1138_v56, %s6610_s4 }
 0x172   : > { %v7255_v4 = vpop.permute.xlu1 %816  ;;  %v7257_v23 = vpop.permute.xlu0 %814 }
 0x173   : > { %12966 = vst [vmem:[#allocation83_spill] sm:$0xff] %v7255_v4  ;;  %12967 = vst [vmem:[#allocation84_spill] sm:$0xff] %v7257_v23 }
 0x174   : > { %1152 = vrot.lane.b32.xlu1 %v1141_v39, %s6610_s4  ;;  %1150 = vrot.lane.b32.xlu0 %v1140_v10, %s6610_s4  ;;  %v1165_v39 = vmul.f32 %v1162_v22, %v6704_v1  ;;  %v7286_v1 = vld [vmem:[%s6701_s5 + $0x8] sm:$0xff] }
 0x176   : > { %v7263_v11 = vpop.permute.xlu1 %820  ;;  %v7265_v56 = vpop.permute.xlu0 %818 }
 0x177   : > { %12968 = vst [vmem:[#allocation85_spill] sm:$0xff] %v7263_v11  ;;  %12969 = vst [vmem:[#allocation86_spill] sm:$0xff] %v7265_v56  ;;  %v1197_v56 = vstv %s6225_s7  ;;  %v1232_v11 = vstv %s6226_s8  ;;  %s6250_s7 = sld [smem:[#allocation2 + $0x32]]  ;;  %s6251_s8 = sld [smem:[#allocation2 + $0x39]] }
 0x178   : > { %1177 = vrot.lane.b32.xlu1 %v1164_v53, %s6610_s4  ;;  %1175 = vrot.lane.b32.xlu0 %v1163_v40, %s6610_s4  ;;  %v1167_v53 = vmul.f32 %v1162_v22, %v6733_v15 }
 0x17a   : > { %v7271_v10 = vpop.permute.xlu1 %847  ;;  %v7273_v6 = vpop.permute.xlu0 %845 }
 0x17b   : > { %12970 = vst [vmem:[#allocation87_spill] sm:$0xff] %v7271_v10  ;;  %12971 = vst [vmem:[#allocation88_spill] sm:$0xff] %v7273_v6 }
 0x17c   : > { %1181 = vrot.lane.b32.xlu1 %v1166_v30, %s6610_s4  ;;  %1179 = vrot.lane.b32.xlu0 %v1165_v39, %s6610_s4  ;;  %v1199_v30 = vmul.f32 %v7286_v1, %v1197_v56  ;;  %v7290_v39 = vld [vmem:[%s6701_s5] sm:$0xff] }
 0x17d   : > { %v1198_v14 = vmul.f32 %v7290_v39, %v1197_v56 }
 0x17e   : > { %v7279_v40 = vpop.permute.xlu1 %851  ;;  %v7281_v3 = vpop.permute.xlu0 %849 }
 0x17f   : > { %12972 = vst [vmem:[#allocation89_spill] sm:$0xff] %v7279_v40  ;;  %12973 = vst [vmem:[#allocation90_spill] sm:$0xff] %v7281_v3  ;;  %v7304_v3 = vld [vmem:[%s6701_s5 + $0x10] sm:$0xff] }
 0x180   : > { %1185 = vrot.lane.b32.xlu1 %v1168_v2, %s6610_s4  ;;  %1183 = vrot.lane.b32.xlu0 %v1167_v53, %s6610_s4  ;;  %v7300_v2 = vld [vmem:[%s6701_s5 + $0x18] sm:$0xff]  ;;  %v1200_v40 = vmul.f32 %v7304_v3, %v1197_v56 }
 0x181   : > { %v1201_v53 = vmul.f32 %v7300_v2, %v1197_v56 }
 0x182   : > { %v7293_v15 = vpop.permute.xlu1 %855  ;;  %v7295_v22 = vpop.permute.xlu0 %853 }
 0x183   : > { %12974 = vst [vmem:[#allocation91_spill] sm:$0xff] %v7293_v15  ;;  %12975 = vst [vmem:[#allocation92_spill] sm:$0xff] %v7295_v22  ;;  %v7314_v22 = vld [vmem:[%s6701_s5 + $0x28] sm:$0x3f] }
 0x184   : > { %1212 = vrot.lane.b32.xlu1 %v1199_v30, %s6610_s4  ;;  %1210 = vrot.lane.b32.xlu0 %v1198_v14, %s6610_s4  ;;  %v1203_v30 = vmul.f32 %v7314_v22, %v1197_v56  ;;  %v7318_v14 = vld [vmem:[%s6701_s5 + $0x20] sm:$0x3f] }
 0x185   : > { %v1202_v15 = vmul.f32 %v7318_v14, %v1197_v56  ;;  %v1236_v56 = vmul.f32 %v7300_v2, %v1232_v11 }
 0x186   : > { %v7307_v6 = vpop.permute.xlu1 %882  ;;  %v7309_v10 = vpop.permute.xlu0 %880 }
 0x187   : > { %12976 = vst [vmem:[#allocation93_spill] sm:$0xff] %v7307_v6  ;;  %12977 = vst [vmem:[#allocation94_spill] sm:$0xff] %v7309_v10 }
 0x188   : > { %1216 = vrot.lane.b32.xlu1 %v1201_v53, %s6610_s4  ;;  %1214 = vrot.lane.b32.xlu0 %v1200_v40, %s6610_s4  ;;  %v1234_v53 = vmul.f32 %v7286_v1, %v1232_v11  ;;  %v1233_v40 = vmul.f32 %v7290_v39, %v1232_v11 }
 0x18a   : > { %v7321_v23 = vpop.permute.xlu1 %886  ;;  %v7323_v4 = vpop.permute.xlu0 %884 }
 0x18b   : > { %12978 = vst [vmem:[#allocation95_spill] sm:$0xff] %v7321_v23  ;;  %12979 = vst [vmem:[#allocation96_spill] sm:$0xff] %v7323_v4  ;;  %v1235_v4 = vmul.f32 %v7304_v3, %v1232_v11  ;;  %v1267_v23 = vstv %s6227_s14  ;;  %s6252_s14 = sld [smem:[#allocation2 + $0x40]] }
 0x18c   : > { %1220 = vrot.lane.b32.xlu1 %v1203_v30, %s6610_s4  ;;  %1218 = vrot.lane.b32.xlu0 %v1202_v15, %s6610_s4 }
 0x18e   : > { %v7329_v10 = vpop.permute.xlu1 %890  ;;  %v7331_v6 = vpop.permute.xlu0 %888 }
 0x18f   : > { %12980 = vst [vmem:[#allocation97_spill] sm:$0xff] %v7329_v10  ;;  %12981 = vst [vmem:[#allocation98_spill] sm:$0xff] %v7331_v6  ;;  %v1238_v10 = vmul.f32 %v7314_v22, %v1232_v11  ;;  %v1237_v6 = vmul.f32 %v7318_v14, %v1232_v11  ;;  %v1271_v11 = vmul.f32 %v7300_v2, %v1267_v23 }
 0x190   : > { %1247 = vrot.lane.b32.xlu1 %v1234_v53, %s6610_s4  ;;  %1245 = vrot.lane.b32.xlu0 %v1233_v40, %s6610_s4 }
 0x192   : > { %v7337_v30 = vpop.permute.xlu1 %913  ;;  %v7339_v15 = vpop.permute.xlu0 %911 }
 0x193   : > { %12982 = vst [vmem:[#allocation99_spill] sm:$0xff] %v7337_v30  ;;  %12983 = vst [vmem:[#allocation100_spill] sm:$0xff] %v7339_v15  ;;  %v1269_v30 = vmul.f32 %v7286_v1, %v1267_v23  ;;  %v1268_v15 = vmul.f32 %v7290_v39, %v1267_v23 }
 0x194   : > { %1251 = vrot.lane.b32.xlu1 %v1236_v56, %s6610_s4  ;;  %1249 = vrot.lane.b32.xlu0 %v1235_v4, %s6610_s4 }
 0x196   : > { %v7345_v53 = vpop.permute.xlu1 %917  ;;  %v7347_v40 = vpop.permute.xlu0 %915 }
 0x197   : > { %12984 = vst [vmem:[#allocation101_spill] sm:$0xff] %v7345_v53  ;;  %12985 = vst [vmem:[#allocation102_spill] sm:$0xff] %v7347_v40  ;;  %v1270_v40 = vmul.f32 %v7304_v3, %v1267_v23  ;;  %v1302_v53 = vstv %s6228_s16  ;;  %s6253_s16 = sld [smem:[#allocation2 + $0x47]] }
 0x198   : > { %1255 = vrot.lane.b32.xlu1 %v1238_v10, %s6610_s4  ;;  %1253 = vrot.lane.b32.xlu0 %v1237_v6, %s6610_s4 }
 0x19a   : > { %v7353_v56 = vpop.permute.xlu1 %942  ;;  %v7355_v4 = vpop.permute.xlu0 %940 }
 0x19b   : > { %12986 = vst [vmem:[#allocation103_spill] sm:$0xff] %v7353_v56  ;;  %12987 = vst [vmem:[#allocation104_spill] sm:$0xff] %v7355_v4  ;;  %v1273_v56 = vmul.f32 %v7314_v22, %v1267_v23  ;;  %v1272_v4 = vmul.f32 %v7318_v14, %v1267_v23  ;;  %v1306_v23 = vmul.f32 %v7300_v2, %v1302_v53 }
 0x19c   : > { %1282 = vrot.lane.b32.xlu1 %v1269_v30, %s6610_s4  ;;  %1280 = vrot.lane.b32.xlu0 %v1268_v15, %s6610_s4 }
 0x19e   : > { %v7361_v10 = vpop.permute.xlu1 %946  ;;  %v7363_v6 = vpop.permute.xlu0 %944 }
 0x19f   : > { %12988 = vst [vmem:[#allocation105_spill] sm:$0xff] %v7361_v10  ;;  %12989 = vst [vmem:[#allocation106_spill] sm:$0xff] %v7363_v6  ;;  %v1304_v10 = vmul.f32 %v7286_v1, %v1302_v53  ;;  %v1303_v6 = vmul.f32 %v7290_v39, %v1302_v53 }
 0x1a0   : > { %1286 = vrot.lane.b32.xlu1 %v1271_v11, %s6610_s4  ;;  %1284 = vrot.lane.b32.xlu0 %v1270_v40, %s6610_s4 }
 0x1a2   : > { %v7369_v30 = vpop.permute.xlu1 %950  ;;  %v7371_v15 = vpop.permute.xlu0 %948 }
 0x1a3   : > { %12990 = vst [vmem:[#allocation107_spill] sm:$0xff] %v7369_v30  ;;  %12991 = vst [vmem:[#allocation108_spill] sm:$0xff] %v7371_v15  ;;  %v1305_v15 = vmul.f32 %v7304_v3, %v1302_v53  ;;  %v1337_v30 = vstv %s6229_s17  ;;  %s6254_s17 = sld [smem:[#allocation2 + $0x4e]] }
 0x1a4   : > { %1290 = vrot.lane.b32.xlu1 %v1273_v56, %s6610_s4  ;;  %1288 = vrot.lane.b32.xlu0 %v1272_v4, %s6610_s4 }
 0x1a6   : > { %v7377_v11 = vpop.permute.xlu1 %977  ;;  %v7379_v40 = vpop.permute.xlu0 %975 }
 0x1a7   : > { %12992 = vst [vmem:[#allocation109_spill] sm:$0xff] %v7377_v11  ;;  %12993 = vst [vmem:[#allocation110_spill] sm:$0xff] %v7379_v40  ;;  %v1308_v11 = vmul.f32 %v7314_v22, %v1302_v53  ;;  %v1307_v40 = vmul.f32 %v7318_v14, %v1302_v53  ;;  %v1341_v53 = vmul.f32 %v7300_v2, %v1337_v30 }
 0x1a8   : > { %1317 = vrot.lane.b32.xlu1 %v1304_v10, %s6610_s4  ;;  %1315 = vrot.lane.b32.xlu0 %v1303_v6, %s6610_s4 }
 0x1aa   : > { %v7385_v56 = vpop.permute.xlu1 %981  ;;  %v7387_v4 = vpop.permute.xlu0 %979 }
 0x1ab   : > { %12994 = vst [vmem:[#allocation111_spill] sm:$0xff] %v7385_v56  ;;  %12995 = vst [vmem:[#allocation112_spill] sm:$0xff] %v7387_v4  ;;  %v1339_v56 = vmul.f32 %v7286_v1, %v1337_v30  ;;  %v1338_v4 = vmul.f32 %v7290_v39, %v1337_v30 }
 0x1ac   : > { %1321 = vrot.lane.b32.xlu1 %v1306_v23, %s6610_s4  ;;  %1319 = vrot.lane.b32.xlu0 %v1305_v15, %s6610_s4 }
 0x1ae   : > { %v7393_v10 = vpop.permute.xlu1 %985  ;;  %v7395_v6 = vpop.permute.xlu0 %983 }
 0x1af   : > { %12996 = vst [vmem:[#allocation113_spill] sm:$0xff] %v7393_v10  ;;  %12997 = vst [vmem:[#allocation114_spill] sm:$0xff] %v7395_v6  ;;  %v1340_v6 = vmul.f32 %v7304_v3, %v1337_v30  ;;  %v1372_v10 = vstv %s6230_s21  ;;  %s6255_s21 = sld [smem:[#allocation2 + $0x55]] }
 0x1b0   : > { %1325 = vrot.lane.b32.xlu1 %v1308_v11, %s6610_s4  ;;  %1323 = vrot.lane.b32.xlu0 %v1307_v40, %s6610_s4 }
 0x1b2   : > { %v7401_v23 = vpop.permute.xlu1 %1012  ;;  %v7403_v15 = vpop.permute.xlu0 %1010 }
 0x1b3   : > { %12998 = vst [vmem:[#allocation115_spill] sm:$0xff] %v7401_v23  ;;  %12999 = vst [vmem:[#allocation116_spill] sm:$0xff] %v7403_v15  ;;  %v1343_v23 = vmul.f32 %v7314_v22, %v1337_v30  ;;  %v1342_v15 = vmul.f32 %v7318_v14, %v1337_v30  ;;  %v1376_v30 = vmul.f32 %v7300_v2, %v1372_v10 }
 0x1b4   : > { %1352 = vrot.lane.b32.xlu1 %v1339_v56, %s6610_s4  ;;  %1350 = vrot.lane.b32.xlu0 %v1338_v4, %s6610_s4 }
 0x1b6   : > { %v7409_v11 = vpop.permute.xlu1 %1016  ;;  %v7411_v40 = vpop.permute.xlu0 %1014 }
 0x1b7   : > { %13000 = vst [vmem:[#allocation117_spill] sm:$0xff] %v7409_v11  ;;  %13001 = vst [vmem:[#allocation118_spill] sm:$0xff] %v7411_v40  ;;  %v1374_v40 = vmul.f32 %v7286_v1, %v1372_v10 }
 0x1b8   : > { %1356 = vrot.lane.b32.xlu1 %v1341_v53, %s6610_s4  ;;  %1354 = vrot.lane.b32.xlu0 %v1340_v6, %s6610_s4  ;;  %v1373_v53 = vmul.f32 %v7290_v39, %v1372_v10 }
 0x1ba   : > { %v7417_v56 = vpop.permute.xlu1 %1020  ;;  %v7419_v4 = vpop.permute.xlu0 %1018 }
 0x1bb   : > { %13002 = vst [vmem:[#allocation119_spill] sm:$0xff] %v7417_v56  ;;  %13003 = vst [vmem:[#allocation120_spill] sm:$0xff] %v7419_v4  ;;  %v1375_v4 = vmul.f32 %v7304_v3, %v1372_v10 }
 0x1bc   : > { %1360 = vrot.lane.b32.xlu1 %v1343_v23, %s6610_s4  ;;  %1358 = vrot.lane.b32.xlu0 %v1342_v15, %s6610_s4  ;;  %v1397_v23 = vstv %s6231_s24  ;;  %s6256_s24 = sld [smem:[#allocation2 + $0x5c]] }
 0x1bd   : > { %v1401_v10 = vmul.f32 %v7300_v2, %v1397_v23 }
 0x1be   : > { %v7425_v11 = vpop.permute.xlu1 %1047  ;;  %v7427_v6 = vpop.permute.xlu0 %1045 }
 0x1bf   : > { %13004 = vst [vmem:[#allocation121_spill] sm:$0xff] %v7425_v11  ;;  %13005 = vst [vmem:[#allocation122_spill] sm:$0xff] %v7427_v6  ;;  %v1399_v6 = vmul.f32 %v7286_v1, %v1397_v23  ;;  %v1398_v11 = vmul.f32 %v7290_v39, %v1397_v23 }
 0x1c0   : > { %1383 = vrot.lane.b32.xlu1 %v1374_v40, %s6611_s25  ;;  %1381 = vrot.lane.b32.xlu0 %v1373_v53, %s6611_s25 }
 0x1c2   : > { %v7433_v56 = vpop.permute.xlu1 %1051  ;;  %v7435_v15 = vpop.permute.xlu0 %1049 }
 0x1c3   : > { %13006 = vst [vmem:[#allocation123_spill] sm:$0xff] %v7433_v56  ;;  %13007 = vst [vmem:[#allocation124_spill] sm:$0xff] %v7435_v15  ;;  %v1400_v15 = vmul.f32 %v7304_v3, %v1397_v23  ;;  %v1432_v56 = vstv %s6232_s26  ;;  %s6257_s26 = sld [smem:[#allocation2 + $0x33]] }
 0x1c4   : > { %1387 = vrot.lane.b32.xlu1 %v1376_v30, %s6611_s25  ;;  %1385 = vrot.lane.b32.xlu0 %v1375_v4, %s6611_s25 }
 0x1c6   : > { %v7441_v40 = vpop.permute.xlu1 %1055  ;;  %v7443_v53 = vpop.permute.xlu0 %1053 }
 0x1c7   : > { %13008 = vst [vmem:[#allocation125_spill] sm:$0xff] %v7441_v40  ;;  %13009 = vst [vmem:[#allocation126_spill] sm:$0xff] %v7443_v53  ;;  %v1403_v40 = vmul.f32 %v7314_v22, %v1397_v23  ;;  %v1402_v53 = vmul.f32 %v7318_v14, %v1397_v23  ;;  %v1436_v23 = vmul.f32 %v7300_v2, %v1432_v56 }
 0x1c8   : > { %1412 = vrot.lane.b32.xlu1 %v1399_v6, %s6611_s25  ;;  %1410 = vrot.lane.b32.xlu0 %v1398_v11, %s6611_s25 }
 0x1ca   : > { %v7449_v30 = vpop.permute.xlu1 %1082  ;;  %v7451_v4 = vpop.permute.xlu0 %1080 }
 0x1cb   : > { %13010 = vst [vmem:[#allocation127_spill] sm:$0xff] %v7449_v30  ;;  %13011 = vst [vmem:[#allocation128_spill] sm:$0xff] %v7451_v4  ;;  %v1434_v30 = vmul.f32 %v7286_v1, %v1432_v56  ;;  %v1433_v4 = vmul.f32 %v7290_v39, %v1432_v56 }
 0x1cc   : > { %1416 = vrot.lane.b32.xlu1 %v1401_v10, %s6611_s25  ;;  %1414 = vrot.lane.b32.xlu0 %v1400_v15, %s6611_s25 }
 0x1ce   : > { %v7457_v6 = vpop.permute.xlu1 %1086  ;;  %v7459_v11 = vpop.permute.xlu0 %1084 }
 0x1cf   : > { %13012 = vst [vmem:[#allocation129_spill] sm:$0xff] %v7457_v6  ;;  %13013 = vst [vmem:[#allocation130_spill] sm:$0xff] %v7459_v11  ;;  %v1435_v11 = vmul.f32 %v7304_v3, %v1432_v56  ;;  %v1467_v6 = vstv %s6233_s27  ;;  %s6258_s27 = sld [smem:[#allocation2 + $0x3a]] }
 0x1d0   : > { %1420 = vrot.lane.b32.xlu1 %v1403_v40, %s6611_s25  ;;  %1418 = vrot.lane.b32.xlu0 %v1402_v53, %s6611_s25 }
 0x1d2   : > { %v7465_v10 = vpop.permute.xlu1 %1090  ;;  %v7467_v15 = vpop.permute.xlu0 %1088 }
 0x1d3   : > { %13014 = vst [vmem:[#allocation131_spill] sm:$0xff] %v7465_v10  ;;  %13015 = vst [vmem:[#allocation132_spill] sm:$0xff] %v7467_v15  ;;  %v1438_v10 = vmul.f32 %v7314_v22, %v1432_v56  ;;  %v1437_v15 = vmul.f32 %v7318_v14, %v1432_v56  ;;  %v1471_v56 = vmul.f32 %v7300_v2, %v1467_v6 }
 0x1d4   : > { %1447 = vrot.lane.b32.xlu1 %v1434_v30, %s6611_s25  ;;  %1445 = vrot.lane.b32.xlu0 %v1433_v4, %s6611_s25 }
 0x1d6   : > { %v7473_v40 = vpop.permute.xlu1 %1117  ;;  %v7475_v53 = vpop.permute.xlu0 %1115 }
 0x1d7   : > { %13016 = vst [vmem:[#allocation133_spill] sm:$0xff] %v7473_v40  ;;  %13017 = vst [vmem:[#allocation134_spill] sm:$0xff] %v7475_v53  ;;  %v1469_v40 = vmul.f32 %v7286_v1, %v1467_v6  ;;  %v1468_v53 = vmul.f32 %v7290_v39, %v1467_v6 }
 0x1d8   : > { %1451 = vrot.lane.b32.xlu1 %v1436_v23, %s6611_s25  ;;  %1449 = vrot.lane.b32.xlu0 %v1435_v11, %s6611_s25 }
 0x1da   : > { %v7481_v30 = vpop.permute.xlu1 %1121  ;;  %v7483_v4 = vpop.permute.xlu0 %1119 }
 0x1db   : > { %13018 = vst [vmem:[#allocation135_spill] sm:$0xff] %v7481_v30  ;;  %13019 = vst [vmem:[#allocation136_spill] sm:$0xff] %v7483_v4  ;;  %v1470_v4 = vmul.f32 %v7304_v3, %v1467_v6  ;;  %v1502_v30 = vstv %s6234_s28  ;;  %s6259_s28 = sld [smem:[#allocation2 + $0x41]] }
 0x1dc   : > { %1455 = vrot.lane.b32.xlu1 %v1438_v10, %s6611_s25  ;;  %1453 = vrot.lane.b32.xlu0 %v1437_v15, %s6611_s25 }
 0x1de   : > { %v7489_v23 = vpop.permute.xlu1 %1125  ;;  %v7491_v11 = vpop.permute.xlu0 %1123 }
 0x1df   : > { %13020 = vst [vmem:[#allocation137_spill] sm:$0xff] %v7489_v23  ;;  %13021 = vst [vmem:[#allocation138_spill] sm:$0xff] %v7491_v11  ;;  %v1473_v23 = vmul.f32 %v7314_v22, %v1467_v6  ;;  %v1472_v11 = vmul.f32 %v7318_v14, %v1467_v6  ;;  %v1506_v6 = vmul.f32 %v7300_v2, %v1502_v30 }
 0x1e0   : > { %1482 = vrot.lane.b32.xlu1 %v1469_v40, %s6611_s25  ;;  %1480 = vrot.lane.b32.xlu0 %v1468_v53, %s6611_s25 }
 0x1e2   : > { %v7497_v10 = vpop.permute.xlu1 %1148  ;;  %v7499_v15 = vpop.permute.xlu0 %1146 }
 0x1e3   : > { %13022 = vst [vmem:[#allocation139_spill] sm:$0xff] %v7497_v10  ;;  %13023 = vst [vmem:[#allocation140_spill] sm:$0xff] %v7499_v15  ;;  %v1504_v10 = vmul.f32 %v7286_v1, %v1502_v30  ;;  %v1503_v15 = vmul.f32 %v7290_v39, %v1502_v30 }
 0x1e4   : > { %1486 = vrot.lane.b32.xlu1 %v1471_v56, %s6611_s25  ;;  %1484 = vrot.lane.b32.xlu0 %v1470_v4, %s6611_s25 }
 0x1e6   : > { %v7505_v40 = vpop.permute.xlu1 %1152  ;;  %v7507_v53 = vpop.permute.xlu0 %1150 }
 0x1e7   : > { %13024 = vst [vmem:[#allocation141_spill] sm:$0xff] %v7505_v40  ;;  %13025 = vst [vmem:[#allocation142_spill] sm:$0xff] %v7507_v53  ;;  %v1505_v53 = vmul.f32 %v7304_v3, %v1502_v30  ;;  %v1537_v40 = vstv %s6235_s29  ;;  %s6260_s29 = sld [smem:[#allocation2 + $0x48]] }
 0x1e8   : > { %1490 = vrot.lane.b32.xlu1 %v1473_v23, %s6611_s25  ;;  %1488 = vrot.lane.b32.xlu0 %v1472_v11, %s6611_s25 }
 0x1ea   : > { %v7513_v56 = vpop.permute.xlu1 %1177  ;;  %v7515_v4 = vpop.permute.xlu0 %1175 }
 0x1eb   : > { %13026 = vst [vmem:[#allocation143_spill] sm:$0xff] %v7513_v56  ;;  %13027 = vst [vmem:[#allocation144_spill] sm:$0xff] %v7515_v4  ;;  %v1508_v56 = vmul.f32 %v7314_v22, %v1502_v30  ;;  %v1507_v4 = vmul.f32 %v7318_v14, %v1502_v30  ;;  %v1541_v30 = vmul.f32 %v7300_v2, %v1537_v40 }
 0x1ec   : > { %1517 = vrot.lane.b32.xlu1 %v1504_v10, %s6611_s25  ;;  %1515 = vrot.lane.b32.xlu0 %v1503_v15, %s6611_s25 }
 0x1ee   : > { %v7521_v23 = vpop.permute.xlu1 %1181  ;;  %v7523_v11 = vpop.permute.xlu0 %1179 }
 0x1ef   : > { %13028 = vst [vmem:[#allocation145_spill] sm:$0xff] %v7521_v23  ;;  %13029 = vst [vmem:[#allocation146_spill] sm:$0xff] %v7523_v11  ;;  %v1539_v23 = vmul.f32 %v7286_v1, %v1537_v40  ;;  %v1538_v11 = vmul.f32 %v7290_v39, %v1537_v40 }
 0x1f0   : > { %1521 = vrot.lane.b32.xlu1 %v1506_v6, %s6611_s25  ;;  %1519 = vrot.lane.b32.xlu0 %v1505_v53, %s6611_s25 }
 0x1f2   : > { %v7529_v10 = vpop.permute.xlu1 %1185  ;;  %v7531_v15 = vpop.permute.xlu0 %1183 }
 0x1f3   : > { %13030 = vst [vmem:[#allocation147_spill] sm:$0xff] %v7529_v10  ;;  %13031 = vst [vmem:[#allocation148_spill] sm:$0xff] %v7531_v15  ;;  %v1540_v15 = vmul.f32 %v7304_v3, %v1537_v40  ;;  %v1572_v10 = vstv %s6236_s30  ;;  %s6261_s30 = sld [smem:[#allocation2 + $0x4f]] }
 0x1f4   : > { %1525 = vrot.lane.b32.xlu1 %v1508_v56, %s6611_s25  ;;  %1523 = vrot.lane.b32.xlu0 %v1507_v4, %s6611_s25 }
 0x1f6   : > { %v7537_v6 = vpop.permute.xlu1 %1212  ;;  %v7539_v53 = vpop.permute.xlu0 %1210 }
 0x1f7   : > { %13032 = vst [vmem:[#allocation149_spill] sm:$0xff] %v7537_v6  ;;  %13033 = vst [vmem:[#allocation150_spill] sm:$0xff] %v7539_v53  ;;  %v1543_v6 = vmul.f32 %v7314_v22, %v1537_v40  ;;  %v1542_v53 = vmul.f32 %v7318_v14, %v1537_v40  ;;  %v1576_v40 = vmul.f32 %v7300_v2, %v1572_v10  ;;  %v7581_v2 = vld [vmem:[%s6701_s5 + $0x30] sm:$0xff] }
 0x1f8   : > { %1552 = vrot.lane.b32.xlu1 %v1539_v23, %s6611_s25  ;;  %1550 = vrot.lane.b32.xlu0 %v1538_v11, %s6611_s25 }
 0x1fa   : > { %v7545_v56 = vpop.permute.xlu1 %1216  ;;  %v7547_v4 = vpop.permute.xlu0 %1214 }
 0x1fb   : > { %13034 = vst [vmem:[#allocation151_spill] sm:$0xff] %v7545_v56  ;;  %13035 = vst [vmem:[#allocation152_spill] sm:$0xff] %v7547_v4  ;;  %v1574_v4 = vmul.f32 %v7286_v1, %v1572_v10 }
 0x1fc   : > { %1556 = vrot.lane.b32.xlu1 %v1541_v30, %s6611_s25  ;;  %1554 = vrot.lane.b32.xlu0 %v1540_v15, %s6611_s25  ;;  %v1573_v30 = vmul.f32 %v7290_v39, %v1572_v10  ;;  %v1578_v39 = vmul.f32 %v7314_v22, %v1572_v10 }
 0x1fe   : > { %v7553_v23 = vpop.permute.xlu1 %1220  ;;  %v7555_v11 = vpop.permute.xlu0 %1218 }
 0x1ff   : > { %13036 = vst [vmem:[#allocation153_spill] sm:$0xff] %v7553_v23  ;;  %13037 = vst [vmem:[#allocation154_spill] sm:$0xff] %v7555_v11 }
 0x200   : > { %1560 = vrot.lane.b32.xlu1 %v1543_v6, %s6611_s25  ;;  %1558 = vrot.lane.b32.xlu0 %v1542_v53, %s6611_s25  ;;  %v1575_v6 = vmul.f32 %v7304_v3, %v1572_v10 }
 0x202   : > { %v7561_v15 = vpop.permute.xlu1 %1247  ;;  %v7563_v56 = vpop.permute.xlu0 %1245 }
 0x203   : > { %13038 = vst [vmem:[#allocation155_spill] sm:$0xff] %v7561_v15  ;;  %13039 = vst [vmem:[#allocation156_spill] sm:$0xff] %v7563_v56  ;;  %v7578_v56 = vld [vmem:[%s6701_s5 + $0x38] sm:$0xff] }
 0x204   : > { %1587 = vrot.lane.b32.xlu1 %v1574_v4, %s6611_s25  ;;  %1585 = vrot.lane.b32.xlu0 %v1573_v30, %s6611_s25  ;;  %v1577_v4 = vmul.f32 %v7318_v14, %v1572_v10  ;;  %v1668_v30 = vstv %s6250_s7  ;;  %v7595_v14 = vld [vmem:[%s6701_s5 + $0x40] sm:$0xff]  ;;  %s6262_s7 = sld [smem:[#allocation2 + $0x56]] }
 0x205   : > { %v1669_v22 = vmul.f32 %v7581_v2, %v1668_v30 }
 0x206   : > { %v7569_v53 = vpop.permute.xlu1 %1251  ;;  %v7571_v1 = vpop.permute.xlu0 %1249 }
 0x207   : > { %13040 = vst [vmem:[#allocation157_spill] sm:$0xff] %v7569_v53  ;;  %13041 = vst [vmem:[#allocation158_spill] sm:$0xff] %v7571_v1 }
 0x208   : > { %1591 = vrot.lane.b32.xlu1 %v1576_v40, %s6611_s25  ;;  %1589 = vrot.lane.b32.xlu0 %v1575_v6, %s6611_s25  ;;  %v1670_v40 = vmul.f32 %v7578_v56, %v1668_v30  ;;  %v7592_v6 = vld [vmem:[%s6701_s5 + $0x48] sm:$0xff] }
 0x20a   : > { %v7583_v3 = vpop.permute.xlu1 %1255  ;;  %v7585_v53 = vpop.permute.xlu0 %1253 }
 0x20b   : > { %13042 = vst [vmem:[#allocation159_spill] sm:$0xff] %v7583_v3  ;;  %13043 = vst [vmem:[#allocation160_spill] sm:$0xff] %v7585_v53  ;;  %v1692_v53 = vstv %s6251_s8  ;;  %s6263_s8 = sld [smem:[#allocation2 + $0x5d]] }
 0x20c   : > { %1595 = vrot.lane.b32.xlu1 %v1578_v39, %s6611_s25  ;;  %1593 = vrot.lane.b32.xlu0 %v1577_v4, %s6611_s25  ;;  %v1672_v39 = vmul.f32 %v7592_v6, %v1668_v30  ;;  %v1671_v4 = vmul.f32 %v7595_v14, %v1668_v30  ;;  %v1696_v30 = vmul.f32 %v7592_v6, %v1692_v53 }
 0x20e   : > { %v7597_v10 = vpop.permute.xlu1 %1282  ;;  %v7599_v1 = vpop.permute.xlu0 %1280 }
 0x20f   : > { %13044 = vst [vmem:[#allocation161_spill] sm:$0xff] %v7597_v10  ;;  %13045 = vst [vmem:[#allocation162_spill] sm:$0xff] %v7599_v1  ;;  %v1694_v1 = vmul.f32 %v7578_v56, %v1692_v53 }
 0x210   : > { %1679 = vrot.lane.b32.xlu1 %v1670_v40, %s6606_s6  ;;  %1677 = vrot.lane.b32.xlu0 %v1669_v22, %s6606_s6  ;;  %v1693_v40 = vmul.f32 %v7581_v2, %v1692_v53 }
 0x212   : > { %v7605_v3 = vpop.permute.xlu1 %1286  ;;  %v7607_v15 = vpop.permute.xlu0 %1284 }
 0x213   : > { %13046 = vst [vmem:[#allocation163_spill] sm:$0xff] %v7605_v3  ;;  %13047 = vst [vmem:[#allocation164_spill] sm:$0xff] %v7607_v15  ;;  %v1695_v15 = vmul.f32 %v7595_v14, %v1692_v53 }
 0x214   : > { %1683 = vrot.lane.b32.xlu1 %v1672_v39, %s6606_s6  ;;  %1681 = vrot.lane.b32.xlu0 %v1671_v4, %s6606_s6  ;;  %v7622_v39 = vld [vmem:[%s6701_s5 + $0x58] sm:$0x3f]  ;;  %v7625_v4 = vld [vmem:[%s6701_s5 + $0x50] sm:$0x3f] }
 0x216   : > { %v7613_v22 = vpop.permute.xlu1 %1290  ;;  %v7615_v10 = vpop.permute.xlu0 %1288 }
 0x217   : > { %13048 = vst [vmem:[#allocation165_spill] sm:$0xff] %v7613_v22  ;;  %13049 = vst [vmem:[#allocation166_spill] sm:$0xff] %v7615_v10  ;;  %v1727_v10 = vstv %s6252_s14  ;;  %s6264_s14 = sld [smem:[#allocation2 + $0x34]] }
 0x218   : > { %1707 = vrot.lane.b32.xlu1 %v1694_v1, %s6606_s6  ;;  %1705 = vrot.lane.b32.xlu0 %v1693_v40, %s6606_s6  ;;  %v1698_v1 = vmul.f32 %v7622_v39, %v1692_v53  ;;  %v1697_v40 = vmul.f32 %v7625_v4, %v1692_v53  ;;  %v1731_v53 = vmul.f32 %v7592_v6, %v1727_v10 }
 0x21a   : > { %v7627_v3 = vpop.permute.xlu1 %1317  ;;  %v7629_v11 = vpop.permute.xlu0 %1315 }
 0x21b   : > { %13050 = vst [vmem:[#allocation167_spill] sm:$0xff] %v7627_v3  ;;  %13051 = vst [vmem:[#allocation168_spill] sm:$0xff] %v7629_v11  ;;  %v1729_v3 = vmul.f32 %v7578_v56, %v1727_v10  ;;  %v1728_v11 = vmul.f32 %v7581_v2, %v1727_v10 }
 0x21c   : > { %1711 = vrot.lane.b32.xlu1 %v1696_v30, %s6606_s6  ;;  %1709 = vrot.lane.b32.xlu0 %v1695_v15, %s6606_s6 }
 0x21e   : > { %v7635_v22 = vpop.permute.xlu1 %1321  ;;  %v7637_v23 = vpop.permute.xlu0 %1319 }
 0x21f   : > { %13052 = vst [vmem:[#allocation169_spill] sm:$0xff] %v7635_v22  ;;  %13053 = vst [vmem:[#allocation170_spill] sm:$0xff] %v7637_v23  ;;  %v1730_v23 = vmul.f32 %v7595_v14, %v1727_v10  ;;  %v1762_v22 = vstv %s6253_s16  ;;  %s6265_s16 = sld [smem:[#allocation2 + $0x3b]] }
 0x220   : > { %1715 = vrot.lane.b32.xlu1 %v1698_v1, %s6606_s6  ;;  %1713 = vrot.lane.b32.xlu0 %v1697_v40, %s6606_s6 }
 0x222   : > { %v7643_v30 = vpop.permute.xlu1 %1325  ;;  %v7645_v15 = vpop.permute.xlu0 %1323 }
 0x223   : > { %13054 = vst [vmem:[#allocation171_spill] sm:$0xff] %v7643_v30  ;;  %13055 = vst [vmem:[#allocation172_spill] sm:$0xff] %v7645_v15  ;;  %v1733_v30 = vmul.f32 %v7622_v39, %v1727_v10  ;;  %v1732_v15 = vmul.f32 %v7625_v4, %v1727_v10  ;;  %v1766_v10 = vmul.f32 %v7592_v6, %v1762_v22 }
 0x224   : > { %1742 = vrot.lane.b32.xlu1 %v1729_v3, %s6606_s6  ;;  %1740 = vrot.lane.b32.xlu0 %v1728_v11, %s6606_s6 }
 0x226   : > { %v7651_v1 = vpop.permute.xlu1 %1352  ;;  %v7653_v40 = vpop.permute.xlu0 %1350 }
 0x227   : > { %13056 = vst [vmem:[#allocation173_spill] sm:$0xff] %v7651_v1  ;;  %13057 = vst [vmem:[#allocation174_spill] sm:$0xff] %v7653_v40  ;;  %v1764_v1 = vmul.f32 %v7578_v56, %v1762_v22  ;;  %v1763_v40 = vmul.f32 %v7581_v2, %v1762_v22 }
 0x228   : > { %1746 = vrot.lane.b32.xlu1 %v1731_v53, %s6606_s6  ;;  %1744 = vrot.lane.b32.xlu0 %v1730_v23, %s6606_s6 }
 0x22a   : > { %v7659_v3 = vpop.permute.xlu1 %1356  ;;  %v7661_v11 = vpop.permute.xlu0 %1354 }
 0x22b   : > { %13058 = vst [vmem:[#allocation175_spill] sm:$0xff] %v7659_v3  ;;  %13059 = vst [vmem:[#allocation176_spill] sm:$0xff] %v7661_v11  ;;  %v1765_v11 = vmul.f32 %v7595_v14, %v1762_v22  ;;  %v1797_v3 = vstv %s6254_s17  ;;  %s6266_s17 = sld [smem:[#allocation2 + $0x42]] }
 0x22c   : > { %1750 = vrot.lane.b32.xlu1 %v1733_v30, %s6606_s6  ;;  %1748 = vrot.lane.b32.xlu0 %v1732_v15, %s6606_s6 }
 0x22e   : > { %v7667_v53 = vpop.permute.xlu1 %1360  ;;  %v7669_v23 = vpop.permute.xlu0 %1358 }
 0x22f   : > { %13060 = vst [vmem:[#allocation177_spill] sm:$0xff] %v7667_v53  ;;  %13061 = vst [vmem:[#allocation178_spill] sm:$0xff] %v7669_v23  ;;  %v1768_v53 = vmul.f32 %v7622_v39, %v1762_v22  ;;  %v1767_v23 = vmul.f32 %v7625_v4, %v1762_v22  ;;  %v1801_v22 = vmul.f32 %v7592_v6, %v1797_v3 }
 0x230   : > { %1777 = vrot.lane.b32.xlu1 %v1764_v1, %s6606_s6  ;;  %1775 = vrot.lane.b32.xlu0 %v1763_v40, %s6606_s6 }
 0x232   : > { %v7675_v30 = vpop.permute.xlu1 %1383  ;;  %v7677_v15 = vpop.permute.xlu0 %1381 }
 0x233   : > { %13062 = vst [vmem:[#allocation179_spill] sm:$0xff] %v7675_v30  ;;  %13063 = vst [vmem:[#allocation180_spill] sm:$0xff] %v7677_v15  ;;  %v1799_v30 = vmul.f32 %v7578_v56, %v1797_v3  ;;  %v1798_v15 = vmul.f32 %v7581_v2, %v1797_v3 }
 0x234   : > { %1781 = vrot.lane.b32.xlu1 %v1766_v10, %s6606_s6  ;;  %1779 = vrot.lane.b32.xlu0 %v1765_v11, %s6606_s6 }
 0x236   : > { %v7683_v1 = vpop.permute.xlu1 %1387  ;;  %v7685_v40 = vpop.permute.xlu0 %1385 }
 0x237   : > { %13064 = vst [vmem:[#allocation181_spill] sm:$0xff] %v7683_v1  ;;  %13065 = vst [vmem:[#allocation182_spill] sm:$0xff] %v7685_v40  ;;  %v1800_v40 = vmul.f32 %v7595_v14, %v1797_v3  ;;  %v1832_v1 = vstv %s6255_s21  ;;  %s6267_s21 = sld [smem:[#allocation2 + $0x49]] }
 0x238   : > { %1785 = vrot.lane.b32.xlu1 %v1768_v53, %s6606_s6  ;;  %1783 = vrot.lane.b32.xlu0 %v1767_v23, %s6606_s6 }
 0x23a   : > { %v7691_v10 = vpop.permute.xlu1 %1412  ;;  %v7693_v11 = vpop.permute.xlu0 %1410 }
 0x23b   : > { %13066 = vst [vmem:[#allocation183_spill] sm:$0xff] %v7691_v10  ;;  %13067 = vst [vmem:[#allocation184_spill] sm:$0xff] %v7693_v11  ;;  %v1803_v10 = vmul.f32 %v7622_v39, %v1797_v3  ;;  %v1802_v11 = vmul.f32 %v7625_v4, %v1797_v3  ;;  %v1836_v3 = vmul.f32 %v7592_v6, %v1832_v1 }
 0x23c   : > { %1812 = vrot.lane.b32.xlu1 %v1799_v30, %s6606_s6  ;;  %1810 = vrot.lane.b32.xlu0 %v1798_v15, %s6606_s6 }
 0x23e   : > { %v7699_v53 = vpop.permute.xlu1 %1416  ;;  %v7701_v23 = vpop.permute.xlu0 %1414 }
 0x23f   : > { %13068 = vst [vmem:[#allocation185_spill] sm:$0xff] %v7699_v53  ;;  %13069 = vst [vmem:[#allocation186_spill] sm:$0xff] %v7701_v23  ;;  %v1834_v53 = vmul.f32 %v7578_v56, %v1832_v1  ;;  %v1833_v23 = vmul.f32 %v7581_v2, %v1832_v1 }
 0x240   : > { %1816 = vrot.lane.b32.xlu1 %v1801_v22, %s6606_s6  ;;  %1814 = vrot.lane.b32.xlu0 %v1800_v40, %s6606_s6 }
 0x242   : > { %v7707_v30 = vpop.permute.xlu1 %1420  ;;  %v7709_v15 = vpop.permute.xlu0 %1418 }
 0x243   : > { %13070 = vst [vmem:[#allocation187_spill] sm:$0xff] %v7707_v30  ;;  %13071 = vst [vmem:[#allocation188_spill] sm:$0xff] %v7709_v15  ;;  %v1835_v15 = vmul.f32 %v7595_v14, %v1832_v1  ;;  %v1867_v30 = vstv %s6256_s24  ;;  %s6268_s24 = sld [smem:[#allocation2 + $0x50]] }
 0x244   : > { %1820 = vrot.lane.b32.xlu1 %v1803_v10, %s6606_s6  ;;  %1818 = vrot.lane.b32.xlu0 %v1802_v11, %s6606_s6 }
 0x246   : > { %v7715_v22 = vpop.permute.xlu1 %1447  ;;  %v7717_v40 = vpop.permute.xlu0 %1445 }
 0x247   : > { %13072 = vst [vmem:[#allocation189_spill] sm:$0xff] %v7715_v22  ;;  %13073 = vst [vmem:[#allocation190_spill] sm:$0xff] %v7717_v40  ;;  %v1838_v22 = vmul.f32 %v7622_v39, %v1832_v1  ;;  %v1837_v40 = vmul.f32 %v7625_v4, %v1832_v1  ;;  %v1871_v1 = vmul.f32 %v7592_v6, %v1867_v30 }
 0x248   : > { %1847 = vrot.lane.b32.xlu1 %v1834_v53, %s6606_s6  ;;  %1845 = vrot.lane.b32.xlu0 %v1833_v23, %s6606_s6 }
 0x24a   : > { %v7723_v10 = vpop.permute.xlu1 %1451  ;;  %v7725_v11 = vpop.permute.xlu0 %1449 }
 0x24b   : > { %13074 = vst [vmem:[#allocation191_spill] sm:$0xff] %v7723_v10  ;;  %13075 = vst [vmem:[#allocation192_spill] sm:$0xff] %v7725_v11  ;;  %v1869_v10 = vmul.f32 %v7578_v56, %v1867_v30  ;;  %v1868_v11 = vmul.f32 %v7581_v2, %v1867_v30 }
 0x24c   : > { %1851 = vrot.lane.b32.xlu1 %v1836_v3, %s6606_s6  ;;  %1849 = vrot.lane.b32.xlu0 %v1835_v15, %s6606_s6 }
 0x24e   : > { %v7731_v53 = vpop.permute.xlu1 %1455  ;;  %v7733_v23 = vpop.permute.xlu0 %1453 }
 0x24f   : > { %13076 = vst [vmem:[#allocation193_spill] sm:$0xff] %v7731_v53  ;;  %13077 = vst [vmem:[#allocation194_spill] sm:$0xff] %v7733_v23  ;;  %v1870_v23 = vmul.f32 %v7595_v14, %v1867_v30  ;;  %v1902_v53 = vstv %s6257_s26  ;;  %s6269_s26 = sld [smem:[#allocation2 + $0x57]] }
 0x250   : > { %1855 = vrot.lane.b32.xlu1 %v1838_v22, %s6606_s6  ;;  %1853 = vrot.lane.b32.xlu0 %v1837_v40, %s6606_s6 }
 0x252   : > { %v7739_v3 = vpop.permute.xlu1 %1482  ;;  %v7741_v15 = vpop.permute.xlu0 %1480 }
 0x253   : > { %13078 = vst [vmem:[#allocation195_spill] sm:$0xff] %v7739_v3  ;;  %13079 = vst [vmem:[#allocation196_spill] sm:$0xff] %v7741_v15  ;;  %v1873_v3 = vmul.f32 %v7622_v39, %v1867_v30  ;;  %v1872_v15 = vmul.f32 %v7625_v4, %v1867_v30  ;;  %v1906_v30 = vmul.f32 %v7592_v6, %v1902_v53 }
 0x254   : > { %1882 = vrot.lane.b32.xlu1 %v1869_v10, %s6606_s6  ;;  %1880 = vrot.lane.b32.xlu0 %v1868_v11, %s6606_s6 }
 0x256   : > { %v7747_v22 = vpop.permute.xlu1 %1486  ;;  %v7749_v40 = vpop.permute.xlu0 %1484 }
 0x257   : > { %13080 = vst [vmem:[#allocation197_spill] sm:$0xff] %v7747_v22  ;;  %13081 = vst [vmem:[#allocation198_spill] sm:$0xff] %v7749_v40  ;;  %v1904_v40 = vmul.f32 %v7578_v56, %v1902_v53 }
 0x258   : > { %1886 = vrot.lane.b32.xlu1 %v1871_v1, %s6606_s6  ;;  %1884 = vrot.lane.b32.xlu0 %v1870_v23, %s6606_s6  ;;  %v1903_v1 = vmul.f32 %v7581_v2, %v1902_v53 }
 0x25a   : > { %v7755_v10 = vpop.permute.xlu1 %1490  ;;  %v7757_v11 = vpop.permute.xlu0 %1488 }
 0x25b   : > { %13082 = vst [vmem:[#allocation199_spill] sm:$0xff] %v7755_v10  ;;  %13083 = vst [vmem:[#allocation200_spill] sm:$0xff] %v7757_v11  ;;  %v1905_v11 = vmul.f32 %v7595_v14, %v1902_v53  ;;  %v1926_v10 = vstv %s6258_s27  ;;  %s6270_s27 = sld [smem:[#allocation2 + $0x5e]] }
 0x25c   : > { %1890 = vrot.lane.b32.xlu1 %v1873_v3, %s6606_s6  ;;  %1888 = vrot.lane.b32.xlu0 %v1872_v15, %s6606_s6  ;;  %v1930_v53 = vmul.f32 %v7592_v6, %v1926_v10 }
 0x25e   : > { %v7763_v22 = vpop.permute.xlu1 %1517  ;;  %v7765_v23 = vpop.permute.xlu0 %1515 }
 0x25f   : > { %13084 = vst [vmem:[#allocation201_spill] sm:$0xff] %v7763_v22  ;;  %13085 = vst [vmem:[#allocation202_spill] sm:$0xff] %v7765_v23  ;;  %v1928_v22 = vmul.f32 %v7578_v56, %v1926_v10  ;;  %v1927_v23 = vmul.f32 %v7581_v2, %v1926_v10 }
 0x260   : > { %1913 = vrot.lane.b32.xlu1 %v1904_v40, %s6607_s23  ;;  %1911 = vrot.lane.b32.xlu0 %v1903_v1, %s6607_s23 }
 0x262   : > { %v7771_v3 = vpop.permute.xlu1 %1521  ;;  %v7773_v15 = vpop.permute.xlu0 %1519 }
 0x263   : > { %13086 = vst [vmem:[#allocation203_spill] sm:$0xff] %v7771_v3  ;;  %13087 = vst [vmem:[#allocation204_spill] sm:$0xff] %v7773_v15  ;;  %v1929_v15 = vmul.f32 %v7595_v14, %v1926_v10  ;;  %v1961_v3 = vstv %s6259_s28  ;;  %s6271_s28 = sld [smem:[#allocation2 + $0x35]] }
 0x264   : > { %1917 = vrot.lane.b32.xlu1 %v1906_v30, %s6607_s23  ;;  %1915 = vrot.lane.b32.xlu0 %v1905_v11, %s6607_s23 }
 0x266   : > { %v7779_v40 = vpop.permute.xlu1 %1525  ;;  %v7781_v1 = vpop.permute.xlu0 %1523 }
 0x267   : > { %13088 = vst [vmem:[#allocation205_spill] sm:$0xff] %v7779_v40  ;;  %13089 = vst [vmem:[#allocation206_spill] sm:$0xff] %v7781_v1  ;;  %v1932_v40 = vmul.f32 %v7622_v39, %v1926_v10  ;;  %v1931_v1 = vmul.f32 %v7625_v4, %v1926_v10  ;;  %v1965_v10 = vmul.f32 %v7592_v6, %v1961_v3 }
 0x268   : > { %1941 = vrot.lane.b32.xlu1 %v1928_v22, %s6607_s23  ;;  %1939 = vrot.lane.b32.xlu0 %v1927_v23, %s6607_s23 }
 0x26a   : > { %v7787_v30 = vpop.permute.xlu1 %1552  ;;  %v7789_v11 = vpop.permute.xlu0 %1550 }
 0x26b   : > { %13090 = vst [vmem:[#allocation207_spill] sm:$0xff] %v7787_v30  ;;  %13091 = vst [vmem:[#allocation208_spill] sm:$0xff] %v7789_v11  ;;  %v1963_v30 = vmul.f32 %v7578_v56, %v1961_v3  ;;  %v1962_v11 = vmul.f32 %v7581_v2, %v1961_v3 }
 0x26c   : > { %1945 = vrot.lane.b32.xlu1 %v1930_v53, %s6607_s23  ;;  %1943 = vrot.lane.b32.xlu0 %v1929_v15, %s6607_s23 }
 0x26e   : > { %v7795_v22 = vpop.permute.xlu1 %1556  ;;  %v7797_v23 = vpop.permute.xlu0 %1554 }
 0x26f   : > { %13092 = vst [vmem:[#allocation209_spill] sm:$0xff] %v7795_v22  ;;  %13093 = vst [vmem:[#allocation210_spill] sm:$0xff] %v7797_v23  ;;  %v1964_v23 = vmul.f32 %v7595_v14, %v1961_v3  ;;  %v1996_v22 = vstv %s6260_s29  ;;  %s6272_s29 = sld [smem:[#allocation2 + $0x3c]] }
 0x270   : > { %1949 = vrot.lane.b32.xlu1 %v1932_v40, %s6607_s23  ;;  %1947 = vrot.lane.b32.xlu0 %v1931_v1, %s6607_s23 }
 0x272   : > { %v7803_v53 = vpop.permute.xlu1 %1560  ;;  %v7805_v15 = vpop.permute.xlu0 %1558 }
 0x273   : > { %13094 = vst [vmem:[#allocation211_spill] sm:$0xff] %v7803_v53  ;;  %13095 = vst [vmem:[#allocation212_spill] sm:$0xff] %v7805_v15  ;;  %v1967_v53 = vmul.f32 %v7622_v39, %v1961_v3  ;;  %v1966_v15 = vmul.f32 %v7625_v4, %v1961_v3  ;;  %v2000_v3 = vmul.f32 %v7592_v6, %v1996_v22 }
 0x274   : > { %1976 = vrot.lane.b32.xlu1 %v1963_v30, %s6607_s23  ;;  %1974 = vrot.lane.b32.xlu0 %v1962_v11, %s6607_s23 }
 0x276   : > { %v7811_v40 = vpop.permute.xlu1 %1587  ;;  %v7813_v1 = vpop.permute.xlu0 %1585 }
 0x277   : > { %13096 = vst [vmem:[#allocation213_spill] sm:$0xff] %v7811_v40  ;;  %13097 = vst [vmem:[#allocation214_spill] sm:$0xff] %v7813_v1  ;;  %v1998_v40 = vmul.f32 %v7578_v56, %v1996_v22  ;;  %v1997_v1 = vmul.f32 %v7581_v2, %v1996_v22 }
 0x278   : > { %1980 = vrot.lane.b32.xlu1 %v1965_v10, %s6607_s23  ;;  %1978 = vrot.lane.b32.xlu0 %v1964_v23, %s6607_s23 }
 0x27a   : > { %v7819_v30 = vpop.permute.xlu1 %1591  ;;  %v7821_v11 = vpop.permute.xlu0 %1589 }
 0x27b   : > { %13098 = vst [vmem:[#allocation215_spill] sm:$0xff] %v7819_v30  ;;  %13099 = vst [vmem:[#allocation216_spill] sm:$0xff] %v7821_v11  ;;  %v1999_v11 = vmul.f32 %v7595_v14, %v1996_v22  ;;  %v2031_v30 = vstv %s6261_s30  ;;  %s6273_s30 = sld [smem:[#allocation2 + $0x43]] }
 0x27c   : > { %1984 = vrot.lane.b32.xlu1 %v1967_v53, %s6607_s23  ;;  %1982 = vrot.lane.b32.xlu0 %v1966_v15, %s6607_s23 }
 0x27e   : > { %v7827_v10 = vpop.permute.xlu1 %1595  ;;  %v7829_v23 = vpop.permute.xlu0 %1593 }
 0x27f   : > { %13100 = vst [vmem:[#allocation217_spill] sm:$0xff] %v7827_v10  ;;  %13101 = vst [vmem:[#allocation218_spill] sm:$0xff] %v7829_v23  ;;  %v2002_v10 = vmul.f32 %v7622_v39, %v1996_v22  ;;  %v2001_v23 = vmul.f32 %v7625_v4, %v1996_v22  ;;  %v2035_v22 = vmul.f32 %v7592_v6, %v2031_v30 }
 0x280   : > { %2011 = vrot.lane.b32.xlu1 %v1998_v40, %s6607_s23  ;;  %2009 = vrot.lane.b32.xlu0 %v1997_v1, %s6607_s23 }
 0x282   : > { %v7835_v53 = vpop.permute.xlu1 %1679  ;;  %v7837_v15 = vpop.permute.xlu0 %1677 }
 0x283   : > { %13102 = vst [vmem:[#allocation219_spill] sm:$0xff] %v7835_v53  ;;  %13103 = vst [vmem:[#allocation220_spill] sm:$0xff] %v7837_v15  ;;  %v2033_v53 = vmul.f32 %v7578_v56, %v2031_v30  ;;  %v2032_v15 = vmul.f32 %v7581_v2, %v2031_v30 }
 0x284   : > { %2015 = vrot.lane.b32.xlu1 %v2000_v3, %s6607_s23  ;;  %2013 = vrot.lane.b32.xlu0 %v1999_v11, %s6607_s23 }
 0x286   : > { %v7843_v40 = vpop.permute.xlu1 %1683  ;;  %v7845_v1 = vpop.permute.xlu0 %1681 }
 0x287   : > { %13104 = vst [vmem:[#allocation221_spill] sm:$0xff] %v7843_v40  ;;  %13105 = vst [vmem:[#allocation222_spill] sm:$0xff] %v7845_v1  ;;  %v2034_v1 = vmul.f32 %v7595_v14, %v2031_v30  ;;  %v2066_v40 = vstv %s6262_s7  ;;  %s6274_s7 = sld [smem:[#allocation2 + $0x4a]] }
 0x288   : > { %2019 = vrot.lane.b32.xlu1 %v2002_v10, %s6607_s23  ;;  %2017 = vrot.lane.b32.xlu0 %v2001_v23, %s6607_s23 }
 0x28a   : > { %v7851_v3 = vpop.permute.xlu1 %1707  ;;  %v7853_v11 = vpop.permute.xlu0 %1705 }
 0x28b   : > { %13106 = vst [vmem:[#allocation223_spill] sm:$0xff] %v7851_v3  ;;  %13107 = vst [vmem:[#allocation224_spill] sm:$0xff] %v7853_v11  ;;  %v2037_v3 = vmul.f32 %v7622_v39, %v2031_v30  ;;  %v2036_v11 = vmul.f32 %v7625_v4, %v2031_v30  ;;  %v2070_v30 = vmul.f32 %v7592_v6, %v2066_v40 }
 0x28c   : > { %2046 = vrot.lane.b32.xlu1 %v2033_v53, %s6607_s23  ;;  %2044 = vrot.lane.b32.xlu0 %v2032_v15, %s6607_s23 }
 0x28e   : > { %v7859_v10 = vpop.permute.xlu1 %1711  ;;  %v7861_v23 = vpop.permute.xlu0 %1709 }
 0x28f   : > { %13108 = vst [vmem:[#allocation225_spill] sm:$0xff] %v7859_v10  ;;  %13109 = vst [vmem:[#allocation226_spill] sm:$0xff] %v7861_v23  ;;  %v2068_v10 = vmul.f32 %v7578_v56, %v2066_v40  ;;  %v2067_v23 = vmul.f32 %v7581_v2, %v2066_v40 }
 0x290   : > { %2050 = vrot.lane.b32.xlu1 %v2035_v22, %s6607_s23  ;;  %2048 = vrot.lane.b32.xlu0 %v2034_v1, %s6607_s23 }
 0x292   : > { %v7867_v53 = vpop.permute.xlu1 %1715  ;;  %v7869_v15 = vpop.permute.xlu0 %1713 }
 0x293   : > { %13110 = vst [vmem:[#allocation227_spill] sm:$0xff] %v7867_v53  ;;  %13111 = vst [vmem:[#allocation228_spill] sm:$0xff] %v7869_v15  ;;  %v2069_v15 = vmul.f32 %v7595_v14, %v2066_v40  ;;  %v2101_v53 = vstv %s6263_s8  ;;  %s6275_s8 = sld [smem:[#allocation2 + $0x51]] }
 0x294   : > { %2054 = vrot.lane.b32.xlu1 %v2037_v3, %s6607_s23  ;;  %2052 = vrot.lane.b32.xlu0 %v2036_v11, %s6607_s23 }
 0x296   : > { %v7875_v22 = vpop.permute.xlu1 %1742  ;;  %v7877_v1 = vpop.permute.xlu0 %1740 }
 0x297   : > { %13112 = vst [vmem:[#allocation229_spill] sm:$0xff] %v7875_v22  ;;  %13113 = vst [vmem:[#allocation230_spill] sm:$0xff] %v7877_v1  ;;  %v2072_v22 = vmul.f32 %v7622_v39, %v2066_v40  ;;  %v2071_v1 = vmul.f32 %v7625_v4, %v2066_v40  ;;  %v2105_v40 = vmul.f32 %v7592_v6, %v2101_v53 }
 0x298   : > { %2081 = vrot.lane.b32.xlu1 %v2068_v10, %s6607_s23  ;;  %2079 = vrot.lane.b32.xlu0 %v2067_v23, %s6607_s23 }
 0x29a   : > { %v7883_v3 = vpop.permute.xlu1 %1746  ;;  %v7885_v11 = vpop.permute.xlu0 %1744 }
 0x29b   : > { %13114 = vst [vmem:[#allocation231_spill] sm:$0xff] %v7883_v3  ;;  %13115 = vst [vmem:[#allocation232_spill] sm:$0xff] %v7885_v11  ;;  %v2103_v3 = vmul.f32 %v7578_v56, %v2101_v53  ;;  %v2102_v11 = vmul.f32 %v7581_v2, %v2101_v53 }
 0x29c   : > { %2085 = vrot.lane.b32.xlu1 %v2070_v30, %s6607_s23  ;;  %2083 = vrot.lane.b32.xlu0 %v2069_v15, %s6607_s23 }
 0x29e   : > { %v7891_v10 = vpop.permute.xlu1 %1750  ;;  %v7893_v23 = vpop.permute.xlu0 %1748 }
 0x29f   : > { %13116 = vst [vmem:[#allocation233_spill] sm:$0xff] %v7891_v10  ;;  %13117 = vst [vmem:[#allocation234_spill] sm:$0xff] %v7893_v23  ;;  %v2104_v23 = vmul.f32 %v7595_v14, %v2101_v53  ;;  %v2136_v10 = vstv %s6264_s14  ;;  %s6276_s14 = sld [smem:[#allocation2 + $0x58]] }
 0x2a0   : > { %2089 = vrot.lane.b32.xlu1 %v2072_v22, %s6607_s23  ;;  %2087 = vrot.lane.b32.xlu0 %v2071_v1, %s6607_s23 }
 0x2a2   : > { %v7899_v30 = vpop.permute.xlu1 %1777  ;;  %v7901_v15 = vpop.permute.xlu0 %1775 }
 0x2a3   : > { %13118 = vst [vmem:[#allocation235_spill] sm:$0xff] %v7899_v30  ;;  %13119 = vst [vmem:[#allocation236_spill] sm:$0xff] %v7901_v15  ;;  %v2107_v30 = vmul.f32 %v7622_v39, %v2101_v53  ;;  %v2106_v15 = vmul.f32 %v7625_v4, %v2101_v53  ;;  %v2140_v53 = vmul.f32 %v7592_v6, %v2136_v10 }
 0x2a4   : > { %2116 = vrot.lane.b32.xlu1 %v2103_v3, %s6607_s23  ;;  %2114 = vrot.lane.b32.xlu0 %v2102_v11, %s6607_s23 }
 0x2a6   : > { %v7907_v22 = vpop.permute.xlu1 %1781  ;;  %v7909_v1 = vpop.permute.xlu0 %1779 }
 0x2a7   : > { %13120 = vst [vmem:[#allocation237_spill] sm:$0xff] %v7907_v22  ;;  %13121 = vst [vmem:[#allocation238_spill] sm:$0xff] %v7909_v1  ;;  %v2138_v1 = vmul.f32 %v7578_v56, %v2136_v10 }
 0x2a8   : > { %2120 = vrot.lane.b32.xlu1 %v2105_v40, %s6607_s23  ;;  %2118 = vrot.lane.b32.xlu0 %v2104_v23, %s6607_s23  ;;  %v2137_v40 = vmul.f32 %v7581_v2, %v2136_v10 }
 0x2aa   : > { %v7915_v3 = vpop.permute.xlu1 %1785  ;;  %v7917_v11 = vpop.permute.xlu0 %1783 }
 0x2ab   : > { %13122 = vst [vmem:[#allocation239_spill] sm:$0xff] %v7915_v3  ;;  %13123 = vst [vmem:[#allocation240_spill] sm:$0xff] %v7917_v11  ;;  %v2139_v11 = vmul.f32 %v7595_v14, %v2136_v10  ;;  %v2160_v3 = vstv %s6265_s16  ;;  %s6277_s16 = sld [smem:[#allocation2 + $0x5f]] }
 0x2ac   : > { %2124 = vrot.lane.b32.xlu1 %v2107_v30, %s6607_s23  ;;  %2122 = vrot.lane.b32.xlu0 %v2106_v15, %s6607_s23  ;;  %v2164_v10 = vmul.f32 %v7592_v6, %v2160_v3 }
 0x2ae   : > { %v7923_v22 = vpop.permute.xlu1 %1812  ;;  %v7925_v23 = vpop.permute.xlu0 %1810 }
 0x2af   : > { %13124 = vst [vmem:[#allocation241_spill] sm:$0xff] %v7923_v22  ;;  %13125 = vst [vmem:[#allocation242_spill] sm:$0xff] %v7925_v23  ;;  %v2162_v22 = vmul.f32 %v7578_v56, %v2160_v3  ;;  %v2161_v23 = vmul.f32 %v7581_v2, %v2160_v3 }
 0x2b0   : > { %2147 = vrot.lane.b32.xlu1 %v2138_v1, %s6608_s3  ;;  %2145 = vrot.lane.b32.xlu0 %v2137_v40, %s6608_s3 }
 0x2b2   : > { %v7931_v30 = vpop.permute.xlu1 %1816  ;;  %v7933_v15 = vpop.permute.xlu0 %1814 }
 0x2b3   : > { %13126 = vst [vmem:[#allocation243_spill] sm:$0xff] %v7931_v30  ;;  %13127 = vst [vmem:[#allocation244_spill] sm:$0xff] %v7933_v15  ;;  %v2163_v15 = vmul.f32 %v7595_v14, %v2160_v3  ;;  %v2195_v30 = vstv %s6266_s17  ;;  %s6278_s17 = sld [smem:[#allocation2 + $0x36]] }
 0x2b4   : > { %2151 = vrot.lane.b32.xlu1 %v2140_v53, %s6608_s3  ;;  %2149 = vrot.lane.b32.xlu0 %v2139_v11, %s6608_s3 }
 0x2b6   : > { %v7939_v1 = vpop.permute.xlu1 %1820  ;;  %v7941_v40 = vpop.permute.xlu0 %1818 }
 0x2b7   : > { %13128 = vst [vmem:[#allocation245_spill] sm:$0xff] %v7939_v1  ;;  %13129 = vst [vmem:[#allocation246_spill] sm:$0xff] %v7941_v40  ;;  %v2166_v1 = vmul.f32 %v7622_v39, %v2160_v3  ;;  %v2165_v40 = vmul.f32 %v7625_v4, %v2160_v3  ;;  %v2199_v3 = vmul.f32 %v7592_v6, %v2195_v30 }
 0x2b8   : > { %2175 = vrot.lane.b32.xlu1 %v2162_v22, %s6608_s3  ;;  %2173 = vrot.lane.b32.xlu0 %v2161_v23, %s6608_s3 }
 0x2ba   : > { %v7947_v53 = vpop.permute.xlu1 %1847  ;;  %v7949_v11 = vpop.permute.xlu0 %1845 }
 0x2bb   : > { %13130 = vst [vmem:[#allocation247_spill] sm:$0xff] %v7947_v53  ;;  %13131 = vst [vmem:[#allocation248_spill] sm:$0xff] %v7949_v11  ;;  %v2197_v53 = vmul.f32 %v7578_v56, %v2195_v30  ;;  %v2196_v11 = vmul.f32 %v7581_v2, %v2195_v30 }
 0x2bc   : > { %2179 = vrot.lane.b32.xlu1 %v2164_v10, %s6608_s3  ;;  %2177 = vrot.lane.b32.xlu0 %v2163_v15, %s6608_s3 }
 0x2be   : > { %v7955_v22 = vpop.permute.xlu1 %1851  ;;  %v7957_v23 = vpop.permute.xlu0 %1849 }
 0x2bf   : > { %13132 = vst [vmem:[#allocation249_spill] sm:$0xff] %v7955_v22  ;;  %13133 = vst [vmem:[#allocation250_spill] sm:$0xff] %v7957_v23  ;;  %v2198_v23 = vmul.f32 %v7595_v14, %v2195_v30  ;;  %v2230_v22 = vstv %s6267_s21  ;;  %s6279_s21 = sld [smem:[#allocation2 + $0x3d]] }
 0x2c0   : > { %2183 = vrot.lane.b32.xlu1 %v2166_v1, %s6608_s3  ;;  %2181 = vrot.lane.b32.xlu0 %v2165_v40, %s6608_s3 }
 0x2c2   : > { %v7963_v10 = vpop.permute.xlu1 %1855  ;;  %v7965_v15 = vpop.permute.xlu0 %1853 }
 0x2c3   : > { %13134 = vst [vmem:[#allocation251_spill] sm:$0xff] %v7963_v10  ;;  %13135 = vst [vmem:[#allocation252_spill] sm:$0xff] %v7965_v15  ;;  %v2201_v10 = vmul.f32 %v7622_v39, %v2195_v30  ;;  %v2200_v15 = vmul.f32 %v7625_v4, %v2195_v30  ;;  %v2234_v30 = vmul.f32 %v7592_v6, %v2230_v22 }
 0x2c4   : > { %2210 = vrot.lane.b32.xlu1 %v2197_v53, %s6608_s3  ;;  %2208 = vrot.lane.b32.xlu0 %v2196_v11, %s6608_s3 }
 0x2c6   : > { %v7971_v1 = vpop.permute.xlu1 %1882  ;;  %v7973_v40 = vpop.permute.xlu0 %1880 }
 0x2c7   : > { %13136 = vst [vmem:[#allocation253_spill] sm:$0xff] %v7971_v1  ;;  %13137 = vst [vmem:[#allocation254_spill] sm:$0xff] %v7973_v40  ;;  %v2232_v1 = vmul.f32 %v7578_v56, %v2230_v22  ;;  %v2231_v40 = vmul.f32 %v7581_v2, %v2230_v22 }
 0x2c8   : > { %2214 = vrot.lane.b32.xlu1 %v2199_v3, %s6608_s3  ;;  %2212 = vrot.lane.b32.xlu0 %v2198_v23, %s6608_s3 }
 0x2ca   : > { %v7979_v53 = vpop.permute.xlu1 %1886  ;;  %v7981_v11 = vpop.permute.xlu0 %1884 }
 0x2cb   : > { %13138 = vst [vmem:[#allocation255_spill] sm:$0xff] %v7979_v53  ;;  %13139 = vst [vmem:[#allocation256_spill] sm:$0xff] %v7981_v11  ;;  %v2233_v11 = vmul.f32 %v7595_v14, %v2230_v22  ;;  %v2265_v53 = vstv %s6268_s24  ;;  %s6280_s24 = sld [smem:[#allocation2 + $0x44]] }
 0x2cc   : > { %2218 = vrot.lane.b32.xlu1 %v2201_v10, %s6608_s3  ;;  %2216 = vrot.lane.b32.xlu0 %v2200_v15, %s6608_s3 }
 0x2ce   : > { %v7987_v3 = vpop.permute.xlu1 %1890  ;;  %v7989_v23 = vpop.permute.xlu0 %1888 }
 0x2cf   : > { %13140 = vst [vmem:[#allocation257_spill] sm:$0xff] %v7987_v3  ;;  %13141 = vst [vmem:[#allocation258_spill] sm:$0xff] %v7989_v23  ;;  %v2236_v3 = vmul.f32 %v7622_v39, %v2230_v22  ;;  %v2235_v23 = vmul.f32 %v7625_v4, %v2230_v22  ;;  %v2269_v22 = vmul.f32 %v7592_v6, %v2265_v53 }
 0x2d0   : > { %2245 = vrot.lane.b32.xlu1 %v2232_v1, %s6608_s3  ;;  %2243 = vrot.lane.b32.xlu0 %v2231_v40, %s6608_s3 }
 0x2d2   : > { %v7995_v10 = vpop.permute.xlu1 %1913  ;;  %v7997_v15 = vpop.permute.xlu0 %1911 }
 0x2d3   : > { %13142 = vst [vmem:[#allocation259_spill] sm:$0xff] %v7995_v10  ;;  %13143 = vst [vmem:[#allocation260_spill] sm:$0xff] %v7997_v15  ;;  %v2267_v10 = vmul.f32 %v7578_v56, %v2265_v53  ;;  %v2266_v15 = vmul.f32 %v7581_v2, %v2265_v53 }
 0x2d4   : > { %2249 = vrot.lane.b32.xlu1 %v2234_v30, %s6608_s3  ;;  %2247 = vrot.lane.b32.xlu0 %v2233_v11, %s6608_s3 }
 0x2d6   : > { %v8003_v1 = vpop.permute.xlu1 %1917  ;;  %v8005_v40 = vpop.permute.xlu0 %1915 }
 0x2d7   : > { %13144 = vst [vmem:[#allocation261_spill] sm:$0xff] %v8003_v1  ;;  %13145 = vst [vmem:[#allocation262_spill] sm:$0xff] %v8005_v40  ;;  %v2268_v40 = vmul.f32 %v7595_v14, %v2265_v53  ;;  %v2300_v1 = vstv %s6269_s26  ;;  %s6281_s26 = sld [smem:[#allocation2 + $0x4b]] }
 0x2d8   : > { %2253 = vrot.lane.b32.xlu1 %v2236_v3, %s6608_s3  ;;  %2251 = vrot.lane.b32.xlu0 %v2235_v23, %s6608_s3 }
 0x2da   : > { %v8011_v30 = vpop.permute.xlu1 %1941  ;;  %v8013_v11 = vpop.permute.xlu0 %1939 }
 0x2db   : > { %13146 = vst [vmem:[#allocation263_spill] sm:$0xff] %v8011_v30  ;;  %13147 = vst [vmem:[#allocation264_spill] sm:$0xff] %v8013_v11  ;;  %v2271_v30 = vmul.f32 %v7622_v39, %v2265_v53  ;;  %v2270_v11 = vmul.f32 %v7625_v4, %v2265_v53  ;;  %v2304_v53 = vmul.f32 %v7592_v6, %v2300_v1 }
 0x2dc   : > { %2280 = vrot.lane.b32.xlu1 %v2267_v10, %s6608_s3  ;;  %2278 = vrot.lane.b32.xlu0 %v2266_v15, %s6608_s3 }
 0x2de   : > { %v8019_v3 = vpop.permute.xlu1 %1945  ;;  %v8021_v23 = vpop.permute.xlu0 %1943 }
 0x2df   : > { %13148 = vst [vmem:[#allocation265_spill] sm:$0xff] %v8019_v3  ;;  %13149 = vst [vmem:[#allocation266_spill] sm:$0xff] %v8021_v23  ;;  %v2302_v3 = vmul.f32 %v7578_v56, %v2300_v1  ;;  %v2301_v23 = vmul.f32 %v7581_v2, %v2300_v1 }
 0x2e0   : > { %2284 = vrot.lane.b32.xlu1 %v2269_v22, %s6608_s3  ;;  %2282 = vrot.lane.b32.xlu0 %v2268_v40, %s6608_s3 }
 0x2e2   : > { %v8027_v10 = vpop.permute.xlu1 %1949  ;;  %v8029_v15 = vpop.permute.xlu0 %1947 }
 0x2e3   : > { %13150 = vst [vmem:[#allocation267_spill] sm:$0xff] %v8027_v10  ;;  %13151 = vst [vmem:[#allocation268_spill] sm:$0xff] %v8029_v15  ;;  %v2303_v15 = vmul.f32 %v7595_v14, %v2300_v1  ;;  %v2335_v10 = vstv %s6270_s27  ;;  %s6282_s27 = sld [smem:[#allocation2 + $0x52]] }
 0x2e4   : > { %2288 = vrot.lane.b32.xlu1 %v2271_v30, %s6608_s3  ;;  %2286 = vrot.lane.b32.xlu0 %v2270_v11, %s6608_s3 }
 0x2e6   : > { %v8035_v22 = vpop.permute.xlu1 %1976  ;;  %v8037_v40 = vpop.permute.xlu0 %1974 }
 0x2e7   : > { %13152 = vst [vmem:[#allocation269_spill] sm:$0xff] %v8035_v22  ;;  %13153 = vst [vmem:[#allocation270_spill] sm:$0xff] %v8037_v40  ;;  %v2306_v22 = vmul.f32 %v7622_v39, %v2300_v1  ;;  %v2305_v40 = vmul.f32 %v7625_v4, %v2300_v1  ;;  %v2339_v1 = vmul.f32 %v7592_v6, %v2335_v10 }
 0x2e8   : > { %2315 = vrot.lane.b32.xlu1 %v2302_v3, %s6608_s3  ;;  %2313 = vrot.lane.b32.xlu0 %v2301_v23, %s6608_s3 }
 0x2ea   : > { %v8043_v30 = vpop.permute.xlu1 %1980  ;;  %v8045_v11 = vpop.permute.xlu0 %1978 }
 0x2eb   : > { %13154 = vst [vmem:[#allocation271_spill] sm:$0xff] %v8043_v30  ;;  %13155 = vst [vmem:[#allocation272_spill] sm:$0xff] %v8045_v11  ;;  %v2337_v30 = vmul.f32 %v7578_v56, %v2335_v10  ;;  %v2336_v11 = vmul.f32 %v7581_v2, %v2335_v10 }
 0x2ec   : > { %2319 = vrot.lane.b32.xlu1 %v2304_v53, %s6608_s3  ;;  %2317 = vrot.lane.b32.xlu0 %v2303_v15, %s6608_s3 }
 0x2ee   : > { %v8051_v3 = vpop.permute.xlu1 %1984  ;;  %v8053_v23 = vpop.permute.xlu0 %1982 }
 0x2ef   : > { %13156 = vst [vmem:[#allocation273_spill] sm:$0xff] %v8051_v3  ;;  %13157 = vst [vmem:[#allocation274_spill] sm:$0xff] %v8053_v23  ;;  %v2338_v23 = vmul.f32 %v7595_v14, %v2335_v10  ;;  %v2370_v3 = vstv %s6271_s28  ;;  %s6283_s28 = sld [smem:[#allocation2 + $0x59]] }
 0x2f0   : > { %2323 = vrot.lane.b32.xlu1 %v2306_v22, %s6608_s3  ;;  %2321 = vrot.lane.b32.xlu0 %v2305_v40, %s6608_s3 }
 0x2f2   : > { %v8059_v53 = vpop.permute.xlu1 %2011  ;;  %v8061_v15 = vpop.permute.xlu0 %2009 }
 0x2f3   : > { %13158 = vst [vmem:[#allocation275_spill] sm:$0xff] %v8059_v53  ;;  %13159 = vst [vmem:[#allocation276_spill] sm:$0xff] %v8061_v15  ;;  %v2341_v53 = vmul.f32 %v7622_v39, %v2335_v10  ;;  %v2340_v15 = vmul.f32 %v7625_v4, %v2335_v10  ;;  %v2374_v10 = vmul.f32 %v7592_v6, %v2370_v3 }
 0x2f4   : > { %2350 = vrot.lane.b32.xlu1 %v2337_v30, %s6608_s3  ;;  %2348 = vrot.lane.b32.xlu0 %v2336_v11, %s6608_s3 }
 0x2f6   : > { %v8067_v22 = vpop.permute.xlu1 %2015  ;;  %v8069_v40 = vpop.permute.xlu0 %2013 }
 0x2f7   : > { %13160 = vst [vmem:[#allocation277_spill] sm:$0xff] %v8067_v22  ;;  %13161 = vst [vmem:[#allocation278_spill] sm:$0xff] %v8069_v40  ;;  %v2372_v40 = vmul.f32 %v7578_v56, %v2370_v3 }
 0x2f8   : > { %2354 = vrot.lane.b32.xlu1 %v2339_v1, %s6608_s3  ;;  %2352 = vrot.lane.b32.xlu0 %v2338_v23, %s6608_s3  ;;  %v2371_v1 = vmul.f32 %v7581_v2, %v2370_v3 }
 0x2fa   : > { %v8075_v30 = vpop.permute.xlu1 %2019  ;;  %v8077_v11 = vpop.permute.xlu0 %2017 }
 0x2fb   : > { %13162 = vst [vmem:[#allocation279_spill] sm:$0xff] %v8075_v30  ;;  %13163 = vst [vmem:[#allocation280_spill] sm:$0xff] %v8077_v11  ;;  %v2373_v11 = vmul.f32 %v7595_v14, %v2370_v3  ;;  %v2394_v30 = vstv %s6272_s29  ;;  %s6284_s29 = sld [smem:[#allocation2 + $0x60]] }
 0x2fc   : > { %2358 = vrot.lane.b32.xlu1 %v2341_v53, %s6608_s3  ;;  %2356 = vrot.lane.b32.xlu0 %v2340_v15, %s6608_s3  ;;  %v2398_v3 = vmul.f32 %v7592_v6, %v2394_v30 }
 0x2fe   : > { %v8083_v22 = vpop.permute.xlu1 %2046  ;;  %v8085_v23 = vpop.permute.xlu0 %2044 }
 0x2ff   : > { %13164 = vst [vmem:[#allocation281_spill] sm:$0xff] %v8083_v22  ;;  %13165 = vst [vmem:[#allocation282_spill] sm:$0xff] %v8085_v23  ;;  %v2396_v22 = vmul.f32 %v7578_v56, %v2394_v30  ;;  %v2395_v23 = vmul.f32 %v7581_v2, %v2394_v30 }
 0x300   : > { %2381 = vrot.lane.b32.xlu1 %v2372_v40, %s6609_s22  ;;  %2379 = vrot.lane.b32.xlu0 %v2371_v1, %s6609_s22 }
 0x302   : > { %v8091_v53 = vpop.permute.xlu1 %2050  ;;  %v8093_v15 = vpop.permute.xlu0 %2048 }
 0x303   : > { %13166 = vst [vmem:[#allocation283_spill] sm:$0xff] %v8091_v53  ;;  %13167 = vst [vmem:[#allocation284_spill] sm:$0xff] %v8093_v15  ;;  %v2397_v15 = vmul.f32 %v7595_v14, %v2394_v30  ;;  %v2429_v53 = vstv %s6273_s30  ;;  %s6285_s30 = sld [smem:[#allocation2 + $0x37]] }
 0x304   : > { %2385 = vrot.lane.b32.xlu1 %v2374_v10, %s6609_s22  ;;  %2383 = vrot.lane.b32.xlu0 %v2373_v11, %s6609_s22 }
 0x306   : > { %v8099_v40 = vpop.permute.xlu1 %2054  ;;  %v8101_v1 = vpop.permute.xlu0 %2052 }
 0x307   : > { %13168 = vst [vmem:[#allocation285_spill] sm:$0xff] %v8099_v40  ;;  %13169 = vst [vmem:[#allocation286_spill] sm:$0xff] %v8101_v1  ;;  %v2400_v40 = vmul.f32 %v7622_v39, %v2394_v30  ;;  %v2399_v1 = vmul.f32 %v7625_v4, %v2394_v30  ;;  %v2433_v30 = vmul.f32 %v7592_v6, %v2429_v53 }
 0x308   : > { %2409 = vrot.lane.b32.xlu1 %v2396_v22, %s6609_s22  ;;  %2407 = vrot.lane.b32.xlu0 %v2395_v23, %s6609_s22 }
 0x30a   : > { %v8107_v10 = vpop.permute.xlu1 %2081  ;;  %v8109_v11 = vpop.permute.xlu0 %2079 }
 0x30b   : > { %13170 = vst [vmem:[#allocation287_spill] sm:$0xff] %v8107_v10  ;;  %13171 = vst [vmem:[#allocation288_spill] sm:$0xff] %v8109_v11  ;;  %v2431_v10 = vmul.f32 %v7578_v56, %v2429_v53  ;;  %v2430_v11 = vmul.f32 %v7581_v2, %v2429_v53 }
 0x30c   : > { %2413 = vrot.lane.b32.xlu1 %v2398_v3, %s6609_s22  ;;  %2411 = vrot.lane.b32.xlu0 %v2397_v15, %s6609_s22 }
 0x30e   : > { %v8115_v22 = vpop.permute.xlu1 %2085  ;;  %v8117_v23 = vpop.permute.xlu0 %2083 }
 0x30f   : > { %13172 = vst [vmem:[#allocation289_spill] sm:$0xff] %v8115_v22  ;;  %13173 = vst [vmem:[#allocation290_spill] sm:$0xff] %v8117_v23  ;;  %v2432_v23 = vmul.f32 %v7595_v14, %v2429_v53  ;;  %v2464_v22 = vstv %s6274_s7  ;;  %s6286_s7 = sld [smem:[#allocation2 + $0x3e]] }
 0x310   : > { %2417 = vrot.lane.b32.xlu1 %v2400_v40, %s6609_s22  ;;  %2415 = vrot.lane.b32.xlu0 %v2399_v1, %s6609_s22 }
 0x312   : > { %v8123_v3 = vpop.permute.xlu1 %2089  ;;  %v8125_v15 = vpop.permute.xlu0 %2087 }
 0x313   : > { %13174 = vst [vmem:[#allocation291_spill] sm:$0xff] %v8123_v3  ;;  %13175 = vst [vmem:[#allocation292_spill] sm:$0xff] %v8125_v15  ;;  %v2435_v3 = vmul.f32 %v7622_v39, %v2429_v53  ;;  %v2434_v15 = vmul.f32 %v7625_v4, %v2429_v53  ;;  %v2468_v53 = vmul.f32 %v7592_v6, %v2464_v22 }
 0x314   : > { %2444 = vrot.lane.b32.xlu1 %v2431_v10, %s6609_s22  ;;  %2442 = vrot.lane.b32.xlu0 %v2430_v11, %s6609_s22 }
 0x316   : > { %v8131_v40 = vpop.permute.xlu1 %2116  ;;  %v8133_v1 = vpop.permute.xlu0 %2114 }
 0x317   : > { %13176 = vst [vmem:[#allocation293_spill] sm:$0xff] %v8131_v40  ;;  %13177 = vst [vmem:[#allocation294_spill] sm:$0xff] %v8133_v1  ;;  %v2466_v40 = vmul.f32 %v7578_v56, %v2464_v22  ;;  %v2465_v1 = vmul.f32 %v7581_v2, %v2464_v22 }
 0x318   : > { %2448 = vrot.lane.b32.xlu1 %v2433_v30, %s6609_s22  ;;  %2446 = vrot.lane.b32.xlu0 %v2432_v23, %s6609_s22 }
 0x31a   : > { %v8139_v10 = vpop.permute.xlu1 %2120  ;;  %v8141_v11 = vpop.permute.xlu0 %2118 }
 0x31b   : > { %13178 = vst [vmem:[#allocation295_spill] sm:$0xff] %v8139_v10  ;;  %13179 = vst [vmem:[#allocation296_spill] sm:$0xff] %v8141_v11  ;;  %v2467_v11 = vmul.f32 %v7595_v14, %v2464_v22  ;;  %v2499_v10 = vstv %s6275_s8  ;;  %s6287_s8 = sld [smem:[#allocation2 + $0x45]] }
 0x31c   : > { %2452 = vrot.lane.b32.xlu1 %v2435_v3, %s6609_s22  ;;  %2450 = vrot.lane.b32.xlu0 %v2434_v15, %s6609_s22 }
 0x31e   : > { %v8147_v30 = vpop.permute.xlu1 %2124  ;;  %v8149_v23 = vpop.permute.xlu0 %2122 }
 0x31f   : > { %13180 = vst [vmem:[#allocation297_spill] sm:$0xff] %v8147_v30  ;;  %13181 = vst [vmem:[#allocation298_spill] sm:$0xff] %v8149_v23  ;;  %v2470_v30 = vmul.f32 %v7622_v39, %v2464_v22  ;;  %v2469_v23 = vmul.f32 %v7625_v4, %v2464_v22  ;;  %v2503_v22 = vmul.f32 %v7592_v6, %v2499_v10 }
 0x320   : > { %2479 = vrot.lane.b32.xlu1 %v2466_v40, %s6609_s22  ;;  %2477 = vrot.lane.b32.xlu0 %v2465_v1, %s6609_s22 }
 0x322   : > { %v8155_v3 = vpop.permute.xlu1 %2147  ;;  %v8157_v15 = vpop.permute.xlu0 %2145 }
 0x323   : > { %13182 = vst [vmem:[#allocation299_spill] sm:$0xff] %v8155_v3  ;;  %13183 = vst [vmem:[#allocation300_spill] sm:$0xff] %v8157_v15  ;;  %v2501_v3 = vmul.f32 %v7578_v56, %v2499_v10  ;;  %v2500_v15 = vmul.f32 %v7581_v2, %v2499_v10 }
 0x324   : > { %2483 = vrot.lane.b32.xlu1 %v2468_v53, %s6609_s22  ;;  %2481 = vrot.lane.b32.xlu0 %v2467_v11, %s6609_s22 }
 0x326   : > { %v8163_v40 = vpop.permute.xlu1 %2151  ;;  %v8165_v1 = vpop.permute.xlu0 %2149 }
 0x327   : > { %13184 = vst [vmem:[#allocation301_spill] sm:$0xff] %v8163_v40  ;;  %13185 = vst [vmem:[#allocation302_spill] sm:$0xff] %v8165_v1  ;;  %v2502_v1 = vmul.f32 %v7595_v14, %v2499_v10  ;;  %v2534_v40 = vstv %s6276_s14  ;;  %s6288_s14 = sld [smem:[#allocation2 + $0x4c]] }
 0x328   : > { %2487 = vrot.lane.b32.xlu1 %v2470_v30, %s6609_s22  ;;  %2485 = vrot.lane.b32.xlu0 %v2469_v23, %s6609_s22 }
 0x32a   : > { %v8171_v53 = vpop.permute.xlu1 %2175  ;;  %v8173_v11 = vpop.permute.xlu0 %2173 }
 0x32b   : > { %13186 = vst [vmem:[#allocation303_spill] sm:$0xff] %v8171_v53  ;;  %13187 = vst [vmem:[#allocation304_spill] sm:$0xff] %v8173_v11  ;;  %v2505_v53 = vmul.f32 %v7622_v39, %v2499_v10  ;;  %v2504_v11 = vmul.f32 %v7625_v4, %v2499_v10  ;;  %v2538_v10 = vmul.f32 %v7592_v6, %v2534_v40 }
 0x32c   : > { %2514 = vrot.lane.b32.xlu1 %v2501_v3, %s6609_s22  ;;  %2512 = vrot.lane.b32.xlu0 %v2500_v15, %s6609_s22 }
 0x32e   : > { %v8179_v30 = vpop.permute.xlu1 %2179  ;;  %v8181_v23 = vpop.permute.xlu0 %2177 }
 0x32f   : > { %13188 = vst [vmem:[#allocation305_spill] sm:$0xff] %v8179_v30  ;;  %13189 = vst [vmem:[#allocation306_spill] sm:$0xff] %v8181_v23  ;;  %v2536_v30 = vmul.f32 %v7578_v56, %v2534_v40  ;;  %v2535_v23 = vmul.f32 %v7581_v2, %v2534_v40  ;;  %v2540_v2 = vmul.f32 %v7622_v39, %v2534_v40 }
 0x330   : > { %2518 = vrot.lane.b32.xlu1 %v2503_v22, %s6609_s22  ;;  %2516 = vrot.lane.b32.xlu0 %v2502_v1, %s6609_s22 }
 0x332   : > { %v8187_v3 = vpop.permute.xlu1 %2183  ;;  %v8189_v15 = vpop.permute.xlu0 %2181 }
 0x333   : > { %13190 = vst [vmem:[#allocation307_spill] sm:$0xff] %v8187_v3  ;;  %13191 = vst [vmem:[#allocation308_spill] sm:$0xff] %v8189_v15 }
 0x334   : > { %2522 = vrot.lane.b32.xlu1 %v2505_v53, %s6609_s22  ;;  %2520 = vrot.lane.b32.xlu0 %v2504_v11, %s6609_s22  ;;  %v2537_v53 = vmul.f32 %v7595_v14, %v2534_v40  ;;  %v8218_v14 = vld [vmem:[%s6701_s5 + $0x38] sm:$0xff] }
 0x336   : > { %v8195_v22 = vpop.permute.xlu1 %2210  ;;  %v8197_v1 = vpop.permute.xlu0 %2208 }
 0x337   : > { %13192 = vst [vmem:[#allocation309_spill] sm:$0xff] %v8195_v22  ;;  %13193 = vst [vmem:[#allocation310_spill] sm:$0xff] %v8197_v1  ;;  %v2569_v1 = vstv %s6277_s16  ;;  %s6289_s16 = sld [smem:[#allocation2 + $0x53]] }
 0x338   : > { %2549 = vrot.lane.b32.xlu1 %v2536_v30, %s6609_s22  ;;  %2547 = vrot.lane.b32.xlu0 %v2535_v23, %s6609_s22  ;;  %v2539_v30 = vmul.f32 %v7625_v4, %v2534_v40 }
 0x33a   : > { %v8203_v11 = vpop.permute.xlu1 %2214  ;;  %v8205_v56 = vpop.permute.xlu0 %2212 }
 0x33b   : > { %13194 = vst [vmem:[#allocation311_spill] sm:$0xff] %v8203_v11  ;;  %13195 = vst [vmem:[#allocation312_spill] sm:$0xff] %v8205_v56 }
 0x33c   : > { %2553 = vrot.lane.b32.xlu1 %v2538_v10, %s6609_s22  ;;  %2551 = vrot.lane.b32.xlu0 %v2537_v53, %s6609_s22  ;;  %v2571_v10 = vmul.f32 %v8218_v14, %v2569_v1  ;;  %v8222_v53 = vld [vmem:[%s6701_s5 + $0x30] sm:$0xff] }
 0x33d   : > { %v2570_v56 = vmul.f32 %v8222_v53, %v2569_v1 }
 0x33e   : > { %v8211_v23 = vpop.permute.xlu1 %2218  ;;  %v8213_v6 = vpop.permute.xlu0 %2216 }
 0x33f   : > { %13196 = vst [vmem:[#allocation313_spill] sm:$0xff] %v8211_v23  ;;  %13197 = vst [vmem:[#allocation314_spill] sm:$0xff] %v8213_v6  ;;  %v8236_v6 = vld [vmem:[%s6701_s5 + $0x40] sm:$0xff] }
 0x340   : > { %2557 = vrot.lane.b32.xlu1 %v2540_v2, %s6609_s22  ;;  %2555 = vrot.lane.b32.xlu0 %v2539_v30, %s6609_s22  ;;  %v8232_v2 = vld [vmem:[%s6701_s5 + $0x48] sm:$0xff]  ;;  %v2572_v23 = vmul.f32 %v8236_v6, %v2569_v1 }
 0x341   : > { %v2573_v30 = vmul.f32 %v8232_v2, %v2569_v1 }
 0x342   : > { %v8225_v40 = vpop.permute.xlu1 %2245  ;;  %v8227_v11 = vpop.permute.xlu0 %2243 }
 0x343   : > { %13198 = vst [vmem:[#allocation315_spill] sm:$0xff] %v8225_v40  ;;  %13199 = vst [vmem:[#allocation316_spill] sm:$0xff] %v8227_v11  ;;  %v2604_v11 = vstv %s6278_s17  ;;  %s6290_s17 = sld [smem:[#allocation2 + $0x5a]] }
 0x344   : > { %2584 = vrot.lane.b32.xlu1 %v2571_v10, %s6609_s22  ;;  %2582 = vrot.lane.b32.xlu0 %v2570_v56, %s6609_s22  ;;  %v2575_v10 = vmul.f32 %v7622_v39, %v2569_v1  ;;  %v2574_v56 = vmul.f32 %v7625_v4, %v2569_v1  ;;  %v2608_v39 = vmul.f32 %v8232_v2, %v2604_v11  ;;  %v2628_v1 = vstv %s6279_s21  ;;  %s6291_s21 = sld [smem:[#allocation2 + $0x61]] }
 0x345   : > { %v2607_v4 = vmul.f32 %v8236_v6, %v2604_v11 }
 0x346   : > { %v8239_v22 = vpop.permute.xlu1 %2249  ;;  %v8241_v15 = vpop.permute.xlu0 %2247 }
 0x347   : > { %13200 = vst [vmem:[#allocation317_spill] sm:$0xff] %v8239_v22  ;;  %13201 = vst [vmem:[#allocation318_spill] sm:$0xff] %v8241_v15  ;;  %v2606_v15 = vmul.f32 %v8218_v14, %v2604_v11 }
 0x348   : > { %2588 = vrot.lane.b32.xlu1 %v2573_v30, %s6609_s22  ;;  %2586 = vrot.lane.b32.xlu0 %v2572_v23, %s6609_s22  ;;  %v2605_v30 = vmul.f32 %v8222_v53, %v2604_v11  ;;  %v2632_v11 = vmul.f32 %v8232_v2, %v2628_v1 }
 0x34a   : > { %v8247_v40 = vpop.permute.xlu1 %2253  ;;  %v8249_v3 = vpop.permute.xlu0 %2251 }
 0x34b   : > { %13202 = vst [vmem:[#allocation319_spill] sm:$0xff] %v8247_v40  ;;  %13203 = vst [vmem:[#allocation320_spill] sm:$0xff] %v8249_v3 }
 0x34c   : > { %2592 = vrot.lane.b32.xlu1 %v2575_v10, %s6609_s22  ;;  %2590 = vrot.lane.b32.xlu0 %v2574_v56, %s6609_s22 }
 0x34e   : > { %v8255_v22 = vpop.permute.xlu1 %2280  ;;  %v8257_v23 = vpop.permute.xlu0 %2278 }
 0x34f   : > { %13204 = vst [vmem:[#allocation321_spill] sm:$0xff] %v8255_v22  ;;  %13205 = vst [vmem:[#allocation322_spill] sm:$0xff] %v8257_v23  ;;  %v2630_v23 = vmul.f32 %v8218_v14, %v2628_v1 }
 0x350   : > { %2615 = vrot.lane.b32.xlu1 %v2606_v15, %s6610_s4  ;;  %2613 = vrot.lane.b32.xlu0 %v2605_v30, %s6610_s4  ;;  %v2629_v15 = vmul.f32 %v8222_v53, %v2628_v1 }
 0x352   : > { %v8263_v10 = vpop.permute.xlu1 %2284  ;;  %v8265_v56 = vpop.permute.xlu0 %2282 }
 0x353   : > { %13206 = vst [vmem:[#allocation323_spill] sm:$0xff] %v8263_v10  ;;  %13207 = vst [vmem:[#allocation324_spill] sm:$0xff] %v8265_v56  ;;  %v8286_v10 = vld [vmem:[%s6701_s5 + $0x58] sm:$0x3f] }
 0x354   : > { %2619 = vrot.lane.b32.xlu1 %v2608_v39, %s6610_s4  ;;  %2617 = vrot.lane.b32.xlu0 %v2607_v4, %s6610_s4  ;;  %v2631_v39 = vmul.f32 %v8236_v6, %v2628_v1 }
 0x356   : > { %v8271_v30 = vpop.permute.xlu1 %2288  ;;  %v8273_v22 = vpop.permute.xlu0 %2286 }
 0x357   : > { %13208 = vst [vmem:[#allocation325_spill] sm:$0xff] %v8271_v30  ;;  %13209 = vst [vmem:[#allocation326_spill] sm:$0xff] %v8273_v22  ;;  %v2634_v22 = vmul.f32 %v8286_v10, %v2628_v1  ;;  %v8290_v30 = vld [vmem:[%s6701_s5 + $0x50] sm:$0x3f] }
 0x358   : > { %2643 = vrot.lane.b32.xlu1 %v2630_v23, %s6610_s4  ;;  %2641 = vrot.lane.b32.xlu0 %v2629_v15, %s6610_s4  ;;  %v2633_v23 = vmul.f32 %v8290_v30, %v2628_v1  ;;  %v2663_v15 = vstv %s6280_s24  ;;  %s6305_s24 = sld [smem:[#allocation2 + $0x63]] }
 0x359   : > { %v2667_v1 = vmul.f32 %v8232_v2, %v2663_v15 }
 0x35a   : > { %v8279_v56 = vpop.permute.xlu1 %2315  ;;  %v8281_v4 = vpop.permute.xlu0 %2313 }
 0x35b   : > { %13210 = vst [vmem:[#allocation327_spill] sm:$0xff] %v8279_v56  ;;  %13211 = vst [vmem:[#allocation328_spill] sm:$0xff] %v8281_v4 }
 0x35c   : > { %2647 = vrot.lane.b32.xlu1 %v2632_v11, %s6610_s4  ;;  %2645 = vrot.lane.b32.xlu0 %v2631_v39, %s6610_s4  ;;  %v2665_v11 = vmul.f32 %v8218_v14, %v2663_v15  ;;  %v2664_v39 = vmul.f32 %v8222_v53, %v2663_v15 }
 0x35e   : > { %v8293_v3 = vpop.permute.xlu1 %2319  ;;  %v8295_v40 = vpop.permute.xlu0 %2317 }
 0x35f   : > { %13212 = vst [vmem:[#allocation329_spill] sm:$0xff] %v8293_v3  ;;  %13213 = vst [vmem:[#allocation330_spill] sm:$0xff] %v8295_v40  ;;  %v2666_v40 = vmul.f32 %v8236_v6, %v2663_v15  ;;  %v2698_v3 = vstv %s6281_s26  ;;  %s6306_s26 = sld [smem:[#allocation2 + $0x6a]] }
 0x360   : > { %2651 = vrot.lane.b32.xlu1 %v2634_v22, %s6610_s4  ;;  %2649 = vrot.lane.b32.xlu0 %v2633_v23, %s6610_s4 }
 0x362   : > { %v8301_v4 = vpop.permute.xlu1 %2323  ;;  %v8303_v56 = vpop.permute.xlu0 %2321 }
 0x363   : > { %13214 = vst [vmem:[#allocation331_spill] sm:$0xff] %v8301_v4  ;;  %13215 = vst [vmem:[#allocation332_spill] sm:$0xff] %v8303_v56  ;;  %v2669_v4 = vmul.f32 %v8286_v10, %v2663_v15  ;;  %v2668_v56 = vmul.f32 %v8290_v30, %v2663_v15  ;;  %v2702_v15 = vmul.f32 %v8232_v2, %v2698_v3 }
 0x364   : > { %2678 = vrot.lane.b32.xlu1 %v2665_v11, %s6610_s4  ;;  %2676 = vrot.lane.b32.xlu0 %v2664_v39, %s6610_s4 }
 0x366   : > { %v8309_v22 = vpop.permute.xlu1 %2350  ;;  %v8311_v23 = vpop.permute.xlu0 %2348 }
 0x367   : > { %13216 = vst [vmem:[#allocation333_spill] sm:$0xff] %v8309_v22  ;;  %13217 = vst [vmem:[#allocation334_spill] sm:$0xff] %v8311_v23  ;;  %v2700_v22 = vmul.f32 %v8218_v14, %v2698_v3  ;;  %v2699_v23 = vmul.f32 %v8222_v53, %v2698_v3 }
 0x368   : > { %2682 = vrot.lane.b32.xlu1 %v2667_v1, %s6610_s4  ;;  %2680 = vrot.lane.b32.xlu0 %v2666_v40, %s6610_s4 }
 0x36a   : > { %v8317_v11 = vpop.permute.xlu1 %2354  ;;  %v8319_v39 = vpop.permute.xlu0 %2352 }
 0x36b   : > { %13218 = vst [vmem:[#allocation335_spill] sm:$0xff] %v8317_v11  ;;  %13219 = vst [vmem:[#allocation336_spill] sm:$0xff] %v8319_v39  ;;  %v2701_v39 = vmul.f32 %v8236_v6, %v2698_v3  ;;  %v2733_v11 = vstv %s6282_s27  ;;  %s6307_s27 = sld [smem:[#allocation2 + $0x71]] }
 0x36c   : > { %2686 = vrot.lane.b32.xlu1 %v2669_v4, %s6610_s4  ;;  %2684 = vrot.lane.b32.xlu0 %v2668_v56, %s6610_s4 }
 0x36e   : > { %v8325_v1 = vpop.permute.xlu1 %2358  ;;  %v8327_v40 = vpop.permute.xlu0 %2356 }
 0x36f   : > { %13220 = vst [vmem:[#allocation337_spill] sm:$0xff] %v8325_v1  ;;  %13221 = vst [vmem:[#allocation338_spill] sm:$0xff] %v8327_v40  ;;  %v2704_v1 = vmul.f32 %v8286_v10, %v2698_v3  ;;  %v2703_v40 = vmul.f32 %v8290_v30, %v2698_v3  ;;  %v2737_v3 = vmul.f32 %v8232_v2, %v2733_v11 }
 0x370   : > { %2713 = vrot.lane.b32.xlu1 %v2700_v22, %s6610_s4  ;;  %2711 = vrot.lane.b32.xlu0 %v2699_v23, %s6610_s4 }
 0x372   : > { %v8333_v4 = vpop.permute.xlu1 %2381  ;;  %v8335_v56 = vpop.permute.xlu0 %2379 }
 0x373   : > { %13222 = vst [vmem:[#allocation339_spill] sm:$0xff] %v8333_v4  ;;  %13223 = vst [vmem:[#allocation340_spill] sm:$0xff] %v8335_v56  ;;  %v2735_v4 = vmul.f32 %v8218_v14, %v2733_v11  ;;  %v2734_v56 = vmul.f32 %v8222_v53, %v2733_v11 }
 0x374   : > { %2717 = vrot.lane.b32.xlu1 %v2702_v15, %s6610_s4  ;;  %2715 = vrot.lane.b32.xlu0 %v2701_v39, %s6610_s4 }
 0x376   : > { %v8341_v22 = vpop.permute.xlu1 %2385  ;;  %v8343_v23 = vpop.permute.xlu0 %2383 }
 0x377   : > { %13224 = vst [vmem:[#allocation341_spill] sm:$0xff] %v8341_v22  ;;  %13225 = vst [vmem:[#allocation342_spill] sm:$0xff] %v8343_v23  ;;  %v2736_v23 = vmul.f32 %v8236_v6, %v2733_v11  ;;  %v2768_v22 = vstv %s6283_s28  ;;  %s6308_s28 = sld [smem:[#allocation2 + $0x78]] }
 0x378   : > { %2721 = vrot.lane.b32.xlu1 %v2704_v1, %s6610_s4  ;;  %2719 = vrot.lane.b32.xlu0 %v2703_v40, %s6610_s4 }
 0x37a   : > { %v8349_v15 = vpop.permute.xlu1 %2409  ;;  %v8351_v39 = vpop.permute.xlu0 %2407 }
 0x37b   : > { %13226 = vst [vmem:[#allocation343_spill] sm:$0xff] %v8349_v15  ;;  %13227 = vst [vmem:[#allocation344_spill] sm:$0xff] %v8351_v39  ;;  %v2739_v15 = vmul.f32 %v8286_v10, %v2733_v11  ;;  %v2738_v39 = vmul.f32 %v8290_v30, %v2733_v11  ;;  %v2772_v11 = vmul.f32 %v8232_v2, %v2768_v22 }
 0x37c   : > { %2748 = vrot.lane.b32.xlu1 %v2735_v4, %s6610_s4  ;;  %2746 = vrot.lane.b32.xlu0 %v2734_v56, %s6610_s4 }
 0x37e   : > { %v8357_v1 = vpop.permute.xlu1 %2413  ;;  %v8359_v40 = vpop.permute.xlu0 %2411 }
 0x37f   : > { %13228 = vst [vmem:[#allocation345_spill] sm:$0xff] %v8357_v1  ;;  %13229 = vst [vmem:[#allocation346_spill] sm:$0xff] %v8359_v40  ;;  %v2770_v1 = vmul.f32 %v8218_v14, %v2768_v22  ;;  %v2769_v40 = vmul.f32 %v8222_v53, %v2768_v22 }
 0x380   : > { %2752 = vrot.lane.b32.xlu1 %v2737_v3, %s6610_s4  ;;  %2750 = vrot.lane.b32.xlu0 %v2736_v23, %s6610_s4 }
 0x382   : > { %v8365_v4 = vpop.permute.xlu1 %2417  ;;  %v8367_v56 = vpop.permute.xlu0 %2415 }
 0x383   : > { %13230 = vst [vmem:[#allocation347_spill] sm:$0xff] %v8365_v4  ;;  %13231 = vst [vmem:[#allocation348_spill] sm:$0xff] %v8367_v56  ;;  %v2771_v56 = vmul.f32 %v8236_v6, %v2768_v22  ;;  %v2803_v4 = vstv %s6284_s29  ;;  %s6309_s29 = sld [smem:[#allocation2 + $0x7f]] }
 0x384   : > { %2756 = vrot.lane.b32.xlu1 %v2739_v15, %s6610_s4  ;;  %2754 = vrot.lane.b32.xlu0 %v2738_v39, %s6610_s4 }
 0x386   : > { %v8373_v3 = vpop.permute.xlu1 %2444  ;;  %v8375_v23 = vpop.permute.xlu0 %2442 }
 0x387   : > { %13232 = vst [vmem:[#allocation349_spill] sm:$0xff] %v8373_v3  ;;  %13233 = vst [vmem:[#allocation350_spill] sm:$0xff] %v8375_v23  ;;  %v2774_v3 = vmul.f32 %v8286_v10, %v2768_v22  ;;  %v2773_v23 = vmul.f32 %v8290_v30, %v2768_v22  ;;  %v2807_v22 = vmul.f32 %v8232_v2, %v2803_v4 }
 0x388   : > { %2783 = vrot.lane.b32.xlu1 %v2770_v1, %s6610_s4  ;;  %2781 = vrot.lane.b32.xlu0 %v2769_v40, %s6610_s4 }
 0x38a   : > { %v8381_v15 = vpop.permute.xlu1 %2448  ;;  %v8383_v39 = vpop.permute.xlu0 %2446 }
 0x38b   : > { %13234 = vst [vmem:[#allocation351_spill] sm:$0xff] %v8381_v15  ;;  %13235 = vst [vmem:[#allocation352_spill] sm:$0xff] %v8383_v39  ;;  %v2805_v15 = vmul.f32 %v8218_v14, %v2803_v4  ;;  %v2804_v39 = vmul.f32 %v8222_v53, %v2803_v4 }
 0x38c   : > { %2787 = vrot.lane.b32.xlu1 %v2772_v11, %s6610_s4  ;;  %2785 = vrot.lane.b32.xlu0 %v2771_v56, %s6610_s4 }
 0x38e   : > { %v8389_v1 = vpop.permute.xlu1 %2452  ;;  %v8391_v40 = vpop.permute.xlu0 %2450 }
 0x38f   : > { %13236 = vst [vmem:[#allocation353_spill] sm:$0xff] %v8389_v1  ;;  %13237 = vst [vmem:[#allocation354_spill] sm:$0xff] %v8391_v40  ;;  %v2806_v40 = vmul.f32 %v8236_v6, %v2803_v4  ;;  %v2838_v1 = vstv %s6285_s30  ;;  %s6310_s30 = sld [smem:[#allocation2 + $0x86]] }
 0x390   : > { %2791 = vrot.lane.b32.xlu1 %v2774_v3, %s6610_s4  ;;  %2789 = vrot.lane.b32.xlu0 %v2773_v23, %s6610_s4 }
 0x392   : > { %v8397_v11 = vpop.permute.xlu1 %2479  ;;  %v8399_v56 = vpop.permute.xlu0 %2477 }
 0x393   : > { %13238 = vst [vmem:[#allocation355_spill] sm:$0xff] %v8397_v11  ;;  %13239 = vst [vmem:[#allocation356_spill] sm:$0xff] %v8399_v56  ;;  %v2809_v11 = vmul.f32 %v8286_v10, %v2803_v4  ;;  %v2808_v56 = vmul.f32 %v8290_v30, %v2803_v4  ;;  %v2842_v4 = vmul.f32 %v8232_v2, %v2838_v1 }
 0x394   : > { %2818 = vrot.lane.b32.xlu1 %v2805_v15, %s6610_s4  ;;  %2816 = vrot.lane.b32.xlu0 %v2804_v39, %s6610_s4 }
 0x396   : > { %v8405_v3 = vpop.permute.xlu1 %2483  ;;  %v8407_v23 = vpop.permute.xlu0 %2481 }
 0x397   : > { %13240 = vst [vmem:[#allocation357_spill] sm:$0xff] %v8405_v3  ;;  %13241 = vst [vmem:[#allocation358_spill] sm:$0xff] %v8407_v23  ;;  %v2840_v23 = vmul.f32 %v8218_v14, %v2838_v1 }
 0x398   : > { %2822 = vrot.lane.b32.xlu1 %v2807_v22, %s6610_s4  ;;  %2820 = vrot.lane.b32.xlu0 %v2806_v40, %s6610_s4  ;;  %v2839_v22 = vmul.f32 %v8222_v53, %v2838_v1 }
 0x39a   : > { %v8413_v15 = vpop.permute.xlu1 %2487  ;;  %v8415_v39 = vpop.permute.xlu0 %2485 }
 0x39b   : > { %13242 = vst [vmem:[#allocation359_spill] sm:$0xff] %v8413_v15  ;;  %13243 = vst [vmem:[#allocation360_spill] sm:$0xff] %v8415_v39  ;;  %v2841_v39 = vmul.f32 %v8236_v6, %v2838_v1  ;;  %v2862_v15 = vstv %s6286_s7  ;;  %s6311_s7 = sld [smem:[#allocation2 + $0x8d]] }
 0x39c   : > { %2826 = vrot.lane.b32.xlu1 %v2809_v11, %s6610_s4  ;;  %2824 = vrot.lane.b32.xlu0 %v2808_v56, %s6610_s4  ;;  %v2866_v1 = vmul.f32 %v8232_v2, %v2862_v15 }
 0x39e   : > { %v8421_v3 = vpop.permute.xlu1 %2514  ;;  %v8423_v40 = vpop.permute.xlu0 %2512 }
 0x39f   : > { %13244 = vst [vmem:[#allocation361_spill] sm:$0xff] %v8421_v3  ;;  %13245 = vst [vmem:[#allocation362_spill] sm:$0xff] %v8423_v40  ;;  %v2864_v3 = vmul.f32 %v8218_v14, %v2862_v15  ;;  %v2863_v40 = vmul.f32 %v8222_v53, %v2862_v15 }
 0x3a0   : > { %2849 = vrot.lane.b32.xlu1 %v2840_v23, %s6611_s25  ;;  %2847 = vrot.lane.b32.xlu0 %v2839_v22, %s6611_s25 }
 0x3a2   : > { %v8429_v11 = vpop.permute.xlu1 %2518  ;;  %v8431_v56 = vpop.permute.xlu0 %2516 }
 0x3a3   : > { %13246 = vst [vmem:[#allocation363_spill] sm:$0xff] %v8429_v11  ;;  %13247 = vst [vmem:[#allocation364_spill] sm:$0xff] %v8431_v56  ;;  %v2865_v56 = vmul.f32 %v8236_v6, %v2862_v15  ;;  %v2897_v11 = vstv %s6287_s8  ;;  %s6312_s8 = sld [smem:[#allocation2 + $0x64]] }
 0x3a4   : > { %2853 = vrot.lane.b32.xlu1 %v2842_v4, %s6611_s25  ;;  %2851 = vrot.lane.b32.xlu0 %v2841_v39, %s6611_s25 }
 0x3a6   : > { %v8437_v23 = vpop.permute.xlu1 %2522  ;;  %v8439_v22 = vpop.permute.xlu0 %2520 }
 0x3a7   : > { %13248 = vst [vmem:[#allocation365_spill] sm:$0xff] %v8437_v23  ;;  %13249 = vst [vmem:[#allocation366_spill] sm:$0xff] %v8439_v22  ;;  %v2868_v23 = vmul.f32 %v8286_v10, %v2862_v15  ;;  %v2867_v22 = vmul.f32 %v8290_v30, %v2862_v15  ;;  %v2901_v15 = vmul.f32 %v8232_v2, %v2897_v11 }
 0x3a8   : > { %2877 = vrot.lane.b32.xlu1 %v2864_v3, %s6611_s25  ;;  %2875 = vrot.lane.b32.xlu0 %v2863_v40, %s6611_s25 }
 0x3aa   : > { %v8445_v4 = vpop.permute.xlu1 %2549  ;;  %v8447_v39 = vpop.permute.xlu0 %2547 }
 0x3ab   : > { %13250 = vst [vmem:[#allocation367_spill] sm:$0xff] %v8445_v4  ;;  %13251 = vst [vmem:[#allocation368_spill] sm:$0xff] %v8447_v39  ;;  %v2899_v4 = vmul.f32 %v8218_v14, %v2897_v11  ;;  %v2898_v39 = vmul.f32 %v8222_v53, %v2897_v11 }
 0x3ac   : > { %2881 = vrot.lane.b32.xlu1 %v2866_v1, %s6611_s25  ;;  %2879 = vrot.lane.b32.xlu0 %v2865_v56, %s6611_s25 }
 0x3ae   : > { %v8453_v3 = vpop.permute.xlu1 %2553  ;;  %v8455_v40 = vpop.permute.xlu0 %2551 }
 0x3af   : > { %13252 = vst [vmem:[#allocation369_spill] sm:$0xff] %v8453_v3  ;;  %13253 = vst [vmem:[#allocation370_spill] sm:$0xff] %v8455_v40  ;;  %v2900_v40 = vmul.f32 %v8236_v6, %v2897_v11  ;;  %v2932_v3 = vstv %s6288_s14  ;;  %s6313_s14 = sld [smem:[#allocation2 + $0x6b]] }
 0x3b0   : > { %2885 = vrot.lane.b32.xlu1 %v2868_v23, %s6611_s25  ;;  %2883 = vrot.lane.b32.xlu0 %v2867_v22, %s6611_s25 }
 0x3b2   : > { %v8461_v1 = vpop.permute.xlu1 %2557  ;;  %v8463_v56 = vpop.permute.xlu0 %2555 }
 0x3b3   : > { %13254 = vst [vmem:[#allocation371_spill] sm:$0xff] %v8461_v1  ;;  %13255 = vst [vmem:[#allocation372_spill] sm:$0xff] %v8463_v56  ;;  %v2903_v1 = vmul.f32 %v8286_v10, %v2897_v11  ;;  %v2902_v56 = vmul.f32 %v8290_v30, %v2897_v11  ;;  %v2936_v11 = vmul.f32 %v8232_v2, %v2932_v3 }
 0x3b4   : > { %2912 = vrot.lane.b32.xlu1 %v2899_v4, %s6611_s25  ;;  %2910 = vrot.lane.b32.xlu0 %v2898_v39, %s6611_s25 }
 0x3b6   : > { %v8469_v23 = vpop.permute.xlu1 %2584  ;;  %v8471_v22 = vpop.permute.xlu0 %2582 }
 0x3b7   : > { %13256 = vst [vmem:[#allocation373_spill] sm:$0xff] %v8469_v23  ;;  %13257 = vst [vmem:[#allocation374_spill] sm:$0xff] %v8471_v22  ;;  %v2934_v23 = vmul.f32 %v8218_v14, %v2932_v3  ;;  %v2933_v22 = vmul.f32 %v8222_v53, %v2932_v3 }
 0x3b8   : > { %2916 = vrot.lane.b32.xlu1 %v2901_v15, %s6611_s25  ;;  %2914 = vrot.lane.b32.xlu0 %v2900_v40, %s6611_s25 }
 0x3ba   : > { %v8477_v4 = vpop.permute.xlu1 %2588  ;;  %v8479_v39 = vpop.permute.xlu0 %2586 }
 0x3bb   : > { %13258 = vst [vmem:[#allocation375_spill] sm:$0xff] %v8477_v4  ;;  %13259 = vst [vmem:[#allocation376_spill] sm:$0xff] %v8479_v39  ;;  %v2935_v39 = vmul.f32 %v8236_v6, %v2932_v3  ;;  %v2967_v4 = vstv %s6289_s16  ;;  %s6314_s16 = sld [smem:[#allocation2 + $0x72]] }
 0x3bc   : > { %2920 = vrot.lane.b32.xlu1 %v2903_v1, %s6611_s25  ;;  %2918 = vrot.lane.b32.xlu0 %v2902_v56, %s6611_s25 }
 0x3be   : > { %v8485_v15 = vpop.permute.xlu1 %2592  ;;  %v8487_v40 = vpop.permute.xlu0 %2590 }
 0x3bf   : > { %13260 = vst [vmem:[#allocation377_spill] sm:$0xff] %v8485_v15  ;;  %13261 = vst [vmem:[#allocation378_spill] sm:$0xff] %v8487_v40  ;;  %v2938_v15 = vmul.f32 %v8286_v10, %v2932_v3  ;;  %v2937_v40 = vmul.f32 %v8290_v30, %v2932_v3  ;;  %v2971_v3 = vmul.f32 %v8232_v2, %v2967_v4 }
 0x3c0   : > { %2947 = vrot.lane.b32.xlu1 %v2934_v23, %s6611_s25  ;;  %2945 = vrot.lane.b32.xlu0 %v2933_v22, %s6611_s25 }
 0x3c2   : > { %v8493_v1 = vpop.permute.xlu1 %2615  ;;  %v8495_v56 = vpop.permute.xlu0 %2613 }
 0x3c3   : > { %13262 = vst [vmem:[#allocation379_spill] sm:$0xff] %v8493_v1  ;;  %13263 = vst [vmem:[#allocation380_spill] sm:$0xff] %v8495_v56  ;;  %v2969_v1 = vmul.f32 %v8218_v14, %v2967_v4  ;;  %v2968_v56 = vmul.f32 %v8222_v53, %v2967_v4 }
 0x3c4   : > { %2951 = vrot.lane.b32.xlu1 %v2936_v11, %s6611_s25  ;;  %2949 = vrot.lane.b32.xlu0 %v2935_v39, %s6611_s25 }
 0x3c6   : > { %v8501_v23 = vpop.permute.xlu1 %2619  ;;  %v8503_v22 = vpop.permute.xlu0 %2617 }
 0x3c7   : > { %13264 = vst [vmem:[#allocation381_spill] sm:$0xff] %v8501_v23  ;;  %13265 = vst [vmem:[#allocation382_spill] sm:$0xff] %v8503_v22  ;;  %v2970_v22 = vmul.f32 %v8236_v6, %v2967_v4  ;;  %v3002_v23 = vstv %s6290_s17  ;;  %s6315_s17 = sld [smem:[#allocation2 + $0x79]] }
 0x3c8   : > { %2955 = vrot.lane.b32.xlu1 %v2938_v15, %s6611_s25  ;;  %2953 = vrot.lane.b32.xlu0 %v2937_v40, %s6611_s25 }
 0x3ca   : > { %v8509_v11 = vpop.permute.xlu1 %2643  ;;  %v8511_v39 = vpop.permute.xlu0 %2641 }
 0x3cb   : > { %13266 = vst [vmem:[#allocation383_spill] sm:$0xff] %v8509_v11  ;;  %13267 = vst [vmem:[#allocation384_spill] sm:$0xff] %v8511_v39  ;;  %v2973_v11 = vmul.f32 %v8286_v10, %v2967_v4  ;;  %v2972_v39 = vmul.f32 %v8290_v30, %v2967_v4  ;;  %v3006_v4 = vmul.f32 %v8232_v2, %v3002_v23 }
 0x3cc   : > { %2982 = vrot.lane.b32.xlu1 %v2969_v1, %s6611_s25  ;;  %2980 = vrot.lane.b32.xlu0 %v2968_v56, %s6611_s25 }
 0x3ce   : > { %v8517_v15 = vpop.permute.xlu1 %2647  ;;  %v8519_v40 = vpop.permute.xlu0 %2645 }
 0x3cf   : > { %13268 = vst [vmem:[#allocation385_spill] sm:$0xff] %v8517_v15  ;;  %13269 = vst [vmem:[#allocation386_spill] sm:$0xff] %v8519_v40  ;;  %v3004_v15 = vmul.f32 %v8218_v14, %v3002_v23  ;;  %v3003_v40 = vmul.f32 %v8222_v53, %v3002_v23 }
 0x3d0   : > { %2986 = vrot.lane.b32.xlu1 %v2971_v3, %s6611_s25  ;;  %2984 = vrot.lane.b32.xlu0 %v2970_v22, %s6611_s25 }
 0x3d2   : > { %v8525_v1 = vpop.permute.xlu1 %2651  ;;  %v8527_v56 = vpop.permute.xlu0 %2649 }
 0x3d3   : > { %13270 = vst [vmem:[#allocation387_spill] sm:$0xff] %v8525_v1  ;;  %13271 = vst [vmem:[#allocation388_spill] sm:$0xff] %v8527_v56  ;;  %v3005_v56 = vmul.f32 %v8236_v6, %v3002_v23  ;;  %v3037_v1 = vstv %s6291_s21  ;;  %s6316_s21 = sld [smem:[#allocation2 + $0x80]] }
 0x3d4   : > { %2990 = vrot.lane.b32.xlu1 %v2973_v11, %s6611_s25  ;;  %2988 = vrot.lane.b32.xlu0 %v2972_v39, %s6611_s25 }
 0x3d6   : > { %v8533_v3 = vpop.permute.xlu1 %2678  ;;  %v8535_v22 = vpop.permute.xlu0 %2676 }
 0x3d7   : > { %13272 = vst [vmem:[#allocation389_spill] sm:$0xff] %v8533_v3  ;;  %13273 = vst [vmem:[#allocation390_spill] sm:$0xff] %v8535_v22  ;;  %v3008_v3 = vmul.f32 %v8286_v10, %v3002_v23  ;;  %v3007_v22 = vmul.f32 %v8290_v30, %v3002_v23  ;;  %v3041_v23 = vmul.f32 %v8232_v2, %v3037_v1  ;;  %v8577_v2 = vld [vmem:[%s6701_s5 + $0x60] sm:$0xff] }
 0x3d8   : > { %3017 = vrot.lane.b32.xlu1 %v3004_v15, %s6611_s25  ;;  %3015 = vrot.lane.b32.xlu0 %v3003_v40, %s6611_s25 }
 0x3da   : > { %v8541_v11 = vpop.permute.xlu1 %2682  ;;  %v8543_v39 = vpop.permute.xlu0 %2680 }
 0x3db   : > { %13274 = vst [vmem:[#allocation391_spill] sm:$0xff] %v8541_v11  ;;  %13275 = vst [vmem:[#allocation392_spill] sm:$0xff] %v8543_v39  ;;  %v3039_v39 = vmul.f32 %v8218_v14, %v3037_v1 }
 0x3dc   : > { %3021 = vrot.lane.b32.xlu1 %v3006_v4, %s6611_s25  ;;  %3019 = vrot.lane.b32.xlu0 %v3005_v56, %s6611_s25  ;;  %v3038_v4 = vmul.f32 %v8222_v53, %v3037_v1  ;;  %v3043_v53 = vmul.f32 %v8286_v10, %v3037_v1 }
 0x3de   : > { %v8549_v15 = vpop.permute.xlu1 %2686  ;;  %v8551_v40 = vpop.permute.xlu0 %2684 }
 0x3df   : > { %13276 = vst [vmem:[#allocation393_spill] sm:$0xff] %v8549_v15  ;;  %13277 = vst [vmem:[#allocation394_spill] sm:$0xff] %v8551_v40 }
 0x3e0   : > { %3025 = vrot.lane.b32.xlu1 %v3008_v3, %s6611_s25  ;;  %3023 = vrot.lane.b32.xlu0 %v3007_v22, %s6611_s25  ;;  %v3040_v3 = vmul.f32 %v8236_v6, %v3037_v1 }
 0x3e2   : > { %v8557_v56 = vpop.permute.xlu1 %2713  ;;  %v8559_v11 = vpop.permute.xlu0 %2711 }
 0x3e3   : > { %13278 = vst [vmem:[#allocation395_spill] sm:$0xff] %v8557_v56  ;;  %13279 = vst [vmem:[#allocation396_spill] sm:$0xff] %v8559_v11  ;;  %v8574_v11 = vld [vmem:[%s6701_s5 + $0x68] sm:$0xff] }
 0x3e4   : > { %3052 = vrot.lane.b32.xlu1 %v3039_v39, %s6611_s25  ;;  %3050 = vrot.lane.b32.xlu0 %v3038_v4, %s6611_s25  ;;  %v3042_v39 = vmul.f32 %v8290_v30, %v3037_v1  ;;  %v3133_v4 = vstv %s6305_s24  ;;  %v8591_v30 = vld [vmem:[%s6701_s5 + $0x70] sm:$0xff]  ;;  %s6317_s24 = sld [smem:[#allocation2 + $0x87]] }
 0x3e5   : > { %v3134_v10 = vmul.f32 %v8577_v2, %v3133_v4 }
 0x3e6   : > { %v8565_v22 = vpop.permute.xlu1 %2717  ;;  %v8567_v14 = vpop.permute.xlu0 %2715 }
 0x3e7   : > { %13280 = vst [vmem:[#allocation397_spill] sm:$0xff] %v8565_v22  ;;  %13281 = vst [vmem:[#allocation398_spill] sm:$0xff] %v8567_v14 }
 0x3e8   : > { %3056 = vrot.lane.b32.xlu1 %v3041_v23, %s6611_s25  ;;  %3054 = vrot.lane.b32.xlu0 %v3040_v3, %s6611_s25  ;;  %v3135_v23 = vmul.f32 %v8574_v11, %v3133_v4  ;;  %v8588_v3 = vld [vmem:[%s6701_s5 + $0x78] sm:$0xff] }
 0x3ea   : > { %v8579_v6 = vpop.permute.xlu1 %2721  ;;  %v8581_v22 = vpop.permute.xlu0 %2719 }
 0x3eb   : > { %13282 = vst [vmem:[#allocation399_spill] sm:$0xff] %v8579_v6  ;;  %13283 = vst [vmem:[#allocation400_spill] sm:$0xff] %v8581_v22  ;;  %v3157_v22 = vstv %s6306_s26  ;;  %s6318_s26 = sld [smem:[#allocation2 + $0x8e]] }
 0x3ec   : > { %3060 = vrot.lane.b32.xlu1 %v3043_v53, %s6611_s25  ;;  %3058 = vrot.lane.b32.xlu0 %v3042_v39, %s6611_s25  ;;  %v3137_v53 = vmul.f32 %v8588_v3, %v3133_v4  ;;  %v3136_v39 = vmul.f32 %v8591_v30, %v3133_v4  ;;  %v3161_v4 = vmul.f32 %v8588_v3, %v3157_v22 }
 0x3ee   : > { %v8593_v1 = vpop.permute.xlu1 %2748  ;;  %v8595_v14 = vpop.permute.xlu0 %2746 }
 0x3ef   : > { %13284 = vst [vmem:[#allocation401_spill] sm:$0xff] %v8593_v1  ;;  %13285 = vst [vmem:[#allocation402_spill] sm:$0xff] %v8595_v14  ;;  %v3159_v14 = vmul.f32 %v8574_v11, %v3157_v22 }
 0x3f0   : > { %3144 = vrot.lane.b32.xlu1 %v3135_v23, %s6606_s6  ;;  %3142 = vrot.lane.b32.xlu0 %v3134_v10, %s6606_s6  ;;  %v3158_v23 = vmul.f32 %v8577_v2, %v3157_v22 }
 0x3f2   : > { %v8601_v6 = vpop.permute.xlu1 %2752  ;;  %v8603_v56 = vpop.permute.xlu0 %2750 }
 0x3f3   : > { %13286 = vst [vmem:[#allocation403_spill] sm:$0xff] %v8601_v6  ;;  %13287 = vst [vmem:[#allocation404_spill] sm:$0xff] %v8603_v56  ;;  %v3160_v56 = vmul.f32 %v8591_v30, %v3157_v22 }
 0x3f4   : > { %3148 = vrot.lane.b32.xlu1 %v3137_v53, %s6606_s6  ;;  %3146 = vrot.lane.b32.xlu0 %v3136_v39, %s6606_s6  ;;  %v8618_v53 = vld [vmem:[%s6701_s5 + $0x88] sm:$0x3f]  ;;  %v8621_v39 = vld [vmem:[%s6701_s5 + $0x80] sm:$0x3f] }
 0x3f6   : > { %v8609_v10 = vpop.permute.xlu1 %2756  ;;  %v8611_v1 = vpop.permute.xlu0 %2754 }
 0x3f7   : > { %13288 = vst [vmem:[#allocation405_spill] sm:$0xff] %v8609_v10  ;;  %13289 = vst [vmem:[#allocation406_spill] sm:$0xff] %v8611_v1  ;;  %v3192_v1 = vstv %s6307_s27  ;;  %s6319_s27 = sld [smem:[#allocation2 + $0x65]] }
 0x3f8   : > { %3172 = vrot.lane.b32.xlu1 %v3159_v14, %s6606_s6  ;;  %3170 = vrot.lane.b32.xlu0 %v3158_v23, %s6606_s6  ;;  %v3163_v14 = vmul.f32 %v8618_v53, %v3157_v22  ;;  %v3162_v23 = vmul.f32 %v8621_v39, %v3157_v22  ;;  %v3196_v22 = vmul.f32 %v8588_v3, %v3192_v1 }
 0x3fa   : > { %v8623_v6 = vpop.permute.xlu1 %2783  ;;  %v8625_v40 = vpop.permute.xlu0 %2781 }
 0x3fb   : > { %13290 = vst [vmem:[#allocation407_spill] sm:$0xff] %v8623_v6  ;;  %13291 = vst [vmem:[#allocation408_spill] sm:$0xff] %v8625_v40  ;;  %v3194_v6 = vmul.f32 %v8574_v11, %v3192_v1  ;;  %v3193_v40 = vmul.f32 %v8577_v2, %v3192_v1 }
 0x3fc   : > { %3176 = vrot.lane.b32.xlu1 %v3161_v4, %s6606_s6  ;;  %3174 = vrot.lane.b32.xlu0 %v3160_v56, %s6606_s6 }
 0x3fe   : > { %v8631_v10 = vpop.permute.xlu1 %2787  ;;  %v8633_v15 = vpop.permute.xlu0 %2785 }
 0x3ff   : > { %13292 = vst [vmem:[#allocation409_spill] sm:$0xff] %v8631_v10  ;;  %13293 = vst [vmem:[#allocation410_spill] sm:$0xff] %v8633_v15  ;;  %v3195_v15 = vmul.f32 %v8591_v30, %v3192_v1  ;;  %v3227_v10 = vstv %s6308_s28  ;;  %s6320_s28 = sld [smem:[#allocation2 + $0x6c]] }
 0x400   : > { %3180 = vrot.lane.b32.xlu1 %v3163_v14, %s6606_s6  ;;  %3178 = vrot.lane.b32.xlu0 %v3162_v23, %s6606_s6 }
 0x402   : > { %v8639_v4 = vpop.permute.xlu1 %2791  ;;  %v8641_v56 = vpop.permute.xlu0 %2789 }
 0x403   : > { %13294 = vst [vmem:[#allocation411_spill] sm:$0xff] %v8639_v4  ;;  %13295 = vst [vmem:[#allocation412_spill] sm:$0xff] %v8641_v56  ;;  %v3198_v4 = vmul.f32 %v8618_v53, %v3192_v1  ;;  %v3197_v56 = vmul.f32 %v8621_v39, %v3192_v1  ;;  %v3231_v1 = vmul.f32 %v8588_v3, %v3227_v10 }
 0x404   : > { %3207 = vrot.lane.b32.xlu1 %v3194_v6, %s6606_s6  ;;  %3205 = vrot.lane.b32.xlu0 %v3193_v40, %s6606_s6 }
 0x406   : > { %v8647_v14 = vpop.permute.xlu1 %2818  ;;  %v8649_v23 = vpop.permute.xlu0 %2816 }
 0x407   : > { %13296 = vst [vmem:[#allocation413_spill] sm:$0xff] %v8647_v14  ;;  %13297 = vst [vmem:[#allocation414_spill] sm:$0xff] %v8649_v23  ;;  %v3229_v14 = vmul.f32 %v8574_v11, %v3227_v10  ;;  %v3228_v23 = vmul.f32 %v8577_v2, %v3227_v10 }
 0x408   : > { %3211 = vrot.lane.b32.xlu1 %v3196_v22, %s6606_s6  ;;  %3209 = vrot.lane.b32.xlu0 %v3195_v15, %s6606_s6 }
 0x40a   : > { %v8655_v6 = vpop.permute.xlu1 %2822  ;;  %v8657_v40 = vpop.permute.xlu0 %2820 }
 0x40b   : > { %13298 = vst [vmem:[#allocation415_spill] sm:$0xff] %v8655_v6  ;;  %13299 = vst [vmem:[#allocation416_spill] sm:$0xff] %v8657_v40  ;;  %v3230_v40 = vmul.f32 %v8591_v30, %v3227_v10  ;;  %v3262_v6 = vstv %s6309_s29  ;;  %s6321_s29 = sld [smem:[#allocation2 + $0x73]] }
 0x40c   : > { %3215 = vrot.lane.b32.xlu1 %v3198_v4, %s6606_s6  ;;  %3213 = vrot.lane.b32.xlu0 %v3197_v56, %s6606_s6 }
 0x40e   : > { %v8663_v22 = vpop.permute.xlu1 %2826  ;;  %v8665_v15 = vpop.permute.xlu0 %2824 }
 0x40f   : > { %13300 = vst [vmem:[#allocation417_spill] sm:$0xff] %v8663_v22  ;;  %13301 = vst [vmem:[#allocation418_spill] sm:$0xff] %v8665_v15  ;;  %v3233_v22 = vmul.f32 %v8618_v53, %v3227_v10  ;;  %v3232_v15 = vmul.f32 %v8621_v39, %v3227_v10  ;;  %v3266_v10 = vmul.f32 %v8588_v3, %v3262_v6 }
 0x410   : > { %3242 = vrot.lane.b32.xlu1 %v3229_v14, %s6606_s6  ;;  %3240 = vrot.lane.b32.xlu0 %v3228_v23, %s6606_s6 }
 0x412   : > { %v8671_v4 = vpop.permute.xlu1 %2849  ;;  %v8673_v56 = vpop.permute.xlu0 %2847 }
 0x413   : > { %13302 = vst [vmem:[#allocation419_spill] sm:$0xff] %v8671_v4  ;;  %13303 = vst [vmem:[#allocation420_spill] sm:$0xff] %v8673_v56  ;;  %v3264_v4 = vmul.f32 %v8574_v11, %v3262_v6  ;;  %v3263_v56 = vmul.f32 %v8577_v2, %v3262_v6 }
 0x414   : > { %3246 = vrot.lane.b32.xlu1 %v3231_v1, %s6606_s6  ;;  %3244 = vrot.lane.b32.xlu0 %v3230_v40, %s6606_s6 }
 0x416   : > { %v8679_v14 = vpop.permute.xlu1 %2853  ;;  %v8681_v23 = vpop.permute.xlu0 %2851 }
 0x417   : > { %13304 = vst [vmem:[#allocation421_spill] sm:$0xff] %v8679_v14  ;;  %13305 = vst [vmem:[#allocation422_spill] sm:$0xff] %v8681_v23  ;;  %v3265_v23 = vmul.f32 %v8591_v30, %v3262_v6  ;;  %v3297_v14 = vstv %s6310_s30  ;;  %s6322_s30 = sld [smem:[#allocation2 + $0x7a]] }
 0x418   : > { %3250 = vrot.lane.b32.xlu1 %v3233_v22, %s6606_s6  ;;  %3248 = vrot.lane.b32.xlu0 %v3232_v15, %s6606_s6 }
 0x41a   : > { %v8687_v1 = vpop.permute.xlu1 %2877  ;;  %v8689_v40 = vpop.permute.xlu0 %2875 }
 0x41b   : > { %13306 = vst [vmem:[#allocation423_spill] sm:$0xff] %v8687_v1  ;;  %13307 = vst [vmem:[#allocation424_spill] sm:$0xff] %v8689_v40  ;;  %v3268_v1 = vmul.f32 %v8618_v53, %v3262_v6  ;;  %v3267_v40 = vmul.f32 %v8621_v39, %v3262_v6  ;;  %v3301_v6 = vmul.f32 %v8588_v3, %v3297_v14 }
 0x41c   : > { %3277 = vrot.lane.b32.xlu1 %v3264_v4, %s6606_s6  ;;  %3275 = vrot.lane.b32.xlu0 %v3263_v56, %s6606_s6 }
 0x41e   : > { %v8695_v22 = vpop.permute.xlu1 %2881  ;;  %v8697_v15 = vpop.permute.xlu0 %2879 }
 0x41f   : > { %13308 = vst [vmem:[#allocation425_spill] sm:$0xff] %v8695_v22  ;;  %13309 = vst [vmem:[#allocation426_spill] sm:$0xff] %v8697_v15  ;;  %v3299_v22 = vmul.f32 %v8574_v11, %v3297_v14  ;;  %v3298_v15 = vmul.f32 %v8577_v2, %v3297_v14 }
 0x420   : > { %3281 = vrot.lane.b32.xlu1 %v3266_v10, %s6606_s6  ;;  %3279 = vrot.lane.b32.xlu0 %v3265_v23, %s6606_s6 }
 0x422   : > { %v8703_v4 = vpop.permute.xlu1 %2885  ;;  %v8705_v56 = vpop.permute.xlu0 %2883 }
 0x423   : > { %13310 = vst [vmem:[#allocation427_spill] sm:$0xff] %v8703_v4  ;;  %13311 = vst [vmem:[#allocation428_spill] sm:$0xff] %v8705_v56  ;;  %v3300_v56 = vmul.f32 %v8591_v30, %v3297_v14  ;;  %v3332_v4 = vstv %s6311_s7  ;;  %s6323_s7 = sld [smem:[#allocation2 + $0x81]] }
 0x424   : > { %3285 = vrot.lane.b32.xlu1 %v3268_v1, %s6606_s6  ;;  %3283 = vrot.lane.b32.xlu0 %v3267_v40, %s6606_s6 }
 0x426   : > { %v8711_v10 = vpop.permute.xlu1 %2912  ;;  %v8713_v23 = vpop.permute.xlu0 %2910 }
 0x427   : > { %13312 = vst [vmem:[#allocation429_spill] sm:$0xff] %v8711_v10  ;;  %13313 = vst [vmem:[#allocation430_spill] sm:$0xff] %v8713_v23  ;;  %v3303_v10 = vmul.f32 %v8618_v53, %v3297_v14  ;;  %v3302_v23 = vmul.f32 %v8621_v39, %v3297_v14  ;;  %v3336_v14 = vmul.f32 %v8588_v3, %v3332_v4 }
 0x428   : > { %3312 = vrot.lane.b32.xlu1 %v3299_v22, %s6606_s6  ;;  %3310 = vrot.lane.b32.xlu0 %v3298_v15, %s6606_s6 }
 0x42a   : > { %v8719_v1 = vpop.permute.xlu1 %2916  ;;  %v8721_v40 = vpop.permute.xlu0 %2914 }
 0x42b   : > { %13314 = vst [vmem:[#allocation431_spill] sm:$0xff] %v8719_v1  ;;  %13315 = vst [vmem:[#allocation432_spill] sm:$0xff] %v8721_v40  ;;  %v3334_v1 = vmul.f32 %v8574_v11, %v3332_v4  ;;  %v3333_v40 = vmul.f32 %v8577_v2, %v3332_v4 }
 0x42c   : > { %3316 = vrot.lane.b32.xlu1 %v3301_v6, %s6606_s6  ;;  %3314 = vrot.lane.b32.xlu0 %v3300_v56, %s6606_s6 }
 0x42e   : > { %v8727_v22 = vpop.permute.xlu1 %2920  ;;  %v8729_v15 = vpop.permute.xlu0 %2918 }
 0x42f   : > { %13316 = vst [vmem:[#allocation433_spill] sm:$0xff] %v8727_v22  ;;  %13317 = vst [vmem:[#allocation434_spill] sm:$0xff] %v8729_v15  ;;  %v3335_v15 = vmul.f32 %v8591_v30, %v3332_v4  ;;  %v3367_v22 = vstv %s6312_s8  ;;  %s6324_s8 = sld [smem:[#allocation2 + $0x88]] }
 0x430   : > { %3320 = vrot.lane.b32.xlu1 %v3303_v10, %s6606_s6  ;;  %3318 = vrot.lane.b32.xlu0 %v3302_v23, %s6606_s6 }
 0x432   : > { %v8735_v6 = vpop.permute.xlu1 %2947  ;;  %v8737_v56 = vpop.permute.xlu0 %2945 }
 0x433   : > { %13318 = vst [vmem:[#allocation435_spill] sm:$0xff] %v8735_v6  ;;  %13319 = vst [vmem:[#allocation436_spill] sm:$0xff] %v8737_v56  ;;  %v3338_v6 = vmul.f32 %v8618_v53, %v3332_v4  ;;  %v3337_v56 = vmul.f32 %v8621_v39, %v3332_v4  ;;  %v3371_v4 = vmul.f32 %v8588_v3, %v3367_v22 }
 0x434   : > { %3347 = vrot.lane.b32.xlu1 %v3334_v1, %s6606_s6  ;;  %3345 = vrot.lane.b32.xlu0 %v3333_v40, %s6606_s6 }
 0x436   : > { %v8743_v10 = vpop.permute.xlu1 %2951  ;;  %v8745_v23 = vpop.permute.xlu0 %2949 }
 0x437   : > { %13320 = vst [vmem:[#allocation437_spill] sm:$0xff] %v8743_v10  ;;  %13321 = vst [vmem:[#allocation438_spill] sm:$0xff] %v8745_v23  ;;  %v3369_v23 = vmul.f32 %v8574_v11, %v3367_v22 }
 0x438   : > { %3351 = vrot.lane.b32.xlu1 %v3336_v14, %s6606_s6  ;;  %3349 = vrot.lane.b32.xlu0 %v3335_v15, %s6606_s6  ;;  %v3368_v14 = vmul.f32 %v8577_v2, %v3367_v22 }
 0x43a   : > { %v8751_v1 = vpop.permute.xlu1 %2955  ;;  %v8753_v40 = vpop.permute.xlu0 %2953 }
 0x43b   : > { %13322 = vst [vmem:[#allocation439_spill] sm:$0xff] %v8751_v1  ;;  %13323 = vst [vmem:[#allocation440_spill] sm:$0xff] %v8753_v40  ;;  %v3370_v40 = vmul.f32 %v8591_v30, %v3367_v22  ;;  %v3391_v1 = vstv %s6313_s14  ;;  %s6325_s14 = sld [smem:[#allocation2 + $0x8f]] }
 0x43c   : > { %3355 = vrot.lane.b32.xlu1 %v3338_v6, %s6606_s6  ;;  %3353 = vrot.lane.b32.xlu0 %v3337_v56, %s6606_s6  ;;  %v3395_v22 = vmul.f32 %v8588_v3, %v3391_v1 }
 0x43e   : > { %v8759_v10 = vpop.permute.xlu1 %2982  ;;  %v8761_v15 = vpop.permute.xlu0 %2980 }
 0x43f   : > { %13324 = vst [vmem:[#allocation441_spill] sm:$0xff] %v8759_v10  ;;  %13325 = vst [vmem:[#allocation442_spill] sm:$0xff] %v8761_v15  ;;  %v3393_v10 = vmul.f32 %v8574_v11, %v3391_v1  ;;  %v3392_v15 = vmul.f32 %v8577_v2, %v3391_v1 }
 0x440   : > { %3378 = vrot.lane.b32.xlu1 %v3369_v23, %s6607_s23  ;;  %3376 = vrot.lane.b32.xlu0 %v3368_v14, %s6607_s23 }
 0x442   : > { %v8767_v6 = vpop.permute.xlu1 %2986  ;;  %v8769_v56 = vpop.permute.xlu0 %2984 }
 0x443   : > { %13326 = vst [vmem:[#allocation443_spill] sm:$0xff] %v8767_v6  ;;  %13327 = vst [vmem:[#allocation444_spill] sm:$0xff] %v8769_v56  ;;  %v3394_v56 = vmul.f32 %v8591_v30, %v3391_v1  ;;  %v3426_v6 = vstv %s6314_s16  ;;  %s6326_s16 = sld [smem:[#allocation2 + $0x66]] }
 0x444   : > { %3382 = vrot.lane.b32.xlu1 %v3371_v4, %s6607_s23  ;;  %3380 = vrot.lane.b32.xlu0 %v3370_v40, %s6607_s23 }
 0x446   : > { %v8775_v23 = vpop.permute.xlu1 %2990  ;;  %v8777_v14 = vpop.permute.xlu0 %2988 }
 0x447   : > { %13328 = vst [vmem:[#allocation445_spill] sm:$0xff] %v8775_v23  ;;  %13329 = vst [vmem:[#allocation446_spill] sm:$0xff] %v8777_v14  ;;  %v3397_v23 = vmul.f32 %v8618_v53, %v3391_v1  ;;  %v3396_v14 = vmul.f32 %v8621_v39, %v3391_v1  ;;  %v3430_v1 = vmul.f32 %v8588_v3, %v3426_v6 }
 0x448   : > { %3406 = vrot.lane.b32.xlu1 %v3393_v10, %s6607_s23  ;;  %3404 = vrot.lane.b32.xlu0 %v3392_v15, %s6607_s23 }
 0x44a   : > { %v8783_v4 = vpop.permute.xlu1 %3017  ;;  %v8785_v40 = vpop.permute.xlu0 %3015 }
 0x44b   : > { %13330 = vst [vmem:[#allocation447_spill] sm:$0xff] %v8783_v4  ;;  %13331 = vst [vmem:[#allocation448_spill] sm:$0xff] %v8785_v40  ;;  %v3428_v4 = vmul.f32 %v8574_v11, %v3426_v6  ;;  %v3427_v40 = vmul.f32 %v8577_v2, %v3426_v6 }
 0x44c   : > { %3410 = vrot.lane.b32.xlu1 %v3395_v22, %s6607_s23  ;;  %3408 = vrot.lane.b32.xlu0 %v3394_v56, %s6607_s23 }
 0x44e   : > { %v8791_v10 = vpop.permute.xlu1 %3021  ;;  %v8793_v15 = vpop.permute.xlu0 %3019 }
 0x44f   : > { %13332 = vst [vmem:[#allocation449_spill] sm:$0xff] %v8791_v10  ;;  %13333 = vst [vmem:[#allocation450_spill] sm:$0xff] %v8793_v15  ;;  %v3429_v15 = vmul.f32 %v8591_v30, %v3426_v6  ;;  %v3461_v10 = vstv %s6315_s17  ;;  %s6327_s17 = sld [smem:[#allocation2 + $0x6d]] }
 0x450   : > { %3414 = vrot.lane.b32.xlu1 %v3397_v23, %s6607_s23  ;;  %3412 = vrot.lane.b32.xlu0 %v3396_v14, %s6607_s23 }
 0x452   : > { %v8799_v22 = vpop.permute.xlu1 %3025  ;;  %v8801_v56 = vpop.permute.xlu0 %3023 }
 0x453   : > { %13334 = vst [vmem:[#allocation451_spill] sm:$0xff] %v8799_v22  ;;  %13335 = vst [vmem:[#allocation452_spill] sm:$0xff] %v8801_v56  ;;  %v3432_v22 = vmul.f32 %v8618_v53, %v3426_v6  ;;  %v3431_v56 = vmul.f32 %v8621_v39, %v3426_v6  ;;  %v3465_v6 = vmul.f32 %v8588_v3, %v3461_v10 }
 0x454   : > { %3441 = vrot.lane.b32.xlu1 %v3428_v4, %s6607_s23  ;;  %3439 = vrot.lane.b32.xlu0 %v3427_v40, %s6607_s23 }
 0x456   : > { %v8807_v23 = vpop.permute.xlu1 %3052  ;;  %v8809_v14 = vpop.permute.xlu0 %3050 }
 0x457   : > { %13336 = vst [vmem:[#allocation453_spill] sm:$0xff] %v8807_v23  ;;  %13337 = vst [vmem:[#allocation454_spill] sm:$0xff] %v8809_v14  ;;  %v3463_v23 = vmul.f32 %v8574_v11, %v3461_v10  ;;  %v3462_v14 = vmul.f32 %v8577_v2, %v3461_v10 }
 0x458   : > { %3445 = vrot.lane.b32.xlu1 %v3430_v1, %s6607_s23  ;;  %3443 = vrot.lane.b32.xlu0 %v3429_v15, %s6607_s23 }
 0x45a   : > { %v8815_v4 = vpop.permute.xlu1 %3056  ;;  %v8817_v40 = vpop.permute.xlu0 %3054 }
 0x45b   : > { %13338 = vst [vmem:[#allocation455_spill] sm:$0xff] %v8815_v4  ;;  %13339 = vst [vmem:[#allocation456_spill] sm:$0xff] %v8817_v40  ;;  %v3464_v40 = vmul.f32 %v8591_v30, %v3461_v10  ;;  %v3496_v4 = vstv %s6316_s21  ;;  %s6328_s21 = sld [smem:[#allocation2 + $0x74]] }
 0x45c   : > { %3449 = vrot.lane.b32.xlu1 %v3432_v22, %s6607_s23  ;;  %3447 = vrot.lane.b32.xlu0 %v3431_v56, %s6607_s23 }
 0x45e   : > { %v8823_v1 = vpop.permute.xlu1 %3060  ;;  %v8825_v15 = vpop.permute.xlu0 %3058 }
 0x45f   : > { %13340 = vst [vmem:[#allocation457_spill] sm:$0xff] %v8823_v1  ;;  %13341 = vst [vmem:[#allocation458_spill] sm:$0xff] %v8825_v15  ;;  %v3467_v1 = vmul.f32 %v8618_v53, %v3461_v10  ;;  %v3466_v15 = vmul.f32 %v8621_v39, %v3461_v10  ;;  %v3500_v10 = vmul.f32 %v8588_v3, %v3496_v4 }
 0x460   : > { %3476 = vrot.lane.b32.xlu1 %v3463_v23, %s6607_s23  ;;  %3474 = vrot.lane.b32.xlu0 %v3462_v14, %s6607_s23 }
 0x462   : > { %v8831_v22 = vpop.permute.xlu1 %3144  ;;  %v8833_v56 = vpop.permute.xlu0 %3142 }
 0x463   : > { %13342 = vst [vmem:[#allocation459_spill] sm:$0xff] %v8831_v22  ;;  %13343 = vst [vmem:[#allocation460_spill] sm:$0xff] %v8833_v56  ;;  %v3498_v22 = vmul.f32 %v8574_v11, %v3496_v4  ;;  %v3497_v56 = vmul.f32 %v8577_v2, %v3496_v4 }
 0x464   : > { %3480 = vrot.lane.b32.xlu1 %v3465_v6, %s6607_s23  ;;  %3478 = vrot.lane.b32.xlu0 %v3464_v40, %s6607_s23 }
 0x466   : > { %v8839_v23 = vpop.permute.xlu1 %3148  ;;  %v8841_v14 = vpop.permute.xlu0 %3146 }
 0x467   : > { %13344 = vst [vmem:[#allocation461_spill] sm:$0xff] %v8839_v23  ;;  %13345 = vst [vmem:[#allocation462_spill] sm:$0xff] %v8841_v14  ;;  %v3499_v14 = vmul.f32 %v8591_v30, %v3496_v4  ;;  %v3531_v23 = vstv %s6317_s24  ;;  %s6329_s24 = sld [smem:[#allocation2 + $0x7b]] }
 0x468   : > { %3484 = vrot.lane.b32.xlu1 %v3467_v1, %s6607_s23  ;;  %3482 = vrot.lane.b32.xlu0 %v3466_v15, %s6607_s23 }
 0x46a   : > { %v8847_v6 = vpop.permute.xlu1 %3172  ;;  %v8849_v40 = vpop.permute.xlu0 %3170 }
 0x46b   : > { %13346 = vst [vmem:[#allocation463_spill] sm:$0xff] %v8847_v6  ;;  %13347 = vst [vmem:[#allocation464_spill] sm:$0xff] %v8849_v40  ;;  %v3502_v6 = vmul.f32 %v8618_v53, %v3496_v4  ;;  %v3501_v40 = vmul.f32 %v8621_v39, %v3496_v4  ;;  %v3535_v4 = vmul.f32 %v8588_v3, %v3531_v23 }
 0x46c   : > { %3511 = vrot.lane.b32.xlu1 %v3498_v22, %s6607_s23  ;;  %3509 = vrot.lane.b32.xlu0 %v3497_v56, %s6607_s23 }
 0x46e   : > { %v8855_v1 = vpop.permute.xlu1 %3176  ;;  %v8857_v15 = vpop.permute.xlu0 %3174 }
 0x46f   : > { %13348 = vst [vmem:[#allocation465_spill] sm:$0xff] %v8855_v1  ;;  %13349 = vst [vmem:[#allocation466_spill] sm:$0xff] %v8857_v15  ;;  %v3533_v1 = vmul.f32 %v8574_v11, %v3531_v23  ;;  %v3532_v15 = vmul.f32 %v8577_v2, %v3531_v23 }
 0x470   : > { %3515 = vrot.lane.b32.xlu1 %v3500_v10, %s6607_s23  ;;  %3513 = vrot.lane.b32.xlu0 %v3499_v14, %s6607_s23 }
 0x472   : > { %v8863_v22 = vpop.permute.xlu1 %3180  ;;  %v8865_v56 = vpop.permute.xlu0 %3178 }
 0x473   : > { %13350 = vst [vmem:[#allocation467_spill] sm:$0xff] %v8863_v22  ;;  %13351 = vst [vmem:[#allocation468_spill] sm:$0xff] %v8865_v56  ;;  %v3534_v56 = vmul.f32 %v8591_v30, %v3531_v23  ;;  %v3566_v22 = vstv %s6318_s26  ;;  %s6330_s26 = sld [smem:[#allocation2 + $0x82]] }
 0x474   : > { %3519 = vrot.lane.b32.xlu1 %v3502_v6, %s6607_s23  ;;  %3517 = vrot.lane.b32.xlu0 %v3501_v40, %s6607_s23 }
 0x476   : > { %v8871_v10 = vpop.permute.xlu1 %3207  ;;  %v8873_v14 = vpop.permute.xlu0 %3205 }
 0x477   : > { %13352 = vst [vmem:[#allocation469_spill] sm:$0xff] %v8871_v10  ;;  %13353 = vst [vmem:[#allocation470_spill] sm:$0xff] %v8873_v14  ;;  %v3537_v10 = vmul.f32 %v8618_v53, %v3531_v23  ;;  %v3536_v14 = vmul.f32 %v8621_v39, %v3531_v23  ;;  %v3570_v23 = vmul.f32 %v8588_v3, %v3566_v22 }
 0x478   : > { %3546 = vrot.lane.b32.xlu1 %v3533_v1, %s6607_s23  ;;  %3544 = vrot.lane.b32.xlu0 %v3532_v15, %s6607_s23 }
 0x47a   : > { %v8879_v6 = vpop.permute.xlu1 %3211  ;;  %v8881_v40 = vpop.permute.xlu0 %3209 }
 0x47b   : > { %13354 = vst [vmem:[#allocation471_spill] sm:$0xff] %v8879_v6  ;;  %13355 = vst [vmem:[#allocation472_spill] sm:$0xff] %v8881_v40  ;;  %v3568_v6 = vmul.f32 %v8574_v11, %v3566_v22  ;;  %v3567_v40 = vmul.f32 %v8577_v2, %v3566_v22 }
 0x47c   : > { %3550 = vrot.lane.b32.xlu1 %v3535_v4, %s6607_s23  ;;  %3548 = vrot.lane.b32.xlu0 %v3534_v56, %s6607_s23 }
 0x47e   : > { %v8887_v1 = vpop.permute.xlu1 %3215  ;;  %v8889_v15 = vpop.permute.xlu0 %3213 }
 0x47f   : > { %13356 = vst [vmem:[#allocation473_spill] sm:$0xff] %v8887_v1  ;;  %13357 = vst [vmem:[#allocation474_spill] sm:$0xff] %v8889_v15  ;;  %v3569_v15 = vmul.f32 %v8591_v30, %v3566_v22  ;;  %v3601_v1 = vstv %s6319_s27  ;;  %s6331_s27 = sld [smem:[#allocation2 + $0x89]] }
 0x480   : > { %3554 = vrot.lane.b32.xlu1 %v3537_v10, %s6607_s23  ;;  %3552 = vrot.lane.b32.xlu0 %v3536_v14, %s6607_s23 }
 0x482   : > { %v8895_v4 = vpop.permute.xlu1 %3242  ;;  %v8897_v56 = vpop.permute.xlu0 %3240 }
 0x483   : > { %13358 = vst [vmem:[#allocation475_spill] sm:$0xff] %v8895_v4  ;;  %13359 = vst [vmem:[#allocation476_spill] sm:$0xff] %v8897_v56  ;;  %v3572_v4 = vmul.f32 %v8618_v53, %v3566_v22  ;;  %v3571_v56 = vmul.f32 %v8621_v39, %v3566_v22  ;;  %v3605_v22 = vmul.f32 %v8588_v3, %v3601_v1 }
 0x484   : > { %3581 = vrot.lane.b32.xlu1 %v3568_v6, %s6607_s23  ;;  %3579 = vrot.lane.b32.xlu0 %v3567_v40, %s6607_s23 }
 0x486   : > { %v8903_v10 = vpop.permute.xlu1 %3246  ;;  %v8905_v14 = vpop.permute.xlu0 %3244 }
 0x487   : > { %13360 = vst [vmem:[#allocation477_spill] sm:$0xff] %v8903_v10  ;;  %13361 = vst [vmem:[#allocation478_spill] sm:$0xff] %v8905_v14  ;;  %v3603_v14 = vmul.f32 %v8574_v11, %v3601_v1 }
 0x488   : > { %3585 = vrot.lane.b32.xlu1 %v3570_v23, %s6607_s23  ;;  %3583 = vrot.lane.b32.xlu0 %v3569_v15, %s6607_s23  ;;  %v3602_v23 = vmul.f32 %v8577_v2, %v3601_v1 }
 0x48a   : > { %v8911_v6 = vpop.permute.xlu1 %3250  ;;  %v8913_v40 = vpop.permute.xlu0 %3248 }
 0x48b   : > { %13362 = vst [vmem:[#allocation479_spill] sm:$0xff] %v8911_v6  ;;  %13363 = vst [vmem:[#allocation480_spill] sm:$0xff] %v8913_v40  ;;  %v3604_v40 = vmul.f32 %v8591_v30, %v3601_v1  ;;  %v3625_v6 = vstv %s6320_s28  ;;  %s6332_s28 = sld [smem:[#allocation2 + $0x90]] }
 0x48c   : > { %3589 = vrot.lane.b32.xlu1 %v3572_v4, %s6607_s23  ;;  %3587 = vrot.lane.b32.xlu0 %v3571_v56, %s6607_s23  ;;  %v3629_v1 = vmul.f32 %v8588_v3, %v3625_v6 }
 0x48e   : > { %v8919_v10 = vpop.permute.xlu1 %3277  ;;  %v8921_v15 = vpop.permute.xlu0 %3275 }
 0x48f   : > { %13364 = vst [vmem:[#allocation481_spill] sm:$0xff] %v8919_v10  ;;  %13365 = vst [vmem:[#allocation482_spill] sm:$0xff] %v8921_v15  ;;  %v3627_v10 = vmul.f32 %v8574_v11, %v3625_v6  ;;  %v3626_v15 = vmul.f32 %v8577_v2, %v3625_v6 }
 0x490   : > { %3612 = vrot.lane.b32.xlu1 %v3603_v14, %s6608_s3  ;;  %3610 = vrot.lane.b32.xlu0 %v3602_v23, %s6608_s3 }
 0x492   : > { %v8927_v4 = vpop.permute.xlu1 %3281  ;;  %v8929_v56 = vpop.permute.xlu0 %3279 }
 0x493   : > { %13366 = vst [vmem:[#allocation483_spill] sm:$0xff] %v8927_v4  ;;  %13367 = vst [vmem:[#allocation484_spill] sm:$0xff] %v8929_v56  ;;  %v3628_v56 = vmul.f32 %v8591_v30, %v3625_v6  ;;  %v3660_v4 = vstv %s6321_s29  ;;  %s6333_s29 = sld [smem:[#allocation2 + $0x67]] }
 0x494   : > { %3616 = vrot.lane.b32.xlu1 %v3605_v22, %s6608_s3  ;;  %3614 = vrot.lane.b32.xlu0 %v3604_v40, %s6608_s3 }
 0x496   : > { %v8935_v14 = vpop.permute.xlu1 %3285  ;;  %v8937_v23 = vpop.permute.xlu0 %3283 }
 0x497   : > { %13368 = vst [vmem:[#allocation485_spill] sm:$0xff] %v8935_v14  ;;  %13369 = vst [vmem:[#allocation486_spill] sm:$0xff] %v8937_v23  ;;  %v3631_v14 = vmul.f32 %v8618_v53, %v3625_v6  ;;  %v3630_v23 = vmul.f32 %v8621_v39, %v3625_v6  ;;  %v3664_v6 = vmul.f32 %v8588_v3, %v3660_v4 }
 0x498   : > { %3640 = vrot.lane.b32.xlu1 %v3627_v10, %s6608_s3  ;;  %3638 = vrot.lane.b32.xlu0 %v3626_v15, %s6608_s3 }
 0x49a   : > { %v8943_v22 = vpop.permute.xlu1 %3312  ;;  %v8945_v40 = vpop.permute.xlu0 %3310 }
 0x49b   : > { %13370 = vst [vmem:[#allocation487_spill] sm:$0xff] %v8943_v22  ;;  %13371 = vst [vmem:[#allocation488_spill] sm:$0xff] %v8945_v40  ;;  %v3662_v22 = vmul.f32 %v8574_v11, %v3660_v4  ;;  %v3661_v40 = vmul.f32 %v8577_v2, %v3660_v4 }
 0x49c   : > { %3644 = vrot.lane.b32.xlu1 %v3629_v1, %s6608_s3  ;;  %3642 = vrot.lane.b32.xlu0 %v3628_v56, %s6608_s3 }
 0x49e   : > { %v8951_v10 = vpop.permute.xlu1 %3316  ;;  %v8953_v15 = vpop.permute.xlu0 %3314 }
 0x49f   : > { %13372 = vst [vmem:[#allocation489_spill] sm:$0xff] %v8951_v10  ;;  %13373 = vst [vmem:[#allocation490_spill] sm:$0xff] %v8953_v15  ;;  %v3663_v15 = vmul.f32 %v8591_v30, %v3660_v4  ;;  %v3695_v10 = vstv %s6322_s30  ;;  %s6334_s30 = sld [smem:[#allocation2 + $0x6e]] }
 0x4a0   : > { %3648 = vrot.lane.b32.xlu1 %v3631_v14, %s6608_s3  ;;  %3646 = vrot.lane.b32.xlu0 %v3630_v23, %s6608_s3 }
 0x4a2   : > { %v8959_v1 = vpop.permute.xlu1 %3320  ;;  %v8961_v56 = vpop.permute.xlu0 %3318 }
 0x4a3   : > { %13374 = vst [vmem:[#allocation491_spill] sm:$0xff] %v8959_v1  ;;  %13375 = vst [vmem:[#allocation492_spill] sm:$0xff] %v8961_v56  ;;  %v3666_v1 = vmul.f32 %v8618_v53, %v3660_v4  ;;  %v3665_v56 = vmul.f32 %v8621_v39, %v3660_v4  ;;  %v3699_v4 = vmul.f32 %v8588_v3, %v3695_v10 }
 0x4a4   : > { %3675 = vrot.lane.b32.xlu1 %v3662_v22, %s6608_s3  ;;  %3673 = vrot.lane.b32.xlu0 %v3661_v40, %s6608_s3 }
 0x4a6   : > { %v8967_v14 = vpop.permute.xlu1 %3347  ;;  %v8969_v23 = vpop.permute.xlu0 %3345 }
 0x4a7   : > { %13376 = vst [vmem:[#allocation493_spill] sm:$0xff] %v8967_v14  ;;  %13377 = vst [vmem:[#allocation494_spill] sm:$0xff] %v8969_v23  ;;  %v3697_v14 = vmul.f32 %v8574_v11, %v3695_v10  ;;  %v3696_v23 = vmul.f32 %v8577_v2, %v3695_v10 }
 0x4a8   : > { %3679 = vrot.lane.b32.xlu1 %v3664_v6, %s6608_s3  ;;  %3677 = vrot.lane.b32.xlu0 %v3663_v15, %s6608_s3 }
 0x4aa   : > { %v8975_v22 = vpop.permute.xlu1 %3351  ;;  %v8977_v40 = vpop.permute.xlu0 %3349 }
 0x4ab   : > { %13378 = vst [vmem:[#allocation495_spill] sm:$0xff] %v8975_v22  ;;  %13379 = vst [vmem:[#allocation496_spill] sm:$0xff] %v8977_v40  ;;  %v3698_v40 = vmul.f32 %v8591_v30, %v3695_v10  ;;  %v3730_v22 = vstv %s6323_s7  ;;  %s6335_s7 = sld [smem:[#allocation2 + $0x75]] }
 0x4ac   : > { %3683 = vrot.lane.b32.xlu1 %v3666_v1, %s6608_s3  ;;  %3681 = vrot.lane.b32.xlu0 %v3665_v56, %s6608_s3 }
 0x4ae   : > { %v8983_v6 = vpop.permute.xlu1 %3355  ;;  %v8985_v15 = vpop.permute.xlu0 %3353 }
 0x4af   : > { %13380 = vst [vmem:[#allocation497_spill] sm:$0xff] %v8983_v6  ;;  %13381 = vst [vmem:[#allocation498_spill] sm:$0xff] %v8985_v15  ;;  %v3701_v6 = vmul.f32 %v8618_v53, %v3695_v10  ;;  %v3700_v15 = vmul.f32 %v8621_v39, %v3695_v10  ;;  %v3734_v10 = vmul.f32 %v8588_v3, %v3730_v22 }
 0x4b0   : > { %3710 = vrot.lane.b32.xlu1 %v3697_v14, %s6608_s3  ;;  %3708 = vrot.lane.b32.xlu0 %v3696_v23, %s6608_s3 }
 0x4b2   : > { %v8991_v1 = vpop.permute.xlu1 %3378  ;;  %v8993_v56 = vpop.permute.xlu0 %3376 }
 0x4b3   : > { %13382 = vst [vmem:[#allocation499_spill] sm:$0xff] %v8991_v1  ;;  %13383 = vst [vmem:[#allocation500_spill] sm:$0xff] %v8993_v56  ;;  %v3732_v1 = vmul.f32 %v8574_v11, %v3730_v22  ;;  %v3731_v56 = vmul.f32 %v8577_v2, %v3730_v22 }
 0x4b4   : > { %3714 = vrot.lane.b32.xlu1 %v3699_v4, %s6608_s3  ;;  %3712 = vrot.lane.b32.xlu0 %v3698_v40, %s6608_s3 }
 0x4b6   : > { %v8999_v14 = vpop.permute.xlu1 %3382  ;;  %v9001_v23 = vpop.permute.xlu0 %3380 }
 0x4b7   : > { %13384 = vst [vmem:[#allocation501_spill] sm:$0xff] %v8999_v14  ;;  %13385 = vst [vmem:[#allocation502_spill] sm:$0xff] %v9001_v23  ;;  %v3733_v23 = vmul.f32 %v8591_v30, %v3730_v22  ;;  %v3765_v14 = vstv %s6324_s8  ;;  %s6336_s8 = sld [smem:[#allocation2 + $0x7c]] }
 0x4b8   : > { %3718 = vrot.lane.b32.xlu1 %v3701_v6, %s6608_s3  ;;  %3716 = vrot.lane.b32.xlu0 %v3700_v15, %s6608_s3 }
 0x4ba   : > { %v9007_v4 = vpop.permute.xlu1 %3406  ;;  %v9009_v40 = vpop.permute.xlu0 %3404 }
 0x4bb   : > { %13386 = vst [vmem:[#allocation503_spill] sm:$0xff] %v9007_v4  ;;  %13387 = vst [vmem:[#allocation504_spill] sm:$0xff] %v9009_v40  ;;  %v3736_v4 = vmul.f32 %v8618_v53, %v3730_v22  ;;  %v3735_v40 = vmul.f32 %v8621_v39, %v3730_v22  ;;  %v3769_v22 = vmul.f32 %v8588_v3, %v3765_v14 }
 0x4bc   : > { %3745 = vrot.lane.b32.xlu1 %v3732_v1, %s6608_s3  ;;  %3743 = vrot.lane.b32.xlu0 %v3731_v56, %s6608_s3 }
 0x4be   : > { %v9015_v6 = vpop.permute.xlu1 %3410  ;;  %v9017_v15 = vpop.permute.xlu0 %3408 }
 0x4bf   : > { %13388 = vst [vmem:[#allocation505_spill] sm:$0xff] %v9015_v6  ;;  %13389 = vst [vmem:[#allocation506_spill] sm:$0xff] %v9017_v15  ;;  %v3767_v6 = vmul.f32 %v8574_v11, %v3765_v14  ;;  %v3766_v15 = vmul.f32 %v8577_v2, %v3765_v14 }
 0x4c0   : > { %3749 = vrot.lane.b32.xlu1 %v3734_v10, %s6608_s3  ;;  %3747 = vrot.lane.b32.xlu0 %v3733_v23, %s6608_s3 }
 0x4c2   : > { %v9023_v1 = vpop.permute.xlu1 %3414  ;;  %v9025_v56 = vpop.permute.xlu0 %3412 }
 0x4c3   : > { %13390 = vst [vmem:[#allocation507_spill] sm:$0xff] %v9023_v1  ;;  %13391 = vst [vmem:[#allocation508_spill] sm:$0xff] %v9025_v56  ;;  %v3768_v56 = vmul.f32 %v8591_v30, %v3765_v14  ;;  %v3800_v1 = vstv %s6325_s14  ;;  %s6337_s14 = sld [smem:[#allocation2 + $0x83]] }
 0x4c4   : > { %3753 = vrot.lane.b32.xlu1 %v3736_v4, %s6608_s3  ;;  %3751 = vrot.lane.b32.xlu0 %v3735_v40, %s6608_s3 }
 0x4c6   : > { %v9031_v10 = vpop.permute.xlu1 %3441  ;;  %v9033_v23 = vpop.permute.xlu0 %3439 }
 0x4c7   : > { %13392 = vst [vmem:[#allocation509_spill] sm:$0xff] %v9031_v10  ;;  %13393 = vst [vmem:[#allocation510_spill] sm:$0xff] %v9033_v23  ;;  %v3771_v10 = vmul.f32 %v8618_v53, %v3765_v14  ;;  %v3770_v23 = vmul.f32 %v8621_v39, %v3765_v14  ;;  %v3804_v14 = vmul.f32 %v8588_v3, %v3800_v1 }
 0x4c8   : > { %3780 = vrot.lane.b32.xlu1 %v3767_v6, %s6608_s3  ;;  %3778 = vrot.lane.b32.xlu0 %v3766_v15, %s6608_s3 }
 0x4ca   : > { %v9039_v4 = vpop.permute.xlu1 %3445  ;;  %v9041_v40 = vpop.permute.xlu0 %3443 }
 0x4cb   : > { %13394 = vst [vmem:[#allocation511_spill] sm:$0xff] %v9039_v4  ;;  %13395 = vst [vmem:[#allocation512_spill] sm:$0xff] %v9041_v40  ;;  %v3802_v4 = vmul.f32 %v8574_v11, %v3800_v1  ;;  %v3801_v40 = vmul.f32 %v8577_v2, %v3800_v1 }
 0x4cc   : > { %3784 = vrot.lane.b32.xlu1 %v3769_v22, %s6608_s3  ;;  %3782 = vrot.lane.b32.xlu0 %v3768_v56, %s6608_s3 }
 0x4ce   : > { %v9047_v6 = vpop.permute.xlu1 %3449  ;;  %v9049_v15 = vpop.permute.xlu0 %3447 }
 0x4cf   : > { %13396 = vst [vmem:[#allocation513_spill] sm:$0xff] %v9047_v6  ;;  %13397 = vst [vmem:[#allocation514_spill] sm:$0xff] %v9049_v15  ;;  %v3803_v15 = vmul.f32 %v8591_v30, %v3800_v1  ;;  %v3835_v6 = vstv %s6326_s16  ;;  %s6338_s16 = sld [smem:[#allocation2 + $0x8a]] }
 0x4d0   : > { %3788 = vrot.lane.b32.xlu1 %v3771_v10, %s6608_s3  ;;  %3786 = vrot.lane.b32.xlu0 %v3770_v23, %s6608_s3 }
 0x4d2   : > { %v9055_v22 = vpop.permute.xlu1 %3476  ;;  %v9057_v56 = vpop.permute.xlu0 %3474 }
 0x4d3   : > { %13398 = vst [vmem:[#allocation515_spill] sm:$0xff] %v9055_v22  ;;  %13399 = vst [vmem:[#allocation516_spill] sm:$0xff] %v9057_v56  ;;  %v3806_v22 = vmul.f32 %v8618_v53, %v3800_v1  ;;  %v3805_v56 = vmul.f32 %v8621_v39, %v3800_v1  ;;  %v3839_v1 = vmul.f32 %v8588_v3, %v3835_v6 }
 0x4d4   : > { %3815 = vrot.lane.b32.xlu1 %v3802_v4, %s6608_s3  ;;  %3813 = vrot.lane.b32.xlu0 %v3801_v40, %s6608_s3 }
 0x4d6   : > { %v9063_v10 = vpop.permute.xlu1 %3480  ;;  %v9065_v23 = vpop.permute.xlu0 %3478 }
 0x4d7   : > { %13400 = vst [vmem:[#allocation517_spill] sm:$0xff] %v9063_v10  ;;  %13401 = vst [vmem:[#allocation518_spill] sm:$0xff] %v9065_v23  ;;  %v3837_v23 = vmul.f32 %v8574_v11, %v3835_v6 }
 0x4d8   : > { %3819 = vrot.lane.b32.xlu1 %v3804_v14, %s6608_s3  ;;  %3817 = vrot.lane.b32.xlu0 %v3803_v15, %s6608_s3  ;;  %v3836_v14 = vmul.f32 %v8577_v2, %v3835_v6 }
 0x4da   : > { %v9071_v4 = vpop.permute.xlu1 %3484  ;;  %v9073_v40 = vpop.permute.xlu0 %3482 }
 0x4db   : > { %13402 = vst [vmem:[#allocation519_spill] sm:$0xff] %v9071_v4  ;;  %13403 = vst [vmem:[#allocation520_spill] sm:$0xff] %v9073_v40  ;;  %v3838_v40 = vmul.f32 %v8591_v30, %v3835_v6  ;;  %v3859_v4 = vstv %s6327_s17  ;;  %s6339_s17 = sld [smem:[#allocation2 + $0x91]] }
 0x4dc   : > { %3823 = vrot.lane.b32.xlu1 %v3806_v22, %s6608_s3  ;;  %3821 = vrot.lane.b32.xlu0 %v3805_v56, %s6608_s3  ;;  %v3863_v6 = vmul.f32 %v8588_v3, %v3859_v4 }
 0x4de   : > { %v9079_v10 = vpop.permute.xlu1 %3511  ;;  %v9081_v15 = vpop.permute.xlu0 %3509 }
 0x4df   : > { %13404 = vst [vmem:[#allocation521_spill] sm:$0xff] %v9079_v10  ;;  %13405 = vst [vmem:[#allocation522_spill] sm:$0xff] %v9081_v15  ;;  %v3861_v10 = vmul.f32 %v8574_v11, %v3859_v4  ;;  %v3860_v15 = vmul.f32 %v8577_v2, %v3859_v4 }
 0x4e0   : > { %3846 = vrot.lane.b32.xlu1 %v3837_v23, %s6609_s22  ;;  %3844 = vrot.lane.b32.xlu0 %v3836_v14, %s6609_s22 }
 0x4e2   : > { %v9087_v22 = vpop.permute.xlu1 %3515  ;;  %v9089_v56 = vpop.permute.xlu0 %3513 }
 0x4e3   : > { %13406 = vst [vmem:[#allocation523_spill] sm:$0xff] %v9087_v22  ;;  %13407 = vst [vmem:[#allocation524_spill] sm:$0xff] %v9089_v56  ;;  %v3862_v56 = vmul.f32 %v8591_v30, %v3859_v4  ;;  %v3894_v22 = vstv %s6328_s21  ;;  %s6340_s21 = sld [smem:[#allocation2 + $0x68]] }
 0x4e4   : > { %3850 = vrot.lane.b32.xlu1 %v3839_v1, %s6609_s22  ;;  %3848 = vrot.lane.b32.xlu0 %v3838_v40, %s6609_s22 }
 0x4e6   : > { %v9095_v23 = vpop.permute.xlu1 %3519  ;;  %v9097_v14 = vpop.permute.xlu0 %3517 }
 0x4e7   : > { %13408 = vst [vmem:[#allocation525_spill] sm:$0xff] %v9095_v23  ;;  %13409 = vst [vmem:[#allocation526_spill] sm:$0xff] %v9097_v14  ;;  %v3865_v23 = vmul.f32 %v8618_v53, %v3859_v4  ;;  %v3864_v14 = vmul.f32 %v8621_v39, %v3859_v4  ;;  %v3898_v4 = vmul.f32 %v8588_v3, %v3894_v22 }
 0x4e8   : > { %3874 = vrot.lane.b32.xlu1 %v3861_v10, %s6609_s22  ;;  %3872 = vrot.lane.b32.xlu0 %v3860_v15, %s6609_s22 }
 0x4ea   : > { %v9103_v1 = vpop.permute.xlu1 %3546  ;;  %v9105_v40 = vpop.permute.xlu0 %3544 }
 0x4eb   : > { %13410 = vst [vmem:[#allocation527_spill] sm:$0xff] %v9103_v1  ;;  %13411 = vst [vmem:[#allocation528_spill] sm:$0xff] %v9105_v40  ;;  %v3896_v1 = vmul.f32 %v8574_v11, %v3894_v22  ;;  %v3895_v40 = vmul.f32 %v8577_v2, %v3894_v22 }
 0x4ec   : > { %3878 = vrot.lane.b32.xlu1 %v3863_v6, %s6609_s22  ;;  %3876 = vrot.lane.b32.xlu0 %v3862_v56, %s6609_s22 }
 0x4ee   : > { %v9111_v10 = vpop.permute.xlu1 %3550  ;;  %v9113_v15 = vpop.permute.xlu0 %3548 }
 0x4ef   : > { %13412 = vst [vmem:[#allocation529_spill] sm:$0xff] %v9111_v10  ;;  %13413 = vst [vmem:[#allocation530_spill] sm:$0xff] %v9113_v15  ;;  %v3897_v15 = vmul.f32 %v8591_v30, %v3894_v22  ;;  %v3929_v10 = vstv %s6329_s24  ;;  %s6341_s24 = sld [smem:[#allocation2 + $0x6f]] }
 0x4f0   : > { %3882 = vrot.lane.b32.xlu1 %v3865_v23, %s6609_s22  ;;  %3880 = vrot.lane.b32.xlu0 %v3864_v14, %s6609_s22 }
 0x4f2   : > { %v9119_v6 = vpop.permute.xlu1 %3554  ;;  %v9121_v56 = vpop.permute.xlu0 %3552 }
 0x4f3   : > { %13414 = vst [vmem:[#allocation531_spill] sm:$0xff] %v9119_v6  ;;  %13415 = vst [vmem:[#allocation532_spill] sm:$0xff] %v9121_v56  ;;  %v3900_v6 = vmul.f32 %v8618_v53, %v3894_v22  ;;  %v3899_v56 = vmul.f32 %v8621_v39, %v3894_v22  ;;  %v3933_v22 = vmul.f32 %v8588_v3, %v3929_v10 }
 0x4f4   : > { %3909 = vrot.lane.b32.xlu1 %v3896_v1, %s6609_s22  ;;  %3907 = vrot.lane.b32.xlu0 %v3895_v40, %s6609_s22 }
 0x4f6   : > { %v9127_v23 = vpop.permute.xlu1 %3581  ;;  %v9129_v14 = vpop.permute.xlu0 %3579 }
 0x4f7   : > { %13416 = vst [vmem:[#allocation533_spill] sm:$0xff] %v9127_v23  ;;  %13417 = vst [vmem:[#allocation534_spill] sm:$0xff] %v9129_v14  ;;  %v3931_v23 = vmul.f32 %v8574_v11, %v3929_v10  ;;  %v3930_v14 = vmul.f32 %v8577_v2, %v3929_v10 }
 0x4f8   : > { %3913 = vrot.lane.b32.xlu1 %v3898_v4, %s6609_s22  ;;  %3911 = vrot.lane.b32.xlu0 %v3897_v15, %s6609_s22 }
 0x4fa   : > { %v9135_v1 = vpop.permute.xlu1 %3585  ;;  %v9137_v40 = vpop.permute.xlu0 %3583 }
 0x4fb   : > { %13418 = vst [vmem:[#allocation535_spill] sm:$0xff] %v9135_v1  ;;  %13419 = vst [vmem:[#allocation536_spill] sm:$0xff] %v9137_v40  ;;  %v3932_v40 = vmul.f32 %v8591_v30, %v3929_v10  ;;  %v3964_v1 = vstv %s6330_s26  ;;  %s6342_s26 = sld [smem:[#allocation2 + $0x76]] }
 0x4fc   : > { %3917 = vrot.lane.b32.xlu1 %v3900_v6, %s6609_s22  ;;  %3915 = vrot.lane.b32.xlu0 %v3899_v56, %s6609_s22 }
 0x4fe   : > { %v9143_v4 = vpop.permute.xlu1 %3589  ;;  %v9145_v15 = vpop.permute.xlu0 %3587 }
 0x4ff   : > { %13420 = vst [vmem:[#allocation537_spill] sm:$0xff] %v9143_v4  ;;  %13421 = vst [vmem:[#allocation538_spill] sm:$0xff] %v9145_v15  ;;  %v3935_v4 = vmul.f32 %v8618_v53, %v3929_v10  ;;  %v3934_v15 = vmul.f32 %v8621_v39, %v3929_v10  ;;  %v3968_v10 = vmul.f32 %v8588_v3, %v3964_v1 }
 0x500   : > { %3944 = vrot.lane.b32.xlu1 %v3931_v23, %s6609_s22  ;;  %3942 = vrot.lane.b32.xlu0 %v3930_v14, %s6609_s22 }
 0x502   : > { %v9151_v6 = vpop.permute.xlu1 %3612  ;;  %v9153_v56 = vpop.permute.xlu0 %3610 }
 0x503   : > { %13422 = vst [vmem:[#allocation539_spill] sm:$0xff] %v9151_v6  ;;  %13423 = vst [vmem:[#allocation540_spill] sm:$0xff] %v9153_v56  ;;  %v3966_v6 = vmul.f32 %v8574_v11, %v3964_v1  ;;  %v3965_v56 = vmul.f32 %v8577_v2, %v3964_v1 }
 0x504   : > { %3948 = vrot.lane.b32.xlu1 %v3933_v22, %s6609_s22  ;;  %3946 = vrot.lane.b32.xlu0 %v3932_v40, %s6609_s22 }
 0x506   : > { %v9159_v23 = vpop.permute.xlu1 %3616  ;;  %v9161_v14 = vpop.permute.xlu0 %3614 }
 0x507   : > { %13424 = vst [vmem:[#allocation541_spill] sm:$0xff] %v9159_v23  ;;  %13425 = vst [vmem:[#allocation542_spill] sm:$0xff] %v9161_v14  ;;  %v3967_v14 = vmul.f32 %v8591_v30, %v3964_v1  ;;  %v3999_v23 = vstv %s6331_s27  ;;  %s6343_s27 = sld [smem:[#allocation2 + $0x7d]] }
 0x508   : > { %3952 = vrot.lane.b32.xlu1 %v3935_v4, %s6609_s22  ;;  %3950 = vrot.lane.b32.xlu0 %v3934_v15, %s6609_s22 }
 0x50a   : > { %v9167_v22 = vpop.permute.xlu1 %3640  ;;  %v9169_v40 = vpop.permute.xlu0 %3638 }
 0x50b   : > { %13426 = vst [vmem:[#allocation543_spill] sm:$0xff] %v9167_v22  ;;  %13427 = vst [vmem:[#allocation544_spill] sm:$0xff] %v9169_v40  ;;  %v3970_v22 = vmul.f32 %v8618_v53, %v3964_v1  ;;  %v3969_v40 = vmul.f32 %v8621_v39, %v3964_v1  ;;  %v4003_v1 = vmul.f32 %v8588_v3, %v3999_v23 }
 0x50c   : > { %3979 = vrot.lane.b32.xlu1 %v3966_v6, %s6609_s22  ;;  %3977 = vrot.lane.b32.xlu0 %v3965_v56, %s6609_s22 }
 0x50e   : > { %v9175_v4 = vpop.permute.xlu1 %3644  ;;  %v9177_v15 = vpop.permute.xlu0 %3642 }
 0x50f   : > { %13428 = vst [vmem:[#allocation545_spill] sm:$0xff] %v9175_v4  ;;  %13429 = vst [vmem:[#allocation546_spill] sm:$0xff] %v9177_v15  ;;  %v4001_v4 = vmul.f32 %v8574_v11, %v3999_v23  ;;  %v4000_v15 = vmul.f32 %v8577_v2, %v3999_v23  ;;  %v4005_v2 = vmul.f32 %v8618_v53, %v3999_v23 }
 0x510   : > { %3983 = vrot.lane.b32.xlu1 %v3968_v10, %s6609_s22  ;;  %3981 = vrot.lane.b32.xlu0 %v3967_v14, %s6609_s22 }
 0x512   : > { %v9183_v6 = vpop.permute.xlu1 %3648  ;;  %v9185_v56 = vpop.permute.xlu0 %3646 }
 0x513   : > { %13430 = vst [vmem:[#allocation547_spill] sm:$0xff] %v9183_v6  ;;  %13431 = vst [vmem:[#allocation548_spill] sm:$0xff] %v9185_v56 }
 0x514   : > { %3987 = vrot.lane.b32.xlu1 %v3970_v22, %s6609_s22  ;;  %3985 = vrot.lane.b32.xlu0 %v3969_v40, %s6609_s22  ;;  %v4002_v22 = vmul.f32 %v8591_v30, %v3999_v23  ;;  %v9214_v30 = vld [vmem:[%s6701_s5 + $0x68] sm:$0xff] }
 0x516   : > { %v9191_v10 = vpop.permute.xlu1 %3675  ;;  %v9193_v14 = vpop.permute.xlu0 %3673 }
 0x517   : > { %13432 = vst [vmem:[#allocation549_spill] sm:$0xff] %v9191_v10  ;;  %13433 = vst [vmem:[#allocation550_spill] sm:$0xff] %v9193_v14  ;;  %v4034_v14 = vstv %s6332_s28  ;;  %s6344_s28 = sld [smem:[#allocation2 + $0x84]] }
 0x518   : > { %4014 = vrot.lane.b32.xlu1 %v4001_v4, %s6609_s22  ;;  %4012 = vrot.lane.b32.xlu0 %v4000_v15, %s6609_s22  ;;  %v4004_v4 = vmul.f32 %v8621_v39, %v3999_v23 }
 0x51a   : > { %v9199_v40 = vpop.permute.xlu1 %3679  ;;  %v9201_v11 = vpop.permute.xlu0 %3677 }
 0x51b   : > { %13434 = vst [vmem:[#allocation551_spill] sm:$0xff] %v9199_v40  ;;  %13435 = vst [vmem:[#allocation552_spill] sm:$0xff] %v9201_v11 }
 0x51c   : > { %4018 = vrot.lane.b32.xlu1 %v4003_v1, %s6609_s22  ;;  %4016 = vrot.lane.b32.xlu0 %v4002_v22, %s6609_s22  ;;  %v4036_v1 = vmul.f32 %v9214_v30, %v4034_v14  ;;  %v9218_v22 = vld [vmem:[%s6701_s5 + $0x60] sm:$0xff] }
 0x51d   : > { %v4035_v11 = vmul.f32 %v9218_v22, %v4034_v14 }
 0x51e   : > { %v9207_v15 = vpop.permute.xlu1 %3683  ;;  %v9209_v3 = vpop.permute.xlu0 %3681 }
 0x51f   : > { %13436 = vst [vmem:[#allocation553_spill] sm:$0xff] %v9207_v15  ;;  %13437 = vst [vmem:[#allocation554_spill] sm:$0xff] %v9209_v3  ;;  %v9232_v3 = vld [vmem:[%s6701_s5 + $0x70] sm:$0xff] }
 0x520   : > { %4022 = vrot.lane.b32.xlu1 %v4005_v2, %s6609_s22  ;;  %4020 = vrot.lane.b32.xlu0 %v4004_v4, %s6609_s22  ;;  %v9228_v2 = vld [vmem:[%s6701_s5 + $0x78] sm:$0xff]  ;;  %v4037_v15 = vmul.f32 %v9232_v3, %v4034_v14 }
 0x521   : > { %v4038_v4 = vmul.f32 %v9228_v2, %v4034_v14 }
 0x522   : > { %v9221_v23 = vpop.permute.xlu1 %3710  ;;  %v9223_v40 = vpop.permute.xlu0 %3708 }
 0x523   : > { %13438 = vst [vmem:[#allocation555_spill] sm:$0xff] %v9221_v23  ;;  %13439 = vst [vmem:[#allocation556_spill] sm:$0xff] %v9223_v40  ;;  %v4069_v40 = vstv %s6333_s29  ;;  %s6345_s29 = sld [smem:[#allocation2 + $0x8b]] }
 0x524   : > { %4049 = vrot.lane.b32.xlu1 %v4036_v1, %s6609_s22  ;;  %4047 = vrot.lane.b32.xlu0 %v4035_v11, %s6609_s22  ;;  %v4040_v1 = vmul.f32 %v8618_v53, %v4034_v14  ;;  %v4039_v11 = vmul.f32 %v8621_v39, %v4034_v14  ;;  %v4073_v53 = vmul.f32 %v9228_v2, %v4069_v40  ;;  %v4093_v14 = vstv %s6334_s30  ;;  %s6346_s30 = sld [smem:[#allocation2 + $0x92]] }
 0x525   : > { %v4072_v39 = vmul.f32 %v9232_v3, %v4069_v40 }
 0x526   : > { %v9235_v10 = vpop.permute.xlu1 %3714  ;;  %v9237_v56 = vpop.permute.xlu0 %3712 }
 0x527   : > { %13440 = vst [vmem:[#allocation557_spill] sm:$0xff] %v9235_v10  ;;  %13441 = vst [vmem:[#allocation558_spill] sm:$0xff] %v9237_v56  ;;  %v4071_v56 = vmul.f32 %v9214_v30, %v4069_v40 }
 0x528   : > { %4053 = vrot.lane.b32.xlu1 %v4038_v4, %s6609_s22  ;;  %4051 = vrot.lane.b32.xlu0 %v4037_v15, %s6609_s22  ;;  %v4070_v4 = vmul.f32 %v9218_v22, %v4069_v40  ;;  %v4097_v40 = vmul.f32 %v9228_v2, %v4093_v14 }
 0x52a   : > { %v9243_v23 = vpop.permute.xlu1 %3718  ;;  %v9245_v6 = vpop.permute.xlu0 %3716 }
 0x52b   : > { %13442 = vst [vmem:[#allocation559_spill] sm:$0xff] %v9243_v23  ;;  %13443 = vst [vmem:[#allocation560_spill] sm:$0xff] %v9245_v6 }
 0x52c   : > { %4057 = vrot.lane.b32.xlu1 %v4040_v1, %s6609_s22  ;;  %4055 = vrot.lane.b32.xlu0 %v4039_v11, %s6609_s22 }
 0x52e   : > { %v9251_v10 = vpop.permute.xlu1 %3745  ;;  %v9253_v15 = vpop.permute.xlu0 %3743 }
 0x52f   : > { %13444 = vst [vmem:[#allocation561_spill] sm:$0xff] %v9251_v10  ;;  %13445 = vst [vmem:[#allocation562_spill] sm:$0xff] %v9253_v15  ;;  %v4095_v15 = vmul.f32 %v9214_v30, %v4093_v14 }
 0x530   : > { %4080 = vrot.lane.b32.xlu1 %v4071_v56, %s6610_s4  ;;  %4078 = vrot.lane.b32.xlu0 %v4070_v4, %s6610_s4  ;;  %v4094_v56 = vmul.f32 %v9218_v22, %v4093_v14 }
 0x532   : > { %v9259_v1 = vpop.permute.xlu1 %3749  ;;  %v9261_v11 = vpop.permute.xlu0 %3747 }
 0x533   : > { %13446 = vst [vmem:[#allocation563_spill] sm:$0xff] %v9259_v1  ;;  %13447 = vst [vmem:[#allocation564_spill] sm:$0xff] %v9261_v11  ;;  %v9282_v1 = vld [vmem:[%s6701_s5 + $0x88] sm:$0x3f] }
 0x534   : > { %4084 = vrot.lane.b32.xlu1 %v4073_v53, %s6610_s4  ;;  %4082 = vrot.lane.b32.xlu0 %v4072_v39, %s6610_s4  ;;  %v4096_v53 = vmul.f32 %v9232_v3, %v4093_v14 }
 0x536   : > { %v9267_v4 = vpop.permute.xlu1 %3753  ;;  %v9269_v10 = vpop.permute.xlu0 %3751 }
 0x537   : > { %13448 = vst [vmem:[#allocation565_spill] sm:$0xff] %v9267_v4  ;;  %13449 = vst [vmem:[#allocation566_spill] sm:$0xff] %v9269_v10  ;;  %v4099_v10 = vmul.f32 %v9282_v1, %v4093_v14  ;;  %v9286_v4 = vld [vmem:[%s6701_s5 + $0x80] sm:$0x3f] }
 0x538   : > { %4108 = vrot.lane.b32.xlu1 %v4095_v15, %s6610_s4  ;;  %4106 = vrot.lane.b32.xlu0 %v4094_v56, %s6610_s4  ;;  %v4098_v15 = vmul.f32 %v9286_v4, %v4093_v14  ;;  %v4128_v56 = vstv %s6335_s7  ;;  %s6360_s7 = sld [smem:[#allocation2 + $0x94]] }
 0x539   : > { %v4132_v14 = vmul.f32 %v9228_v2, %v4128_v56 }
 0x53a   : > { %v9275_v11 = vpop.permute.xlu1 %3780  ;;  %v9277_v39 = vpop.permute.xlu0 %3778 }
 0x53b   : > { %13450 = vst [vmem:[#allocation567_spill] sm:$0xff] %v9275_v11  ;;  %13451 = vst [vmem:[#allocation568_spill] sm:$0xff] %v9277_v39 }
 0x53c   : > { %4112 = vrot.lane.b32.xlu1 %v4097_v40, %s6610_s4  ;;  %4110 = vrot.lane.b32.xlu0 %v4096_v53, %s6610_s4  ;;  %v4130_v40 = vmul.f32 %v9214_v30, %v4128_v56  ;;  %v4129_v53 = vmul.f32 %v9218_v22, %v4128_v56 }
 0x53e   : > { %v9289_v6 = vpop.permute.xlu1 %3784  ;;  %v9291_v23 = vpop.permute.xlu0 %3782 }
 0x53f   : > { %13452 = vst [vmem:[#allocation569_spill] sm:$0xff] %v9289_v6  ;;  %13453 = vst [vmem:[#allocation570_spill] sm:$0xff] %v9291_v23  ;;  %v4131_v23 = vmul.f32 %v9232_v3, %v4128_v56  ;;  %v4163_v6 = vstv %s6336_s8  ;;  %s6361_s8 = sld [smem:[#allocation2 + $0x9b]] }
 0x540   : > { %4116 = vrot.lane.b32.xlu1 %v4099_v10, %s6610_s4  ;;  %4114 = vrot.lane.b32.xlu0 %v4098_v15, %s6610_s4 }
 0x542   : > { %v9297_v39 = vpop.permute.xlu1 %3788  ;;  %v9299_v11 = vpop.permute.xlu0 %3786 }
 0x543   : > { %13454 = vst [vmem:[#allocation571_spill] sm:$0xff] %v9297_v39  ;;  %13455 = vst [vmem:[#allocation572_spill] sm:$0xff] %v9299_v11  ;;  %v4134_v39 = vmul.f32 %v9282_v1, %v4128_v56  ;;  %v4133_v11 = vmul.f32 %v9286_v4, %v4128_v56  ;;  %v4167_v56 = vmul.f32 %v9228_v2, %v4163_v6 }
 0x544   : > { %4143 = vrot.lane.b32.xlu1 %v4130_v40, %s6610_s4  ;;  %4141 = vrot.lane.b32.xlu0 %v4129_v53, %s6610_s4 }
 0x546   : > { %v9305_v10 = vpop.permute.xlu1 %3815  ;;  %v9307_v15 = vpop.permute.xlu0 %3813 }
 0x547   : > { %13456 = vst [vmem:[#allocation573_spill] sm:$0xff] %v9305_v10  ;;  %13457 = vst [vmem:[#allocation574_spill] sm:$0xff] %v9307_v15  ;;  %v4165_v10 = vmul.f32 %v9214_v30, %v4163_v6  ;;  %v4164_v15 = vmul.f32 %v9218_v22, %v4163_v6 }
 0x548   : > { %4147 = vrot.lane.b32.xlu1 %v4132_v14, %s6610_s4  ;;  %4145 = vrot.lane.b32.xlu0 %v4131_v23, %s6610_s4 }
 0x54a   : > { %v9313_v40 = vpop.permute.xlu1 %3819  ;;  %v9315_v53 = vpop.permute.xlu0 %3817 }
 0x54b   : > { %13458 = vst [vmem:[#allocation575_spill] sm:$0xff] %v9313_v40  ;;  %13459 = vst [vmem:[#allocation576_spill] sm:$0xff] %v9315_v53  ;;  %v4166_v53 = vmul.f32 %v9232_v3, %v4163_v6  ;;  %v4198_v40 = vstv %s6337_s14  ;;  %s6362_s14 = sld [smem:[#allocation2 + $0xa2]] }
 0x54c   : > { %4151 = vrot.lane.b32.xlu1 %v4134_v39, %s6610_s4  ;;  %4149 = vrot.lane.b32.xlu0 %v4133_v11, %s6610_s4 }
 0x54e   : > { %v9321_v14 = vpop.permute.xlu1 %3823  ;;  %v9323_v23 = vpop.permute.xlu0 %3821 }
 0x54f   : > { %13460 = vst [vmem:[#allocation577_spill] sm:$0xff] %v9321_v14  ;;  %13461 = vst [vmem:[#allocation578_spill] sm:$0xff] %v9323_v23  ;;  %v4169_v14 = vmul.f32 %v9282_v1, %v4163_v6  ;;  %v4168_v23 = vmul.f32 %v9286_v4, %v4163_v6  ;;  %v4202_v6 = vmul.f32 %v9228_v2, %v4198_v40 }
 0x550   : > { %4178 = vrot.lane.b32.xlu1 %v4165_v10, %s6610_s4  ;;  %4176 = vrot.lane.b32.xlu0 %v4164_v15, %s6610_s4 }
 0x552   : > { %v9329_v39 = vpop.permute.xlu1 %3846  ;;  %v9331_v11 = vpop.permute.xlu0 %3844 }
 0x553   : > { %13462 = vst [vmem:[#allocation579_spill] sm:$0xff] %v9329_v39  ;;  %13463 = vst [vmem:[#allocation580_spill] sm:$0xff] %v9331_v11  ;;  %v4200_v39 = vmul.f32 %v9214_v30, %v4198_v40  ;;  %v4199_v11 = vmul.f32 %v9218_v22, %v4198_v40 }
 0x554   : > { %4182 = vrot.lane.b32.xlu1 %v4167_v56, %s6610_s4  ;;  %4180 = vrot.lane.b32.xlu0 %v4166_v53, %s6610_s4 }
 0x556   : > { %v9337_v10 = vpop.permute.xlu1 %3850  ;;  %v9339_v15 = vpop.permute.xlu0 %3848 }
 0x557   : > { %13464 = vst [vmem:[#allocation581_spill] sm:$0xff] %v9337_v10  ;;  %13465 = vst [vmem:[#allocation582_spill] sm:$0xff] %v9339_v15  ;;  %v4201_v15 = vmul.f32 %v9232_v3, %v4198_v40  ;;  %v4233_v10 = vstv %s6338_s16  ;;  %s6363_s16 = sld [smem:[#allocation2 + $0xa9]] }
 0x558   : > { %4186 = vrot.lane.b32.xlu1 %v4169_v14, %s6610_s4  ;;  %4184 = vrot.lane.b32.xlu0 %v4168_v23, %s6610_s4 }
 0x55a   : > { %v9345_v56 = vpop.permute.xlu1 %3874  ;;  %v9347_v53 = vpop.permute.xlu0 %3872 }
 0x55b   : > { %13466 = vst [vmem:[#allocation583_spill] sm:$0xff] %v9345_v56  ;;  %13467 = vst [vmem:[#allocation584_spill] sm:$0xff] %v9347_v53  ;;  %v4204_v56 = vmul.f32 %v9282_v1, %v4198_v40  ;;  %v4203_v53 = vmul.f32 %v9286_v4, %v4198_v40  ;;  %v4237_v40 = vmul.f32 %v9228_v2, %v4233_v10 }
 0x55c   : > { %4213 = vrot.lane.b32.xlu1 %v4200_v39, %s6610_s4  ;;  %4211 = vrot.lane.b32.xlu0 %v4199_v11, %s6610_s4 }
 0x55e   : > { %v9353_v14 = vpop.permute.xlu1 %3878  ;;  %v9355_v23 = vpop.permute.xlu0 %3876 }
 0x55f   : > { %13468 = vst [vmem:[#allocation585_spill] sm:$0xff] %v9353_v14  ;;  %13469 = vst [vmem:[#allocation586_spill] sm:$0xff] %v9355_v23  ;;  %v4235_v14 = vmul.f32 %v9214_v30, %v4233_v10  ;;  %v4234_v23 = vmul.f32 %v9218_v22, %v4233_v10 }
 0x560   : > { %4217 = vrot.lane.b32.xlu1 %v4202_v6, %s6610_s4  ;;  %4215 = vrot.lane.b32.xlu0 %v4201_v15, %s6610_s4 }
 0x562   : > { %v9361_v39 = vpop.permute.xlu1 %3882  ;;  %v9363_v11 = vpop.permute.xlu0 %3880 }
 0x563   : > { %13470 = vst [vmem:[#allocation587_spill] sm:$0xff] %v9361_v39  ;;  %13471 = vst [vmem:[#allocation588_spill] sm:$0xff] %v9363_v11  ;;  %v4236_v11 = vmul.f32 %v9232_v3, %v4233_v10  ;;  %v4268_v39 = vstv %s6339_s17  ;;  %s6364_s17 = sld [smem:[#allocation2 + $0xb0]] }
 0x564   : > { %4221 = vrot.lane.b32.xlu1 %v4204_v56, %s6610_s4  ;;  %4219 = vrot.lane.b32.xlu0 %v4203_v53, %s6610_s4 }
 0x566   : > { %v9369_v6 = vpop.permute.xlu1 %3909  ;;  %v9371_v15 = vpop.permute.xlu0 %3907 }
 0x567   : > { %13472 = vst [vmem:[#allocation589_spill] sm:$0xff] %v9369_v6  ;;  %13473 = vst [vmem:[#allocation590_spill] sm:$0xff] %v9371_v15  ;;  %v4239_v6 = vmul.f32 %v9282_v1, %v4233_v10  ;;  %v4238_v15 = vmul.f32 %v9286_v4, %v4233_v10  ;;  %v4272_v10 = vmul.f32 %v9228_v2, %v4268_v39 }
 0x568   : > { %4248 = vrot.lane.b32.xlu1 %v4235_v14, %s6610_s4  ;;  %4246 = vrot.lane.b32.xlu0 %v4234_v23, %s6610_s4 }
 0x56a   : > { %v9377_v56 = vpop.permute.xlu1 %3913  ;;  %v9379_v53 = vpop.permute.xlu0 %3911 }
 0x56b   : > { %13474 = vst [vmem:[#allocation591_spill] sm:$0xff] %v9377_v56  ;;  %13475 = vst [vmem:[#allocation592_spill] sm:$0xff] %v9379_v53  ;;  %v4270_v56 = vmul.f32 %v9214_v30, %v4268_v39  ;;  %v4269_v53 = vmul.f32 %v9218_v22, %v4268_v39 }
 0x56c   : > { %4252 = vrot.lane.b32.xlu1 %v4237_v40, %s6610_s4  ;;  %4250 = vrot.lane.b32.xlu0 %v4236_v11, %s6610_s4 }
 0x56e   : > { %v9385_v14 = vpop.permute.xlu1 %3917  ;;  %v9387_v23 = vpop.permute.xlu0 %3915 }
 0x56f   : > { %13476 = vst [vmem:[#allocation593_spill] sm:$0xff] %v9385_v14  ;;  %13477 = vst [vmem:[#allocation594_spill] sm:$0xff] %v9387_v23  ;;  %v4271_v23 = vmul.f32 %v9232_v3, %v4268_v39  ;;  %v4303_v14 = vstv %s6340_s21  ;;  %s6365_s21 = sld [smem:[#allocation2 + $0xb7]] }
 0x570   : > { %4256 = vrot.lane.b32.xlu1 %v4239_v6, %s6610_s4  ;;  %4254 = vrot.lane.b32.xlu0 %v4238_v15, %s6610_s4 }
 0x572   : > { %v9393_v40 = vpop.permute.xlu1 %3944  ;;  %v9395_v11 = vpop.permute.xlu0 %3942 }
 0x573   : > { %13478 = vst [vmem:[#allocation595_spill] sm:$0xff] %v9393_v40  ;;  %13479 = vst [vmem:[#allocation596_spill] sm:$0xff] %v9395_v11  ;;  %v4274_v40 = vmul.f32 %v9282_v1, %v4268_v39  ;;  %v4273_v11 = vmul.f32 %v9286_v4, %v4268_v39  ;;  %v4307_v39 = vmul.f32 %v9228_v2, %v4303_v14 }
 0x574   : > { %4283 = vrot.lane.b32.xlu1 %v4270_v56, %s6610_s4  ;;  %4281 = vrot.lane.b32.xlu0 %v4269_v53, %s6610_s4 }
 0x576   : > { %v9401_v6 = vpop.permute.xlu1 %3948  ;;  %v9403_v15 = vpop.permute.xlu0 %3946 }
 0x577   : > { %13480 = vst [vmem:[#allocation597_spill] sm:$0xff] %v9401_v6  ;;  %13481 = vst [vmem:[#allocation598_spill] sm:$0xff] %v9403_v15  ;;  %v4305_v15 = vmul.f32 %v9214_v30, %v4303_v14 }
 0x578   : > { %4287 = vrot.lane.b32.xlu1 %v4272_v10, %s6610_s4  ;;  %4285 = vrot.lane.b32.xlu0 %v4271_v23, %s6610_s4  ;;  %v4304_v10 = vmul.f32 %v9218_v22, %v4303_v14 }
 0x57a   : > { %v9409_v56 = vpop.permute.xlu1 %3952  ;;  %v9411_v53 = vpop.permute.xlu0 %3950 }
 0x57b   : > { %13482 = vst [vmem:[#allocation599_spill] sm:$0xff] %v9409_v56  ;;  %13483 = vst [vmem:[#allocation600_spill] sm:$0xff] %v9411_v53  ;;  %v4306_v53 = vmul.f32 %v9232_v3, %v4303_v14  ;;  %v4327_v56 = vstv %s6341_s24  ;;  %s6366_s24 = sld [smem:[#allocation2 + $0xbe]] }
 0x57c   : > { %4291 = vrot.lane.b32.xlu1 %v4274_v40, %s6610_s4  ;;  %4289 = vrot.lane.b32.xlu0 %v4273_v11, %s6610_s4  ;;  %v4331_v14 = vmul.f32 %v9228_v2, %v4327_v56 }
 0x57e   : > { %v9417_v6 = vpop.permute.xlu1 %3979  ;;  %v9419_v23 = vpop.permute.xlu0 %3977 }
 0x57f   : > { %13484 = vst [vmem:[#allocation601_spill] sm:$0xff] %v9417_v6  ;;  %13485 = vst [vmem:[#allocation602_spill] sm:$0xff] %v9419_v23  ;;  %v4329_v6 = vmul.f32 %v9214_v30, %v4327_v56  ;;  %v4328_v23 = vmul.f32 %v9218_v22, %v4327_v56 }
 0x580   : > { %4314 = vrot.lane.b32.xlu1 %v4305_v15, %s6611_s25  ;;  %4312 = vrot.lane.b32.xlu0 %v4304_v10, %s6611_s25 }
 0x582   : > { %v9425_v40 = vpop.permute.xlu1 %3983  ;;  %v9427_v11 = vpop.permute.xlu0 %3981 }
 0x583   : > { %13486 = vst [vmem:[#allocation603_spill] sm:$0xff] %v9425_v40  ;;  %13487 = vst [vmem:[#allocation604_spill] sm:$0xff] %v9427_v11  ;;  %v4330_v11 = vmul.f32 %v9232_v3, %v4327_v56  ;;  %v4362_v40 = vstv %s6342_s26  ;;  %s6367_s26 = sld [smem:[#allocation2 + $0x95]] }
 0x584   : > { %4318 = vrot.lane.b32.xlu1 %v4307_v39, %s6611_s25  ;;  %4316 = vrot.lane.b32.xlu0 %v4306_v53, %s6611_s25 }
 0x586   : > { %v9433_v15 = vpop.permute.xlu1 %3987  ;;  %v9435_v10 = vpop.permute.xlu0 %3985 }
 0x587   : > { %13488 = vst [vmem:[#allocation605_spill] sm:$0xff] %v9433_v15  ;;  %13489 = vst [vmem:[#allocation606_spill] sm:$0xff] %v9435_v10  ;;  %v4333_v15 = vmul.f32 %v9282_v1, %v4327_v56  ;;  %v4332_v10 = vmul.f32 %v9286_v4, %v4327_v56  ;;  %v4366_v56 = vmul.f32 %v9228_v2, %v4362_v40 }
 0x588   : > { %4342 = vrot.lane.b32.xlu1 %v4329_v6, %s6611_s25  ;;  %4340 = vrot.lane.b32.xlu0 %v4328_v23, %s6611_s25 }
 0x58a   : > { %v9441_v39 = vpop.permute.xlu1 %4014  ;;  %v9443_v53 = vpop.permute.xlu0 %4012 }
 0x58b   : > { %13490 = vst [vmem:[#allocation607_spill] sm:$0xff] %v9441_v39  ;;  %13491 = vst [vmem:[#allocation608_spill] sm:$0xff] %v9443_v53  ;;  %v4364_v39 = vmul.f32 %v9214_v30, %v4362_v40  ;;  %v4363_v53 = vmul.f32 %v9218_v22, %v4362_v40 }
 0x58c   : > { %4346 = vrot.lane.b32.xlu1 %v4331_v14, %s6611_s25  ;;  %4344 = vrot.lane.b32.xlu0 %v4330_v11, %s6611_s25 }
 0x58e   : > { %v9449_v6 = vpop.permute.xlu1 %4018  ;;  %v9451_v23 = vpop.permute.xlu0 %4016 }
 0x58f   : > { %13492 = vst [vmem:[#allocation609_spill] sm:$0xff] %v9449_v6  ;;  %13493 = vst [vmem:[#allocation610_spill] sm:$0xff] %v9451_v23  ;;  %v4365_v23 = vmul.f32 %v9232_v3, %v4362_v40  ;;  %v4397_v6 = vstv %s6343_s27  ;;  %s6368_s27 = sld [smem:[#allocation2 + $0x9c]] }
 0x590   : > { %4350 = vrot.lane.b32.xlu1 %v4333_v15, %s6611_s25  ;;  %4348 = vrot.lane.b32.xlu0 %v4332_v10, %s6611_s25 }
 0x592   : > { %v9457_v14 = vpop.permute.xlu1 %4022  ;;  %v9459_v11 = vpop.permute.xlu0 %4020 }
 0x593   : > { %13494 = vst [vmem:[#allocation611_spill] sm:$0xff] %v9457_v14  ;;  %13495 = vst [vmem:[#allocation612_spill] sm:$0xff] %v9459_v11  ;;  %v4368_v14 = vmul.f32 %v9282_v1, %v4362_v40  ;;  %v4367_v11 = vmul.f32 %v9286_v4, %v4362_v40  ;;  %v4401_v40 = vmul.f32 %v9228_v2, %v4397_v6 }
 0x594   : > { %4377 = vrot.lane.b32.xlu1 %v4364_v39, %s6611_s25  ;;  %4375 = vrot.lane.b32.xlu0 %v4363_v53, %s6611_s25 }
 0x596   : > { %v9465_v15 = vpop.permute.xlu1 %4049  ;;  %v9467_v10 = vpop.permute.xlu0 %4047 }
 0x597   : > { %13496 = vst [vmem:[#allocation613_spill] sm:$0xff] %v9465_v15  ;;  %13497 = vst [vmem:[#allocation614_spill] sm:$0xff] %v9467_v10  ;;  %v4399_v15 = vmul.f32 %v9214_v30, %v4397_v6  ;;  %v4398_v10 = vmul.f32 %v9218_v22, %v4397_v6 }
 0x598   : > { %4381 = vrot.lane.b32.xlu1 %v4366_v56, %s6611_s25  ;;  %4379 = vrot.lane.b32.xlu0 %v4365_v23, %s6611_s25 }
 0x59a   : > { %v9473_v39 = vpop.permute.xlu1 %4053  ;;  %v9475_v53 = vpop.permute.xlu0 %4051 }
 0x59b   : > { %13498 = vst [vmem:[#allocation615_spill] sm:$0xff] %v9473_v39  ;;  %13499 = vst [vmem:[#allocation616_spill] sm:$0xff] %v9475_v53  ;;  %v4400_v53 = vmul.f32 %v9232_v3, %v4397_v6  ;;  %v4432_v39 = vstv %s6344_s28  ;;  %s6370_s28 = sld [smem:[#allocation2 + $0xaa]] }
 0x59c   : > { %4385 = vrot.lane.b32.xlu1 %v4368_v14, %s6611_s25  ;;  %4383 = vrot.lane.b32.xlu0 %v4367_v11, %s6611_s25 }
 0x59e   : > { %v9481_v56 = vpop.permute.xlu1 %4057  ;;  %v9483_v23 = vpop.permute.xlu0 %4055 }
 0x59f   : > { %13500 = vst [vmem:[#allocation617_spill] sm:$0xff] %v9481_v56  ;;  %13501 = vst [vmem:[#allocation618_spill] sm:$0xff] %v9483_v23  ;;  %v4403_v56 = vmul.f32 %v9282_v1, %v4397_v6  ;;  %v4402_v23 = vmul.f32 %v9286_v4, %v4397_v6  ;;  %v4436_v6 = vmul.f32 %v9228_v2, %v4432_v39 }
 0x5a0   : > { %4412 = vrot.lane.b32.xlu1 %v4399_v15, %s6611_s25  ;;  %4410 = vrot.lane.b32.xlu0 %v4398_v10, %s6611_s25 }
 0x5a2   : > { %v9489_v14 = vpop.permute.xlu1 %4080  ;;  %v9491_v11 = vpop.permute.xlu0 %4078 }
 0x5a3   : > { %13502 = vst [vmem:[#allocation619_spill] sm:$0xff] %v9489_v14  ;;  %13503 = vst [vmem:[#allocation620_spill] sm:$0xff] %v9491_v11  ;;  %v4434_v14 = vmul.f32 %v9214_v30, %v4432_v39  ;;  %v4433_v11 = vmul.f32 %v9218_v22, %v4432_v39 }
 0x5a4   : > { %4416 = vrot.lane.b32.xlu1 %v4401_v40, %s6611_s25  ;;  %4414 = vrot.lane.b32.xlu0 %v4400_v53, %s6611_s25 }
 0x5a6   : > { %v9497_v15 = vpop.permute.xlu1 %4084  ;;  %v9499_v10 = vpop.permute.xlu0 %4082 }
 0x5a7   : > { %13504 = vst [vmem:[#allocation621_spill] sm:$0xff] %v9497_v15  ;;  %13505 = vst [vmem:[#allocation622_spill] sm:$0xff] %v9499_v10  ;;  %v4435_v10 = vmul.f32 %v9232_v3, %v4432_v39  ;;  %v4438_v15 = vmul.f32 %v9282_v1, %v4432_v39 }
 0x5a8   : > { %4420 = vrot.lane.b32.xlu1 %v4403_v56, %s6611_s25  ;;  %4418 = vrot.lane.b32.xlu0 %v4402_v23, %s6611_s25 }
 0x5aa   : > { %v9505_v40 = vpop.permute.xlu1 %4108  ;;  %v9507_v53 = vpop.permute.xlu0 %4106 }
 0x5ab   : > { %13506 = vst [vmem:[#allocation623_spill] sm:$0xff] %v9505_v40  ;;  %13507 = vst [vmem:[#allocation624_spill] sm:$0xff] %v9507_v53  ;;  %v4437_v53 = vmul.f32 %v9286_v4, %v4432_v39  ;;  %v4467_v40 = vstv %s6345_s29  ;;  %s6371_s29 = sld [smem:[#allocation2 + $0xb1]] }
 0x5ac   : > { %4447 = vrot.lane.b32.xlu1 %v4434_v14, %s6611_s25  ;;  %4445 = vrot.lane.b32.xlu0 %v4433_v11, %s6611_s25  ;;  %v4471_v39 = vmul.f32 %v9228_v2, %v4467_v40 }
 0x5ae   : > { %v9513_v56 = vpop.permute.xlu1 %4112  ;;  %v9515_v23 = vpop.permute.xlu0 %4110 }
 0x5af   : > { %13508 = vst [vmem:[#allocation625_spill] sm:$0xff] %v9513_v56  ;;  %13509 = vst [vmem:[#allocation626_spill] sm:$0xff] %v9515_v23  ;;  %v4469_v56 = vmul.f32 %v9214_v30, %v4467_v40  ;;  %v4468_v23 = vmul.f32 %v9218_v22, %v4467_v40 }
 0x5b0   : > { %4451 = vrot.lane.b32.xlu1 %v4436_v6, %s6611_s25  ;;  %4449 = vrot.lane.b32.xlu0 %v4435_v10, %s6611_s25 }
 0x5b2   : > { %v9521_v14 = vpop.permute.xlu1 %4116  ;;  %v9523_v11 = vpop.permute.xlu0 %4114 }
 0x5b3   : > { %13510 = vst [vmem:[#allocation627_spill] sm:$0xff] %v9521_v14  ;;  %13511 = vst [vmem:[#allocation628_spill] sm:$0xff] %v9523_v11  ;;  %v4470_v11 = vmul.f32 %v9232_v3, %v4467_v40  ;;  %v4502_v14 = vstv %s6346_s30  ;;  %s6372_s30 = sld [smem:[#allocation2 + $0xb8]] }
 0x5b4   : > { %4455 = vrot.lane.b32.xlu1 %v4438_v15, %s6611_s25  ;;  %4453 = vrot.lane.b32.xlu0 %v4437_v53, %s6611_s25 }
 0x5b6   : > { %v9529_v6 = vpop.permute.xlu1 %4143  ;;  %v9531_v10 = vpop.permute.xlu0 %4141 }
 0x5b7   : > { %13512 = vst [vmem:[#allocation629_spill] sm:$0xff] %v9529_v6  ;;  %13513 = vst [vmem:[#allocation630_spill] sm:$0xff] %v9531_v10  ;;  %v4473_v6 = vmul.f32 %v9282_v1, %v4467_v40  ;;  %v4472_v10 = vmul.f32 %v9286_v4, %v4467_v40  ;;  %v4506_v40 = vmul.f32 %v9228_v2, %v4502_v14  ;;  %v9573_v2 = vld [vmem:[%s6701_s5 + $0x90] sm:$0xff] }
 0x5b8   : > { %4482 = vrot.lane.b32.xlu1 %v4469_v56, %s6611_s25  ;;  %4480 = vrot.lane.b32.xlu0 %v4468_v23, %s6611_s25 }
 0x5ba   : > { %v9537_v15 = vpop.permute.xlu1 %4147  ;;  %v9539_v53 = vpop.permute.xlu0 %4145 }
 0x5bb   : > { %13514 = vst [vmem:[#allocation631_spill] sm:$0xff] %v9537_v15  ;;  %13515 = vst [vmem:[#allocation632_spill] sm:$0xff] %v9539_v53  ;;  %v4504_v53 = vmul.f32 %v9214_v30, %v4502_v14 }
 0x5bc   : > { %4486 = vrot.lane.b32.xlu1 %v4471_v39, %s6611_s25  ;;  %4484 = vrot.lane.b32.xlu0 %v4470_v11, %s6611_s25  ;;  %v4503_v39 = vmul.f32 %v9218_v22, %v4502_v14  ;;  %v4508_v22 = vmul.f32 %v9282_v1, %v4502_v14 }
 0x5be   : > { %v9545_v56 = vpop.permute.xlu1 %4151  ;;  %v9547_v23 = vpop.permute.xlu0 %4149 }
 0x5bf   : > { %13516 = vst [vmem:[#allocation633_spill] sm:$0xff] %v9545_v56  ;;  %13517 = vst [vmem:[#allocation634_spill] sm:$0xff] %v9547_v23 }
 0x5c0   : > { %4490 = vrot.lane.b32.xlu1 %v4473_v6, %s6611_s25  ;;  %4488 = vrot.lane.b32.xlu0 %v4472_v10, %s6611_s25  ;;  %v4505_v6 = vmul.f32 %v9232_v3, %v4502_v14 }
 0x5c2   : > { %v9553_v11 = vpop.permute.xlu1 %4178  ;;  %v9555_v15 = vpop.permute.xlu0 %4176 }
 0x5c3   : > { %13518 = vst [vmem:[#allocation635_spill] sm:$0xff] %v9553_v11  ;;  %13519 = vst [vmem:[#allocation636_spill] sm:$0xff] %v9555_v15  ;;  %v9570_v15 = vld [vmem:[%s6701_s5 + $0x98] sm:$0xff] }
 0x5c4   : > { %4517 = vrot.lane.b32.xlu1 %v4504_v53, %s6611_s25  ;;  %4515 = vrot.lane.b32.xlu0 %v4503_v39, %s6611_s25  ;;  %v4507_v53 = vmul.f32 %v9286_v4, %v4502_v14  ;;  %v4598_v39 = vstv %s6360_s7  ;;  %v9587_v4 = vld [vmem:[%s6701_s5 + $0xa0] sm:$0xff]  ;;  %s6373_s7 = sld [smem:[#allocation2 + $0xbf]] }
 0x5c5   : > { %v4599_v1 = vmul.f32 %v9573_v2, %v4598_v39 }
 0x5c6   : > { %v9561_v10 = vpop.permute.xlu1 %4182  ;;  %v9563_v30 = vpop.permute.xlu0 %4180 }
 0x5c7   : > { %13520 = vst [vmem:[#allocation637_spill] sm:$0xff] %v9561_v10  ;;  %13521 = vst [vmem:[#allocation638_spill] sm:$0xff] %v9563_v30 }
 0x5c8   : > { %4521 = vrot.lane.b32.xlu1 %v4506_v40, %s6611_s25  ;;  %4519 = vrot.lane.b32.xlu0 %v4505_v6, %s6611_s25  ;;  %v4600_v40 = vmul.f32 %v9570_v15, %v4598_v39  ;;  %v9584_v6 = vld [vmem:[%s6701_s5 + $0xa8] sm:$0xff] }
 0x5ca   : > { %v9575_v3 = vpop.permute.xlu1 %4186  ;;  %v9577_v10 = vpop.permute.xlu0 %4184 }
 0x5cb   : > { %13522 = vst [vmem:[#allocation639_spill] sm:$0xff] %v9575_v3  ;;  %13523 = vst [vmem:[#allocation640_spill] sm:$0xff] %v9577_v10  ;;  %v4622_v10 = vstv %s6361_s8  ;;  %s6374_s8 = sld [smem:[#allocation2 + $0x96]] }
 0x5cc   : > { %4525 = vrot.lane.b32.xlu1 %v4508_v22, %s6611_s25  ;;  %4523 = vrot.lane.b32.xlu0 %v4507_v53, %s6611_s25  ;;  %v4602_v22 = vmul.f32 %v9584_v6, %v4598_v39  ;;  %v4601_v53 = vmul.f32 %v9587_v4, %v4598_v39  ;;  %v4624_v23 = vmul.f32 %v9570_v15, %v4622_v10 }
 0x5cd   : > { %v4626_v39 = vmul.f32 %v9584_v6, %v4622_v10 }
 0x5ce   : > { %v9589_v14 = vpop.permute.xlu1 %4213  ;;  %v9591_v30 = vpop.permute.xlu0 %4211 }
 0x5cf   : > { %13524 = vst [vmem:[#allocation641_spill] sm:$0xff] %v9589_v14  ;;  %13525 = vst [vmem:[#allocation642_spill] sm:$0xff] %v9591_v30 }
 0x5d0   : > { %4609 = vrot.lane.b32.xlu1 %v4600_v40, %s6606_s6  ;;  %4607 = vrot.lane.b32.xlu0 %v4599_v1, %s6606_s6  ;;  %v4623_v40 = vmul.f32 %v9573_v2, %v4622_v10 }
 0x5d2   : > { %v9597_v3 = vpop.permute.xlu1 %4217  ;;  %v9599_v11 = vpop.permute.xlu0 %4215 }
 0x5d3   : > { %13526 = vst [vmem:[#allocation643_spill] sm:$0xff] %v9597_v3  ;;  %13527 = vst [vmem:[#allocation644_spill] sm:$0xff] %v9599_v11  ;;  %v4625_v11 = vmul.f32 %v9587_v4, %v4622_v10 }
 0x5d4   : > { %4613 = vrot.lane.b32.xlu1 %v4602_v22, %s6606_s6  ;;  %4611 = vrot.lane.b32.xlu0 %v4601_v53, %s6606_s6  ;;  %v9614_v22 = vld [vmem:[%s6701_s5 + $0xb8] sm:$0x3f]  ;;  %v9617_v53 = vld [vmem:[%s6701_s5 + $0xb0] sm:$0x3f] }
 0x5d5   : > { %13530 = vst [vmem:[#allocation647_spill] sm:$0xff] %v9614_v22  ;;  %13531 = vst [vmem:[#allocation648_spill] sm:$0xff] %v9617_v53 }
 0x5d6   : > { %v9605_v1 = vpop.permute.xlu1 %4221  ;;  %v9607_v56 = vpop.permute.xlu0 %4219 }
 0x5d7   : > { %13528 = vst [vmem:[#allocation645_spill] sm:$0xff] %v9605_v1  ;;  %13529 = vst [vmem:[#allocation646_spill] sm:$0xff] %v9607_v56  ;;  %v4657_v56 = vstv %s6362_s14  ;;  %s6375_s14 = sld [smem:[#allocation2 + $0x9d]] }
 0x5d8   : > { %4637 = vrot.lane.b32.xlu1 %v4624_v23, %s6606_s6  ;;  %4635 = vrot.lane.b32.xlu0 %v4623_v40, %s6606_s6  ;;  %v4628_v23 = vmul.f32 %v9614_v22, %v4622_v10  ;;  %v4627_v40 = vmul.f32 %v9617_v53, %v4622_v10  ;;  %v4661_v10 = vmul.f32 %v9584_v6, %v4657_v56 }
 0x5da   : > { %v9619_v3 = vpop.permute.xlu1 %4248  ;;  %v9621_v30 = vpop.permute.xlu0 %4246 }
 0x5db   : > { %13532 = vst [vmem:[#allocation649_spill] sm:$0xff] %v9619_v3  ;;  %13533 = vst [vmem:[#allocation650_spill] sm:$0xff] %v9621_v30  ;;  %v4659_v3 = vmul.f32 %v9570_v15, %v4657_v56  ;;  %v4658_v30 = vmul.f32 %v9573_v2, %v4657_v56 }
 0x5dc   : > { %4641 = vrot.lane.b32.xlu1 %v4626_v39, %s6606_s6  ;;  %4639 = vrot.lane.b32.xlu0 %v4625_v11, %s6606_s6 }
 0x5de   : > { %v9627_v1 = vpop.permute.xlu1 %4252  ;;  %v9629_v14 = vpop.permute.xlu0 %4250 }
 0x5df   : > { %13534 = vst [vmem:[#allocation651_spill] sm:$0xff] %v9627_v1  ;;  %13535 = vst [vmem:[#allocation652_spill] sm:$0xff] %v9629_v14  ;;  %v4660_v14 = vmul.f32 %v9587_v4, %v4657_v56  ;;  %v4692_v1 = vstv %s6363_s16  ;;  %s6377_s16 = sld [smem:[#allocation2 + $0xab]] }
 0x5e0   : > { %4645 = vrot.lane.b32.xlu1 %v4628_v23, %s6606_s6  ;;  %4643 = vrot.lane.b32.xlu0 %v4627_v40, %s6606_s6 }
 0x5e2   : > { %v9635_v39 = vpop.permute.xlu1 %4256  ;;  %v9637_v11 = vpop.permute.xlu0 %4254 }
 0x5e3   : > { %13536 = vst [vmem:[#allocation653_spill] sm:$0xff] %v9635_v39  ;;  %13537 = vst [vmem:[#allocation654_spill] sm:$0xff] %v9637_v11  ;;  %v4663_v39 = vmul.f32 %v9614_v22, %v4657_v56  ;;  %v4662_v11 = vmul.f32 %v9617_v53, %v4657_v56  ;;  %v4696_v56 = vmul.f32 %v9584_v6, %v4692_v1 }
 0x5e4   : > { %4672 = vrot.lane.b32.xlu1 %v4659_v3, %s6606_s6  ;;  %4670 = vrot.lane.b32.xlu0 %v4658_v30, %s6606_s6 }
 0x5e6   : > { %v9643_v23 = vpop.permute.xlu1 %4283  ;;  %v9645_v40 = vpop.permute.xlu0 %4281 }
 0x5e7   : > { %13538 = vst [vmem:[#allocation655_spill] sm:$0xff] %v9643_v23  ;;  %13539 = vst [vmem:[#allocation656_spill] sm:$0xff] %v9645_v40  ;;  %v4694_v23 = vmul.f32 %v9570_v15, %v4692_v1  ;;  %v4693_v40 = vmul.f32 %v9573_v2, %v4692_v1 }
 0x5e8   : > { %4676 = vrot.lane.b32.xlu1 %v4661_v10, %s6606_s6  ;;  %4674 = vrot.lane.b32.xlu0 %v4660_v14, %s6606_s6 }
 0x5ea   : > { %v9651_v3 = vpop.permute.xlu1 %4287  ;;  %v9653_v30 = vpop.permute.xlu0 %4285 }
 0x5eb   : > { %13540 = vst [vmem:[#allocation657_spill] sm:$0xff] %v9651_v3  ;;  %13541 = vst [vmem:[#allocation658_spill] sm:$0xff] %v9653_v30  ;;  %v4695_v30 = vmul.f32 %v9587_v4, %v4692_v1  ;;  %v4727_v3 = vstv %s6364_s17  ;;  %s6378_s17 = sld [smem:[#allocation2 + $0xb2]] }
 0x5ec   : > { %4680 = vrot.lane.b32.xlu1 %v4663_v39, %s6606_s6  ;;  %4678 = vrot.lane.b32.xlu0 %v4662_v11, %s6606_s6 }
 0x5ee   : > { %v9659_v10 = vpop.permute.xlu1 %4291  ;;  %v9661_v14 = vpop.permute.xlu0 %4289 }
 0x5ef   : > { %13542 = vst [vmem:[#allocation659_spill] sm:$0xff] %v9659_v10  ;;  %13543 = vst [vmem:[#allocation660_spill] sm:$0xff] %v9661_v14  ;;  %v4698_v10 = vmul.f32 %v9614_v22, %v4692_v1  ;;  %v4697_v14 = vmul.f32 %v9617_v53, %v4692_v1  ;;  %v4731_v1 = vmul.f32 %v9584_v6, %v4727_v3 }
 0x5f0   : > { %4707 = vrot.lane.b32.xlu1 %v4694_v23, %s6606_s6  ;;  %4705 = vrot.lane.b32.xlu0 %v4693_v40, %s6606_s6 }
 0x5f2   : > { %v9667_v39 = vpop.permute.xlu1 %4314  ;;  %v9669_v11 = vpop.permute.xlu0 %4312 }
 0x5f3   : > { %13544 = vst [vmem:[#allocation661_spill] sm:$0xff] %v9667_v39  ;;  %13545 = vst [vmem:[#allocation662_spill] sm:$0xff] %v9669_v11  ;;  %v4729_v39 = vmul.f32 %v9570_v15, %v4727_v3  ;;  %v4728_v11 = vmul.f32 %v9573_v2, %v4727_v3 }
 0x5f4   : > { %4711 = vrot.lane.b32.xlu1 %v4696_v56, %s6606_s6  ;;  %4709 = vrot.lane.b32.xlu0 %v4695_v30, %s6606_s6 }
 0x5f6   : > { %v9675_v23 = vpop.permute.xlu1 %4318  ;;  %v9677_v40 = vpop.permute.xlu0 %4316 }
 0x5f7   : > { %13546 = vst [vmem:[#allocation663_spill] sm:$0xff] %v9675_v23  ;;  %13547 = vst [vmem:[#allocation664_spill] sm:$0xff] %v9677_v40  ;;  %v4730_v40 = vmul.f32 %v9587_v4, %v4727_v3  ;;  %v4733_v23 = vmul.f32 %v9614_v22, %v4727_v3 }
 0x5f8   : > { %4715 = vrot.lane.b32.xlu1 %v4698_v10, %s6606_s6  ;;  %4713 = vrot.lane.b32.xlu0 %v4697_v14, %s6606_s6 }
 0x5fa   : > { %v9683_v56 = vpop.permute.xlu1 %4342  ;;  %v9685_v30 = vpop.permute.xlu0 %4340 }
 0x5fb   : > { %13548 = vst [vmem:[#allocation665_spill] sm:$0xff] %v9683_v56  ;;  %13549 = vst [vmem:[#allocation666_spill] sm:$0xff] %v9685_v30  ;;  %v4732_v30 = vmul.f32 %v9617_v53, %v4727_v3  ;;  %v4762_v56 = vstv %s6365_s21  ;;  %s6379_s21 = sld [smem:[#allocation2 + $0xb9]] }
 0x5fc   : > { %4742 = vrot.lane.b32.xlu1 %v4729_v39, %s6606_s6  ;;  %4740 = vrot.lane.b32.xlu0 %v4728_v11, %s6606_s6  ;;  %v4766_v3 = vmul.f32 %v9584_v6, %v4762_v56 }
 0x5fe   : > { %v9691_v10 = vpop.permute.xlu1 %4346  ;;  %v9693_v14 = vpop.permute.xlu0 %4344 }
 0x5ff   : > { %13550 = vst [vmem:[#allocation667_spill] sm:$0xff] %v9691_v10  ;;  %13551 = vst [vmem:[#allocation668_spill] sm:$0xff] %v9693_v14  ;;  %v4764_v10 = vmul.f32 %v9570_v15, %v4762_v56  ;;  %v4763_v14 = vmul.f32 %v9573_v2, %v4762_v56 }
 0x600   : > { %4746 = vrot.lane.b32.xlu1 %v4731_v1, %s6606_s6  ;;  %4744 = vrot.lane.b32.xlu0 %v4730_v40, %s6606_s6 }
 0x602   : > { %v9699_v39 = vpop.permute.xlu1 %4350  ;;  %v9701_v11 = vpop.permute.xlu0 %4348 }
 0x603   : > { %13552 = vst [vmem:[#allocation669_spill] sm:$0xff] %v9699_v39  ;;  %13553 = vst [vmem:[#allocation670_spill] sm:$0xff] %v9701_v11  ;;  %v4765_v11 = vmul.f32 %v9587_v4, %v4762_v56  ;;  %v4797_v39 = vstv %s6366_s24  ;;  %s6380_s24 = sld [smem:[#allocation2 + $0xc0]] }
 0x604   : > { %4750 = vrot.lane.b32.xlu1 %v4733_v23, %s6606_s6  ;;  %4748 = vrot.lane.b32.xlu0 %v4732_v30, %s6606_s6 }
 0x606   : > { %v9707_v1 = vpop.permute.xlu1 %4377  ;;  %v9709_v40 = vpop.permute.xlu0 %4375 }
 0x607   : > { %13554 = vst [vmem:[#allocation671_spill] sm:$0xff] %v9707_v1  ;;  %13555 = vst [vmem:[#allocation672_spill] sm:$0xff] %v9709_v40  ;;  %v4768_v1 = vmul.f32 %v9614_v22, %v4762_v56  ;;  %v4767_v40 = vmul.f32 %v9617_v53, %v4762_v56  ;;  %v4801_v56 = vmul.f32 %v9584_v6, %v4797_v39 }
 0x608   : > { %4777 = vrot.lane.b32.xlu1 %v4764_v10, %s6606_s6  ;;  %4775 = vrot.lane.b32.xlu0 %v4763_v14, %s6606_s6 }
 0x60a   : > { %v9715_v23 = vpop.permute.xlu1 %4381  ;;  %v9717_v30 = vpop.permute.xlu0 %4379 }
 0x60b   : > { %13556 = vst [vmem:[#allocation673_spill] sm:$0xff] %v9715_v23  ;;  %13557 = vst [vmem:[#allocation674_spill] sm:$0xff] %v9717_v30  ;;  %v4799_v23 = vmul.f32 %v9570_v15, %v4797_v39  ;;  %v4798_v30 = vmul.f32 %v9573_v2, %v4797_v39 }
 0x60c   : > { %4781 = vrot.lane.b32.xlu1 %v4766_v3, %s6606_s6  ;;  %4779 = vrot.lane.b32.xlu0 %v4765_v11, %s6606_s6 }
 0x60e   : > { %v9723_v10 = vpop.permute.xlu1 %4385  ;;  %v9725_v14 = vpop.permute.xlu0 %4383 }
 0x60f   : > { %13558 = vst [vmem:[#allocation675_spill] sm:$0xff] %v9723_v10  ;;  %13559 = vst [vmem:[#allocation676_spill] sm:$0xff] %v9725_v14  ;;  %v4800_v14 = vmul.f32 %v9587_v4, %v4797_v39  ;;  %v4832_v10 = vstv %s6367_s26  ;;  %s6381_s26 = sld [smem:[#allocation2 + $0x97]] }
 0x610   : > { %4785 = vrot.lane.b32.xlu1 %v4768_v1, %s6606_s6  ;;  %4783 = vrot.lane.b32.xlu0 %v4767_v40, %s6606_s6 }
 0x612   : > { %v9731_v3 = vpop.permute.xlu1 %4412  ;;  %v9733_v11 = vpop.permute.xlu0 %4410 }
 0x613   : > { %13560 = vst [vmem:[#allocation677_spill] sm:$0xff] %v9731_v3  ;;  %13561 = vst [vmem:[#allocation678_spill] sm:$0xff] %v9733_v11  ;;  %v4803_v3 = vmul.f32 %v9614_v22, %v4797_v39  ;;  %v4802_v11 = vmul.f32 %v9617_v53, %v4797_v39  ;;  %v4836_v39 = vmul.f32 %v9584_v6, %v4832_v10 }
 0x614   : > { %4812 = vrot.lane.b32.xlu1 %v4799_v23, %s6606_s6  ;;  %4810 = vrot.lane.b32.xlu0 %v4798_v30, %s6606_s6 }
 0x616   : > { %v9739_v1 = vpop.permute.xlu1 %4416  ;;  %v9741_v40 = vpop.permute.xlu0 %4414 }
 0x617   : > { %13562 = vst [vmem:[#allocation679_spill] sm:$0xff] %v9739_v1  ;;  %13563 = vst [vmem:[#allocation680_spill] sm:$0xff] %v9741_v40  ;;  %v4834_v40 = vmul.f32 %v9570_v15, %v4832_v10 }
 0x618   : > { %4816 = vrot.lane.b32.xlu1 %v4801_v56, %s6606_s6  ;;  %4814 = vrot.lane.b32.xlu0 %v4800_v14, %s6606_s6  ;;  %v4833_v56 = vmul.f32 %v9573_v2, %v4832_v10 }
 0x61a   : > { %v9747_v23 = vpop.permute.xlu1 %4420  ;;  %v9749_v30 = vpop.permute.xlu0 %4418 }
 0x61b   : > { %13564 = vst [vmem:[#allocation681_spill] sm:$0xff] %v9747_v23  ;;  %13565 = vst [vmem:[#allocation682_spill] sm:$0xff] %v9749_v30  ;;  %v4835_v30 = vmul.f32 %v9587_v4, %v4832_v10  ;;  %v4856_v23 = vstv %s6368_s27  ;;  %s6382_s27 = sld [smem:[#allocation2 + $0x9e]] }
 0x61c   : > { %4820 = vrot.lane.b32.xlu1 %v4803_v3, %s6606_s6  ;;  %4818 = vrot.lane.b32.xlu0 %v4802_v11, %s6606_s6  ;;  %s6369_s6 = sld [smem:[#allocation2 + $0xa3]]  ;;  %v4860_v10 = vmul.f32 %v9584_v6, %v4856_v23 }
 0x61e   : > { %v9755_v1 = vpop.permute.xlu1 %4447  ;;  %v9757_v14 = vpop.permute.xlu0 %4445 }
 0x61f   : > { %13566 = vst [vmem:[#allocation683_spill] sm:$0xff] %v9755_v1  ;;  %13567 = vst [vmem:[#allocation684_spill] sm:$0xff] %v9757_v14  ;;  %v4858_v1 = vmul.f32 %v9570_v15, %v4856_v23  ;;  %v4857_v14 = vmul.f32 %v9573_v2, %v4856_v23 }
 0x620   : > { %4843 = vrot.lane.b32.xlu1 %v4834_v40, %s6607_s23  ;;  %4841 = vrot.lane.b32.xlu0 %v4833_v56, %s6607_s23 }
 0x622   : > { %v9763_v3 = vpop.permute.xlu1 %4451  ;;  %v9765_v11 = vpop.permute.xlu0 %4449 }
 0x623   : > { %13568 = vst [vmem:[#allocation685_spill] sm:$0xff] %v9763_v3  ;;  %13569 = vst [vmem:[#allocation686_spill] sm:$0xff] %v9765_v11  ;;  %v4859_v11 = vmul.f32 %v9587_v4, %v4856_v23  ;;  %v4891_v3 = vstv %s6369_s6  ;;  %s10075_s6 = sld [smem:[#allocation2]] }
 0x624   : > { %4847 = vrot.lane.b32.xlu1 %v4836_v39, %s6607_s23  ;;  %4845 = vrot.lane.b32.xlu0 %v4835_v30, %s6607_s23 }
 0x626   : > { %v9771_v40 = vpop.permute.xlu1 %4455  ;;  %v9773_v56 = vpop.permute.xlu0 %4453 }
 0x627   : > { %13570 = vst [vmem:[#allocation687_spill] sm:$0xff] %v9771_v40  ;;  %13571 = vst [vmem:[#allocation688_spill] sm:$0xff] %v9773_v56  ;;  %v4862_v40 = vmul.f32 %v9614_v22, %v4856_v23  ;;  %v4861_v56 = vmul.f32 %v9617_v53, %v4856_v23  ;;  %v4895_v23 = vmul.f32 %v9584_v6, %v4891_v3 }
 0x628   : > { %4871 = vrot.lane.b32.xlu1 %v4858_v1, %s6607_s23  ;;  %4869 = vrot.lane.b32.xlu0 %v4857_v14, %s6607_s23 }
 0x62a   : > { %v9779_v39 = vpop.permute.xlu1 %4482  ;;  %v9781_v30 = vpop.permute.xlu0 %4480 }
 0x62b   : > { %13572 = vst [vmem:[#allocation689_spill] sm:$0xff] %v9779_v39  ;;  %13573 = vst [vmem:[#allocation690_spill] sm:$0xff] %v9781_v30  ;;  %v4893_v39 = vmul.f32 %v9570_v15, %v4891_v3  ;;  %v4892_v30 = vmul.f32 %v9573_v2, %v4891_v3 }
 0x62c   : > { %4875 = vrot.lane.b32.xlu1 %v4860_v10, %s6607_s23  ;;  %4873 = vrot.lane.b32.xlu0 %v4859_v11, %s6607_s23 }
 0x62e   : > { %v9787_v1 = vpop.permute.xlu1 %4486  ;;  %v9789_v14 = vpop.permute.xlu0 %4484 }
 0x62f   : > { %13574 = vst [vmem:[#allocation691_spill] sm:$0xff] %v9787_v1  ;;  %13575 = vst [vmem:[#allocation692_spill] sm:$0xff] %v9789_v14  ;;  %v4894_v14 = vmul.f32 %v9587_v4, %v4891_v3  ;;  %v4926_v1 = vstv %s6370_s28  ;;  %s6189_s28 = sld [smem:[#allocation2 + $0x7]] }
 0x630   : > { %4879 = vrot.lane.b32.xlu1 %v4862_v40, %s6607_s23  ;;  %4877 = vrot.lane.b32.xlu0 %v4861_v56, %s6607_s23 }
 0x632   : > { %v9795_v10 = vpop.permute.xlu1 %4490  ;;  %v9797_v11 = vpop.permute.xlu0 %4488 }
 0x633   : > { %13576 = vst [vmem:[#allocation693_spill] sm:$0xff] %v9795_v10  ;;  %13577 = vst [vmem:[#allocation694_spill] sm:$0xff] %v9797_v11  ;;  %v4897_v10 = vmul.f32 %v9614_v22, %v4891_v3  ;;  %v4896_v11 = vmul.f32 %v9617_v53, %v4891_v3  ;;  %v4930_v3 = vmul.f32 %v9584_v6, %v4926_v1 }
 0x634   : > { %4906 = vrot.lane.b32.xlu1 %v4893_v39, %s6607_s23  ;;  %4904 = vrot.lane.b32.xlu0 %v4892_v30, %s6607_s23 }
 0x636   : > { %v9803_v40 = vpop.permute.xlu1 %4517  ;;  %v9805_v56 = vpop.permute.xlu0 %4515 }
 0x637   : > { %13578 = vst [vmem:[#allocation695_spill] sm:$0xff] %v9803_v40  ;;  %13579 = vst [vmem:[#allocation696_spill] sm:$0xff] %v9805_v56  ;;  %v4928_v40 = vmul.f32 %v9570_v15, %v4926_v1  ;;  %v4927_v56 = vmul.f32 %v9573_v2, %v4926_v1 }
 0x638   : > { %4910 = vrot.lane.b32.xlu1 %v4895_v23, %s6607_s23  ;;  %4908 = vrot.lane.b32.xlu0 %v4894_v14, %s6607_s23 }
 0x63a   : > { %v9811_v39 = vpop.permute.xlu1 %4521  ;;  %v9813_v30 = vpop.permute.xlu0 %4519 }
 0x63b   : > { %13580 = vst [vmem:[#allocation697_spill] sm:$0xff] %v9811_v39  ;;  %13581 = vst [vmem:[#allocation698_spill] sm:$0xff] %v9813_v30  ;;  %v4929_v30 = vmul.f32 %v9587_v4, %v4926_v1  ;;  %v4961_v39 = vstv %s6371_s29  ;;  %s6190_s29 = sld [smem:[#allocation2 + $0xe]] }
 0x63c   : > { %4914 = vrot.lane.b32.xlu1 %v4897_v10, %s6607_s23  ;;  %4912 = vrot.lane.b32.xlu0 %v4896_v11, %s6607_s23 }
 0x63e   : > { %v9819_v23 = vpop.permute.xlu1 %4525  ;;  %v9821_v14 = vpop.permute.xlu0 %4523 }
 0x63f   : > { %13582 = vst [vmem:[#allocation699_spill] sm:$0xff] %v9819_v23  ;;  %13583 = vst [vmem:[#allocation700_spill] sm:$0xff] %v9821_v14  ;;  %v4932_v23 = vmul.f32 %v9614_v22, %v4926_v1  ;;  %v4931_v14 = vmul.f32 %v9617_v53, %v4926_v1  ;;  %v4965_v1 = vmul.f32 %v9584_v6, %v4961_v39 }
 0x640   : > { %4941 = vrot.lane.b32.xlu1 %v4928_v40, %s6607_s23  ;;  %4939 = vrot.lane.b32.xlu0 %v4927_v56, %s6607_s23 }
 0x642   : > { %v9827_v10 = vpop.permute.xlu1 %4609  ;;  %v9829_v11 = vpop.permute.xlu0 %4607 }
 0x643   : > { %13584 = vst [vmem:[#allocation701_spill] sm:$0xff] %v9827_v10  ;;  %13585 = vst [vmem:[#allocation702_spill] sm:$0xff] %v9829_v11  ;;  %v4963_v10 = vmul.f32 %v9570_v15, %v4961_v39  ;;  %v4962_v11 = vmul.f32 %v9573_v2, %v4961_v39 }
 0x644   : > { %4945 = vrot.lane.b32.xlu1 %v4930_v3, %s6607_s23  ;;  %4943 = vrot.lane.b32.xlu0 %v4929_v30, %s6607_s23 }
 0x646   : > { %v9835_v40 = vpop.permute.xlu1 %4613  ;;  %v9837_v56 = vpop.permute.xlu0 %4611 }
 0x647   : > { %13586 = vst [vmem:[#allocation703_spill] sm:$0xff] %v9835_v40  ;;  %13587 = vst [vmem:[#allocation704_spill] sm:$0xff] %v9837_v56  ;;  %v4964_v56 = vmul.f32 %v9587_v4, %v4961_v39  ;;  %v4967_v40 = vmul.f32 %v9614_v22, %v4961_v39 }
 0x648   : > { %4949 = vrot.lane.b32.xlu1 %v4932_v23, %s6607_s23  ;;  %4947 = vrot.lane.b32.xlu0 %v4931_v14, %s6607_s23 }
 0x64a   : > { %v9843_v3 = vpop.permute.xlu1 %4637  ;;  %v9845_v30 = vpop.permute.xlu0 %4635 }
 0x64b   : > { %13588 = vst [vmem:[#allocation705_spill] sm:$0xff] %v9843_v3  ;;  %13589 = vst [vmem:[#allocation706_spill] sm:$0xff] %v9845_v30  ;;  %v4966_v30 = vmul.f32 %v9617_v53, %v4961_v39  ;;  %v4996_v3 = vstv %s6372_s30  ;;  %s6191_s30 = sld [smem:[#allocation2 + $0x15]] }
 0x64c   : > { %4976 = vrot.lane.b32.xlu1 %v4963_v10, %s6607_s23  ;;  %4974 = vrot.lane.b32.xlu0 %v4962_v11, %s6607_s23  ;;  %v5000_v39 = vmul.f32 %v9584_v6, %v4996_v3 }
 0x64e   : > { %v9851_v23 = vpop.permute.xlu1 %4641  ;;  %v9853_v14 = vpop.permute.xlu0 %4639 }
 0x64f   : > { %13590 = vst [vmem:[#allocation707_spill] sm:$0xff] %v9851_v23  ;;  %13591 = vst [vmem:[#allocation708_spill] sm:$0xff] %v9853_v14  ;;  %v4998_v23 = vmul.f32 %v9570_v15, %v4996_v3  ;;  %v4997_v14 = vmul.f32 %v9573_v2, %v4996_v3 }
 0x650   : > { %4980 = vrot.lane.b32.xlu1 %v4965_v1, %s6607_s23  ;;  %4978 = vrot.lane.b32.xlu0 %v4964_v56, %s6607_s23 }
 0x652   : > { %v9859_v10 = vpop.permute.xlu1 %4645  ;;  %v9861_v11 = vpop.permute.xlu0 %4643 }
 0x653   : > { %13592 = vst [vmem:[#allocation709_spill] sm:$0xff] %v9859_v10  ;;  %13593 = vst [vmem:[#allocation710_spill] sm:$0xff] %v9861_v11  ;;  %v4999_v11 = vmul.f32 %v9587_v4, %v4996_v3  ;;  %v5031_v10 = vstv %s6373_s7  ;;  %s10089_s7 = sld [smem:[#allocation2 + $0x23]] }
 0x654   : > { %4984 = vrot.lane.b32.xlu1 %v4967_v40, %s6607_s23  ;;  %4982 = vrot.lane.b32.xlu0 %v4966_v30, %s6607_s23 }
 0x656   : > { %v9867_v1 = vpop.permute.xlu1 %4672  ;;  %v9869_v56 = vpop.permute.xlu0 %4670 }
 0x657   : > { %13594 = vst [vmem:[#allocation711_spill] sm:$0xff] %v9867_v1  ;;  %13595 = vst [vmem:[#allocation712_spill] sm:$0xff] %v9869_v56  ;;  %v5002_v1 = vmul.f32 %v9614_v22, %v4996_v3  ;;  %v5001_v56 = vmul.f32 %v9617_v53, %v4996_v3  ;;  %v5035_v3 = vmul.f32 %v9584_v6, %v5031_v10 }
 0x658   : > { %5011 = vrot.lane.b32.xlu1 %v4998_v23, %s6607_s23  ;;  %5009 = vrot.lane.b32.xlu0 %v4997_v14, %s6607_s23 }
 0x659   : > { %v187_v52 = vstv %s10089_s7  ;;  %s10782_s7 = sld [smem:[#allocation2 + $0x9f]] }
 0x65a   : > { %v9875_v40 = vpop.permute.xlu1 %4676  ;;  %v9877_v30 = vpop.permute.xlu0 %4674  ;;  %v10126_v35 = vmul.f32 %v6496_v47, %v187_v52 }
 0x65b   : > { %13596 = vst [vmem:[#allocation713_spill] sm:$0xff] %v9875_v40  ;;  %13597 = vst [vmem:[#allocation714_spill] sm:$0xff] %v9877_v30  ;;  %v5033_v40 = vmul.f32 %v9570_v15, %v5031_v10  ;;  %v5032_v30 = vmul.f32 %v9573_v2, %v5031_v10 }
 0x65c   : > { %5015 = vrot.lane.b32.xlu1 %v5000_v39, %s6607_s23  ;;  %5013 = vrot.lane.b32.xlu0 %v4999_v11, %s6607_s23 }
 0x65e   : > { %v9883_v23 = vpop.permute.xlu1 %4680  ;;  %v9885_v14 = vpop.permute.xlu0 %4678 }
 0x65f   : > { %13598 = vst [vmem:[#allocation715_spill] sm:$0xff] %v9883_v23  ;;  %13599 = vst [vmem:[#allocation716_spill] sm:$0xff] %v9885_v14  ;;  %v5034_v14 = vmul.f32 %v9587_v4, %v5031_v10  ;;  %v5066_v23 = vstv %s6374_s8  ;;  %s10095_s8 = sld [smem:[#allocation2 + $0xa5]] }
 0x660   : > { %5019 = vrot.lane.b32.xlu1 %v5002_v1, %s6607_s23  ;;  %5017 = vrot.lane.b32.xlu0 %v5001_v56, %s6607_s23 }
 0x662   : > { %v9891_v39 = vpop.permute.xlu1 %4707  ;;  %v9893_v11 = vpop.permute.xlu0 %4705 }
 0x663   : > { %13600 = vst [vmem:[#allocation717_spill] sm:$0xff] %v9891_v39  ;;  %13601 = vst [vmem:[#allocation718_spill] sm:$0xff] %v9893_v11  ;;  %v5037_v39 = vmul.f32 %v9614_v22, %v5031_v10  ;;  %v5036_v11 = vmul.f32 %v9617_v53, %v5031_v10  ;;  %v5070_v10 = vmul.f32 %v9584_v6, %v5066_v23 }
 0x664   : > { %5046 = vrot.lane.b32.xlu1 %v5033_v40, %s6607_s23  ;;  %5044 = vrot.lane.b32.xlu0 %v5032_v30, %s6607_s23 }
 0x666   : > { %v9899_v1 = vpop.permute.xlu1 %4711  ;;  %v9901_v56 = vpop.permute.xlu0 %4709 }
 0x667   : > { %13602 = vst [vmem:[#allocation719_spill] sm:$0xff] %v9899_v1  ;;  %13603 = vst [vmem:[#allocation720_spill] sm:$0xff] %v9901_v56  ;;  %v5068_v56 = vmul.f32 %v9570_v15, %v5066_v23 }
 0x668   : > { %5050 = vrot.lane.b32.xlu1 %v5035_v3, %s6607_s23  ;;  %5048 = vrot.lane.b32.xlu0 %v5034_v14, %s6607_s23  ;;  %v5067_v3 = vmul.f32 %v9573_v2, %v5066_v23 }
 0x66a   : > { %v9907_v40 = vpop.permute.xlu1 %4715  ;;  %v9909_v30 = vpop.permute.xlu0 %4713 }
 0x66b   : > { %13604 = vst [vmem:[#allocation721_spill] sm:$0xff] %v9907_v40  ;;  %13605 = vst [vmem:[#allocation722_spill] sm:$0xff] %v9909_v30  ;;  %v5069_v30 = vmul.f32 %v9587_v4, %v5066_v23  ;;  %v5090_v40 = vstv %s6375_s14  ;;  %s10098_s14 = sld [smem:[#allocation2 + $0x2a]] }
 0x66c   : > { %5054 = vrot.lane.b32.xlu1 %v5037_v39, %s6607_s23  ;;  %5052 = vrot.lane.b32.xlu0 %v5036_v11, %s6607_s23  ;;  %s6376_s23 = sld [smem:[#allocation2 + $0xa4]]  ;;  %v5094_v23 = vmul.f32 %v9584_v6, %v5090_v40 }
 0x66e   : > { %v9915_v1 = vpop.permute.xlu1 %4742  ;;  %v9917_v14 = vpop.permute.xlu0 %4740 }
 0x66f   : > { %13606 = vst [vmem:[#allocation723_spill] sm:$0xff] %v9915_v1  ;;  %13607 = vst [vmem:[#allocation724_spill] sm:$0xff] %v9917_v14  ;;  %v5092_v1 = vmul.f32 %v9570_v15, %v5090_v40  ;;  %v5091_v14 = vmul.f32 %v9573_v2, %v5090_v40 }
 0x670   : > { %5077 = vrot.lane.b32.xlu1 %v5068_v56, %s6608_s3  ;;  %5075 = vrot.lane.b32.xlu0 %v5067_v3, %s6608_s3 }
 0x671   : > { %v192_v27 = vstv %s10098_s14  ;;  %s11111_s14 = sld [smem:[#allocation2 + $0xb4]] }
 0x672   : > { %v9923_v39 = vpop.permute.xlu1 %4746  ;;  %v9925_v11 = vpop.permute.xlu0 %4744 }
 0x673   : > { %13608 = vst [vmem:[#allocation725_spill] sm:$0xff] %v9923_v39  ;;  %13609 = vst [vmem:[#allocation726_spill] sm:$0xff] %v9925_v11  ;;  %v5093_v11 = vmul.f32 %v9587_v4, %v5090_v40  ;;  %v5125_v39 = vstv %s6376_s23  ;;  %s10148_s23 = sld [smem:[#allocation2 + $0xac]] }
 0x674   : > { %5081 = vrot.lane.b32.xlu1 %v5070_v10, %s6608_s3  ;;  %5079 = vrot.lane.b32.xlu0 %v5069_v30, %s6608_s3 }
 0x676   : > { %v9931_v56 = vpop.permute.xlu1 %4750  ;;  %v9933_v3 = vpop.permute.xlu0 %4748 }
 0x677   : > { %13610 = vst [vmem:[#allocation727_spill] sm:$0xff] %v9931_v56  ;;  %13611 = vst [vmem:[#allocation728_spill] sm:$0xff] %v9933_v3  ;;  %v5096_v56 = vmul.f32 %v9614_v22, %v5090_v40  ;;  %v5095_v3 = vmul.f32 %v9617_v53, %v5090_v40  ;;  %v5129_v40 = vmul.f32 %v9584_v6, %v5125_v39 }
 0x678   : > { %5105 = vrot.lane.b32.xlu1 %v5092_v1, %s6608_s3  ;;  %5103 = vrot.lane.b32.xlu0 %v5091_v14, %s6608_s3 }
 0x67a   : > { %v9939_v10 = vpop.permute.xlu1 %4777  ;;  %v9941_v30 = vpop.permute.xlu0 %4775 }
 0x67b   : > { %13612 = vst [vmem:[#allocation729_spill] sm:$0xff] %v9939_v10  ;;  %13613 = vst [vmem:[#allocation730_spill] sm:$0xff] %v9941_v30  ;;  %v5127_v10 = vmul.f32 %v9570_v15, %v5125_v39  ;;  %v5126_v30 = vmul.f32 %v9573_v2, %v5125_v39 }
 0x67c   : > { %5109 = vrot.lane.b32.xlu1 %v5094_v23, %s6608_s3  ;;  %5107 = vrot.lane.b32.xlu0 %v5093_v11, %s6608_s3 }
 0x67e   : > { %v9947_v1 = vpop.permute.xlu1 %4781  ;;  %v9949_v14 = vpop.permute.xlu0 %4779 }
 0x67f   : > { %13614 = vst [vmem:[#allocation731_spill] sm:$0xff] %v9947_v1  ;;  %13615 = vst [vmem:[#allocation732_spill] sm:$0xff] %v9949_v14  ;;  %v5128_v14 = vmul.f32 %v9587_v4, %v5125_v39  ;;  %v5160_v1 = vstv %s6377_s16  ;;  %s10275_s16 = sld [smem:[#allocation2 + $0xb3]] }
 0x680   : > { %5113 = vrot.lane.b32.xlu1 %v5096_v56, %s6608_s3  ;;  %5111 = vrot.lane.b32.xlu0 %v5095_v3, %s6608_s3 }
 0x682   : > { %v9955_v23 = vpop.permute.xlu1 %4785  ;;  %v9957_v11 = vpop.permute.xlu0 %4783 }
 0x683   : > { %13616 = vst [vmem:[#allocation733_spill] sm:$0xff] %v9955_v23  ;;  %13617 = vst [vmem:[#allocation734_spill] sm:$0xff] %v9957_v11  ;;  %v5131_v23 = vmul.f32 %v9614_v22, %v5125_v39  ;;  %v5130_v11 = vmul.f32 %v9617_v53, %v5125_v39  ;;  %v5164_v39 = vmul.f32 %v9584_v6, %v5160_v1 }
 0x684   : > { %5140 = vrot.lane.b32.xlu1 %v5127_v10, %s6608_s3  ;;  %5138 = vrot.lane.b32.xlu0 %v5126_v30, %s6608_s3 }
 0x686   : > { %v9963_v56 = vpop.permute.xlu1 %4812  ;;  %v9965_v3 = vpop.permute.xlu0 %4810 }
 0x687   : > { %13618 = vst [vmem:[#allocation735_spill] sm:$0xff] %v9963_v56  ;;  %13619 = vst [vmem:[#allocation736_spill] sm:$0xff] %v9965_v3  ;;  %v5162_v56 = vmul.f32 %v9570_v15, %v5160_v1  ;;  %v5161_v3 = vmul.f32 %v9573_v2, %v5160_v1 }
 0x688   : > { %5144 = vrot.lane.b32.xlu1 %v5129_v40, %s6608_s3  ;;  %5142 = vrot.lane.b32.xlu0 %v5128_v14, %s6608_s3 }
 0x68a   : > { %v9971_v10 = vpop.permute.xlu1 %4816  ;;  %v9973_v30 = vpop.permute.xlu0 %4814 }
 0x68b   : > { %13620 = vst [vmem:[#allocation737_spill] sm:$0xff] %v9971_v10  ;;  %13621 = vst [vmem:[#allocation738_spill] sm:$0xff] %v9973_v30  ;;  %v5163_v30 = vmul.f32 %v9587_v4, %v5160_v1  ;;  %v5195_v10 = vstv %s6378_s17  ;;  %s10402_s17 = sld [smem:[#allocation2 + $0xba]] }
 0x68c   : > { %5148 = vrot.lane.b32.xlu1 %v5131_v23, %s6608_s3  ;;  %5146 = vrot.lane.b32.xlu0 %v5130_v11, %s6608_s3 }
 0x68e   : > { %v9979_v40 = vpop.permute.xlu1 %4820  ;;  %v9981_v14 = vpop.permute.xlu0 %4818 }
 0x68f   : > { %13622 = vst [vmem:[#allocation739_spill] sm:$0xff] %v9979_v40  ;;  %13623 = vst [vmem:[#allocation740_spill] sm:$0xff] %v9981_v14  ;;  %v5166_v40 = vmul.f32 %v9614_v22, %v5160_v1  ;;  %v5165_v14 = vmul.f32 %v9617_v53, %v5160_v1  ;;  %v5199_v1 = vmul.f32 %v9584_v6, %v5195_v10 }
 0x690   : > { %5175 = vrot.lane.b32.xlu1 %v5162_v56, %s6608_s3  ;;  %5173 = vrot.lane.b32.xlu0 %v5161_v3, %s6608_s3 }
 0x692   : > { %v9987_v23 = vpop.permute.xlu1 %4843  ;;  %v9989_v11 = vpop.permute.xlu0 %4841 }
 0x693   : > { %13624 = vst [vmem:[#allocation741_spill] sm:$0xff] %v9987_v23  ;;  %13625 = vst [vmem:[#allocation742_spill] sm:$0xff] %v9989_v11  ;;  %v5197_v23 = vmul.f32 %v9570_v15, %v5195_v10  ;;  %v5196_v11 = vmul.f32 %v9573_v2, %v5195_v10 }
 0x694   : > { %5179 = vrot.lane.b32.xlu1 %v5164_v39, %s6608_s3  ;;  %5177 = vrot.lane.b32.xlu0 %v5163_v30, %s6608_s3 }
 0x696   : > { %v9995_v56 = vpop.permute.xlu1 %4847  ;;  %v9997_v3 = vpop.permute.xlu0 %4845 }
 0x697   : > { %13626 = vst [vmem:[#allocation743_spill] sm:$0xff] %v9995_v56  ;;  %13627 = vst [vmem:[#allocation744_spill] sm:$0xff] %v9997_v3  ;;  %v5198_v3 = vmul.f32 %v9587_v4, %v5195_v10  ;;  %v5201_v56 = vmul.f32 %v9614_v22, %v5195_v10 }
 0x698   : > { %5183 = vrot.lane.b32.xlu1 %v5166_v40, %s6608_s3  ;;  %5181 = vrot.lane.b32.xlu0 %v5165_v14, %s6608_s3 }
 0x69a   : > { %v10003_v39 = vpop.permute.xlu1 %4871  ;;  %v10005_v30 = vpop.permute.xlu0 %4869 }
 0x69b   : > { %13628 = vst [vmem:[#allocation745_spill] sm:$0xff] %v10003_v39  ;;  %13629 = vst [vmem:[#allocation746_spill] sm:$0xff] %v10005_v30  ;;  %v5200_v30 = vmul.f32 %v9617_v53, %v5195_v10  ;;  %v5230_v39 = vstv %s6379_s21  ;;  %s10499_s21 = sld [smem:[#allocation2 + $0x31]] }
 0x69c   : > { %5210 = vrot.lane.b32.xlu1 %v5197_v23, %s6608_s3  ;;  %5208 = vrot.lane.b32.xlu0 %v5196_v11, %s6608_s3  ;;  %v5234_v10 = vmul.f32 %v9584_v6, %v5230_v39 }
 0x69e   : > { %v10011_v40 = vpop.permute.xlu1 %4875  ;;  %v10013_v14 = vpop.permute.xlu0 %4873 }
 0x69f   : > { %13630 = vst [vmem:[#allocation747_spill] sm:$0xff] %v10011_v40  ;;  %13631 = vst [vmem:[#allocation748_spill] sm:$0xff] %v10013_v14  ;;  %v5232_v40 = vmul.f32 %v9570_v15, %v5230_v39  ;;  %v5231_v14 = vmul.f32 %v9573_v2, %v5230_v39 }
 0x6a0   : > { %5214 = vrot.lane.b32.xlu1 %v5199_v1, %s6608_s3  ;;  %5212 = vrot.lane.b32.xlu0 %v5198_v3, %s6608_s3 }
 0x6a2   : > { %v10019_v23 = vpop.permute.xlu1 %4879  ;;  %v10021_v11 = vpop.permute.xlu0 %4877 }
 0x6a3   : > { %13632 = vst [vmem:[#allocation749_spill] sm:$0xff] %v10019_v23  ;;  %13633 = vst [vmem:[#allocation750_spill] sm:$0xff] %v10021_v11  ;;  %v5233_v11 = vmul.f32 %v9587_v4, %v5230_v39  ;;  %v5265_v23 = vstv %s6380_s24  ;;  %s10518_s24 = sld [smem:[#allocation2 + $0x38]] }
 0x6a4   : > { %5218 = vrot.lane.b32.xlu1 %v5201_v56, %s6608_s3  ;;  %5216 = vrot.lane.b32.xlu0 %v5200_v30, %s6608_s3 }
 0x6a6   : > { %v10027_v1 = vpop.permute.xlu1 %4906  ;;  %v10029_v3 = vpop.permute.xlu0 %4904 }
 0x6a7   : > { %13634 = vst [vmem:[#allocation751_spill] sm:$0xff] %v10027_v1  ;;  %13635 = vst [vmem:[#allocation752_spill] sm:$0xff] %v10029_v3  ;;  %v5236_v1 = vmul.f32 %v9614_v22, %v5230_v39  ;;  %v5235_v3 = vmul.f32 %v9617_v53, %v5230_v39  ;;  %v5269_v39 = vmul.f32 %v9584_v6, %v5265_v23 }
 0x6a8   : > { %5245 = vrot.lane.b32.xlu1 %v5232_v40, %s6608_s3  ;;  %5243 = vrot.lane.b32.xlu0 %v5231_v14, %s6608_s3 }
 0x6aa   : > { %v10035_v56 = vpop.permute.xlu1 %4910  ;;  %v10037_v30 = vpop.permute.xlu0 %4908 }
 0x6ab   : > { %13636 = vst [vmem:[#allocation753_spill] sm:$0xff] %v10035_v56  ;;  %13637 = vst [vmem:[#allocation754_spill] sm:$0xff] %v10037_v30  ;;  %v5267_v56 = vmul.f32 %v9570_v15, %v5265_v23  ;;  %v5266_v30 = vmul.f32 %v9573_v2, %v5265_v23 }
 0x6ac   : > { %5249 = vrot.lane.b32.xlu1 %v5234_v10, %s6608_s3  ;;  %5247 = vrot.lane.b32.xlu0 %v5233_v11, %s6608_s3 }
 0x6ae   : > { %v10043_v40 = vpop.permute.xlu1 %4914  ;;  %v10045_v14 = vpop.permute.xlu0 %4912 }
 0x6af   : > { %13638 = vst [vmem:[#allocation755_spill] sm:$0xff] %v10043_v40  ;;  %13639 = vst [vmem:[#allocation756_spill] sm:$0xff] %v10045_v14  ;;  %v5268_v14 = vmul.f32 %v9587_v4, %v5265_v23  ;;  %v5300_v40 = vstv %s6381_s26  ;;  %s10532_s26 = sld [smem:[#allocation2 + $0xc1]] }
 0x6b0   : > { %5253 = vrot.lane.b32.xlu1 %v5236_v1, %s6608_s3  ;;  %5251 = vrot.lane.b32.xlu0 %v5235_v3, %s6608_s3 }
 0x6b2   : > { %v10051_v10 = vpop.permute.xlu1 %4941  ;;  %v10053_v11 = vpop.permute.xlu0 %4939 }
 0x6b3   : > { %13640 = vst [vmem:[#allocation757_spill] sm:$0xff] %v10051_v10  ;;  %13641 = vst [vmem:[#allocation758_spill] sm:$0xff] %v10053_v11  ;;  %v5271_v10 = vmul.f32 %v9614_v22, %v5265_v23  ;;  %v5270_v11 = vmul.f32 %v9617_v53, %v5265_v23 }
 0x6b4   : > { %5280 = vrot.lane.b32.xlu1 %v5267_v56, %s6608_s3  ;;  %5278 = vrot.lane.b32.xlu0 %v5266_v30, %s6608_s3 }
 0x6b6   : > { %v10059_v1 = vpop.permute.xlu1 %4945  ;;  %v10061_v3 = vpop.permute.xlu0 %4943 }
 0x6b7   : > { %13642 = vst [vmem:[#allocation759_spill] sm:$0xff] %v10059_v1  ;;  %13643 = vst [vmem:[#allocation760_spill] sm:$0xff] %v10061_v3  ;;  %v5302_v3 = vmul.f32 %v9570_v15, %v5300_v40 }
 0x6b8   : > { %5284 = vrot.lane.b32.xlu1 %v5269_v39, %s6608_s3  ;;  %5282 = vrot.lane.b32.xlu0 %v5268_v14, %s6608_s3  ;;  %v5301_v39 = vmul.f32 %v9573_v2, %v5300_v40 }
 0x6ba   : > { %v10067_v56 = vpop.permute.xlu1 %4949  ;;  %v10069_v30 = vpop.permute.xlu0 %4947 }
 0x6bb   : > { %13644 = vst [vmem:[#allocation761_spill] sm:$0xff] %v10067_v56  ;;  %13645 = vst [vmem:[#allocation762_spill] sm:$0xff] %v10069_v30  ;;  %v5324_v30 = vstv %s6382_s27  ;;  %s10561_s27 = sld [smem:[#allocation2 + $0x3f]] }
 0x6bc   : > { %5288 = vrot.lane.b32.xlu1 %v5271_v10, %s6608_s3  ;;  %5286 = vrot.lane.b32.xlu0 %v5270_v11, %s6608_s3  ;;  %v5304_v10 = vmul.f32 %v9584_v6, %v5300_v40  ;;  %v5303_v11 = vmul.f32 %v9587_v4, %v5300_v40  ;;  %s6192_s3 = sld [smem:[#allocation2 + $0x1c]]  ;;  %v163_v40 = vstv %s10075_s6  ;;  %v5327_v62 = vmul.f32 %v9587_v4, %v5324_v30  ;;  %s10592_s6 = sld [smem:[#allocation2 + $0x46]] }
 0x6bd   : > { %v165_v48 = vmul.f32 %v6495_v57, %v163_v40  ;;  %v164_v34 = vmul.f32 %v6496_v47, %v163_v40  ;;  %v5330_v40 = vmul.f32 %v9614_v22, %v5324_v30  ;;  %v190_v22 = vmul.f32 %v6497_v17, %v187_v52 }
 0x6be   : > { %v10077_v14 = vpop.permute.xlu1 %4976  ;;  %v10079_v23 = vpop.permute.xlu0 %4974 }
 0x6bf   : > { %13646 = vst [vmem:[#allocation763_spill] sm:$0xff] %v10077_v14  ;;  %13647 = vst [vmem:[#allocation764_spill] sm:$0xff] %v10079_v23  ;;  %v167_v23 = vstv %s6189_s28  ;;  %v177_v14 = vstv %s6191_s30  ;;  %s10614_s28 = sld [smem:[#allocation2 + $0x4d]]  ;;  %s10686_s30 = sld [smem:[#allocation2 + $0x98]] }
 0x6c0   : > { %5311 = vrot.lane.b32.xlu1 %v5302_v3, %s6609_s22  ;;  %5309 = vrot.lane.b32.xlu0 %v5301_v39, %s6609_s22  ;;  %v5326_v3 = vmul.f32 %v9570_v15, %v5324_v30  ;;  %v5325_v39 = vmul.f32 %v9573_v2, %v5324_v30  ;;  %v168_v31 = vmul.f32 %v6496_v47, %v167_v23 }
 0x6c1   : > { %v178_v60 = vmul.f32 %v6496_v47, %v177_v14  ;;  %v179_v49 = vmul.f32 %v6495_v57, %v177_v14  ;;  %v180_v44 = vmul.f32 %v6497_v17, %v177_v14  ;;  %v247_v14 = vsel %vm214_vm0, %v6857_v29, %v6855_v28 }
 0x6c2   : > { %v10085_v56 = vpop.permute.xlu1 %4980  ;;  %v10087_v1 = vpop.permute.xlu0 %4978  ;;  %v182_v9 = vstv %s6192_s3  ;;  %v249_v28 = vsel %vm214_vm0, %v6873_v38, %v6871_v37  ;;  %v282_v29 = vsel %vm214_vm0, %v6881_v42, %v6879_v41  ;;  %v317_v38 = vsel %vm214_vm0, %v6905_v55, %v6903_v54  ;;  %s10698_s3 = sld [smem:[#allocation2 + $0x5b]] }
 0x6c3   : > { %13648 = vst [vmem:[#allocation765_spill] sm:$0xff] %v10085_v56  ;;  %13649 = vst [vmem:[#allocation766_spill] sm:$0xff] %v10087_v1  ;;  %v183_v43 = vmul.f32 %v6496_v47, %v182_v9  ;;  %v184_v36 = vmul.f32 %v6495_v57, %v182_v9  ;;  %v318_v41 = vsel %vm214_vm0, %v6913_v59, %v6911_v58 }
 0x6c4   : > { %5315 = vrot.lane.b32.xlu1 %v5304_v10, %s6609_s22  ;;  %5313 = vrot.lane.b32.xlu0 %v5303_v11, %s6609_s22  ;;  %v172_v10 = vstv %s6190_s29  ;;  %v5328_v11 = vmul.f32 %v9584_v6, %v5324_v30  ;;  %v10188_v55 = vadd.f32 %v317_v38, %v178_v60  ;;  %v319_v58 = vsel %vm214_vm0, %v6921_v0, %v6919_v63  ;;  %v13660_v63 = vld [vmem:[#allocation8_spill] sm:$0xff]  ;;  %v13678_v38 = vld [vmem:[#allocation22_spill] sm:$0xff]  ;;  %s10665_s29 = sld [smem:[#allocation2 + $0x54]] }
 0x6c5   : > { %v173_v16 = vmul.f32 %v6496_v47, %v172_v10  ;;  %v174_v5 = vmul.f32 %v6495_v57, %v172_v10  ;;  %v175_v61 = vmul.f32 %v6497_v17, %v172_v10  ;;  %v10124_v10 = vmul.f32 %v6497_v17, %v182_v9 }
 0x6c6   : > { %v10100_v1 = vpop.permute.xlu1 %4984  ;;  %v10102_v56 = vpop.permute.xlu0 %4982  ;;  %v352_v59 = vsel %vm214_vm0, %v6929_v8, %v6927_v7  ;;  %v354_v60 = vsel %vm214_vm0, %v6945_v21, %v6943_v18  ;;  %v387_v0 = vsel %vm214_vm0, %v13660_v63, %v6951_v26  ;;  %v13661_v7 = vld [vmem:[#allocation9_spill] sm:$0xff]  ;;  %v13662_v8 = vld [vmem:[#allocation10_spill] sm:$0xff]  ;;  %v10221_v21 = vadd.f32 %v319_v58, %v180_v44 }
 0x6c7   : > { %13650 = vst [vmem:[#allocation767_spill] sm:$0xff] %v10100_v1  ;;  %13651 = vst [vmem:[#allocation768_spill] sm:$0xff] %v10102_v56  ;;  %v169_v1 = vmul.f32 %v6495_v57, %v167_v23  ;;  %v170_v56 = vmul.f32 %v6497_v17, %v167_v23  ;;  %v5329_v23 = vmul.f32 %v9617_v53, %v5324_v30 }
 0x6c8   : > { %5339 = vrot.lane.b32.xlu1 %v5326_v3, %s6609_s22  ;;  %5337 = vrot.lane.b32.xlu0 %v5325_v39, %s6609_s22  ;;  %v215_v30 = vsel %vm214_vm0, %v6841_v20, %v6849_v25  ;;  %v189_v53 = vmul.f32 %v6495_v57, %v187_v52  ;;  %v193_v20 = vmul.f32 %v6496_v47, %v192_v27 }
 0x6c9   : > { %v194_v25 = vmul.f32 %v6495_v57, %v192_v27  ;;  %v10166_v47 = vadd.f32 %v247_v14, %v168_v31  ;;  %v13672_v14 = vld [vmem:[#allocation18_spill] sm:$0xff] }
 0x6ca   : > { %v10111_v3 = vpop.permute.xlu1 %5011  ;;  %v10113_v39 = vpop.permute.xlu0 %5009 }
 0x6cb   : > { %13652 = vst [vmem:[#allocation769_spill] sm:$0xff] %v10111_v3  ;;  %13653 = vst [vmem:[#allocation770_spill] sm:$0xff] %v10113_v39  ;;  %v5359_v3 = vstv %s10095_s8  ;;  %v216_v39 = vsel %vm214_vm0, %v6839_v19, %v6847_v24  ;;  %v248_v19 = vsel %vm214_vm0, %v6865_v33, %v6863_v32  ;;  %v283_v32 = vsel %vm214_vm0, %v6889_v46, %v6887_v45  ;;  %s11019_s8 = sld [smem:[#allocation2 + $0xad]] }
 0x6cc   : > { %5343 = vrot.lane.b32.xlu1 %v5328_v11, %s6609_s22  ;;  %5341 = vrot.lane.b32.xlu0 %v5327_v62, %s6609_s22  ;;  %v5361_v24 = vmul.f32 %v9570_v15, %v5359_v3  ;;  %v5360_v9 = vmul.f32 %v9573_v2, %v5359_v3  ;;  %v284_v33 = vsel %vm214_vm0, %v6897_v51, %v6895_v50  ;;  %v13666_v15 = vld [vmem:[#allocation648_spill] sm:$0xff] }
 0x6cd   : > { %v10168_v37 = vadd.f32 %v248_v19, %v169_v1  ;;  %v5363_v42 = vmul.f32 %v9584_v6, %v5359_v3  ;;  %v5362_v45 = vmul.f32 %v9587_v4, %v5359_v3  ;;  %v10180_v46 = vadd.f32 %v249_v28, %v170_v56  ;;  %v13667_v4 = vld [vmem:[#allocation13_spill] sm:$0xff]  ;;  %v13668_v1 = vld [vmem:[#allocation14_spill] sm:$0xff] }
 0x6ce   : > { %v10129_v11 = vpop.permute.xlu1 %5015  ;;  %v10131_v62 = vpop.permute.xlu0 %5013  ;;  %v10182_v50 = vadd.f32 %v282_v29, %v173_v16  ;;  %v10184_v51 = vadd.f32 %v283_v32, %v174_v5  ;;  %v10186_v54 = vadd.f32 %v284_v33, %v175_v61  ;;  %v353_v16 = vsel %vm214_vm0, %v6937_v13, %v6935_v12  ;;  %v13664_v12 = vld [vmem:[#allocation12_spill] sm:$0xff]  ;;  %v13677_v33 = vld [vmem:[#allocation21_spill] sm:$0xff] }
 0x6cf   : > { %13654 = vst [vmem:[#allocation771_spill] sm:$0xff] %v10129_v11  ;;  %13655 = vst [vmem:[#allocation772_spill] sm:$0xff] %v10131_v62  ;;  %v10146_v62 = vadd.f32 %v216_v39, %v165_v48  ;;  %v195_v11 = vmul.f32 %v6497_v17, %v192_v27  ;;  %v219_v17 = vadd.f32 %v215_v30, %v164_v34  ;;  %v13663_v48 = vld [vmem:[#allocation11_spill] sm:$0xff]  ;;  %v5394_v6 = vstv %s10148_s23  ;;  %v13671_v30 = vld [vmem:[#allocation17_spill] sm:$0xff]  ;;  %s11210_s23 = sld [smem:[#allocation2 + $0xa0]] }
 0x6d0   : > { %5347 = vrot.lane.b32.xlu1 %v5330_v40, %s6609_s22  ;;  %5345 = vrot.lane.b32.xlu0 %v5329_v23, %s6609_s22  ;;  %v10203_v61 = vadd.f32 %v318_v41, %v179_v49  ;;  %v388_v34 = vsel %vm214_vm0, %v13662_v8, %v13661_v7  ;;  %v389_v13 = vsel %vm214_vm0, %v13664_v12, %v13663_v48  ;;  %v13665_v49 = vld [vmem:[#allocation647_spill] sm:$0xff]  ;;  %v13670_v40 = vld [vmem:[#allocation16_spill] sm:$0xff]  ;;  %v13682_v7 = vld [vmem:[#allocation26_spill] sm:$0xff] }
 0x6d1   : > { %v5365_v57 = vmul.f32 %v13665_v49, %v5359_v3  ;;  %v5364_v18 = vmul.f32 %v13666_v15, %v5359_v3  ;;  %v10223_v2 = vadd.f32 %v352_v59, %v183_v43  ;;  %v10225_v26 = vadd.f32 %v353_v16, %v184_v36  ;;  %v13669_v39 = vld [vmem:[#allocation15_spill] sm:$0xff]  ;;  %v13674_v43 = vld [vmem:[#allocation20_spill] sm:$0xff]  ;;  %v13686_v48 = vld [vmem:[#allocation30_spill] sm:$0xff] }
 0x6d2   : > { %v10162_v52 = vpop.permute.xlu1 %5019  ;;  %v10164_v27 = vpop.permute.xlu0 %5017  ;;  %v422_v56 = vsel %vm214_vm0, %v13668_v1, %v13667_v4  ;;  %v423_v23 = vsel %vm214_vm0, %v13670_v40, %v13669_v39  ;;  %v424_v44 = vsel %vm214_vm0, %v13672_v14, %v13671_v30  ;;  %v13673_v3 = vld [vmem:[#allocation19_spill] sm:$0xff]  ;;  %v10248_v28 = vadd.f32 %v387_v0, %v10126_v35  ;;  %v13681_v0 = vld [vmem:[#allocation25_spill] sm:$0xff]  ;;  %v13690_v15 = vld [vmem:[#allocation32_spill] sm:$0xff] }
 0x6d3   : > { %13656 = vst [vmem:[#allocation773_spill] sm:$0xff] %v10162_v52  ;;  %13657 = vst [vmem:[#allocation774_spill] sm:$0xff] %v10164_v27  ;;  %v450_v19 = vsel %vm449_vm1, %v13674_v43, %v13673_v3  ;;  %v10250_v29 = vadd.f32 %v388_v34, %v189_v53  ;;  %v10252_v32 = vadd.f32 %v389_v13, %v190_v22  ;;  %v13679_v16 = vld [vmem:[#allocation23_spill] sm:$0xff]  ;;  %v13684_v34 = vld [vmem:[#allocation28_spill] sm:$0xff] }
 0x6d4   : > { %5374 = vrot.lane.b32.xlu1 %v5361_v24, %s6609_s22  ;;  %5372 = vrot.lane.b32.xlu0 %v5360_v9, %s6609_s22  ;;  %v10245_v9 = vadd.f32 %v354_v60, %v10124_v10  ;;  %v451_v41 = vsel %vm449_vm1, %v13678_v38, %v13677_v33  ;;  %v10267_v53 = vadd.f32 %v422_v56, %v193_v20  ;;  %v13680_v60 = vld [vmem:[#allocation24_spill] sm:$0xff]  ;;  %v13683_v20 = vld [vmem:[#allocation27_spill] sm:$0xff]  ;;  %v13691_v4 = vld [vmem:[#allocation33_spill] sm:$0xff] }
 0x6d5   : > { %v10269_v22 = vadd.f32 %v423_v23, %v194_v25  ;;  %v10271_v58 = vadd.f32 %v424_v44, %v195_v11  ;;  %v10273_v59 = vadd.f32 %v450_v19, %v219_v17  ;;  %v482_v63 = vsel %vm449_vm1, %v13680_v60, %v13679_v16  ;;  %v13685_v11 = vld [vmem:[#allocation29_spill] sm:$0xff]  ;;  %v13692_v1 = vld [vmem:[#allocation34_spill] sm:$0xff]  ;;  %v13693_v39 = vld [vmem:[#allocation35_spill] sm:$0xff] }
 0x6d6   : > { %v10199_v31 = vpop.permute.xlu1 %5046  ;;  %v10201_v5 = vpop.permute.xlu0 %5044  ;;  %v483_v8 = vsel %vm449_vm1, %v13682_v7, %v13681_v0  ;;  %v484_v25 = vsel %vm449_vm1, %v13684_v34, %v13683_v20  ;;  %v517_v17 = vsel %vm449_vm1, %v13686_v48, %v13685_v11  ;;  %v10294_v49 = vadd.f32 %v451_v41, %v10146_v62  ;;  %v13694_v40 = vld [vmem:[#allocation36_spill] sm:$0xff]  ;;  %v13695_v30 = vld [vmem:[#allocation37_spill] sm:$0xff]  ;;  %v13696_v14 = vld [vmem:[#allocation38_spill] sm:$0xff] }
 0x6d7   : > { %13658 = vst [vmem:[#allocation775_spill] sm:$0xff] %v10199_v31  ;;  %13659 = vst [vmem:[#allocation776_spill] sm:$0xff] %v10201_v5  ;;  %v519_v56 = vsel %vm449_vm1, %v13692_v1, %v13691_v4  ;;  %v552_v23 = vsel %vm449_vm1, %v13694_v40, %v13693_v39  ;;  %v553_v44 = vsel %vm449_vm1, %v13696_v14, %v13695_v30  ;;  %v10311_v62 = vld [vmem:[%s6701_s5 + $0xa8] sm:$0xff]  ;;  %v10315_v43 = vld [vmem:[%s6701_s5 + $0xa0] sm:$0xff]  ;;  %v5429_v40 = vstv %s10275_s16  ;;  %s11212_s16 = sld [smem:[#allocation2 + $0xbb]] }
 0x6d8   : > { %5378 = vrot.lane.b32.xlu1 %v5363_v42, %s6609_s22  ;;  %5376 = vrot.lane.b32.xlu0 %v5362_v45, %s6609_s22  ;;  %v10260_v42 = vld [vmem:[%s6701_s5 + $0x98] sm:$0xff]  ;;  %v10264_v45 = vld [vmem:[%s6701_s5 + $0x90] sm:$0xff]  ;;  %v5398_v3 = vmul.f32 %v10311_v62, %v5394_v6  ;;  %v5397_v19 = vmul.f32 %v10315_v43, %v5394_v6  ;;  %v488_v33 = vadd.f32 %v482_v63, %v10166_v47  ;;  %v13698_v60 = vld [vmem:[#allocation40_spill] sm:$0xff] }
 0x6d9   : > { %v5396_v10 = vmul.f32 %v10260_v42, %v5394_v6  ;;  %v5395_v35 = vmul.f32 %v10264_v45, %v5394_v6  ;;  %v489_v38 = vadd.f32 %v483_v8, %v10168_v37  ;;  %v490_v41 = vadd.f32 %v484_v25, %v10180_v46  ;;  %v13699_v7 = vld [vmem:[#allocation41_spill] sm:$0xff]  ;;  %v13700_v20 = vld [vmem:[#allocation42_spill] sm:$0xff]  ;;  %v13701_v11 = vld [vmem:[#allocation43_spill] sm:$0xff] }
 0x6da   : > { %v10240_v36 = vpop.permute.xlu1 %5050  ;;  %v10242_v24 = vpop.permute.xlu0 %5048  ;;  %v523_v16 = vadd.f32 %v517_v17, %v10182_v50  ;;  %v587_v34 = vsel %vm449_vm1, %v13700_v20, %v13699_v7  ;;  %v13702_v47 = vld [vmem:[#allocation44_spill] sm:$0xff]  ;;  %v525_v50 = vadd.f32 %v519_v56, %v10186_v54  ;;  %v10341_v8 = vadd.f32 %v553_v44, %v10203_v61  ;;  %v13705_v25 = vld [vmem:[#allocation45_spill] sm:$0xff]  ;;  %v13706_v48 = vld [vmem:[#allocation46_spill] sm:$0xff] }
 0x6db   : > { %13675 = vst [vmem:[#allocation8_spill] sm:$0xff] %v10240_v36  ;;  %13676 = vst [vmem:[#allocation9_spill] sm:$0xff] %v10242_v24  ;;  %v588_v37 = vsel %vm449_vm1, %v13702_v47, %v13701_v11  ;;  %v589_v17 = vsel %vm449_vm1, %v13706_v48, %v13705_v25  ;;  %v10352_v54 = vld [vmem:[%s6701_s5 + $0xb8] sm:$0x3f]  ;;  %v10356_v4 = vld [vmem:[%s6701_s5 + $0xb0] sm:$0x3f]  ;;  %v10361_v56 = vadd.f32 %v587_v34, %v10223_v2  ;;  %v1614_v24 = vstv %s10499_s21 }
 0x6dc   : > { %5382 = vrot.lane.b32.xlu1 %v5365_v57, %s6609_s22  ;;  %5380 = vrot.lane.b32.xlu0 %v5364_v18, %s6609_s22  ;;  %v13689_v57 = vld [vmem:[#allocation31_spill] sm:$0xff]  ;;  %v5399_v61 = vmul.f32 %v10356_v4, %v5394_v6  ;;  %v10364_v39 = vadd.f32 %v588_v37, %v10225_v26  ;;  %v13710_v30 = vld [vmem:[#allocation50_spill] sm:$0xff]  ;;  %v595_v20 = vadd.f32 %v589_v17, %v10245_v9  ;;  %v13719_v11 = vld [vmem:[#allocation57_spill] sm:$0xff]  ;;  %s11377_s21 = sld [smem:[#allocation2 + $0x62]] }
 0x6dd   : > { %v518_v18 = vsel %vm449_vm1, %v13690_v15, %v13689_v57  ;;  %v13707_v57 = vld [vmem:[#allocation47_spill] sm:$0xff]  ;;  %v13708_v15 = vld [vmem:[#allocation48_spill] sm:$0xff]  ;;  %v13720_v47 = vld [vmem:[#allocation58_spill] sm:$0xff]  ;;  %v5431_v9 = vmul.f32 %v10260_v42, %v5429_v40 }
 0x6de   : > { %v10289_v12 = vpop.permute.xlu1 %5054  ;;  %v10291_v13 = vpop.permute.xlu0 %5052  ;;  %v13711_v44 = vld [vmem:[#allocation51_spill] sm:$0xff]  ;;  %v659_v37 = vsel %vm449_vm1, %v13720_v47, %v13719_v11  ;;  %v13722_v48 = vld [vmem:[#allocation60_spill] sm:$0xff]  ;;  %v13804_v31 = vld [vmem:[#allocation130_spill] sm:$0xff] }
 0x6df   : > { %13687 = vst [vmem:[#allocation10_spill] sm:$0xff] %v10289_v12  ;;  %13688 = vst [vmem:[#allocation11_spill] sm:$0xff] %v10291_v13  ;;  %v13721_v25 = vld [vmem:[#allocation59_spill] sm:$0xff]  ;;  %v13730_v47 = vld [vmem:[#allocation68_spill] sm:$0xff] }
 0x6e0   : > { %5409 = vrot.lane.b32.xlu1 %v5396_v10, %s6609_s22  ;;  %5407 = vrot.lane.b32.xlu0 %v5395_v35, %s6609_s22  ;;  %v524_v10 = vadd.f32 %v518_v18, %v10184_v51  ;;  %v13697_v35 = vld [vmem:[#allocation39_spill] sm:$0xff]  ;;  %v10338_v51 = vadd.f32 %v552_v23, %v10188_v55  ;;  %v622_v18 = vsel %vm449_vm1, %v13708_v15, %v13707_v57  ;;  %v13709_v23 = vld [vmem:[#allocation49_spill] sm:$0xff]  ;;  %v13802_v5 = vld [vmem:[#allocation128_spill] sm:$0xff] }
 0x6e1   : > { %v554_v0 = vsel %vm449_vm1, %v13698_v60, %v13697_v35  ;;  %v5400_v55 = vmul.f32 %v10352_v54, %v5394_v6  ;;  %v623_v14 = vsel %vm449_vm1, %v13710_v30, %v13709_v23  ;;  %v13713_v35 = vld [vmem:[#allocation53_spill] sm:$0xff]  ;;  %v13714_v60 = vld [vmem:[#allocation54_spill] sm:$0xff]  ;;  %v628_v34 = vadd.f32 %v622_v18, %v10248_v28  ;;  %v13729_v11 = vld [vmem:[#allocation67_spill] sm:$0xff] }
 0x6e2   : > { %v10332_v63 = vpop.permute.xlu1 %5077  ;;  %v10334_v46 = vpop.permute.xlu0 %5075  ;;  %v560_v1 = vadd.f32 %v554_v0, %v10221_v21  ;;  %v657_v6 = vsel %vm449_vm1, %v13714_v60, %v13713_v35  ;;  %v13715_v21 = vld [vmem:[#allocation55_spill] sm:$0xff]  ;;  %v13716_v0 = vld [vmem:[#allocation56_spill] sm:$0xff]  ;;  %v685_v57 = vsel %vm684_vm2, %v13722_v48, %v13721_v25  ;;  %v13723_v15 = vld [vmem:[#allocation61_spill] sm:$0xff]  ;;  %v5430_v28 = vmul.f32 %v10264_v45, %v5429_v40 }
 0x6e3   : > { %13703 = vst [vmem:[#allocation12_spill] sm:$0xff] %v10332_v63  ;;  %13704 = vst [vmem:[#allocation647_spill] sm:$0xff] %v10334_v46  ;;  %v658_v2 = vsel %vm449_vm1, %v13716_v0, %v13715_v21  ;;  %v13724_v23 = vld [vmem:[#allocation62_spill] sm:$0xff]  ;;  %v629_v17 = vadd.f32 %v623_v14, %v10250_v29  ;;  %v13725_v35 = vld [vmem:[#allocation63_spill] sm:$0xff]  ;;  %v719_v29 = vsel %vm684_vm2, %v13730_v47, %v13729_v11 }
 0x6e4   : > { %5413 = vrot.lane.b32.xlu1 %v5398_v3, %s6609_s22  ;;  %5411 = vrot.lane.b32.xlu0 %v5397_v19, %s6609_s22  ;;  %v13712_v3 = vld [vmem:[#allocation52_spill] sm:$0xff]  ;;  %v686_v30 = vsel %vm684_vm2, %v13724_v23, %v13723_v15  ;;  %v13727_v21 = vld [vmem:[#allocation65_spill] sm:$0xff]  ;;  %v13735_v48 = vld [vmem:[#allocation71_spill] sm:$0xff] }
 0x6e5   : > { %v624_v19 = vsel %vm449_vm1, %v13712_v3, %v13711_v44  ;;  %v663_v44 = vadd.f32 %v657_v6, %v10267_v53  ;;  %v664_v3 = vadd.f32 %v658_v2, %v10269_v22  ;;  %v13726_v60 = vld [vmem:[#allocation64_spill] sm:$0xff]  ;;  %v13731_v14 = vld [vmem:[#allocation69_spill] sm:$0xff]  ;;  %v665_v6 = vadd.f32 %v659_v37, %v10271_v58  ;;  %v13739_v11 = vld [vmem:[#allocation75_spill] sm:$0xff] }
 0x6e6   : > { %v10379_v7 = vpop.permute.xlu1 %5081  ;;  %v10381_v26 = vpop.permute.xlu0 %5079  ;;  %v630_v18 = vadd.f32 %v624_v19, %v10252_v32  ;;  %v13732_v32 = vld [vmem:[#allocation70_spill] sm:$0xff]  ;;  %v10422_v2 = vadd.f32 %v685_v57, %v10273_v59  ;;  %v10425_v25 = vadd.f32 %v686_v30, %v10294_v49  ;;  %v13736_v15 = vld [vmem:[#allocation72_spill] sm:$0xff]  ;;  %v5433_v58 = vmul.f32 %v10311_v62, %v5429_v40  ;;  %v13779_v13 = vld [vmem:[#allocation109_spill] sm:$0xff] }
 0x6e7   : > { %13717 = vst [vmem:[#allocation648_spill] sm:$0xff] %v10379_v7  ;;  %13718 = vst [vmem:[#allocation13_spill] sm:$0xff] %v10381_v26  ;;  %v752_v53 = vsel %vm684_vm2, %v13732_v32, %v13731_v14  ;;  %v753_v23 = vsel %vm684_vm2, %v13736_v15, %v13735_v48  ;;  %v5432_v59 = vmul.f32 %v10315_v43, %v5429_v40  ;;  %v13740_v47 = vld [vmem:[#allocation76_spill] sm:$0xff]  ;;  %v13741_v14 = vld [vmem:[#allocation77_spill] sm:$0xff]  ;;  %v1636_v26 = vstv %s10592_s6  ;;  %s11485_s6 = sld [smem:[#allocation2 + $0x7e]] }
 0x6e8   : > { %5417 = vrot.lane.b32.xlu1 %v5400_v55, %s6609_s22  ;;  %5415 = vrot.lane.b32.xlu0 %v5399_v61, %s6609_s22  ;;  %v717_v55 = vsel %vm684_vm2, %v13726_v60, %v13725_v35  ;;  %v13728_v61 = vld [vmem:[#allocation66_spill] sm:$0xff]  ;;  %v13737_v35 = vld [vmem:[#allocation73_spill] sm:$0xff]  ;;  %v10441_v57 = vadd.f32 %v719_v29, %v490_v41  ;;  %v10443_v30 = vadd.f32 %v752_v53, %v523_v16  ;;  %v13743_v48 = vld [vmem:[#allocation79_spill] sm:$0xff] }
 0x6e9   : > { %v718_v0 = vsel %vm684_vm2, %v13728_v61, %v13727_v21  ;;  %v13738_v60 = vld [vmem:[#allocation74_spill] sm:$0xff]  ;;  %v10437_v37 = vadd.f32 %v717_v55, %v488_v33  ;;  %v10445_v61 = vadd.f32 %v753_v23, %v524_v10  ;;  %v13744_v15 = vld [vmem:[#allocation80_spill] sm:$0xff]  ;;  %v13747_v10 = vld [vmem:[#allocation81_spill] sm:$0xff] }
 0x6ea   : > { %v10416_v19 = vpop.permute.xlu1 %5105  ;;  %v10418_v22 = vpop.permute.xlu0 %5103  ;;  %v754_v21 = vsel %vm684_vm2, %v13738_v60, %v13737_v35  ;;  %v10439_v49 = vadd.f32 %v718_v0, %v489_v38  ;;  %v789_v33 = vsel %vm684_vm2, %v13744_v15, %v13743_v48  ;;  %v13748_v55 = vld [vmem:[#allocation82_spill] sm:$0xff]  ;;  %v13749_v29 = vld [vmem:[#allocation83_spill] sm:$0xff]  ;;  %v13750_v53 = vld [vmem:[#allocation84_spill] sm:$0xff] }
 0x6eb   : > { %13733 = vst [vmem:[#allocation14_spill] sm:$0xff] %v10416_v19  ;;  %13734 = vst [vmem:[#allocation15_spill] sm:$0xff] %v10418_v22  ;;  %v10460_v16 = vadd.f32 %v754_v21, %v525_v50  ;;  %v822_v0 = vsel %vm684_vm2, %v13748_v55, %v13747_v10  ;;  %v823_v23 = vsel %vm684_vm2, %v13750_v53, %v13749_v29  ;;  %v13751_v35 = vld [vmem:[#allocation85_spill] sm:$0xff]  ;;  %v13752_v60 = vld [vmem:[#allocation86_spill] sm:$0xff]  ;;  %v5464_v55 = vstv %s10402_s17  ;;  %s11344_s17 = sld [smem:[#allocation2 + $0xa7]] }
 0x6ec   : > { %5444 = vrot.lane.b32.xlu1 %v5431_v9, %s6609_s22  ;;  %5442 = vrot.lane.b32.xlu0 %v5430_v28, %s6609_s22  ;;  %v787_v9 = vsel %vm684_vm2, %v13740_v47, %v13739_v11  ;;  %v13742_v28 = vld [vmem:[#allocation78_spill] sm:$0xff]  ;;  %v824_v11 = vsel %vm684_vm2, %v13752_v60, %v13751_v35  ;;  %v13753_v47 = vld [vmem:[#allocation87_spill] sm:$0xff]  ;;  %v5435_v50 = vmul.f32 %v10352_v54, %v5429_v40  ;;  %v13755_v29 = vld [vmem:[#allocation89_spill] sm:$0xff] }
 0x6ed   : > { %v788_v32 = vsel %vm684_vm2, %v13742_v28, %v13741_v14  ;;  %v13754_v14 = vld [vmem:[#allocation88_spill] sm:$0xff]  ;;  %v5434_v21 = vmul.f32 %v10356_v4, %v5429_v40  ;;  %v10479_v48 = vadd.f32 %v787_v9, %v10338_v51  ;;  %v10484_v10 = vadd.f32 %v789_v33, %v560_v1  ;;  %v13756_v53 = vld [vmem:[#allocation90_spill] sm:$0xff]  ;;  %v13761_v51 = vld [vmem:[#allocation95_spill] sm:$0xff] }
 0x6ee   : > { %v10456_v38 = vpop.permute.xlu1 %5109  ;;  %v10458_v41 = vpop.permute.xlu0 %5107  ;;  %v857_v28 = vsel %vm684_vm2, %v13754_v14, %v13753_v47  ;;  %v10482_v15 = vadd.f32 %v788_v32, %v10341_v8  ;;  %v858_v35 = vsel %vm684_vm2, %v13756_v53, %v13755_v29  ;;  %v13758_v60 = vld [vmem:[#allocation92_spill] sm:$0xff]  ;;  %v13759_v47 = vld [vmem:[#allocation93_spill] sm:$0xff]  ;;  %v13760_v14 = vld [vmem:[#allocation94_spill] sm:$0xff]  ;;  %v10506_v33 = vadd.f32 %v822_v0, %v10361_v56 }
 0x6ef   : > { %13745 = vst [vmem:[#allocation16_spill] sm:$0xff] %v10456_v38  ;;  %13746 = vst [vmem:[#allocation17_spill] sm:$0xff] %v10458_v41  ;;  %v892_v40 = vsel %vm684_vm2, %v13760_v14, %v13759_v47  ;;  %v13762_v9 = vld [vmem:[#allocation96_spill] sm:$0xff]  ;;  %v10509_v29 = vadd.f32 %v823_v23, %v10364_v39  ;;  %v10511_v53 = vadd.f32 %v824_v11, %v595_v20  ;;  %v13766_v47 = vld [vmem:[#allocation98_spill] sm:$0xff] }
 0x6f0   : > { %5448 = vrot.lane.b32.xlu1 %v5433_v58, %s6609_s22  ;;  %5446 = vrot.lane.b32.xlu0 %v5432_v59, %s6609_s22  ;;  %v13757_v58 = vld [vmem:[#allocation91_spill] sm:$0xff]  ;;  %v893_v8 = vsel %vm684_vm2, %v13762_v9, %v13761_v51  ;;  %v5466_v56 = vmul.f32 %v10260_v42, %v5464_v55  ;;  %v5465_v0 = vmul.f32 %v10264_v45, %v5464_v55  ;;  %v13769_v51 = vld [vmem:[#allocation101_spill] sm:$0xff]  ;;  %v13806_v27 = vld [vmem:[#allocation132_spill] sm:$0xff] }
 0x6f1   : > { %v859_v59 = vsel %vm684_vm2, %v13758_v60, %v13757_v58  ;;  %v10513_v58 = vadd.f32 %v857_v28, %v628_v34  ;;  %v13765_v60 = vld [vmem:[#allocation97_spill] sm:$0xff]  ;;  %v10524_v39 = vadd.f32 %v858_v35, %v629_v17  ;;  %v10528_v34 = vadd.f32 %v892_v40, %v663_v44  ;;  %v13767_v11 = vld [vmem:[#allocation99_spill] sm:$0xff]  ;;  %v13768_v28 = vld [vmem:[#allocation100_spill] sm:$0xff] }
 0x6f2   : > { %v10501_v1 = vpop.permute.xlu1 %5113  ;;  %v10503_v32 = vpop.permute.xlu0 %5111  ;;  %v894_v14 = vsel %vm684_vm2, %v13766_v47, %v13765_v60  ;;  %v10526_v20 = vadd.f32 %v859_v59, %v630_v18  ;;  %v10530_v23 = vadd.f32 %v893_v8, %v664_v3  ;;  %v13771_v60 = vld [vmem:[#allocation103_spill] sm:$0xff]  ;;  %v13772_v47 = vld [vmem:[#allocation104_spill] sm:$0xff]  ;;  %v13773_v18 = vld [vmem:[#allocation105_spill] sm:$0xff] }
 0x6f3   : > { %13763 = vst [vmem:[#allocation18_spill] sm:$0xff] %v10501_v1  ;;  %13764 = vst [vmem:[#allocation19_spill] sm:$0xff] %v10503_v32  ;;  %v952_v17 = vsel %vm919_vm3, %v13772_v47, %v13771_v60  ;;  %v13774_v35 = vld [vmem:[#allocation106_spill] sm:$0xff]  ;;  %v10550_v40 = vadd.f32 %v894_v14, %v665_v6  ;;  %v13777_v8 = vld [vmem:[#allocation107_spill] sm:$0xff]  ;;  %v5468_v14 = vmul.f32 %v10311_v62, %v5464_v55 }
 0x6f4   : > { %5452 = vrot.lane.b32.xlu1 %v5435_v50, %s6609_s22  ;;  %5450 = vrot.lane.b32.xlu0 %v5434_v21, %s6609_s22  ;;  %v920_v50 = vsel %vm919_vm3, %v13768_v28, %v13767_v11  ;;  %v13770_v21 = vld [vmem:[#allocation102_spill] sm:$0xff]  ;;  %v953_v44 = vsel %vm919_vm3, %v13774_v35, %v13773_v18  ;;  %v13778_v11 = vld [vmem:[#allocation108_spill] sm:$0xff]  ;;  %v13781_v60 = vld [vmem:[#allocation111_spill] sm:$0xff] }
 0x6f5   : > { %v921_v9 = vsel %vm919_vm3, %v13770_v21, %v13769_v51  ;;  %v954_v28 = vsel %vm919_vm3, %v13778_v11, %v13777_v8  ;;  %v13780_v51 = vld [vmem:[#allocation110_spill] sm:$0xff]  ;;  %v13782_v47 = vld [vmem:[#allocation112_spill] sm:$0xff]  ;;  %v13783_v18 = vld [vmem:[#allocation113_spill] sm:$0xff]  ;;  %v5467_v8 = vmul.f32 %v10315_v43, %v5464_v55 }
 0x6f6   : > { %v10546_v3 = vpop.permute.xlu1 %5140  ;;  %v10548_v59 = vpop.permute.xlu0 %5138  ;;  %v987_v21 = vsel %vm919_vm3, %v13780_v51, %v13779_v13  ;;  %v988_v12 = vsel %vm919_vm3, %v13782_v47, %v13781_v60  ;;  %v13784_v35 = vld [vmem:[#allocation114_spill] sm:$0xff]  ;;  %v10571_v13 = vadd.f32 %v920_v50, %v10422_v2  ;;  %v10574_v11 = vadd.f32 %v921_v9, %v10425_v25  ;;  %v13786_v47 = vld [vmem:[#allocation116_spill] sm:$0xff]  ;;  %v13834_v38 = vld [vmem:[#allocation151_spill] sm:$0xff] }
 0x6f7   : > { %13775 = vst [vmem:[#allocation20_spill] sm:$0xff] %v10546_v3  ;;  %13776 = vst [vmem:[#allocation21_spill] sm:$0xff] %v10548_v59  ;;  %v989_v6 = vsel %vm919_vm3, %v13784_v35, %v13783_v18  ;;  %v10577_v51 = vadd.f32 %v952_v17, %v10437_v37  ;;  %v10580_v60 = vadd.f32 %v953_v44, %v10439_v49  ;;  %v13787_v35 = vld [vmem:[#allocation117_spill] sm:$0xff]  ;;  %v13788_v2 = vld [vmem:[#allocation118_spill] sm:$0xff]  ;;  %v1652_v3 = vstv %s10665_s29  ;;  %s11537_s29 = sld [smem:[#allocation2 + $0x85]] }
 0x6f8   : > { %5479 = vrot.lane.b32.xlu1 %v5466_v56, %s6609_s22  ;;  %5477 = vrot.lane.b32.xlu0 %v5465_v0, %s6609_s22  ;;  %v10583_v56 = vadd.f32 %v954_v28, %v10441_v57  ;;  %v13785_v0 = vld [vmem:[#allocation115_spill] sm:$0xff]  ;;  %v1023_v50 = vsel %vm919_vm3, %v13788_v2, %v13787_v35  ;;  %v10599_v49 = vadd.f32 %v987_v21, %v10443_v30  ;;  %v13792_v44 = vld [vmem:[#allocation120_spill] sm:$0xff]  ;;  %v1620_v2 = vstv %s10518_s24  ;;  %v10627_v21 = vld [vmem:[%s6701_s5 + $0x30] sm:$0xff]  ;;  %s11421_s24 = sld [smem:[#allocation2 + $0x69]] }
 0x6f9   : > { %v1022_v18 = vsel %vm919_vm3, %v13786_v47, %v13785_v0  ;;  %v10602_v57 = vadd.f32 %v988_v12, %v10445_v61  ;;  %v10605_v9 = vadd.f32 %v989_v6, %v10460_v16  ;;  %v13791_v17 = vld [vmem:[#allocation119_spill] sm:$0xff]  ;;  %v13793_v0 = vld [vmem:[#allocation121_spill] sm:$0xff]  ;;  %v13794_v47 = vld [vmem:[#allocation122_spill] sm:$0xff]  ;;  %v5470_v12 = vmul.f32 %v10352_v54, %v5464_v55 }
 0x6fa   : > { %v10594_v25 = vpop.permute.xlu1 %5144  ;;  %v10596_v37 = vpop.permute.xlu0 %5142  ;;  %v1024_v28 = vsel %vm919_vm3, %v13792_v44, %v13791_v17  ;;  %v1057_v35 = vsel %vm919_vm3, %v13794_v47, %v13793_v0  ;;  %v5469_v30 = vmul.f32 %v10356_v4, %v5464_v55  ;;  %v10621_v61 = vadd.f32 %v1022_v18, %v10479_v48  ;;  %v13796_v44 = vld [vmem:[#allocation124_spill] sm:$0xff]  ;;  %v13797_v0 = vld [vmem:[#allocation125_spill] sm:$0xff]  ;;  %v13798_v47 = vld [vmem:[#allocation126_spill] sm:$0xff] }
 0x6fb   : > { %13789 = vst [vmem:[#allocation22_spill] sm:$0xff] %v10594_v25  ;;  %13790 = vst [vmem:[#allocation23_spill] sm:$0xff] %v10596_v37  ;;  %v10624_v16 = vadd.f32 %v1023_v50, %v10482_v15  ;;  %v10630_v6 = vmul.f32 %v10627_v21, %v1614_v24  ;;  %v5499_v17 = vstv %s10532_s26  ;;  %v1059_v48 = vsel %vm919_vm3, %v13798_v47, %v13797_v0  ;;  %v10643_v18 = vld [vmem:[%s6701_s5 + $0x40] sm:$0xff]  ;;  %v13803_v47 = vld [vmem:[#allocation129_spill] sm:$0xff]  ;;  %s11449_s26 = sld [smem:[#allocation2 + $0x70]] }
 0x6fc   : > { %5483 = vrot.lane.b32.xlu1 %v5468_v14, %s6609_s22  ;;  %5481 = vrot.lane.b32.xlu0 %v5467_v8, %s6609_s22  ;;  %v10634_v14 = vadd.f32 %v1024_v28, %v10484_v10  ;;  %v13795_v8 = vld [vmem:[#allocation123_spill] sm:$0xff]  ;;  %v10646_v15 = vmul.f32 %v10643_v18, %v1614_v24  ;;  %v10653_v10 = vadd.f32 %v1057_v35, %v10506_v33  ;;  %v1628_v0 = vstv %s10561_s27  ;;  %v13818_v25 = vld [vmem:[#allocation142_spill] sm:$0xff]  ;;  %v13835_v22 = vld [vmem:[#allocation152_spill] sm:$0xff]  ;;  %s11480_s27 = sld [smem:[#allocation2 + $0x77]] }
 0x6fd   : > { %v1058_v55 = vsel %vm919_vm3, %v13796_v44, %v13795_v8  ;;  %v13801_v28 = vld [vmem:[#allocation127_spill] sm:$0xff]  ;;  %v10659_v44 = vmul.f32 %v10627_v21, %v1620_v2  ;;  %v1093_v24 = vsel %vm919_vm3, %v13804_v31, %v13803_v47  ;;  %v5501_v33 = vmul.f32 %v10260_v42, %v5499_v17  ;;  %v10681_v47 = vld [vmem:[%s6701_s5 + $0x50] sm:$0x3f] }
 0x6fe   : > { %v10648_v50 = vpop.permute.xlu1 %5148  ;;  %v10650_v36 = vpop.permute.xlu0 %5146  ;;  %v1092_v8 = vsel %vm919_vm3, %v13802_v5, %v13801_v28  ;;  %v5500_v5 = vmul.f32 %v10264_v45, %v5499_v17  ;;  %v10672_v35 = vadd.f32 %v1058_v55, %v10509_v29  ;;  %v10675_v28 = vadd.f32 %v1059_v48, %v10511_v53  ;;  %v13807_v29 = vld [vmem:[#allocation133_spill] sm:$0xff]  ;;  %v13808_v55 = vld [vmem:[#allocation134_spill] sm:$0xff] }
 0x6ff   : > { %13799 = vst [vmem:[#allocation24_spill] sm:$0xff] %v10648_v50  ;;  %13800 = vst [vmem:[#allocation25_spill] sm:$0xff] %v10650_v36  ;;  %v10678_v31 = vmul.f32 %v10643_v18, %v1620_v2  ;;  %v1127_v53 = vsel %vm919_vm3, %v13808_v55, %v13807_v29  ;;  %v10695_v48 = vmul.f32 %v10627_v21, %v1628_v0  ;;  %v13813_v36 = vld [vmem:[#allocation137_spill] sm:$0xff]  ;;  %v13814_v50 = vld [vmem:[#allocation138_spill] sm:$0xff] }
 0x700   : > { %5487 = vrot.lane.b32.xlu1 %v5470_v12, %s6609_s22  ;;  %5485 = vrot.lane.b32.xlu0 %v5469_v30, %s6609_s22  ;;  %v10684_v12 = vmul.f32 %v10681_v47, %v1620_v2  ;;  %v13805_v30 = vld [vmem:[#allocation131_spill] sm:$0xff]  ;;  %v10705_v46 = vadd.f32 %v1092_v8, %v10513_v58  ;;  %v10708_v63 = vadd.f32 %v1093_v24, %v10524_v39  ;;  %v13830_v32 = vld [vmem:[#allocation150_spill] sm:$0xff] }
 0x701   : > { %v1094_v52 = vsel %vm919_vm3, %v13806_v27, %v13805_v30  ;;  %v13811_v27 = vld [vmem:[#allocation135_spill] sm:$0xff]  ;;  %v13812_v30 = vld [vmem:[#allocation136_spill] sm:$0xff]  ;;  %v10714_v55 = vmul.f32 %v10643_v18, %v1628_v0  ;;  %v1129_v37 = vsel %vm919_vm3, %v13814_v50, %v13813_v36  ;;  %v5503_v58 = vmul.f32 %v10311_v62, %v5499_v17 }
 0x702   : > { %v10700_v7 = vpop.permute.xlu1 %5175  ;;  %v10702_v2 = vpop.permute.xlu0 %5173  ;;  %v1128_v29 = vsel %vm919_vm3, %v13812_v30, %v13811_v27  ;;  %v5502_v39 = vmul.f32 %v10315_v43, %v5499_v17  ;;  %v10725_v8 = vadd.f32 %v1094_v52, %v10526_v20  ;;  %v10728_v24 = vadd.f32 %v1127_v53, %v10528_v34 }
 0x703   : > { %13809 = vst [vmem:[#allocation26_spill] sm:$0xff] %v10700_v7  ;;  %13810 = vst [vmem:[#allocation27_spill] sm:$0xff] %v10702_v2  ;;  %v1644_v7 = vstv %s10614_s28  ;;  %v10731_v27 = vmul.f32 %v10681_v47, %v1628_v0  ;;  %v10734_v36 = vmul.f32 %v10627_v21, %v1636_v26  ;;  %v10737_v50 = vadd.f32 %v1128_v29, %v10530_v23  ;;  %v13817_v2 = vld [vmem:[#allocation141_spill] sm:$0xff]  ;;  %v13821_v23 = vld [vmem:[#allocation143_spill] sm:$0xff]  ;;  %s11505_s28 = sld [smem:[#allocation2 + $0x99]] }
 0x704   : > { %5514 = vrot.lane.b32.xlu1 %v5501_v33, %s6609_s22  ;;  %5512 = vrot.lane.b32.xlu0 %v5500_v5, %s6609_s22  ;;  %v13815_v33 = vld [vmem:[#allocation139_spill] sm:$0xff]  ;;  %v13816_v5 = vld [vmem:[#allocation140_spill] sm:$0xff]  ;;  %v1156_v52 = vsel %vm1154_vm4, %v13818_v25, %v13817_v2  ;;  %v10746_v20 = vmul.f32 %v10643_v18, %v1636_v26  ;;  %v10753_v53 = vadd.f32 %v1129_v37, %v10550_v40  ;;  %v13824_v2 = vld [vmem:[#allocation145_spill] sm:$0xff] }
 0x705   : > { %v1155_v30 = vsel %vm1154_vm4, %v13816_v5, %v13815_v33  ;;  %v13822_v29 = vld [vmem:[#allocation144_spill] sm:$0xff]  ;;  %v10759_v33 = vmul.f32 %v10681_v47, %v1636_v26  ;;  %v10762_v25 = vmul.f32 %v10627_v21, %v1644_v7  ;;  %v13825_v5 = vld [vmem:[#allocation146_spill] sm:$0xff]  ;;  %v5505_v40 = vmul.f32 %v10352_v54, %v5499_v17 }
 0x706   : > { %v10748_v34 = vpop.permute.xlu1 %5179  ;;  %v10750_v0 = vpop.permute.xlu0 %5177  ;;  %v1187_v59 = vsel %vm1154_vm4, %v13822_v29, %v13821_v23  ;;  %v5504_v37 = vmul.f32 %v10356_v4, %v5499_v17  ;;  %v10773_v26 = vadd.f32 %v1155_v30, %v10571_v13  ;;  %v10776_v23 = vadd.f32 %v1156_v52, %v10574_v11 }
 0x707   : > { %13819 = vst [vmem:[#allocation28_spill] sm:$0xff] %v10748_v34  ;;  %13820 = vst [vmem:[#allocation29_spill] sm:$0xff] %v10750_v0  ;;  %v1188_v34 = vsel %vm1154_vm4, %v13825_v5, %v13824_v2  ;;  %v10779_v29 = vmul.f32 %v10643_v18, %v1644_v7  ;;  %v5534_v0 = vstv %s10686_s30  ;;  %v13827_v2 = vld [vmem:[#allocation147_spill] sm:$0xff]  ;;  %v13829_v5 = vld [vmem:[#allocation149_spill] sm:$0xff]  ;;  %v10791_v13 = vmul.f32 %v10681_v47, %v1644_v7  ;;  %s11598_s30 = sld [smem:[#allocation2 + $0xae]] }
 0x708   : > { %13823 = vst [vmem:[#allocation30_spill] sm:$0xff] %v10762_v25  ;;  %5518 = vrot.lane.b32.xlu1 %v5503_v58, %s6609_s22  ;;  %5516 = vrot.lane.b32.xlu0 %v5502_v39, %s6609_s22  ;;  %v13828_v58 = vld [vmem:[#allocation148_spill] sm:$0xff]  ;;  %v1222_v17 = vsel %vm1154_vm4, %v13830_v32, %v13829_v5  ;;  %v1660_v30 = vstv %s10698_s3  ;;  %v1193_v1 = vadd.f32 %v1187_v59, %v10577_v51  ;;  %v13841_v5 = vld [vmem:[#allocation154_spill] sm:$0xff]  ;;  %s11789_s3 = sld [smem:[#allocation2 + $0xb5]] }
 0x709   : > { %13826 = vst [vmem:[#allocation31_spill] sm:$0xff] %v10779_v29  ;;  %v1189_v39 = vsel %vm1154_vm4, %v13828_v58, %v13827_v2  ;;  %13831 = vst [vmem:[#allocation32_spill] sm:$0xff] %v10791_v13  ;;  %v10800_v41 = vadd.f32 %v1188_v34, %v10580_v60  ;;  %v1223_v2 = vsel %vm1154_vm4, %v13835_v22, %v13834_v38  ;;  %v13885_v13 = vld [vmem:[#allocation178_spill] sm:$0xff]  ;;  %v13886_v29 = vld [vmem:[#allocation191_spill] sm:$0xff] }
 0x70a   : > { %v10794_v11 = vpop.permute.xlu1 %5183  ;;  %v10796_v52 = vpop.permute.xlu0 %5181  ;;  %v10806_v58 = vmul.f32 %v10627_v21, %v1652_v3  ;;  %v10809_v7 = vmul.f32 %v10643_v18, %v1652_v3  ;;  %v5536_v32 = vmul.f32 %v10260_v42, %v5534_v0  ;;  %v5535_v59 = vmul.f32 %v10264_v45, %v5534_v0  ;;  %v13887_v25 = vld [vmem:[#allocation192_spill] sm:$0xff] }
 0x70b   : > { %13832 = vst [vmem:[#allocation33_spill] sm:$0xff] %v10794_v11  ;;  %13833 = vst [vmem:[#allocation34_spill] sm:$0xff] %v10796_v52  ;;  %v1195_v51 = vadd.f32 %v1189_v39, %v10583_v56  ;;  %v1228_v60 = vadd.f32 %v1222_v17, %v10599_v49  ;;  %v10818_v22 = vmul.f32 %v10681_v47, %v1652_v3  ;;  %v13842_v52 = vld [vmem:[#allocation155_spill] sm:$0xff]  ;;  %v13843_v11 = vld [vmem:[#allocation156_spill] sm:$0xff] }
 0x70c   : > { %13836 = vst [vmem:[#allocation35_spill] sm:$0xff] %v10806_v58  ;;  %13837 = vst [vmem:[#allocation36_spill] sm:$0xff] %v10809_v7  ;;  %5522 = vrot.lane.b32.xlu1 %v5505_v40, %s6609_s22  ;;  %5520 = vrot.lane.b32.xlu0 %v5504_v37, %s6609_s22  ;;  %v10821_v38 = vmul.f32 %v10627_v21, %v1660_v30  ;;  %v10824_v34 = vadd.f32 %v1223_v2, %v10602_v57  ;;  %v13840_v40 = vld [vmem:[#allocation153_spill] sm:$0xff]  ;;  %v13848_v39 = vld [vmem:[#allocation158_spill] sm:$0xff]  ;;  %s10915_s22 = sld [smem:[#allocation2 + $0xa6]] }
 0x70d   : > { %13838 = vst [vmem:[#allocation37_spill] sm:$0xff] %v10818_v22  ;;  %v1224_v37 = vsel %vm1154_vm4, %v13841_v5, %v13840_v40  ;;  %v1257_v19 = vsel %vm1154_vm4, %v13843_v11, %v13842_v52  ;;  %v10833_v56 = vmul.f32 %v10643_v18, %v1660_v30  ;;  %v13847_v21 = vld [vmem:[#allocation157_spill] sm:$0xff]  ;;  %v13849_v17 = vld [vmem:[#allocation159_spill] sm:$0xff]  ;;  %v13850_v2 = vld [vmem:[#allocation160_spill] sm:$0xff] }
 0x70e   : > { %13839 = vst [vmem:[#allocation38_spill] sm:$0xff] %v10821_v38  ;;  %v10835_v3 = vpop.permute.xlu1 %5210  ;;  %v10837_v49 = vpop.permute.xlu0 %5208  ;;  %v1258_v57 = vsel %vm1154_vm4, %v13848_v39, %v13847_v21  ;;  %v1259_v40 = vsel %vm1154_vm4, %v13850_v2, %v13849_v17  ;;  %v13851_v5 = vld [vmem:[#allocation161_spill] sm:$0xff]  ;;  %v13852_v38 = vld [vmem:[#allocation162_spill] sm:$0xff]  ;;  %v13853_v52 = vld [vmem:[#allocation163_spill] sm:$0xff]  ;;  %v5538_v21 = vmul.f32 %v10311_v62, %v5534_v0  ;;  %v5537_v39 = vmul.f32 %v10315_v43, %v5534_v0 }
 0x70f   : > { %13844 = vst [vmem:[#allocation39_spill] sm:$0xff] %v10833_v56  ;;  %13845 = vst [vmem:[#allocation40_spill] sm:$0xff] %v10835_v3  ;;  %v1292_v11 = vsel %vm1154_vm4, %v13852_v38, %v13851_v5  ;;  %v13854_v18 = vld [vmem:[#allocation164_spill] sm:$0xff]  ;;  %v13855_v22 = vld [vmem:[#allocation165_spill] sm:$0xff]  ;;  %v10859_v17 = vadd.f32 %v1224_v37, %v10605_v9  ;;  %v10862_v38 = vadd.f32 %v1257_v19, %v10621_v61  ;;  %v5558_v5 = vstv %s10782_s7  ;;  %s11868_s7 = sld [smem:[#allocation2 + $0xc2]] }
 0x710   : > { %13846 = vst [vmem:[#allocation41_spill] sm:$0xff] %v10837_v49  ;;  %v1293_v56 = vsel %vm1154_vm4, %v13854_v18, %v13853_v52  ;;  %v13856_v3 = vld [vmem:[#allocation166_spill] sm:$0xff]  ;;  %5545 = vrot.lane.b32.xlu1 %v5536_v32, %s6610_s4  ;;  %5543 = vrot.lane.b32.xlu0 %v5535_v59, %s6610_s4  ;;  %v10865_v2 = vmul.f32 %v10681_v47, %v1660_v30  ;;  %v13858_v0 = vld [vmem:[#allocation167_spill] sm:$0xff]  ;;  %v13867_v52 = vld [vmem:[#allocation184_spill] sm:$0xff] }
 0x711   : > { %v1294_v49 = vsel %vm1154_vm4, %v13856_v3, %v13855_v22  ;;  %v10869_v22 = vadd.f32 %v1258_v57, %v10624_v16  ;;  %v10872_v32 = vadd.f32 %v1259_v40, %v10634_v14  ;;  %v10875_v59 = vadd.f32 %v1292_v11, %v10653_v10  ;;  %v13859_v3 = vld [vmem:[#allocation168_spill] sm:$0xff]  ;;  %v13862_v47 = vld [vmem:[#allocation179_spill] sm:$0xff]  ;;  %v13864_v10 = vld [vmem:[#allocation181_spill] sm:$0xff] }
 0x712   : > { %13857 = vst [vmem:[#allocation42_spill] sm:$0xff] %v10865_v2  ;;  %v1327_v9 = vsel %vm1154_vm4, %v13859_v3, %v13858_v0  ;;  %v10880_v37 = vpop.permute.xlu1 %5214  ;;  %v10882_v19 = vpop.permute.xlu0 %5212  ;;  %v10885_v61 = vadd.f32 %v1293_v56, %v10672_v35  ;;  %v10888_v16 = vadd.f32 %v1294_v49, %v10675_v28  ;;  %v13863_v14 = vld [vmem:[#allocation180_spill] sm:$0xff]  ;;  %v13865_v57 = vld [vmem:[#allocation182_spill] sm:$0xff]  ;;  %v13866_v11 = vld [vmem:[#allocation183_spill] sm:$0xff]  ;;  %v5560_v35 = vmul.f32 %v10260_v42, %v5558_v5 }
 0x713   : > { %13860 = vst [vmem:[#allocation43_spill] sm:$0xff] %v10880_v37  ;;  %13861 = vst [vmem:[#allocation44_spill] sm:$0xff] %v10882_v19  ;;  %v1390_v30 = vsel %vm1389_vm5, %v13863_v14, %v13862_v47  ;;  %v1391_v40 = vsel %vm1389_vm5, %v13865_v57, %v13864_v10  ;;  %v1422_v18 = vsel %vm1389_vm5, %v13867_v52, %v13866_v11  ;;  %v13868_v49 = vld [vmem:[#allocation169_spill] sm:$0xff]  ;;  %v13869_v0 = vld [vmem:[#allocation170_spill] sm:$0xff] }
 0x714   : > { %5549 = vrot.lane.b32.xlu1 %v5538_v21, %s6610_s4  ;;  %5547 = vrot.lane.b32.xlu0 %v5537_v39, %s6610_s4  ;;  %v5559_v28 = vmul.f32 %v10264_v45, %v5558_v5  ;;  %v10904_v56 = vadd.f32 %v1327_v9, %v10705_v46  ;;  %v1328_v3 = vsel %vm1154_vm4, %v13869_v0, %v13868_v49  ;;  %v13870_v47 = vld [vmem:[#allocation171_spill] sm:$0xff]  ;;  %v13871_v14 = vld [vmem:[#allocation172_spill] sm:$0xff]  ;;  %v13872_v57 = vld [vmem:[#allocation173_spill] sm:$0xff] }
 0x715   : > { %v1329_v10 = vsel %vm1154_vm4, %v13871_v14, %v13870_v47  ;;  %v13873_v11 = vld [vmem:[#allocation174_spill] sm:$0xff]  ;;  %v13874_v39 = vld [vmem:[#allocation175_spill] sm:$0xff]  ;;  %v13875_v52 = vld [vmem:[#allocation176_spill] sm:$0xff] }
 0x716   : > { %v1362_v21 = vsel %vm1154_vm4, %v13873_v11, %v13872_v57  ;;  %v1363_v19 = vsel %vm1154_vm4, %v13875_v52, %v13874_v39  ;;  %v13876_v46 = vld [vmem:[#allocation185_spill] sm:$0xff]  ;;  %v13877_v9 = vld [vmem:[#allocation186_spill] sm:$0xff]  ;;  %v13878_v2 = vld [vmem:[#allocation187_spill] sm:$0xff]  ;;  %v10929_v58 = vpop.permute.xlu1 %5218  ;;  %v10931_v57 = vpop.permute.xlu0 %5216  ;;  %v1394_v52 = vadd.f32 %v1390_v30, %v10773_v26 }
 0x717   : > { %v1423_v37 = vsel %vm1389_vm5, %v13877_v9, %v13876_v46  ;;  %v13879_v49 = vld [vmem:[#allocation188_spill] sm:$0xff]  ;;  %v13880_v7 = vld [vmem:[#allocation189_spill] sm:$0xff]  ;;  %v13881_v47 = vld [vmem:[#allocation190_spill] sm:$0xff]  ;;  %13882 = vst [vmem:[#allocation45_spill] sm:$0xff] %v10929_v58  ;;  %v1395_v46 = vadd.f32 %v1391_v40, %v10776_v23  ;;  %v1428_v9 = vadd.f32 %v1422_v18, %v1193_v1  ;;  %v1335_v1 = vadd.f32 %v1329_v10, %v10725_v8 }
 0x718   : > { %v1424_v0 = vsel %vm1389_vm5, %v13879_v49, %v13878_v2  ;;  %v1457_v14 = vsel %vm1389_vm5, %v13881_v47, %v13880_v7  ;;  %13883 = vst [vmem:[#allocation46_spill] sm:$0xff] %v10931_v57  ;;  %v13884_v11 = vld [vmem:[#allocation177_spill] sm:$0xff]  ;;  %v1458_v2 = vsel %vm1389_vm5, %v13887_v25, %v13886_v29  ;;  %5573 = vrot.lane.b32.xlu1 %v5560_v35, %s6610_s4  ;;  %v13895_v10 = vld [vmem:[#allocation198_spill] sm:$0xff] }
 0x719   : > { %v1364_v39 = vsel %vm1154_vm4, %v13885_v13, %v13884_v11  ;;  %5571 = vrot.lane.b32.xlu0 %v5559_v28, %s6610_s4  ;;  %v5562_v7 = vmul.f32 %v10311_v62, %v5558_v5  ;;  %v5561_v49 = vmul.f32 %v10315_v43, %v5558_v5  ;;  %v1334_v47 = vadd.f32 %v1328_v3, %v10708_v63  ;;  %v13894_v3 = vld [vmem:[#allocation197_spill] sm:$0xff]  ;;  %v13899_v11 = vld [vmem:[#allocation202_spill] sm:$0xff] }
 0x71a   : > { %v1429_v13 = vadd.f32 %v1423_v37, %v10800_v41  ;;  %v1430_v26 = vadd.f32 %v1424_v0, %v1195_v51  ;;  %v1463_v30 = vadd.f32 %v1457_v14, %v1228_v60  ;;  %v1368_v23 = vadd.f32 %v1362_v21, %v10728_v24  ;;  %v10951_v40 = vpop.permute.xlu1 %5245  ;;  %v10953_v18 = vpop.permute.xlu0 %5243  ;;  %v13890_v24 = vld [vmem:[#allocation193_spill] sm:$0xff]  ;;  %v13892_v37 = vld [vmem:[#allocation195_spill] sm:$0xff]  ;;  %v14142_v57 = vld [vmem:[#allocation406_spill] sm:$0xff] }
 0x71b   : > { %v1369_v25 = vadd.f32 %v1363_v19, %v10737_v50  ;;  %v1370_v29 = vadd.f32 %v1364_v39, %v10753_v53  ;;  %13888 = vst [vmem:[#allocation47_spill] sm:$0xff] %v10951_v40  ;;  %13889 = vst [vmem:[#allocation48_spill] sm:$0xff] %v10953_v18  ;;  %v1464_v35 = vadd.f32 %v1458_v2, %v10824_v34  ;;  %v13891_v50 = vld [vmem:[#allocation194_spill] sm:$0xff]  ;;  %v5593_v34 = vstv %s10915_s22  ;;  %v13893_v19 = vld [vmem:[#allocation196_spill] sm:$0xff]  ;;  %s11946_s22 = sld [smem:[#allocation2 + $0xbc]] }
 0x71c   : > { %v10957_v63 = vadd.f32 %v10630_v6, %v1394_v52  ;;  %v10960_v41 = vadd.f32 %v10646_v15, %v1395_v46  ;;  %v10963_v8 = vadd.f32 %v10659_v44, %v1428_v9  ;;  %v1459_v51 = vsel %vm1389_vm5, %v13891_v50, %v13890_v24  ;;  %5577 = vrot.lane.b32.xlu1 %v5562_v7, %s6610_s4  ;;  %v13896_v0 = vld [vmem:[#allocation199_spill] sm:$0xff]  ;;  %v13898_v14 = vld [vmem:[#allocation201_spill] sm:$0xff]  ;;  %v13903_v9 = vld [vmem:[#allocation204_spill] sm:$0xff] }
 0x71d   : > { %5575 = vrot.lane.b32.xlu0 %v5561_v49, %s6610_s4  ;;  %v5564_v53 = vmul.f32 %v10352_v54, %v5558_v5  ;;  %v5563_v60 = vmul.f32 %v10356_v4, %v5558_v5  ;;  %v10973_v6 = vadd.f32 %v10678_v31, %v1429_v13  ;;  %v10976_v15 = vadd.f32 %v10684_v12, %v1430_v26  ;;  %v13897_v5 = vld [vmem:[#allocation200_spill] sm:$0xff]  ;;  %v13902_v46 = vld [vmem:[#allocation203_spill] sm:$0xff]  ;;  %v13904_v7 = vld [vmem:[#allocation205_spill] sm:$0xff] }
 0x71e   : > { %v10979_v44 = vadd.f32 %v10695_v48, %v1463_v30  ;;  %v1492_v28 = vsel %vm1389_vm5, %v13893_v19, %v13892_v37  ;;  %v1493_v21 = vsel %vm1389_vm5, %v13895_v10, %v13894_v3  ;;  %v1494_v31 = vsel %vm1389_vm5, %v13897_v5, %v13896_v0  ;;  %v10994_v39 = vpop.permute.xlu1 %5249  ;;  %v10996_v48 = vpop.permute.xlu0 %5247  ;;  %v13905_v49 = vld [vmem:[#allocation206_spill] sm:$0xff]  ;;  %v13906_v30 = vld [vmem:[#allocation207_spill] sm:$0xff]  ;;  %v13907_v24 = vld [vmem:[#allocation208_spill] sm:$0xff] }
 0x71f   : > { %v1527_v12 = vsel %vm1389_vm5, %v13899_v11, %v13898_v14  ;;  %13900 = vst [vmem:[#allocation49_spill] sm:$0xff] %v10994_v39  ;;  %13901 = vst [vmem:[#allocation50_spill] sm:$0xff] %v10996_v48  ;;  %v1465_v52 = vadd.f32 %v1459_v51, %v10859_v17  ;;  %v1528_v2 = vsel %vm1389_vm5, %v13903_v9, %v13902_v46  ;;  %v13908_v10 = vld [vmem:[#allocation209_spill] sm:$0xff]  ;;  %v13910_v0 = vld [vmem:[#allocation211_spill] sm:$0xff] }
 0x720   : > { %v1529_v13 = vsel %vm1389_vm5, %v13905_v49, %v13904_v7  ;;  %v11006_v26 = vadd.f32 %v10714_v55, %v1464_v35  ;;  %v1562_v50 = vsel %vm1389_vm5, %v13907_v24, %v13906_v30  ;;  %5581 = vrot.lane.b32.xlu1 %v5564_v53, %s6610_s4  ;;  %v5595_v17 = vmul.f32 %v10260_v42, %v5593_v34  ;;  %v13909_v53 = vld [vmem:[#allocation210_spill] sm:$0xff]  ;;  %v13911_v5 = vld [vmem:[#allocation212_spill] sm:$0xff]  ;;  %v13912_v11 = vld [vmem:[#allocation213_spill] sm:$0xff] }
 0x721   : > { %5579 = vrot.lane.b32.xlu0 %v5563_v60, %s6610_s4  ;;  %v5594_v51 = vmul.f32 %v10264_v45, %v5593_v34  ;;  %v1498_v37 = vadd.f32 %v1492_v28, %v10862_v38  ;;  %v1499_v19 = vadd.f32 %v1493_v21, %v10869_v22  ;;  %v1500_v3 = vadd.f32 %v1494_v31, %v10872_v32  ;;  %v13913_v38 = vld [vmem:[#allocation214_spill] sm:$0xff]  ;;  %v13916_v21 = vld [vmem:[#allocation215_spill] sm:$0xff]  ;;  %v13917_v31 = vld [vmem:[#allocation216_spill] sm:$0xff] }
 0x722   : > { %v1533_v55 = vadd.f32 %v1527_v12, %v10875_v59  ;;  %v1534_v35 = vadd.f32 %v1528_v2, %v10885_v61  ;;  %v1563_v60 = vsel %vm1389_vm5, %v13909_v53, %v13908_v10  ;;  %v1564_v14 = vsel %vm1389_vm5, %v13911_v5, %v13910_v0  ;;  %v11031_v28 = vpop.permute.xlu1 %5253  ;;  %v11033_v32 = vpop.permute.xlu0 %5251  ;;  %v13918_v9 = vld [vmem:[#allocation217_spill] sm:$0xff]  ;;  %v13919_v2 = vld [vmem:[#allocation218_spill] sm:$0xff]  ;;  %v13921_v53 = vld [vmem:[#allocation31_spill] sm:$0xff] }
 0x723   : > { %v1597_v22 = vsel %vm1389_vm5, %v13913_v38, %v13912_v11  ;;  %13914 = vst [vmem:[#allocation51_spill] sm:$0xff] %v11031_v28  ;;  %13915 = vst [vmem:[#allocation52_spill] sm:$0xff] %v11033_v32  ;;  %v1535_v59 = vadd.f32 %v1529_v13, %v10888_v16  ;;  %v1568_v61 = vadd.f32 %v1562_v50, %v10904_v56  ;;  %v13920_v50 = vld [vmem:[#allocation30_spill] sm:$0xff]  ;;  %v5628_v38 = vstv %s11019_s8  ;;  %v14059_v32 = vld [vmem:[#allocation324_spill] sm:$0xff]  ;;  %s11994_s8 = sld [smem:[#allocation2 + $0x93]] }
 0x724   : > { %v1598_v12 = vsel %vm1389_vm5, %v13917_v31, %v13916_v21  ;;  %v11041_v46 = vadd.f32 %v10731_v27, %v1465_v52  ;;  %v1599_v7 = vsel %vm1389_vm5, %v13919_v2, %v13918_v9  ;;  %5608 = vrot.lane.b32.xlu1 %v5595_v17, %s6610_s4  ;;  %v5597_v49 = vmul.f32 %v10311_v62, %v5593_v34  ;;  %v13933_v21 = vld [vmem:[#allocation223_spill] sm:$0xff]  ;;  %v13934_v31 = vld [vmem:[#allocation224_spill] sm:$0xff]  ;;  %v13935_v9 = vld [vmem:[#allocation225_spill] sm:$0xff] }
 0x725   : > { %5606 = vrot.lane.b32.xlu0 %v5594_v51, %s6610_s4  ;;  %v5596_v16 = vmul.f32 %v10315_v43, %v5593_v34  ;;  %v1569_v56 = vadd.f32 %v1563_v60, %v1334_v47  ;;  %v1570_v13 = vadd.f32 %v1564_v14, %v1335_v1  ;;  %v1603_v30 = vadd.f32 %v1597_v22, %v1368_v23  ;;  %v13924_v47 = vld [vmem:[#allocation32_spill] sm:$0xff]  ;;  %v13925_v23 = vld [vmem:[#allocation35_spill] sm:$0xff]  ;;  %v13931_v22 = vld [vmem:[#allocation221_spill] sm:$0xff] }
 0x726   : > { %v1640_v24 = vadd.f32 %v10734_v36, %v1498_v37  ;;  %v1641_v27 = vadd.f32 %v10746_v20, %v1499_v19  ;;  %v1642_v52 = vadd.f32 %v10759_v33, %v1500_v3  ;;  %v1648_v10 = vadd.f32 %v13920_v50, %v1533_v55  ;;  %v11055_v0 = vpop.permute.xlu1 %5280  ;;  %v11057_v51 = vpop.permute.xlu0 %5278  ;;  %v13926_v36 = vld [vmem:[#allocation219_spill] sm:$0xff]  ;;  %v13927_v20 = vld [vmem:[#allocation220_spill] sm:$0xff]  ;;  %v13936_v2 = vld [vmem:[#allocation226_spill] sm:$0xff] }
 0x727   : > { %v1649_v17 = vadd.f32 %v13921_v53, %v1534_v35  ;;  %13922 = vst [vmem:[#allocation53_spill] sm:$0xff] %v11055_v0  ;;  %13923 = vst [vmem:[#allocation54_spill] sm:$0xff] %v11057_v51  ;;  %v1604_v5 = vadd.f32 %v1598_v12, %v1369_v25  ;;  %v1605_v11 = vadd.f32 %v1599_v7, %v1370_v29  ;;  %v13928_v3 = vld [vmem:[#allocation36_spill] sm:$0xff]  ;;  %v13929_v29 = vld [vmem:[#allocation37_spill] sm:$0xff] }
 0x728   : > { %v1650_v1 = vadd.f32 %v13924_v47, %v1535_v59  ;;  %v11061_v60 = vadd.f32 %v13925_v23, %v1568_v61  ;;  %v1685_v33 = vsel %vm214_vm0, %v13927_v20, %v13926_v36  ;;  %5612 = vrot.lane.b32.xlu1 %v5597_v49, %s6610_s4  ;;  %v5599_v37 = vmul.f32 %v10352_v54, %v5593_v34  ;;  %v13930_v35 = vld [vmem:[#allocation38_spill] sm:$0xff]  ;;  %v13937_v7 = vld [vmem:[#allocation227_spill] sm:$0xff]  ;;  %v13938_v49 = vld [vmem:[#allocation228_spill] sm:$0xff] }
 0x729   : > { %5610 = vrot.lane.b32.xlu0 %v5596_v16, %s6610_s4  ;;  %v5598_v19 = vmul.f32 %v10356_v4, %v5593_v34  ;;  %v1657_v25 = vadd.f32 %v13928_v3, %v1569_v56  ;;  %v11072_v55 = vadd.f32 %v13929_v29, %v1570_v13  ;;  %v11075_v14 = vadd.f32 %v13930_v35, %v1603_v30  ;;  %v13932_v59 = vld [vmem:[#allocation222_spill] sm:$0xff]  ;;  %v13941_v50 = vld [vmem:[#allocation229_spill] sm:$0xff]  ;;  %v13943_v23 = vld [vmem:[#allocation39_spill] sm:$0xff] }
 0x72a   : > { %v1686_v61 = vsel %vm214_vm0, %v13932_v59, %v13931_v22  ;;  %v1717_v12 = vsel %vm214_vm0, %v13934_v31, %v13933_v21  ;;  %v1718_v34 = vsel %vm214_vm0, %v13936_v2, %v13935_v9  ;;  %v1719_v16 = vsel %vm214_vm0, %v13938_v49, %v13937_v7  ;;  %v11090_v56 = vpop.permute.xlu1 %5284  ;;  %v11092_v13 = vpop.permute.xlu0 %5282  ;;  %v13942_v53 = vld [vmem:[#allocation230_spill] sm:$0xff]  ;;  %v13945_v29 = vld [vmem:[#allocation231_spill] sm:$0xff]  ;;  %v13946_v35 = vld [vmem:[#allocation232_spill] sm:$0xff] }
 0x72b   : > { %13939 = vst [vmem:[#allocation55_spill] sm:$0xff] %v11090_v56  ;;  %13940 = vst [vmem:[#allocation56_spill] sm:$0xff] %v11092_v13  ;;  %v1689_v30 = vadd.f32 %v1685_v33, %v10957_v63  ;;  %v1752_v47 = vsel %vm214_vm0, %v13942_v53, %v13941_v50  ;;  %v1665_v36 = vadd.f32 %v13943_v23, %v1604_v5  ;;  %v13944_v20 = vld [vmem:[#allocation42_spill] sm:$0xff]  ;;  %v13947_v31 = vld [vmem:[#allocation233_spill] sm:$0xff] }
 0x72c   : > { %v1666_v3 = vadd.f32 %v13944_v20, %v1605_v11  ;;  %v1753_v22 = vsel %vm214_vm0, %v13946_v35, %v13945_v29  ;;  %5616 = vrot.lane.b32.xlu1 %v5599_v37, %s6610_s4  ;;  %v5630_v59 = vmul.f32 %v10260_v42, %v5628_v38  ;;  %v5629_v63 = vmul.f32 %v10264_v45, %v5628_v38  ;;  %v13948_v9 = vld [vmem:[#allocation234_spill] sm:$0xff]  ;;  %v13949_v2 = vld [vmem:[#allocation235_spill] sm:$0xff]  ;;  %v13951_v49 = vld [vmem:[#allocation237_spill] sm:$0xff] }
 0x72d   : > { %5614 = vrot.lane.b32.xlu0 %v5598_v19, %s6610_s4  ;;  %v1690_v33 = vadd.f32 %v1686_v61, %v10960_v41  ;;  %v1723_v21 = vadd.f32 %v1717_v12, %v10963_v8  ;;  %v1724_v5 = vadd.f32 %v1718_v34, %v10973_v6  ;;  %v1725_v11 = vadd.f32 %v1719_v16, %v10976_v15  ;;  %v13950_v19 = vld [vmem:[#allocation236_spill] sm:$0xff]  ;;  %v13952_v50 = vld [vmem:[#allocation238_spill] sm:$0xff]  ;;  %v13953_v61 = vld [vmem:[#allocation239_spill] sm:$0xff] }
 0x72e   : > { %v1754_v37 = vsel %vm214_vm0, %v13948_v9, %v13947_v31  ;;  %v1787_v7 = vsel %vm214_vm0, %v13950_v19, %v13949_v2  ;;  %v1788_v41 = vsel %vm214_vm0, %v13952_v50, %v13951_v49  ;;  %v13954_v8 = vld [vmem:[#allocation240_spill] sm:$0xff]  ;;  %v11125_v12 = vpop.permute.xlu1 %5288  ;;  %v11127_v15 = vpop.permute.xlu0 %5286  ;;  %v11130_v34 = vadd.f32 %v1752_v47, %v10979_v44  ;;  %v13957_v53 = vld [vmem:[#allocation241_spill] sm:$0xff]  ;;  %v13958_v23 = vld [vmem:[#allocation242_spill] sm:$0xff] }
 0x72f   : > { %v1789_v6 = vsel %vm214_vm0, %v13954_v8, %v13953_v61  ;;  %13955 = vst [vmem:[#allocation57_spill] sm:$0xff] %v11125_v12  ;;  %13956 = vst [vmem:[#allocation58_spill] sm:$0xff] %v11127_v15  ;;  %v11133_v16 = vadd.f32 %v1753_v22, %v11006_v26  ;;  %v1822_v20 = vsel %vm214_vm0, %v13958_v23, %v13957_v53  ;;  %v13959_v29 = vld [vmem:[#allocation243_spill] sm:$0xff]  ;;  %v13960_v35 = vld [vmem:[#allocation244_spill] sm:$0xff] }
 0x730   : > { %v1823_v31 = vsel %vm214_vm0, %v13960_v35, %v13959_v29  ;;  %v13961_v9 = vld [vmem:[#allocation245_spill] sm:$0xff]  ;;  %v13962_v2 = vld [vmem:[#allocation246_spill] sm:$0xff]  ;;  %5643 = vrot.lane.b32.xlu1 %v5630_v59, %s6610_s4  ;;  %v5632_v44 = vmul.f32 %v10311_v62, %v5628_v38  ;;  %v5631_v26 = vmul.f32 %v10315_v43, %v5628_v38  ;;  %v1760_v47 = vadd.f32 %v1754_v37, %v11041_v46  ;;  %v13963_v53 = vld [vmem:[#allocation247_spill] sm:$0xff] }
 0x731   : > { %v1824_v19 = vsel %vm214_vm0, %v13962_v2, %v13961_v9  ;;  %5641 = vrot.lane.b32.xlu0 %v5629_v63, %s6610_s4  ;;  %v1793_v22 = vadd.f32 %v1787_v7, %v1640_v24  ;;  %v1794_v49 = vadd.f32 %v1788_v41, %v1641_v27  ;;  %v1795_v50 = vadd.f32 %v1789_v6, %v1642_v52  ;;  %v13964_v23 = vld [vmem:[#allocation248_spill] sm:$0xff]  ;;  %v13965_v35 = vld [vmem:[#allocation249_spill] sm:$0xff]  ;;  %v13966_v59 = vld [vmem:[#allocation250_spill] sm:$0xff] }
 0x732   : > { %v1828_v61 = vadd.f32 %v1822_v20, %v1648_v10  ;;  %v11149_v8 = vadd.f32 %v1823_v31, %v1649_v17  ;;  %v1857_v29 = vsel %vm214_vm0, %v13964_v23, %v13963_v53  ;;  %v1858_v63 = vsel %vm214_vm0, %v13966_v59, %v13965_v35  ;;  %v11157_v9 = vpop.permute.xlu1 %5311  ;;  %v11159_v2 = vpop.permute.xlu0 %5309  ;;  %v13969_v24 = vld [vmem:[#allocation251_spill] sm:$0xff]  ;;  %v13970_v27 = vld [vmem:[#allocation252_spill] sm:$0xff]  ;;  %v13971_v10 = vld [vmem:[#allocation253_spill] sm:$0xff] }
 0x733   : > { %13967 = vst [vmem:[#allocation59_spill] sm:$0xff] %v11157_v9  ;;  %13968 = vst [vmem:[#allocation60_spill] sm:$0xff] %v11159_v2  ;;  %v1830_v46 = vadd.f32 %v1824_v19, %v1650_v1  ;;  %v1859_v52 = vsel %vm214_vm0, %v13970_v27, %v13969_v24  ;;  %v13972_v17 = vld [vmem:[#allocation254_spill] sm:$0xff]  ;;  %v13973_v7 = vld [vmem:[#allocation255_spill] sm:$0xff]  ;;  %v5634_v1 = vmul.f32 %v10352_v54, %v5628_v38 }
 0x734   : > { %v1892_v37 = vsel %vm214_vm0, %v13972_v17, %v13971_v10  ;;  %v13974_v41 = vld [vmem:[#allocation256_spill] sm:$0xff]  ;;  %v13975_v20 = vld [vmem:[#allocation257_spill] sm:$0xff]  ;;  %v13976_v31 = vld [vmem:[#allocation258_spill] sm:$0xff]  ;;  %5647 = vrot.lane.b32.xlu1 %v5632_v44, %s6610_s4  ;;  %v5633_v19 = vmul.f32 %v10356_v4, %v5628_v38  ;;  %v1863_v23 = vadd.f32 %v1857_v29, %v11061_v60  ;;  %v1864_v35 = vadd.f32 %v1858_v63, %v1657_v25 }
 0x735   : > { %v1893_v6 = vsel %vm214_vm0, %v13974_v41, %v13973_v7  ;;  %v1894_v53 = vsel %vm214_vm0, %v13976_v31, %v13975_v20  ;;  %5645 = vrot.lane.b32.xlu0 %v5631_v26, %s6610_s4  ;;  %v13977_v59 = vld [vmem:[#allocation259_spill] sm:$0xff]  ;;  %v13978_v24 = vld [vmem:[#allocation260_spill] sm:$0xff]  ;;  %v5663_v10 = vstv %s11111_s14  ;;  %v13979_v17 = vld [vmem:[#allocation261_spill] sm:$0xff]  ;;  %s12015_s14 = sld [smem:[#allocation2 + $0x9a]] }
 0x736   : > { %v1919_v27 = vsel %vm449_vm1, %v13978_v24, %v13977_v59  ;;  %v13980_v7 = vld [vmem:[#allocation262_spill] sm:$0xff]  ;;  %v13981_v20 = vld [vmem:[#allocation263_spill] sm:$0xff]  ;;  %v13982_v44 = vld [vmem:[#allocation264_spill] sm:$0xff]  ;;  %v11194_v29 = vpop.permute.xlu1 %5315  ;;  %v11196_v63 = vpop.permute.xlu0 %5313  ;;  %v1865_v59 = vadd.f32 %v1859_v52, %v11072_v55  ;;  %v1898_v24 = vadd.f32 %v1892_v37, %v11075_v14 }
 0x737   : > { %v1920_v41 = vsel %vm449_vm1, %v13980_v7, %v13979_v17  ;;  %v1951_v26 = vsel %vm449_vm1, %v13982_v44, %v13981_v20  ;;  %v13983_v31 = vld [vmem:[#allocation265_spill] sm:$0xff]  ;;  %v13984_v15 = vld [vmem:[#allocation266_spill] sm:$0xff]  ;;  %v13985_v12 = vld [vmem:[#allocation267_spill] sm:$0xff]  ;;  %13987 = vst [vmem:[#allocation61_spill] sm:$0xff] %v11194_v29  ;;  %v11200_v17 = vadd.f32 %v1893_v6, %v1665_v36  ;;  %v11202_v7 = vadd.f32 %v1894_v53, %v1666_v3 }
 0x738   : > { %v1952_v38 = vsel %vm449_vm1, %v13984_v15, %v13983_v31  ;;  %v13986_v60 = vld [vmem:[#allocation268_spill] sm:$0xff]  ;;  %13988 = vst [vmem:[#allocation62_spill] sm:$0xff] %v11196_v63  ;;  %v1923_v20 = vadd.f32 %v1919_v27, %v1689_v30  ;;  %5651 = vrot.lane.b32.xlu1 %v5634_v1, %s6610_s4  ;;  %v5665_v15 = vmul.f32 %v10260_v42, %v5663_v10  ;;  %v13991_v55 = vld [vmem:[#allocation269_spill] sm:$0xff]  ;;  %v13992_v14 = vld [vmem:[#allocation270_spill] sm:$0xff] }
 0x739   : > { %v1953_v25 = vsel %vm449_vm1, %v13986_v60, %v13985_v12  ;;  %13989 = vst [vmem:[#allocation63_spill] sm:$0xff] %v11200_v17  ;;  %13990 = vst [vmem:[#allocation64_spill] sm:$0xff] %v11202_v7  ;;  %5649 = vrot.lane.b32.xlu0 %v5633_v19, %s6610_s4  ;;  %v5664_v12 = vmul.f32 %v10264_v45, %v5663_v10  ;;  %v1924_v44 = vadd.f32 %v1920_v41, %v1690_v33  ;;  %v13993_v36 = vld [vmem:[#allocation271_spill] sm:$0xff]  ;;  %v13994_v3 = vld [vmem:[#allocation272_spill] sm:$0xff] }
 0x73a   : > { %v1957_v31 = vadd.f32 %v1951_v26, %v1723_v21  ;;  %v1958_v60 = vadd.f32 %v1952_v38, %v1724_v5  ;;  %v11208_v13 = vadd.f32 %v1953_v25, %v1725_v11  ;;  %v1986_v30 = vsel %vm449_vm1, %v13992_v14, %v13991_v55  ;;  %v13995_v42 = vld [vmem:[#allocation273_spill] sm:$0xff]  ;;  %v13996_v37 = vld [vmem:[#allocation274_spill] sm:$0xff]  ;;  %v13997_v33 = vld [vmem:[#allocation275_spill] sm:$0xff]  ;;  %v11226_v11 = vpop.permute.xlu1 %5339  ;;  %v11228_v6 = vpop.permute.xlu0 %5337 }
 0x73b   : > { %v1987_v52 = vsel %vm449_vm1, %v13994_v3, %v13993_v36  ;;  %v1988_v45 = vsel %vm449_vm1, %v13996_v37, %v13995_v42  ;;  %v13998_v21 = vld [vmem:[#allocation276_spill] sm:$0xff]  ;;  %13999 = vst [vmem:[#allocation65_spill] sm:$0xff] %v11226_v11  ;;  %14000 = vst [vmem:[#allocation66_spill] sm:$0xff] %v11228_v6  ;;  %v14001_v53 = vld [vmem:[#allocation277_spill] sm:$0xff] }
 0x73c   : > { %v2021_v5 = vsel %vm449_vm1, %v13998_v21, %v13997_v33  ;;  %v14002_v1 = vld [vmem:[#allocation278_spill] sm:$0xff]  ;;  %v14003_v27 = vld [vmem:[#allocation279_spill] sm:$0xff]  ;;  %v14004_v41 = vld [vmem:[#allocation280_spill] sm:$0xff]  ;;  %5678 = vrot.lane.b32.xlu1 %v5665_v15, %s6610_s4  ;;  %v5667_v21 = vmul.f32 %v10311_v62, %v5663_v10 }
 0x73d   : > { %v2022_v19 = vsel %vm449_vm1, %v14002_v1, %v14001_v53  ;;  %v2023_v26 = vsel %vm449_vm1, %v14004_v41, %v14003_v27  ;;  %v14005_v38 = vld [vmem:[#allocation281_spill] sm:$0xff]  ;;  %v14006_v25 = vld [vmem:[#allocation282_spill] sm:$0xff]  ;;  %v14007_v14 = vld [vmem:[#allocation283_spill] sm:$0xff]  ;;  %5676 = vrot.lane.b32.xlu0 %v5664_v12, %s6610_s4  ;;  %v5666_v53 = vmul.f32 %v10315_v43, %v5663_v10  ;;  %v11250_v1 = vadd.f32 %v1986_v30, %v11130_v34 }
 0x73e   : > { %v2056_v55 = vsel %vm449_vm1, %v14006_v25, %v14005_v38  ;;  %v14008_v36 = vld [vmem:[#allocation284_spill] sm:$0xff]  ;;  %v14009_v42 = vld [vmem:[#allocation285_spill] sm:$0xff]  ;;  %v14010_v37 = vld [vmem:[#allocation286_spill] sm:$0xff]  ;;  %v11253_v27 = vadd.f32 %v1987_v52, %v11133_v16  ;;  %v11255_v41 = vadd.f32 %v1988_v45, %v1760_v47  ;;  %v11257_v38 = vadd.f32 %v2021_v5, %v1793_v22  ;;  %v11268_v34 = vpop.permute.xlu1 %5343  ;;  %v11270_v16 = vpop.permute.xlu0 %5341 }
 0x73f   : > { %v2057_v3 = vsel %vm449_vm1, %v14008_v36, %v14007_v14  ;;  %v2058_v33 = vsel %vm449_vm1, %v14010_v37, %v14009_v42  ;;  %v11259_v25 = vadd.f32 %v2022_v19, %v1794_v49  ;;  %v11261_v14 = vadd.f32 %v2023_v26, %v1795_v50  ;;  %v14011_v62 = vld [vmem:[#allocation287_spill] sm:$0xff]  ;;  %v14012_v12 = vld [vmem:[#allocation288_spill] sm:$0xff]  ;;  %14013 = vst [vmem:[#allocation67_spill] sm:$0xff] %v11268_v34  ;;  %v14015_v49 = vld [vmem:[#allocation289_spill] sm:$0xff] }
 0x740   : > { %v11263_v15 = vadd.f32 %v2056_v55, %v1828_v61  ;;  %v2091_v43 = vsel %vm449_vm1, %v14012_v12, %v14011_v62  ;;  %14014 = vst [vmem:[#allocation68_spill] sm:$0xff] %v11270_v16  ;;  %v11273_v47 = vadd.f32 %v2057_v3, %v11149_v8  ;;  %v11275_v22 = vadd.f32 %v2058_v33, %v1830_v46  ;;  %v14016_v50 = vld [vmem:[#allocation290_spill] sm:$0xff]  ;;  %v14017_v61 = vld [vmem:[#allocation291_spill] sm:$0xff]  ;;  %v14018_v52 = vld [vmem:[#allocation292_spill] sm:$0xff] }
 0x741   : > { %v2092_v30 = vsel %vm449_vm1, %v14016_v50, %v14015_v49  ;;  %v2093_v45 = vsel %vm449_vm1, %v14018_v52, %v14017_v61  ;;  %v14019_v5 = vld [vmem:[#allocation293_spill] sm:$0xff]  ;;  %v14020_v19 = vld [vmem:[#allocation294_spill] sm:$0xff]  ;;  %5682 = vrot.lane.b32.xlu1 %v5667_v21, %s6610_s4  ;;  %5680 = vrot.lane.b32.xlu0 %v5666_v53, %s6610_s4  ;;  %v5669_v8 = vmul.f32 %v10352_v54, %v5663_v10  ;;  %v14021_v36 = vld [vmem:[#allocation299_spill] sm:$0xff]  ;;  %v11296_v37 = vstv %s11210_s23  ;;  %s12035_s23 = sld [smem:[#allocation2 + $0xc3]] }
 0x742   : > { %v2126_v26 = vsel %vm449_vm1, %v14020_v19, %v14019_v5  ;;  %v5668_v46 = vmul.f32 %v10356_v4, %v5663_v10  ;;  %v11290_v55 = vadd.f32 %v2091_v43, %v1863_v23  ;;  %v14022_v3 = vld [vmem:[#allocation300_spill] sm:$0xff]  ;;  %v11299_v33 = vstv %s11212_s16  ;;  %v14024_v21 = vld [vmem:[#allocation301_spill] sm:$0xff]  ;;  %v14025_v12 = vld [vmem:[#allocation302_spill] sm:$0xff]  ;;  %v11312_v50 = vpop.permute.xlu1 %5347  ;;  %v11314_v61 = vpop.permute.xlu0 %5345  ;;  %s12059_s16 = sld [smem:[#allocation2 + $0xaf]] }
 0x743   : > { %v2153_v42 = vsel %vm684_vm2, %v14022_v3, %v14021_v36  ;;  %v11301_v62 = vadd.f32 %v2092_v30, %v1864_v35  ;;  %v2154_v53 = vsel %vm684_vm2, %v14025_v12, %v14024_v21  ;;  %v14026_v54 = vld [vmem:[#allocation303_spill] sm:$0xff]  ;;  %v14027_v49 = vld [vmem:[#allocation304_spill] sm:$0xff]  ;;  %v14028_v23 = vld [vmem:[#allocation305_spill] sm:$0xff]  ;;  %14030 = vst [vmem:[#allocation70_spill] sm:$0xff] %v11312_v50  ;;  %v11316_v52 = vadd.f32 %v2093_v45, %v1865_v59 }
 0x744   : > { %v2185_v4 = vsel %vm684_vm2, %v14027_v49, %v14026_v54  ;;  %v14029_v10 = vld [vmem:[#allocation306_spill] sm:$0xff]  ;;  %14031 = vst [vmem:[#allocation71_spill] sm:$0xff] %v11314_v61  ;;  %v11318_v35 = vadd.f32 %v2126_v26, %v1898_v24  ;;  %v14034_v30 = vld [vmem:[#allocation295_spill] sm:$0xff]  ;;  %v14035_v5 = vld [vmem:[#allocation296_spill] sm:$0xff]  ;;  %v2157_v12 = vadd.f32 %v2153_v42, %v1923_v20  ;;  %v2158_v45 = vadd.f32 %v2154_v53, %v1924_v44 }
 0x745   : > { %14023 = vst [vmem:[#allocation69_spill] sm:$0xff] %v11301_v62  ;;  %v2186_v43 = vsel %vm684_vm2, %v14029_v10, %v14028_v23  ;;  %14032 = vst [vmem:[#allocation72_spill] sm:$0xff] %v11316_v52  ;;  %v11323_v19 = vsel %vm449_vm1, %v14035_v5, %v14034_v30  ;;  %v14037_v36 = vld [vmem:[#allocation297_spill] sm:$0xff]  ;;  %v14038_v3 = vld [vmem:[#allocation298_spill] sm:$0xff]  ;;  %5686 = vrot.lane.b32.xlu1 %v5669_v8, %s6610_s4  ;;  %5684 = vrot.lane.b32.xlu0 %v5668_v46, %s6610_s4 }
 0x746   : > { %14033 = vst [vmem:[#allocation73_spill] sm:$0xff] %v11318_v35  ;;  %14036 = vst [vmem:[#allocation74_spill] sm:$0xff] %v11323_v19  ;;  %v11328_v21 = vsel %vm449_vm1, %v14038_v3, %v14037_v36  ;;  %v11333_v54 = vld [vmem:[%s6701_s5 + $0x90] sm:$0xff]  ;;  %v2191_v26 = vadd.f32 %v2185_v4, %v1957_v31  ;;  %v11339_v49 = vadd.f32 %v2186_v43, %v1958_v60  ;;  %v14040_v23 = vld [vmem:[#allocation307_spill] sm:$0xff]  ;;  %v11358_v3 = vpop.permute.xlu1 %5374 }
 0x747   : > { %14039 = vst [vmem:[#allocation75_spill] sm:$0xff] %v11328_v21  ;;  %v5793_v59 = vmul.f32 %v11333_v54, %v11296_v37  ;;  %v5699_v24 = vmul.f32 %v11333_v54, %v11299_v33  ;;  %v14041_v10 = vld [vmem:[#allocation308_spill] sm:$0xff]  ;;  %v14042_v8 = vld [vmem:[#allocation309_spill] sm:$0xff]  ;;  %v14043_v46 = vld [vmem:[#allocation310_spill] sm:$0xff] }
 0x748   : > { %v2187_v20 = vsel %vm684_vm2, %v14041_v10, %v14040_v23  ;;  %v2220_v42 = vsel %vm684_vm2, %v14043_v46, %v14042_v8  ;;  %v14044_v30 = vld [vmem:[#allocation311_spill] sm:$0xff]  ;;  %v14045_v5 = vld [vmem:[#allocation312_spill] sm:$0xff]  ;;  %v14046_v44 = vld [vmem:[#allocation313_spill] sm:$0xff]  ;;  %14050 = vst [vmem:[#allocation76_spill] sm:$0xff] %v11358_v3  ;;  %v11360_v23 = vpop.permute.xlu0 %5372 }
 0x749   : > { %v2221_v36 = vsel %vm684_vm2, %v14045_v5, %v14044_v30  ;;  %v14047_v31 = vld [vmem:[#allocation314_spill] sm:$0xff]  ;;  %v14048_v53 = vld [vmem:[#allocation315_spill] sm:$0xff]  ;;  %v14049_v4 = vld [vmem:[#allocation316_spill] sm:$0xff]  ;;  %14051 = vst [vmem:[#allocation77_spill] sm:$0xff] %v11360_v23  ;;  %5805 = vrot.lane.b32.xlu1 %v5793_v59, %s6611_s25  ;;  %5711 = vrot.lane.b32.xlu0 %v5699_v24, %s6610_s4 }
 0x74a   : > { %v2222_v60 = vsel %vm684_vm2, %v14047_v31, %v14046_v44  ;;  %v2255_v43 = vsel %vm684_vm2, %v14049_v4, %v14048_v53  ;;  %v14052_v10 = vld [vmem:[#allocation317_spill] sm:$0xff]  ;;  %v14053_v56 = vld [vmem:[#allocation318_spill] sm:$0xff]  ;;  %v14054_v46 = vld [vmem:[#allocation319_spill] sm:$0xff] }
 0x74b   : > { %v2256_v8 = vsel %vm684_vm2, %v14053_v56, %v14052_v10  ;;  %v14055_v51 = vld [vmem:[#allocation320_spill] sm:$0xff]  ;;  %v14056_v5 = vld [vmem:[#allocation321_spill] sm:$0xff]  ;;  %v14057_v0 = vld [vmem:[#allocation322_spill] sm:$0xff]  ;;  %v2193_v10 = vadd.f32 %v2187_v20, %v11208_v13  ;;  %v2228_v59 = vadd.f32 %v2222_v60, %v11255_v41  ;;  %v2261_v24 = vadd.f32 %v2255_v43, %v11257_v38  ;;  %v11405_v20 = vpop.permute.xlu1 %5378 }
 0x74c   : > { %v2257_v30 = vsel %vm684_vm2, %v14055_v51, %v14054_v46  ;;  %v2290_v44 = vsel %vm684_vm2, %v14057_v0, %v14056_v5  ;;  %v14058_v31 = vld [vmem:[#allocation323_spill] sm:$0xff]  ;;  %v14060_v4 = vld [vmem:[#allocation325_spill] sm:$0xff]  ;;  %v14061_v28 = vld [vmem:[#allocation326_spill] sm:$0xff]  ;;  %v2227_v46 = vadd.f32 %v2221_v36, %v11253_v27  ;;  %v11397_v5 = vadd.f32 %v2256_v8, %v11259_v25  ;;  %14064 = vst [vmem:[#allocation78_spill] sm:$0xff] %v11405_v20 }
 0x74d   : > { %v2291_v53 = vsel %vm684_vm2, %v14059_v32, %v14058_v31  ;;  %v2292_v48 = vsel %vm684_vm2, %v14061_v28, %v14060_v4  ;;  %v11382_v56 = vld [vmem:[%s6701_s5 + $0xa0] sm:$0xff]  ;;  %v11387_v0 = vld [vmem:[%s6701_s5 + $0x98] sm:$0xff]  ;;  %v2226_v28 = vadd.f32 %v2220_v42, %v11250_v1  ;;  %v11400_v31 = vadd.f32 %v2257_v30, %v11261_v14  ;;  %v11407_v1 = vpop.permute.xlu0 %5376  ;;  %v14069_v36 = vld [vmem:[#allocation342_spill] sm:$0xff] }
 0x74e   : > { %v5795_v51 = vmul.f32 %v11382_v56, %v11296_v37  ;;  %v5794_v32 = vmul.f32 %v11387_v0, %v11296_v37  ;;  %v14062_v4 = vld [vmem:[#allocation327_spill] sm:$0xff]  ;;  %v14063_v39 = vld [vmem:[#allocation328_spill] sm:$0xff]  ;;  %14065 = vst [vmem:[#allocation79_spill] sm:$0xff] %v11407_v1  ;;  %v11410_v27 = vadd.f32 %v2290_v44, %v11263_v15  ;;  %v11413_v41 = vadd.f32 %v2291_v53, %v11273_v47  ;;  %v11429_v15 = vld [vmem:[%s6701_s5 + $0xb0] sm:$0x3f] }
 0x74f   : > { %v2325_v13 = vsel %vm684_vm2, %v14063_v39, %v14062_v4  ;;  %v11416_v38 = vadd.f32 %v2292_v48, %v11275_v22  ;;  %v14066_v25 = vld [vmem:[#allocation339_spill] sm:$0xff]  ;;  %v14067_v14 = vld [vmem:[#allocation340_spill] sm:$0xff]  ;;  %v14068_v39 = vld [vmem:[#allocation341_spill] sm:$0xff]  ;;  %v5797_v48 = vmul.f32 %v11429_v15, %v11296_v37  ;;  %v11452_v4 = vstv %s11344_s17  ;;  %s12096_s17 = sld [smem:[#allocation2 + $0xa8]] }
 0x750   : > { %v2387_v42 = vsel %vm919_vm3, %v14067_v14, %v14066_v25  ;;  %v2388_v60 = vsel %vm919_vm3, %v14069_v36, %v14068_v39  ;;  %5809 = vrot.lane.b32.xlu1 %v5795_v51, %s6611_s25  ;;  %5807 = vrot.lane.b32.xlu0 %v5794_v32, %s6611_s25  ;;  %v11434_v47 = vld [vmem:[%s6701_s5 + $0xa8] sm:$0xff]  ;;  %v11439_v43 = vadd.f32 %v2325_v13, %v11290_v55  ;;  %v14071_v30 = vld [vmem:[#allocation330_spill] sm:$0xff]  ;;  %v14073_v53 = vld [vmem:[#allocation343_spill] sm:$0xff] }
 0x751   : > { %v5796_v22 = vmul.f32 %v11434_v47, %v11296_v37  ;;  %v14070_v8 = vld [vmem:[#allocation329_spill] sm:$0xff]  ;;  %v14074_v51 = vld [vmem:[#allocation344_spill] sm:$0xff]  ;;  %v14076_v14 = vld [vmem:[#allocation346_spill] sm:$0xff]  ;;  %v11468_v62 = vpop.permute.xlu0 %5380  ;;  %v11470_v18 = vadd.f32 %v2387_v42, %v2157_v12  ;;  %v5828_v12 = vmul.f32 %v11333_v54, %v11452_v4 }
 0x752   : > { %v11444_v44 = vsel %vm684_vm2, %v14071_v30, %v14070_v8  ;;  %v2419_v32 = vsel %vm919_vm3, %v14074_v51, %v14073_v53  ;;  %v14075_v25 = vld [vmem:[#allocation345_spill] sm:$0xff]  ;;  %v14077_v55 = vld [vmem:[#allocation347_spill] sm:$0xff]  ;;  %v14078_v13 = vld [vmem:[#allocation348_spill] sm:$0xff]  ;;  %v11466_v51 = vpop.permute.xlu1 %5382  ;;  %14084 = vst [vmem:[#allocation82_spill] sm:$0xff] %v11468_v62 }
 0x753   : > { %14072 = vst [vmem:[#allocation80_spill] sm:$0xff] %v11444_v44  ;;  %v2420_v39 = vsel %vm919_vm3, %v14076_v14, %v14075_v25  ;;  %v2421_v36 = vsel %vm919_vm3, %v14078_v13, %v14077_v55  ;;  %v14079_v35 = vld [vmem:[#allocation349_spill] sm:$0xff]  ;;  %v14080_v8 = vld [vmem:[#allocation350_spill] sm:$0xff]  ;;  %v14081_v52 = vld [vmem:[#allocation351_spill] sm:$0xff]  ;;  %v11472_v25 = vadd.f32 %v2388_v60, %v2158_v45 }
 0x754   : > { %v2454_v30 = vsel %vm919_vm3, %v14080_v8, %v14079_v35  ;;  %v14082_v44 = vld [vmem:[#allocation352_spill] sm:$0xff]  ;;  %14083 = vst [vmem:[#allocation81_spill] sm:$0xff] %v11466_v51  ;;  %v14085_v14 = vld [vmem:[#allocation353_spill] sm:$0xff]  ;;  %v14086_v40 = vld [vmem:[#allocation354_spill] sm:$0xff]  ;;  %v11482_v8 = vadd.f32 %v2419_v32, %v2191_v26  ;;  %5813 = vrot.lane.b32.xlu1 %v5797_v48, %s6611_s25  ;;  %5811 = vrot.lane.b32.xlu0 %v5796_v22, %s6611_s25 }
 0x755   : > { %v2455_v53 = vsel %vm919_vm3, %v14082_v44, %v14081_v52  ;;  %v2456_v55 = vsel %vm919_vm3, %v14086_v40, %v14085_v14  ;;  %v14087_v13 = vld [vmem:[#allocation355_spill] sm:$0xff]  ;;  %v14088_v21 = vld [vmem:[#allocation356_spill] sm:$0xff]  ;;  %v3079_v52 = vstv %s11377_s21  ;;  %v11497_v45 = vadd.f32 %v2420_v39, %v11339_v49  ;;  %v14089_v44 = vld [vmem:[#allocation357_spill] sm:$0xff]  ;;  %s12163_s21 = sld [smem:[#allocation2 + $0xb6]] }
 0x756   : > { %v2489_v35 = vsel %vm919_vm3, %v14088_v21, %v14087_v13  ;;  %v11492_v40 = vld [vmem:[%s6701_s5 + $0xb8] sm:$0x3f]  ;;  %v11499_v26 = vadd.f32 %v2421_v36, %v2193_v10  ;;  %v11501_v42 = vadd.f32 %v2454_v30, %v2226_v28  ;;  %v11503_v60 = vadd.f32 %v2455_v53, %v2227_v46  ;;  %v14090_v32 = vld [vmem:[#allocation358_spill] sm:$0xff]  ;;  %v14092_v13 = vld [vmem:[#allocation360_spill] sm:$0xff]  ;;  %v11517_v10 = vpop.permute.xlu1 %5409  ;;  %v11519_v28 = vpop.permute.xlu0 %5407 }
 0x757   : > { %v5798_v21 = vmul.f32 %v11492_v40, %v11296_v37  ;;  %v11507_v48 = vadd.f32 %v2456_v55, %v2228_v59  ;;  %v11509_v22 = vadd.f32 %v2489_v35, %v2261_v24  ;;  %v2490_v37 = vsel %vm919_vm3, %v14090_v32, %v14089_v44  ;;  %v14091_v14 = vld [vmem:[#allocation359_spill] sm:$0xff]  ;;  %14093 = vst [vmem:[#allocation83_spill] sm:$0xff] %v11517_v10  ;;  %v14095_v46 = vld [vmem:[#allocation361_spill] sm:$0xff]  ;;  %v14096_v39 = vld [vmem:[#allocation362_spill] sm:$0xff] }
 0x758   : > { %v2491_v49 = vsel %vm919_vm3, %v14092_v13, %v14091_v14  ;;  %14094 = vst [vmem:[#allocation84_spill] sm:$0xff] %v11519_v28  ;;  %v2524_v59 = vsel %vm919_vm3, %v14096_v39, %v14095_v46  ;;  %v14097_v24 = vld [vmem:[#allocation363_spill] sm:$0xff]  ;;  %v14098_v36 = vld [vmem:[#allocation364_spill] sm:$0xff]  ;;  %v3085_v35 = vstv %s11421_s24  ;;  %v14099_v44 = vld [vmem:[#allocation365_spill] sm:$0xff]  ;;  %5840 = vrot.lane.b32.xlu1 %v5828_v12, %s6611_s25  ;;  %v5830_v13 = vmul.f32 %v11382_v56, %v11452_v4  ;;  %s12683_s24 = sld [smem:[#allocation2 + $0xbd]] }
 0x759   : > { %v2525_v30 = vsel %vm919_vm3, %v14098_v36, %v14097_v24  ;;  %v11528_v53 = vld [vmem:[%s6701_s5 + $0x60] sm:$0xff]  ;;  %v14100_v32 = vld [vmem:[#allocation366_spill] sm:$0xff]  ;;  %5815 = vrot.lane.b32.xlu0 %v5798_v21, %s6611_s25  ;;  %v5829_v46 = vmul.f32 %v11387_v0, %v11452_v4  ;;  %v11546_v39 = vadd.f32 %v2490_v37, %v11397_v5  ;;  %v11549_v24 = vadd.f32 %v2491_v49, %v11400_v31  ;;  %v14107_v10 = vld [vmem:[#allocation381_spill] sm:$0xff] }
 0x75a   : > { %v11531_v55 = vmul.f32 %v11528_v53, %v3079_v52  ;;  %v2526_v14 = vsel %vm919_vm3, %v14100_v32, %v14099_v44  ;;  %v6514_v36 = vld [vmem:[%s6701_s5 + $0x70] sm:$0xff]  ;;  %v3093_v12 = vstv %s11449_s26  ;;  %v11556_v21 = vadd.f32 %v2524_v59, %v11410_v27  ;;  %v14101_v32 = vld [vmem:[#allocation367_spill] sm:$0xff]  ;;  %v14102_v7 = vld [vmem:[#allocation368_spill] sm:$0xff]  ;;  %v11566_v37 = vpop.permute.xlu1 %5413  ;;  %v11568_v31 = vpop.permute.xlu0 %5411 }
 0x75b   : > { %v11552_v44 = vmul.f32 %v6514_v36, %v3079_v52  ;;  %v2559_v19 = vsel %vm919_vm3, %v14102_v7, %v14101_v32  ;;  %v11562_v17 = vmul.f32 %v11528_v53, %v3085_v35  ;;  %v11564_v5 = vmul.f32 %v6514_v36, %v3085_v35  ;;  %14103 = vst [vmem:[#allocation85_spill] sm:$0xff] %v11566_v37  ;;  %v6515_v49 = vld [vmem:[%s6701_s5 + $0x80] sm:$0x3f]  ;;  %v14108_v63 = vld [vmem:[#allocation382_spill] sm:$0xff]  ;;  %v14111_v9 = vld [vmem:[#allocation383_spill] sm:$0xff] }
 0x75c   : > { %14104 = vst [vmem:[#allocation86_spill] sm:$0xff] %v11568_v31  ;;  %v11571_v52 = vadd.f32 %v2525_v30, %v11413_v41  ;;  %v11574_v27 = vadd.f32 %v2526_v14, %v11416_v38  ;;  %v11577_v59 = vmul.f32 %v6515_v49, %v3085_v35  ;;  %v3101_v7 = vstv %s11480_s27  ;;  %5844 = vrot.lane.b32.xlu1 %v5830_v13, %s6611_s25  ;;  %v14105_v13 = vld [vmem:[#allocation379_spill] sm:$0xff]  ;;  %v14106_v37 = vld [vmem:[#allocation380_spill] sm:$0xff]  ;;  %v14113_v1 = vld [vmem:[#allocation385_spill] sm:$0xff]  ;;  %s6409_s27 = sshll.u32 %s6651_s13, 8  ;;  %s6612_s13 = smov [#allocation5]  }
 0x75d   : > { %v11581_v32 = vmul.f32 %v11528_v53, %v3093_v12  ;;  %v3109_v28 = vstv %s11485_s6  ;;  %5842 = vrot.lane.b32.xlu0 %v5829_v46, %s6611_s25  ;;  %v5832_v31 = vmul.f32 %v11429_v15, %v11452_v4  ;;  %v5831_v41 = vmul.f32 %v11434_v47, %v11452_v4  ;;  %v14112_v62 = vld [vmem:[#allocation384_spill] sm:$0xff]  ;;  %v14114_v20 = vld [vmem:[#allocation386_spill] sm:$0xff]  ;;  %v14122_v16 = vld [vmem:[#allocation393_spill] sm:$0xff] }
 0x75e   : > { %v11591_v38 = vadd.f32 %v2559_v19, %v11439_v43  ;;  %v11593_v30 = vmul.f32 %v6514_v36, %v3093_v12  ;;  %v11595_v35 = vmul.f32 %v6515_v49, %v3093_v12  ;;  %v5768_v14 = vstv %s11505_s28  ;;  %v11611_v43 = vpop.permute.xlu1 %5417  ;;  %v11613_v12 = vpop.permute.xlu0 %5415  ;;  %v14116_v23 = vld [vmem:[#allocation388_spill] sm:$0xff]  ;;  %v14123_v34 = vld [vmem:[#allocation394_spill] sm:$0xff]  ;;  %v14136_v6 = vld [vmem:[#allocation401_spill] sm:$0xff] }
 0x75f   : > { %v2621_v46 = vsel %vm1154_vm4, %v14106_v37, %v14105_v13  ;;  %v2622_v29 = vsel %vm1154_vm4, %v14108_v63, %v14107_v10  ;;  %v11607_v2 = vmul.f32 %v11528_v53, %v3101_v7  ;;  %v11609_v19 = vmul.f32 %v6514_v36, %v3101_v7  ;;  %14109 = vst [vmem:[#allocation87_spill] sm:$0xff] %v11611_v43  ;;  %v14115_v10 = vld [vmem:[#allocation387_spill] sm:$0xff]  ;;  %v14121_v50 = vld [vmem:[#allocation392_spill] sm:$0xff] }
 0x760   : > { %14110 = vst [vmem:[#allocation88_spill] sm:$0xff] %v11613_v12  ;;  %v2653_v51 = vsel %vm1154_vm4, %v14112_v62, %v14111_v9  ;;  %v2654_v37 = vsel %vm1154_vm4, %v14114_v20, %v14113_v1  ;;  %v11621_v13 = vmul.f32 %v6515_v49, %v3101_v7  ;;  %v11624_v63 = vmul.f32 %v11528_v53, %v3109_v28  ;;  %v14118_v7 = vld [vmem:[#allocation389_spill] sm:$0xff]  ;;  %v14119_v12 = vld [vmem:[#allocation390_spill] sm:$0xff]  ;;  %v14138_v11 = vld [vmem:[#allocation403_spill] sm:$0xff] }
 0x761   : > { %v2655_v3 = vsel %vm1154_vm4, %v14116_v23, %v14115_v10  ;;  %v11630_v43 = vstv %s11537_s29  ;;  %5848 = vrot.lane.b32.xlu1 %v5832_v31, %s6611_s25  ;;  %5846 = vrot.lane.b32.xlu0 %v5831_v41, %s6611_s25  ;;  %v5769_v9 = vmul.f32 %v11333_v54, %v5768_v14  ;;  %v5833_v62 = vmul.f32 %v11492_v40, %v11452_v4  ;;  %v14120_v31 = vld [vmem:[#allocation391_spill] sm:$0xff] }
 0x762   : > { %14117 = vst [vmem:[#allocation89_spill] sm:$0xff] %v11630_v43  ;;  %v2625_v20 = vadd.f32 %v2621_v46, %v11470_v18  ;;  %v2626_v1 = vadd.f32 %v2622_v29, %v11472_v25  ;;  %v2688_v61 = vsel %vm1154_vm4, %v14119_v12, %v14118_v7  ;;  %v11642_v23 = vmul.f32 %v6514_v36, %v3109_v28  ;;  %v5445_v29 = vpop.permute.xlu1 %5444  ;;  %v5443_v25 = vpop.permute.xlu0 %5442  ;;  %v14126_v12 = vld [vmem:[#allocation397_spill] sm:$0xff] }
 0x763   : > { %v2659_v10 = vadd.f32 %v2653_v51, %v11482_v8  ;;  %v2689_v41 = vsel %vm1154_vm4, %v14121_v50, %v14120_v31  ;;  %v2690_v4 = vsel %vm1154_vm4, %v14123_v34, %v14122_v16  ;;  %v11651_v18 = vmul.f32 %v6515_v49, %v3109_v28  ;;  %v14125_v28 = vld [vmem:[#allocation396_spill] sm:$0xff]  ;;  %v14130_v7 = vld [vmem:[#allocation421_spill] sm:$0xff]  ;;  %v14131_v31 = vld [vmem:[#allocation422_spill] sm:$0xff] }
 0x764   : > { %v2660_v46 = vadd.f32 %v2654_v37, %v11497_v45  ;;  %v2661_v36 = vadd.f32 %v2655_v3, %v11499_v26  ;;  %v11657_v51 = vmul.f32 %v11528_v53, %v11630_v43  ;;  %v11660_v8 = vsel %vm919_vm3, %v5443_v25, %v5445_v29  ;;  %v14124_v26 = vld [vmem:[#allocation395_spill] sm:$0xff] }
 0x765   : > { %v2694_v50 = vadd.f32 %v2688_v61, %v11501_v42  ;;  %5777 = vrot.lane.b32.xlu1 %v5769_v9, %s6611_s25  ;;  %5850 = vrot.lane.b32.xlu0 %v5833_v62, %s6611_s25  ;;  %v5771_v34 = vmul.f32 %v11382_v56, %v5768_v14  ;;  %v5770_v16 = vmul.f32 %v11387_v0, %v5768_v14  ;;  %v11673_v49 = vstv %s11598_s30  ;;  %v14127_v61 = vld [vmem:[#allocation398_spill] sm:$0xff]  ;;  %v14128_v37 = vld [vmem:[#allocation419_spill] sm:$0xff]  ;;  %v14129_v9 = vld [vmem:[#allocation420_spill] sm:$0xff] }
 0x766   : > { %v2695_v45 = vadd.f32 %v2689_v41, %v11503_v60  ;;  %v2696_v3 = vadd.f32 %v2690_v4, %v11507_v48  ;;  %v2723_v53 = vsel %vm1154_vm4, %v14125_v28, %v14124_v26  ;;  %v2724_v42 = vsel %vm1154_vm4, %v14127_v61, %v14126_v12  ;;  %v14132_v41 = vld [vmem:[#allocation423_spill] sm:$0xff]  ;;  %v14133_v48 = vld [vmem:[#allocation424_spill] sm:$0xff]  ;;  %v5449_v29 = vpop.permute.xlu1 %5448  ;;  %v5447_v25 = vpop.permute.xlu0 %5446  ;;  %v14137_v12 = vld [vmem:[#allocation402_spill] sm:$0xff] }
 0x767   : > { %v2855_v62 = vsel %vm1389_vm5, %v14129_v9, %v14128_v37  ;;  %v2856_v60 = vsel %vm1389_vm5, %v14131_v31, %v14130_v7  ;;  %v2887_v4 = vsel %vm1389_vm5, %v14133_v48, %v14132_v41  ;;  %v14134_v26 = vld [vmem:[#allocation399_spill] sm:$0xff]  ;;  %v14135_v28 = vld [vmem:[#allocation400_spill] sm:$0xff]  ;;  %v2758_v61 = vsel %vm1154_vm4, %v14137_v12, %v14136_v6  ;;  %v14141_v31 = vld [vmem:[#allocation405_spill] sm:$0xff] }
 0x768   : > { %v2725_v43 = vsel %vm1154_vm4, %v14135_v28, %v14134_v26  ;;  %v14139_v37 = vld [vmem:[#allocation404_spill] sm:$0xff]  ;;  %v11697_v7 = vsel %vm919_vm3, %v5447_v25, %v5449_v29  ;;  %v2760_v41 = vsel %vm1154_vm4, %v14142_v57, %v14141_v31  ;;  %v5863_v48 = vmul.f32 %v11333_v54, %v11673_v49 }
 0x769   : > { %v2759_v9 = vsel %vm1154_vm4, %v14139_v37, %v14138_v11  ;;  %14140 = vst [vmem:[#allocation90_spill] sm:$0xff] %v11697_v7  ;;  %5781 = vrot.lane.b32.xlu1 %v5771_v34, %s6611_s25  ;;  %5779 = vrot.lane.b32.xlu0 %v5770_v16, %s6611_s25  ;;  %v5772_v6 = vmul.f32 %v11434_v47, %v5768_v14  ;;  %v14143_v37 = vld [vmem:[#allocation407_spill] sm:$0xff]  ;;  %v14144_v34 = vld [vmem:[#allocation408_spill] sm:$0xff] }
 0x76a   : > { %v2729_v26 = vadd.f32 %v2723_v53, %v11509_v22  ;;  %v2859_v28 = vadd.f32 %v2855_v62, %v2625_v20  ;;  %v2860_v11 = vadd.f32 %v2856_v60, %v2626_v1  ;;  %v2893_v12 = vadd.f32 %v2887_v4, %v2659_v10  ;;  %v5453_v31 = vpop.permute.xlu1 %5452  ;;  %v5451_v7 = vpop.permute.xlu0 %5450  ;;  %v14145_v22 = vld [vmem:[#allocation425_spill] sm:$0xff]  ;;  %v14146_v20 = vld [vmem:[#allocation426_spill] sm:$0xff] }
 0x76b   : > { %v2730_v29 = vadd.f32 %v2724_v42, %v11546_v39  ;;  %v2731_v25 = vadd.f32 %v2725_v43, %v11549_v24  ;;  %v2764_v57 = vadd.f32 %v2758_v61, %v11556_v21  ;;  %v2793_v16 = vsel %vm1154_vm4, %v14144_v34, %v14143_v37  ;;  %v14147_v24 = vld [vmem:[#allocation427_spill] sm:$0xff]  ;;  %v14148_v43 = vld [vmem:[#allocation428_spill] sm:$0xff]  ;;  %v14149_v60 = vld [vmem:[#allocation429_spill] sm:$0xff] }
 0x76c   : > { %v2765_v58 = vadd.f32 %v2759_v9, %v11571_v52  ;;  %v2766_v14 = vadd.f32 %v2760_v41, %v11574_v27  ;;  %v2888_v1 = vsel %vm1389_vm5, %v14146_v20, %v14145_v22  ;;  %v11720_v39 = vsel %vm919_vm3, %v5451_v7, %v5453_v31  ;;  %v14150_v4 = vld [vmem:[#allocation430_spill] sm:$0xff]  ;;  %v14151_v9 = vld [vmem:[#allocation431_spill] sm:$0xff]  ;;  %v14152_v7 = vld [vmem:[#allocation432_spill] sm:$0xff] }
 0x76d   : > { %v2889_v21 = vsel %vm1389_vm5, %v14148_v43, %v14147_v24  ;;  %5875 = vrot.lane.b32.xlu1 %v5863_v48, %s6611_s25  ;;  %5783 = vrot.lane.b32.xlu0 %v5772_v6, %s6611_s25  ;;  %v5865_v52 = vmul.f32 %v11382_v56, %v11673_v49  ;;  %v5864_v27 = vmul.f32 %v11387_v0, %v11673_v49  ;;  %v14153_v48 = vld [vmem:[#allocation433_spill] sm:$0xff]  ;;  %v14154_v6 = vld [vmem:[#allocation434_spill] sm:$0xff]  ;;  %v14155_v37 = vld [vmem:[#allocation435_spill] sm:$0xff] }
 0x76e   : > { %v2799_v10 = vadd.f32 %v2793_v16, %v11591_v38  ;;  %v3082_v53 = vadd.f32 %v11531_v55, %v2859_v28  ;;  %v11734_v42 = vadd.f32 %v11552_v44, %v2860_v11  ;;  %v11737_v62 = vadd.f32 %v11562_v17, %v2893_v12  ;;  %v14156_v55 = vld [vmem:[#allocation436_spill] sm:$0xff]  ;;  %v5480_v28 = vpop.permute.xlu1 %5479  ;;  %v5478_v11 = vpop.permute.xlu0 %5477  ;;  %v14157_v34 = vld [vmem:[#allocation437_spill] sm:$0xff]  ;;  %v14158_v16 = vld [vmem:[#allocation438_spill] sm:$0xff] }
 0x76f   : > { %v2922_v61 = vsel %vm1389_vm5, %v14150_v4, %v14149_v60  ;;  %v2923_v41 = vsel %vm1389_vm5, %v14152_v7, %v14151_v9  ;;  %v2924_v38 = vsel %vm1389_vm5, %v14154_v6, %v14153_v48  ;;  %v2957_v44 = vsel %vm1389_vm5, %v14156_v55, %v14155_v37  ;;  %v14159_v20 = vld [vmem:[#allocation439_spill] sm:$0xff]  ;;  %v14160_v24 = vld [vmem:[#allocation440_spill] sm:$0xff]  ;;  %v14161_v9 = vld [vmem:[#allocation441_spill] sm:$0xff] }
 0x770   : > { %v2894_v17 = vadd.f32 %v2888_v1, %v2660_v46  ;;  %v2895_v12 = vadd.f32 %v2889_v21, %v2661_v36  ;;  %v2958_v31 = vsel %vm1389_vm5, %v14158_v16, %v14157_v34  ;;  %v11755_v22 = vsel %vm919_vm3, %v5478_v11, %v5480_v28  ;;  %v14162_v7 = vld [vmem:[#allocation442_spill] sm:$0xff]  ;;  %v14163_v6 = vld [vmem:[#allocation443_spill] sm:$0xff]  ;;  %v14164_v37 = vld [vmem:[#allocation444_spill] sm:$0xff] }
 0x771   : > { %v2959_v43 = vsel %vm1389_vm5, %v14160_v24, %v14159_v20  ;;  %5879 = vrot.lane.b32.xlu1 %v5865_v52, %s6611_s25  ;;  %5877 = vrot.lane.b32.xlu0 %v5864_v27, %s6611_s25  ;;  %v5867_v60 = vmul.f32 %v11429_v15, %v11673_v49  ;;  %v5866_v46 = vmul.f32 %v11434_v47, %v11673_v49  ;;  %v14165_v55 = vld [vmem:[#allocation445_spill] sm:$0xff]  ;;  %v14166_v27 = vld [vmem:[#allocation446_spill] sm:$0xff]  ;;  %v14167_v11 = vld [vmem:[#allocation447_spill] sm:$0xff] }
 0x772   : > { %v2928_v36 = vadd.f32 %v2922_v61, %v2694_v50  ;;  %v2929_v1 = vadd.f32 %v2923_v41, %v2695_v45  ;;  %v2930_v21 = vadd.f32 %v2924_v38, %v2696_v3  ;;  %v2963_v4 = vadd.f32 %v2957_v44, %v2729_v26  ;;  %v14168_v34 = vld [vmem:[#allocation448_spill] sm:$0xff]  ;;  %v5484_v50 = vpop.permute.xlu1 %5483  ;;  %v5482_v45 = vpop.permute.xlu0 %5481 }
 0x773   : > { %v2992_v48 = vsel %vm1389_vm5, %v14162_v7, %v14161_v9  ;;  %v2993_v52 = vsel %vm1389_vm5, %v14164_v37, %v14163_v6  ;;  %v2994_v28 = vsel %vm1389_vm5, %v14166_v27, %v14165_v55  ;;  %v3027_v16 = vsel %vm1389_vm5, %v14168_v34, %v14167_v11  ;;  %v14171_v9 = vld [vmem:[#allocation460_spill] sm:$0xff]  ;;  %v14177_v6 = vld [vmem:[#allocation465_spill] sm:$0xff]  ;;  %v14178_v37 = vld [vmem:[#allocation466_spill] sm:$0xff] }
 0x774   : > { %v2964_v3 = vadd.f32 %v2958_v31, %v2730_v29  ;;  %v2965_v26 = vadd.f32 %v2959_v43, %v2731_v25  ;;  %v3090_v61 = vadd.f32 %v11564_v5, %v2894_v17  ;;  %v11780_v41 = vsel %vm919_vm3, %v5482_v45, %v5484_v50  ;;  %v14176_v7 = vld [vmem:[#allocation464_spill] sm:$0xff]  ;;  %v14179_v55 = vld [vmem:[#allocation467_spill] sm:$0xff]  ;;  %v14181_v11 = vld [vmem:[#allocation469_spill] sm:$0xff] }
 0x775   : > { %14169 = vst [vmem:[#allocation91_spill] sm:$0xff] %v11780_v41  ;;  %v3091_v38 = vadd.f32 %v11577_v59, %v2895_v12  ;;  %5883 = vrot.lane.b32.xlu1 %v5867_v60, %s6611_s25  ;;  %5881 = vrot.lane.b32.xlu0 %v5866_v46, %s6611_s25  ;;  %v5700_v44 = vmul.f32 %v11387_v0, %v11299_v33  ;;  %v14170_v46 = vld [vmem:[#allocation459_spill] sm:$0xff]  ;;  %v14180_v27 = vld [vmem:[#allocation468_spill] sm:$0xff] }
 0x776   : > { %v5868_v20 = vmul.f32 %v11492_v40, %v11673_v49  ;;  %v2998_v24 = vadd.f32 %v2992_v48, %v2764_v57  ;;  %v2999_v29 = vadd.f32 %v2993_v52, %v2765_v58  ;;  %v3000_v25 = vadd.f32 %v2994_v28, %v2766_v14  ;;  %v5488_v43 = vpop.permute.xlu1 %5487  ;;  %v5486_v60 = vpop.permute.xlu0 %5485  ;;  %v14183_v34 = vld [vmem:[#allocation471_spill] sm:$0xff] }
 0x777   : > { %v3033_v31 = vadd.f32 %v3027_v16, %v2799_v10  ;;  %v3097_v5 = vadd.f32 %v11581_v32, %v2928_v36  ;;  %v3098_v59 = vadd.f32 %v11593_v30, %v2929_v1  ;;  %v3099_v17 = vadd.f32 %v11595_v35, %v2930_v21  ;;  %v14173_v32 = vld [vmem:[#allocation461_spill] sm:$0xff]  ;;  %v14174_v10 = vld [vmem:[#allocation462_spill] sm:$0xff]  ;;  %v14184_v16 = vld [vmem:[#allocation472_spill] sm:$0xff] }
 0x778   : > { %v3105_v12 = vadd.f32 %v11607_v2, %v2963_v4  ;;  %v3150_v49 = vsel %vm214_vm0, %v14171_v9, %v14170_v46  ;;  %v3106_v58 = vadd.f32 %v11609_v19, %v2964_v3  ;;  %v3107_v57 = vadd.f32 %v11621_v13, %v2965_v26  ;;  %v14175_v4 = vld [vmem:[#allocation463_spill] sm:$0xff]  ;;  %v14186_v3 = vld [vmem:[#allocation473_spill] sm:$0xff]  ;;  %v14187_v26 = vld [vmem:[#allocation474_spill] sm:$0xff] }
 0x779   : > { %v11801_v14 = vsel %vm919_vm3, %v5486_v60, %v5488_v43  ;;  %v3151_v30 = vsel %vm214_vm0, %v14174_v10, %v14173_v32  ;;  %5713 = vrot.lane.b32.xlu1 %v5700_v44, %s6610_s4  ;;  %5885 = vrot.lane.b32.xlu0 %v5868_v20, %s6611_s25  ;;  %v5702_v2 = vmul.f32 %v11434_v47, %v11299_v33  ;;  %v14188_v43 = vld [vmem:[#allocation475_spill] sm:$0xff]  ;;  %v14189_v60 = vld [vmem:[#allocation476_spill] sm:$0xff]  ;;  %v14190_v9 = vld [vmem:[#allocation477_spill] sm:$0xff] }
 0x77a   : > { %14172 = vst [vmem:[#allocation92_spill] sm:$0xff] %v11801_v14  ;;  %v5701_v35 = vmul.f32 %v11382_v56, %v11299_v33  ;;  %v3113_v19 = vadd.f32 %v11624_v63, %v2998_v24  ;;  %v3114_v13 = vadd.f32 %v11642_v23, %v2999_v29  ;;  %v3115_v36 = vadd.f32 %v11651_v18, %v3000_v25  ;;  %v5515_v28 = vpop.permute.xlu1 %5514  ;;  %v5513_v23 = vpop.permute.xlu0 %5512  ;;  %v14192_v10 = vld [vmem:[#allocation479_spill] sm:$0xff] }
 0x77b   : > { %v3121_v1 = vadd.f32 %v11657_v51, %v3033_v31  ;;  %v3154_v21 = vadd.f32 %v3150_v49, %v3082_v53  ;;  %v3182_v48 = vsel %vm214_vm0, %v14176_v7, %v14175_v4  ;;  %v3183_v52 = vsel %vm214_vm0, %v14178_v37, %v14177_v6  ;;  %v14182_v51 = vld [vmem:[#allocation470_spill] sm:$0xff]  ;;  %v14197_v37 = vld [vmem:[#allocation483_spill] sm:$0xff] }
 0x77c   : > { %v3184_v63 = vsel %vm214_vm0, %v14180_v27, %v14179_v55  ;;  %v3155_v18 = vadd.f32 %v3151_v30, %v11734_v42  ;;  %v3217_v53 = vsel %vm214_vm0, %v14182_v51, %v14181_v11  ;;  %v3218_v50 = vsel %vm214_vm0, %v14184_v16, %v14183_v34  ;;  %v14191_v49 = vld [vmem:[#allocation478_spill] sm:$0xff]  ;;  %v14193_v30 = vld [vmem:[#allocation480_spill] sm:$0xff] }
 0x77d   : > { %v11833_v45 = vsel %vm919_vm3, %v5513_v23, %v5515_v28  ;;  %v3219_v44 = vsel %vm214_vm0, %v14187_v26, %v14186_v3  ;;  %5717 = vrot.lane.b32.xlu1 %v5702_v2, %s6610_s4  ;;  %5715 = vrot.lane.b32.xlu0 %v5701_v35, %s6610_s4  ;;  %v5704_v42 = vmul.f32 %v11492_v40, %v11299_v33  ;;  %v5897_v31 = vstv %s11789_s3  ;;  %v14194_v35 = vld [vmem:[#allocation481_spill] sm:$0xff]  ;;  %v14195_v4 = vld [vmem:[#allocation482_spill] sm:$0xff]  ;;  %v14202_v34 = vld [vmem:[#allocation488_spill] sm:$0xff]  ;;  %s12836_s3 = scalar_lea.hbm %s12883_s2, %s6409_s27 }
 0x77e   : > { %14185 = vst [vmem:[#allocation93_spill] sm:$0xff] %v11833_v45  ;;  %v5703_v20 = vmul.f32 %v11429_v15, %v11299_v33  ;;  %v3188_v24 = vadd.f32 %v3182_v48, %v11737_v62  ;;  %v3189_v29 = vadd.f32 %v3183_v52, %v3090_v61  ;;  %v3190_v25 = vadd.f32 %v3184_v63, %v3091_v38  ;;  %v5519_v62 = vpop.permute.xlu1 %5518  ;;  %v5517_v61 = vpop.permute.xlu0 %5516  ;;  %v14198_v52 = vld [vmem:[#allocation484_spill] sm:$0xff]  ;;  %v14200_v11 = vld [vmem:[#allocation486_spill] sm:$0xff] }
 0x77f   : > { %v3252_v46 = vsel %vm214_vm0, %v14189_v60, %v14188_v43  ;;  %v3253_v32 = vsel %vm214_vm0, %v14191_v49, %v14190_v9  ;;  %v3254_v2 = vsel %vm214_vm0, %v14193_v30, %v14192_v10  ;;  %v3287_v33 = vsel %vm214_vm0, %v14195_v4, %v14194_v35  ;;  %v14204_v3 = vld [vmem:[#allocation500_spill] sm:$0xff]  ;;  %v14210_v9 = vld [vmem:[#allocation506_spill] sm:$0xff]  ;;  %v14212_v10 = vld [vmem:[#allocation507_spill] sm:$0xff] }
 0x780   : > { %v3223_v38 = vadd.f32 %v3217_v53, %v3097_v5  ;;  %v3224_v7 = vadd.f32 %v3218_v50, %v3098_v59  ;;  %v3225_v48 = vadd.f32 %v3219_v44, %v3099_v17  ;;  %v11859_v6 = vsel %vm919_vm3, %v5517_v61, %v5519_v62  ;;  %v14199_v17 = vld [vmem:[#allocation485_spill] sm:$0xff]  ;;  %v14201_v53 = vld [vmem:[#allocation487_spill] sm:$0xff]  ;;  %v14208_v43 = vld [vmem:[#allocation504_spill] sm:$0xff] }
 0x781   : > { %14196 = vst [vmem:[#allocation94_spill] sm:$0xff] %v11859_v6  ;;  %v3288_v55 = vsel %vm214_vm0, %v14198_v52, %v14197_v37  ;;  %5721 = vrot.lane.b32.xlu1 %v5704_v42, %s6610_s4  ;;  %5719 = vrot.lane.b32.xlu0 %v5703_v20, %s6610_s4  ;;  %v5899_v27 = vmul.f32 %v11387_v0, %v5897_v31  ;;  %v14203_v50 = vld [vmem:[#allocation499_spill] sm:$0xff]  ;;  %v14205_v44 = vld [vmem:[#allocation501_spill] sm:$0xff]  ;;  %v14206_v42 = vld [vmem:[#allocation502_spill] sm:$0xff] }
 0x782   : > { %v5898_v63 = vmul.f32 %v11333_v54, %v5897_v31  ;;  %v3258_v28 = vadd.f32 %v3252_v46, %v3105_v12  ;;  %v3259_v23 = vadd.f32 %v3253_v32, %v3106_v58  ;;  %v3260_v5 = vadd.f32 %v3254_v2, %v3107_v57  ;;  %v5523_v58 = vpop.permute.xlu1 %5522  ;;  %v5521_v57 = vpop.permute.xlu0 %5520  ;;  %v14207_v20 = vld [vmem:[#allocation503_spill] sm:$0xff]  ;;  %v14209_v46 = vld [vmem:[#allocation505_spill] sm:$0xff]  ;;  %v14213_v30 = vld [vmem:[#allocation508_spill] sm:$0xff] }
 0x783   : > { %v3293_v59 = vadd.f32 %v3287_v33, %v3113_v19  ;;  %v3289_v51 = vsel %vm214_vm0, %v14200_v11, %v14199_v17  ;;  %v3322_v16 = vsel %vm214_vm0, %v14202_v34, %v14201_v53  ;;  %v3384_v26 = vsel %vm449_vm1, %v14204_v3, %v14203_v50  ;;  %v14214_v52 = vld [vmem:[#allocation509_spill] sm:$0xff]  ;;  %v14216_v11 = vld [vmem:[#allocation511_spill] sm:$0xff]  ;;  %v14217_v53 = vld [vmem:[#allocation512_spill] sm:$0xff] }
 0x784   : > { %v3385_v12 = vsel %vm449_vm1, %v14206_v42, %v14205_v44  ;;  %v3294_v19 = vadd.f32 %v3288_v55, %v3114_v13  ;;  %v3416_v60 = vsel %vm449_vm1, %v14208_v43, %v14207_v20  ;;  %v3417_v49 = vsel %vm449_vm1, %v14210_v9, %v14209_v46  ;;  %v14215_v55 = vld [vmem:[#allocation510_spill] sm:$0xff]  ;;  %v14224_v43 = vld [vmem:[#allocation519_spill] sm:$0xff]  ;;  %v14226_v9 = vld [vmem:[#allocation521_spill] sm:$0xff] }
 0x785   : > { %v11889_v32 = vsel %vm919_vm3, %v5521_v57, %v5523_v58  ;;  %v3418_v2 = vsel %vm449_vm1, %v14213_v30, %v14212_v10  ;;  %5912 = vrot.lane.b32.xlu1 %v5899_v27, %s6611_s25  ;;  %5910 = vrot.lane.b32.xlu0 %v5898_v63, %s6611_s25  ;;  %v5901_v13 = vmul.f32 %v11434_v47, %v5897_v31  ;;  %v14218_v27 = vld [vmem:[#allocation513_spill] sm:$0xff]  ;;  %v14219_v50 = vld [vmem:[#allocation514_spill] sm:$0xff]  ;;  %v5733_v20 = vstv %s11868_s7  ;;  %v14228_v30 = vld [vmem:[#allocation523_spill] sm:$0xff] }
 0x786   : > { %14211 = vst [vmem:[#allocation95_spill] sm:$0xff] %v11889_v32  ;;  %v5900_v35 = vmul.f32 %v11382_v56, %v5897_v31  ;;  %v3295_v4 = vadd.f32 %v3289_v51, %v3115_v36  ;;  %v3328_v33 = vadd.f32 %v3322_v16, %v3121_v1  ;;  %v3388_v62 = vadd.f32 %v3384_v26, %v3154_v21  ;;  %v5546_v3 = vpop.permute.xlu1 %5545  ;;  %v5544_v44 = vpop.permute.xlu0 %5543  ;;  %v14220_v21 = vld [vmem:[#allocation515_spill] sm:$0xff]  ;;  %v14222_v16 = vld [vmem:[#allocation517_spill] sm:$0xff]  ;;  %v14223_v26 = vld [vmem:[#allocation518_spill] sm:$0xff] }
 0x787   : > { %v3389_v61 = vadd.f32 %v3385_v12, %v3155_v18  ;;  %v3422_v37 = vadd.f32 %v3416_v60, %v3188_v24  ;;  %v3451_v17 = vsel %vm449_vm1, %v14215_v55, %v14214_v52  ;;  %v3452_v34 = vsel %vm449_vm1, %v14217_v53, %v14216_v11  ;;  %v14221_v18 = vld [vmem:[#allocation516_spill] sm:$0xff]  ;;  %v14231_v52 = vld [vmem:[#allocation526_spill] sm:$0xff] }
 0x788   : > { %v3453_v63 = vsel %vm449_vm1, %v14219_v50, %v14218_v27  ;;  %v3423_v36 = vadd.f32 %v3417_v49, %v3189_v29  ;;  %v3424_v1 = vadd.f32 %v3418_v2, %v3190_v25  ;;  %v3486_v24 = vsel %vm449_vm1, %v14221_v18, %v14220_v21  ;;  %v14225_v60 = vld [vmem:[#allocation520_spill] sm:$0xff]  ;;  %v14227_v49 = vld [vmem:[#allocation522_spill] sm:$0xff]  ;;  %v14234_v27 = vld [vmem:[#allocation539_spill] sm:$0xff] }
 0x789   : > { %v11911_v51 = vsel %vm1154_vm4, %v5544_v44, %v5546_v3  ;;  %v3487_v42 = vsel %vm449_vm1, %v14223_v26, %v14222_v16  ;;  %5916 = vrot.lane.b32.xlu1 %v5901_v13, %s6611_s25  ;;  %5914 = vrot.lane.b32.xlu0 %v5900_v35, %s6611_s25  ;;  %v5903_v12 = vmul.f32 %v11492_v40, %v5897_v31  ;;  %v14229_v2 = vld [vmem:[#allocation524_spill] sm:$0xff]  ;;  %v14230_v35 = vld [vmem:[#allocation525_spill] sm:$0xff]  ;;  %v14237_v16 = vld [vmem:[#allocation542_spill] sm:$0xff] }
 0x78a   : > { %v5902_v29 = vmul.f32 %v11429_v15, %v5897_v31  ;;  %v3457_v25 = vadd.f32 %v3451_v17, %v3223_v38  ;;  %v3458_v58 = vadd.f32 %v3452_v34, %v3224_v7  ;;  %v3459_v57 = vadd.f32 %v3453_v63, %v3225_v48  ;;  %v5550_v38 = vpop.permute.xlu1 %5549  ;;  %v5548_v7 = vpop.permute.xlu0 %5547  ;;  %v14232_v17 = vld [vmem:[#allocation527_spill] sm:$0xff]  ;;  %v14233_v11 = vld [vmem:[#allocation528_spill] sm:$0xff] }
 0x78b   : > { %v3488_v46 = vsel %vm449_vm1, %v14225_v60, %v14224_v43  ;;  %v3521_v10 = vsel %vm449_vm1, %v14227_v49, %v14226_v9  ;;  %v3522_v13 = vsel %vm449_vm1, %v14229_v2, %v14228_v30  ;;  %v3523_v31 = vsel %vm449_vm1, %v14231_v52, %v14230_v35  ;;  %v14235_v50 = vld [vmem:[#allocation540_spill] sm:$0xff]  ;;  %v14240_v60 = vld [vmem:[#allocation545_spill] sm:$0xff]  ;;  %v14242_v49 = vld [vmem:[#allocation547_spill] sm:$0xff] }
 0x78c   : > { %v3492_v48 = vadd.f32 %v3486_v24, %v3258_v28  ;;  %v3493_v55 = vadd.f32 %v3487_v42, %v3259_v23  ;;  %v3556_v53 = vsel %vm449_vm1, %v14233_v11, %v14232_v17  ;;  %v11937_v34 = vsel %vm1154_vm4, %v5548_v7, %v5550_v38  ;;  %v14236_v24 = vld [vmem:[#allocation541_spill] sm:$0xff]  ;;  %v14238_v42 = vld [vmem:[#allocation543_spill] sm:$0xff]  ;;  %v14239_v43 = vld [vmem:[#allocation544_spill] sm:$0xff] }
 0x78d   : > { %v3618_v63 = vsel %vm684_vm2, %v14235_v50, %v14234_v27  ;;  %5920 = vrot.lane.b32.xlu1 %v5903_v12, %s6611_s25  ;;  %5918 = vrot.lane.b32.xlu0 %v5902_v29, %s6611_s25  ;;  %v5735_v3 = vmul.f32 %v11387_v0, %v5733_v20  ;;  %v5734_v28 = vmul.f32 %v11333_v54, %v5733_v20  ;;  %v14241_v29 = vld [vmem:[#allocation546_spill] sm:$0xff]  ;;  %v14243_v30 = vld [vmem:[#allocation548_spill] sm:$0xff]  ;;  %v14246_v52 = vld [vmem:[#allocation551_spill] sm:$0xff] }
 0x78e   : > { %v3494_v23 = vadd.f32 %v3488_v46, %v3260_v5  ;;  %v3527_v44 = vadd.f32 %v3521_v10, %v3293_v59  ;;  %v3528_v21 = vadd.f32 %v3522_v13, %v3294_v19  ;;  %v3529_v18 = vadd.f32 %v3523_v31, %v3295_v4  ;;  %v5574_v59 = vpop.permute.xlu1 %5573  ;;  %v5572_v19 = vpop.permute.xlu0 %5571  ;;  %v14244_v10 = vld [vmem:[#allocation549_spill] sm:$0xff]  ;;  %v14245_v2 = vld [vmem:[#allocation550_spill] sm:$0xff]  ;;  %v14247_v31 = vld [vmem:[#allocation552_spill] sm:$0xff] }
 0x78f   : > { %v3619_v26 = vsel %vm684_vm2, %v14237_v16, %v14236_v24  ;;  %v3650_v12 = vsel %vm684_vm2, %v14239_v43, %v14238_v42  ;;  %v3651_v9 = vsel %vm684_vm2, %v14241_v29, %v14240_v60  ;;  %v3652_v5 = vsel %vm684_vm2, %v14243_v30, %v14242_v49  ;;  %v14248_v50 = vld [vmem:[#allocation553_spill] sm:$0xff]  ;;  %v14250_v16 = vld [vmem:[#allocation555_spill] sm:$0xff]  ;;  %v14251_v42 = vld [vmem:[#allocation556_spill] sm:$0xff] }
 0x790   : > { %v3562_v4 = vadd.f32 %v3556_v53, %v3328_v33  ;;  %v3622_v46 = vadd.f32 %v3618_v63, %v3388_v62  ;;  %v3685_v13 = vsel %vm684_vm2, %v14245_v2, %v14244_v10  ;;  %v11964_v35 = vsel %vm1154_vm4, %v5572_v19, %v5574_v59  ;;  %v14249_v63 = vld [vmem:[#allocation554_spill] sm:$0xff]  ;;  %v14258_v30 = vld [vmem:[#allocation563_spill] sm:$0xff]  ;;  %v14307_v32 = vld [vmem:[#allocation688_spill] sm:$0xff] }
 0x791   : > { %v3686_v38 = vsel %vm684_vm2, %v14247_v31, %v14246_v52  ;;  %5748 = vrot.lane.b32.xlu1 %v5735_v3, %s6610_s4  ;;  %5746 = vrot.lane.b32.xlu0 %v5734_v28, %s6610_s4  ;;  %v5737_v7 = vmul.f32 %v11434_v47, %v5733_v20  ;;  %v5736_v33 = vmul.f32 %v11382_v56, %v5733_v20  ;;  %v14252_v3 = vld [vmem:[#allocation557_spill] sm:$0xff]  ;;  %v14253_v60 = vld [vmem:[#allocation558_spill] sm:$0xff]  ;;  %v5932_v52 = vstv %s11946_s22  ;;  %v14309_v45 = vld [vmem:[#allocation764_spill] sm:$0xff] }
 0x792   : > { %v3623_v62 = vadd.f32 %v3619_v26, %v3389_v61  ;;  %v3656_v17 = vadd.f32 %v3650_v12, %v3422_v37  ;;  %v3657_v11 = vadd.f32 %v3651_v9, %v3423_v36  ;;  %v3658_v53 = vadd.f32 %v3652_v5, %v3424_v1  ;;  %v5578_v29 = vpop.permute.xlu1 %5577  ;;  %v5576_v49 = vpop.permute.xlu0 %5575  ;;  %v14254_v37 = vld [vmem:[#allocation559_spill] sm:$0xff]  ;;  %v14255_v36 = vld [vmem:[#allocation560_spill] sm:$0xff]  ;;  %v14257_v26 = vld [vmem:[#allocation562_spill] sm:$0xff] }
 0x793   : > { %v3691_v27 = vadd.f32 %v3685_v13, %v3457_v25  ;;  %v3687_v24 = vsel %vm684_vm2, %v14249_v63, %v14248_v50  ;;  %v3720_v43 = vsel %vm684_vm2, %v14251_v42, %v14250_v16  ;;  %v3721_v28 = vsel %vm684_vm2, %v14253_v60, %v14252_v3  ;;  %v14256_v25 = vld [vmem:[#allocation561_spill] sm:$0xff]  ;;  %v14259_v5 = vld [vmem:[#allocation564_spill] sm:$0xff]  ;;  %v14262_v63 = vld [vmem:[#allocation567_spill] sm:$0xff] }
 0x794   : > { %v3692_v61 = vadd.f32 %v3686_v38, %v3458_v58  ;;  %v3722_v1 = vsel %vm684_vm2, %v14255_v36, %v14254_v37  ;;  %v3755_v12 = vsel %vm684_vm2, %v14257_v26, %v14256_v25  ;;  %v11989_v9 = vsel %vm1154_vm4, %v5576_v49, %v5578_v29  ;;  %v14260_v31 = vld [vmem:[#allocation565_spill] sm:$0xff]  ;;  %v14261_v38 = vld [vmem:[#allocation566_spill] sm:$0xff]  ;;  %v14263_v16 = vld [vmem:[#allocation568_spill] sm:$0xff] }
 0x795   : > { %v3756_v59 = vsel %vm684_vm2, %v14259_v5, %v14258_v30  ;;  %5752 = vrot.lane.b32.xlu1 %v5737_v7, %s6610_s4  ;;  %5750 = vrot.lane.b32.xlu0 %v5736_v33, %s6610_s4  ;;  %v5739_v58 = vmul.f32 %v11492_v40, %v5733_v20  ;;  %v5738_v19 = vmul.f32 %v11429_v15, %v5733_v20  ;;  %v14264_v3 = vld [vmem:[#allocation579_spill] sm:$0xff]  ;;  %v14265_v7 = vld [vmem:[#allocation580_spill] sm:$0xff]  ;;  %v14266_v60 = vld [vmem:[#allocation581_spill] sm:$0xff] }
 0x796   : > { %v3693_v10 = vadd.f32 %v3687_v24, %v3459_v57  ;;  %v3726_v2 = vadd.f32 %v3720_v43, %v3492_v48  ;;  %v3727_v13 = vadd.f32 %v3721_v28, %v3493_v55  ;;  %v3757_v50 = vsel %vm684_vm2, %v14261_v38, %v14260_v31  ;;  %v14267_v29 = vld [vmem:[#allocation582_spill] sm:$0xff]  ;;  %v5582_v57 = vpop.permute.xlu1 %5581  ;;  %v5580_v48 = vpop.permute.xlu0 %5579  ;;  %v14268_v49 = vld [vmem:[#allocation583_spill] sm:$0xff]  ;;  %v14269_v37 = vld [vmem:[#allocation584_spill] sm:$0xff] }
 0x797   : > { %v3790_v42 = vsel %vm684_vm2, %v14263_v16, %v14262_v63  ;;  %v3852_v33 = vsel %vm919_vm3, %v14265_v7, %v14264_v3  ;;  %v3853_v20 = vsel %vm919_vm3, %v14267_v29, %v14266_v60  ;;  %v3728_v55 = vadd.f32 %v3722_v1, %v3494_v23  ;;  %v14271_v30 = vld [vmem:[#allocation586_spill] sm:$0xff]  ;;  %v14274_v31 = vld [vmem:[#allocation589_spill] sm:$0xff]  ;;  %v14276_v38 = vld [vmem:[#allocation591_spill] sm:$0xff] }
 0x798   : > { %v3761_v24 = vadd.f32 %v3755_v12, %v3527_v44  ;;  %v12013_v43 = vadd.f32 %v3756_v59, %v3528_v21  ;;  %v12018_v28 = vsel %vm1154_vm4, %v5580_v48, %v5582_v57  ;;  %v3884_v36 = vsel %vm919_vm3, %v14269_v37, %v14268_v49  ;;  %v14270_v12 = vld [vmem:[#allocation585_spill] sm:$0xff]  ;;  %v14272_v59 = vld [vmem:[#allocation587_spill] sm:$0xff]  ;;  %v14279_v3 = vld [vmem:[#allocation594_spill] sm:$0xff] }
 0x799   : > { %5756 = vrot.lane.b32.xlu1 %v5739_v58, %s6610_s4  ;;  %5754 = vrot.lane.b32.xlu0 %v5738_v19, %s6610_s4  ;;  %v5934_v25 = vmul.f32 %v11387_v0, %v5932_v52  ;;  %v5933_v23 = vmul.f32 %v11333_v54, %v5932_v52  ;;  %v12027_v44 = vadd.f32 %v3757_v50, %v3529_v18  ;;  %v14273_v58 = vld [vmem:[#allocation588_spill] sm:$0xff]  ;;  %v14275_v18 = vld [vmem:[#allocation590_spill] sm:$0xff]  ;;  %s12049_s4 = sld [smem:[#allocation2 + $0xa1]]  ;;  %v14282_v57 = vld [vmem:[#allocation597_spill] sm:$0xff]  ;;  %v4544_v37 = vstv %s11994_s8  ;;  %s6541_s8 = sshll.u32 %s6612_s13, 4  ;;  %s6542_s8 = int_to_ptr.vmem [resolvable:$false] %s6541_s8 }
 0x79a   : > { %v12029_v21 = vadd.f32 %v3790_v42, %v3562_v4  ;;  %v12031_v1 = vadd.f32 %v3852_v33, %v3622_v46  ;;  %v12033_v26 = vadd.f32 %v3853_v20, %v3623_v62  ;;  %v3885_v5 = vsel %vm919_vm3, %v14271_v30, %v14270_v12  ;;  %v14277_v46 = vld [vmem:[#allocation592_spill] sm:$0xff]  ;;  %v5609_v62 = vpop.permute.xlu1 %5608  ;;  %v5607_v63 = vpop.permute.xlu0 %5606  ;;  %v14278_v42 = vld [vmem:[#allocation593_spill] sm:$0xff]  ;;  %v14280_v33 = vld [vmem:[#allocation595_spill] sm:$0xff] }
 0x79b   : > { %v3886_v19 = vsel %vm919_vm3, %v14273_v58, %v14272_v59  ;;  %v3919_v4 = vsel %vm919_vm3, %v14275_v18, %v14274_v31  ;;  %v3920_v50 = vsel %vm919_vm3, %v14277_v46, %v14276_v38  ;;  %v12051_v16 = vadd.f32 %v3884_v36, %v3656_v17  ;;  %v14281_v60 = vld [vmem:[#allocation596_spill] sm:$0xff]  ;;  %v14283_v48 = vld [vmem:[#allocation598_spill] sm:$0xff]  ;;  %v14286_v46 = vld [vmem:[#allocation601_spill] sm:$0xff] }
 0x79c   : > { %v3921_v7 = vsel %vm919_vm3, %v14279_v3, %v14278_v42  ;;  %v3954_v29 = vsel %vm919_vm3, %v14281_v60, %v14280_v33  ;;  %v12062_v20 = vsel %vm1154_vm4, %v5607_v63, %v5609_v62  ;;  %v3955_v49 = vsel %vm919_vm3, %v14283_v48, %v14282_v57  ;;  %v14285_v38 = vld [vmem:[#allocation600_spill] sm:$0xff]  ;;  %v14287_v62 = vld [vmem:[#allocation602_spill] sm:$0xff]  ;;  %v14290_v60 = vld [vmem:[#allocation603_spill] sm:$0xff] }
 0x79d   : > { %5947 = vrot.lane.b32.xlu1 %v5934_v25, %s6611_s25  ;;  %5945 = vrot.lane.b32.xlu0 %v5933_v23, %s6611_s25  ;;  %v5936_v17 = vmul.f32 %v11434_v47, %v5932_v52  ;;  %v5935_v36 = vmul.f32 %v11382_v56, %v5932_v52  ;;  %v12072_v12 = vadd.f32 %v3885_v5, %v3657_v11  ;;  %v14284_v25 = vld [vmem:[#allocation599_spill] sm:$0xff]  ;;  %v5967_v33 = vstv %s12035_s23  ;;  %v14292_v48 = vld [vmem:[#allocation605_spill] sm:$0xff] }
 0x79e   : > { %v12074_v30 = vadd.f32 %v3886_v19, %v3658_v53  ;;  %v12076_v59 = vadd.f32 %v3919_v4, %v3691_v27  ;;  %v12078_v58 = vadd.f32 %v3920_v50, %v3692_v61  ;;  %v12080_v31 = vadd.f32 %v3921_v7, %v3693_v10  ;;  %v5613_v11 = vpop.permute.xlu1 %5612  ;;  %v5611_v53 = vpop.permute.xlu0 %5610  ;;  %v14289_v19 = vld [vmem:[#allocation642_spill] sm:$0xff] }
 0x79f   : > { %v12082_v18 = vadd.f32 %v3954_v29, %v3726_v2  ;;  %v3956_v23 = vsel %vm919_vm3, %v14285_v38, %v14284_v25  ;;  %v3989_v63 = vsel %vm919_vm3, %v14287_v62, %v14286_v46  ;;  %v12090_v5 = vadd.f32 %v3955_v49, %v3727_v13  ;;  %v14288_v2 = vld [vmem:[#allocation641_spill] sm:$0xff]  ;;  %v14291_v29 = vld [vmem:[#allocation604_spill] sm:$0xff]  ;;  %v14293_v49 = vld [vmem:[#allocation606_spill] sm:$0xff] }
 0x7a0   : > { %v12093_v27 = vmul.f32 %v11333_v54, %v4544_v37  ;;  %v4550_v61 = vstv %s12015_s14  ;;  %v12099_v10 = vsel %vm1154_vm4, %v5611_v53, %v5613_v11  ;;  %v4223_v4 = vsel %vm1154_vm4, %v14289_v19, %v14288_v2  ;;  %v14297_v11 = vld [vmem:[#allocation644_spill] sm:$0xff]  ;;  %s6543_s14 = scalar_lea.vmem %s6542_s8, 512 }
 0x7a1   : > { %5951 = vrot.lane.b32.xlu1 %v5936_v17, %s6611_s25  ;;  %5949 = vrot.lane.b32.xlu0 %v5935_v36, %s6611_s25  ;;  %v5938_v13 = vmul.f32 %v11492_v40, %v5932_v52  ;;  %v5937_v50 = vmul.f32 %v11429_v15, %v5932_v52  ;;  %v12108_v42 = vadd.f32 %v3956_v23, %v3728_v55  ;;  %v4558_v25 = vstv %s12049_s4  ;;  %v14295_v23 = vld [vmem:[#allocation684_spill] sm:$0xff] }
 0x7a2   : > { %v3995_v3 = vadd.f32 %v3989_v63, %v3761_v24  ;;  %v12111_v7 = vmul.f32 %v11382_v56, %v4544_v37  ;;  %v3990_v57 = vsel %vm919_vm3, %v14291_v29, %v14290_v60  ;;  %v3991_v17 = vsel %vm919_vm3, %v14293_v49, %v14292_v48  ;;  %v5617_v52 = vpop.permute.xlu1 %5616  ;;  %v5615_v55 = vpop.permute.xlu0 %5614  ;;  %v14294_v24 = vld [vmem:[#allocation683_spill] sm:$0xff]  ;;  %v14299_v49 = vld [vmem:[#allocation608_spill] sm:$0xff] }
 0x7a3   : > { %v12121_v36 = vmul.f32 %v11333_v54, %v4550_v61  ;;  %v4457_v37 = vsel %vm1389_vm5, %v14295_v23, %v14294_v24  ;;  %v4574_v46 = vstv %s12059_s16  ;;  %v12129_v62 = vsel %vm1154_vm4, %v5615_v55, %v5617_v52  ;;  %v14296_v63 = vld [vmem:[#allocation643_spill] sm:$0xff] }
 0x7a4   : > { %v4229_v38 = vadd.f32 %v4223_v4, %v3995_v3  ;;  %v4224_v53 = vsel %vm1154_vm4, %v14297_v11, %v14296_v63  ;;  %v5969_v2 = vmul.f32 %v11387_v0, %v5967_v33  ;;  %v5968_v19 = vmul.f32 %v11333_v54, %v5967_v33  ;;  %v14298_v48 = vld [vmem:[#allocation607_spill] sm:$0xff]  ;;  %v14302_v63 = vld [vmem:[#allocation645_spill] sm:$0xff]  ;;  %v14303_v11 = vld [vmem:[#allocation646_spill] sm:$0xff] }
 0x7a5   : > { %5955 = vrot.lane.b32.xlu1 %v5938_v13, %s6611_s25  ;;  %5953 = vrot.lane.b32.xlu0 %v5937_v50, %s6611_s25  ;;  %v3996_v4 = vadd.f32 %v3990_v57, %v12013_v43  ;;  %v3997_v3 = vadd.f32 %v3991_v17, %v12027_v44  ;;  %v12141_v60 = vmul.f32 %v11382_v56, %v4550_v61  ;;  %v14300_v44 = vld [vmem:[#allocation685_spill] sm:$0xff]  ;;  %v14301_v17 = vld [vmem:[#allocation686_spill] sm:$0xff]  ;;  %v4566_v23 = vstv %s12096_s17 }
 0x7a6   : > { %v12144_v29 = vmul.f32 %v11429_v15, %v4550_v61  ;;  %v4024_v13 = vsel %vm919_vm3, %v14299_v49, %v14298_v48  ;;  %v4463_v52 = vadd.f32 %v4457_v37, %v4229_v38  ;;  %v12150_v50 = vmul.f32 %v11333_v54, %v4558_v25  ;;  %v5644_v55 = vpop.permute.xlu1 %5643  ;;  %v5642_v43 = vpop.permute.xlu0 %5641 }
 0x7a7   : > { %v4575_v0 = vmul.f32 %v11333_v54, %v4574_v46  ;;  %v4230_v57 = vadd.f32 %v4224_v53, %v3996_v4  ;;  %v4458_v24 = vsel %vm1389_vm5, %v14301_v17, %v14300_v44  ;;  %v12158_v61 = vsel %vm1154_vm4, %v5642_v43, %v5644_v55  ;;  %v14304_v55 = vld [vmem:[#allocation723_spill] sm:$0xff]  ;;  %v14305_v43 = vld [vmem:[#allocation724_spill] sm:$0xff] }
 0x7a8   : > { %v4225_v38 = vsel %vm1154_vm4, %v14303_v11, %v14302_v63  ;;  %v5971_v37 = vmul.f32 %v11434_v47, %v5967_v33  ;;  %v5970_v53 = vmul.f32 %v11382_v56, %v5967_v33  ;;  %v12170_v4 = vadd.f32 %v4024_v13, %v12029_v21  ;;  %v14306_v11 = vld [vmem:[#allocation687_spill] sm:$0xff] }
 0x7a9   : > { %5982 = vrot.lane.b32.xlu1 %v5969_v2, %s6611_s25  ;;  %5980 = vrot.lane.b32.xlu0 %v5968_v19, %s6611_s25  ;;  %v12173_v48 = vmul.f32 %v11382_v56, %v4558_v25  ;;  %v12176_v49 = vmul.f32 %v11429_v15, %v4558_v25  ;;  %v4752_v44 = vsel %vm214_vm0, %v14305_v43, %v14304_v55  ;;  %v14308_v25 = vld [vmem:[#allocation763_spill] sm:$0xff]  ;;  %v14313_v43 = vld [vmem:[#allocation41_spill] sm:$0xff] }
 0x7aa   : > { %v4464_v2 = vadd.f32 %v4458_v24, %v4230_v57  ;;  %v12182_v19 = vmul.f32 %v11333_v54, %v4566_v23  ;;  %v4578_v47 = vadd.f32 %v4575_v0, %v4463_v52  ;;  %v4576_v17 = vmul.f32 %v11382_v56, %v4574_v46  ;;  %v5648_v63 = vpop.permute.xlu1 %5647  ;;  %v5646_v21 = vpop.permute.xlu0 %5645  ;;  %v14311_v0 = vld [vmem:[#allocation726_spill] sm:$0xff] }
 0x7ab   : > { %v4231_v13 = vadd.f32 %v4225_v38, %v3997_v3  ;;  %v4459_v6 = vsel %vm1389_vm5, %v14307_v32, %v14306_v11  ;;  %v4986_v14 = vsel %vm449_vm1, %v14309_v45, %v14308_v25  ;;  %v12192_v55 = vsel %vm1154_vm4, %v5646_v21, %v5648_v63  ;;  %v14310_v32 = vld [vmem:[#allocation725_spill] sm:$0xff]  ;;  %v14312_v38 = vld [vmem:[#allocation40_spill] sm:$0xff]  ;;  %v14316_v11 = vld [vmem:[#allocation619_spill] sm:$0xff] }
 0x7ac   : > { %v4758_v57 = vadd.f32 %v4752_v44, %v4578_v47  ;;  %v5973_v54 = vmul.f32 %v11492_v40, %v5967_v33  ;;  %v5972_v3 = vmul.f32 %v11429_v15, %v5967_v33  ;;  %v12199_v52 = vmul.f32 %v11382_v56, %v4566_v23  ;;  %v14314_v44 = vld [vmem:[#allocation623_spill] sm:$0xff]  ;;  %v14317_v25 = vld [vmem:[#allocation620_spill] sm:$0xff] }
 0x7ad   : > { %5986 = vrot.lane.b32.xlu1 %v5971_v37, %s6611_s25  ;;  %5984 = vrot.lane.b32.xlu0 %v5970_v53, %s6611_s25  ;;  %v4753_v45 = vsel %vm214_vm0, %v14311_v0, %v14310_v32  ;;  %v4577_v24 = vmul.f32 %v11429_v15, %v4574_v46  ;;  %v5220_v37 = vsel %vm684_vm2, %v14313_v43, %v14312_v38  ;;  %v14315_v53 = vld [vmem:[#allocation624_spill] sm:$0xff]  ;;  %v14318_v46 = vld [vmem:[#allocation765_spill] sm:$0xff]  ;;  %v14319_v0 = vld [vmem:[#allocation766_spill] sm:$0xff] }
 0x7ae   : > { %v4118_v40 = vsel %vm1154_vm4, %v14315_v53, %v14314_v44  ;;  %v4465_v47 = vadd.f32 %v4459_v6, %v4231_v13  ;;  %v4579_v33 = vadd.f32 %v4576_v17, %v4464_v2  ;;  %v4992_v63 = vadd.f32 %v4986_v14, %v4758_v57  ;;  %v5652_v56 = vpop.permute.xlu1 %5651  ;;  %v5650_v21 = vpop.permute.xlu0 %5649  ;;  %v14321_v44 = vld [vmem:[#allocation621_spill] sm:$0xff]  ;;  %v14322_v6 = vld [vmem:[#allocation622_spill] sm:$0xff] }
 0x7af   : > { %v4086_v41 = vsel %vm1154_vm4, %v14317_v25, %v14316_v11  ;;  %v12215_v32 = vmul.f32 %v11429_v15, %v4566_v23  ;;  %v4987_v38 = vsel %vm449_vm1, %v14319_v0, %v14318_v46  ;;  %v12221_v43 = vsel %vm1154_vm4, %v5650_v21, %v5652_v56  ;;  %v14323_v23 = vld [vmem:[#allocation665_spill] sm:$0xff]  ;;  %v14324_v57 = vld [vmem:[#allocation666_spill] sm:$0xff]  ;;  %v14325_v56 = vld [vmem:[#allocation727_spill] sm:$0xff] }
 0x7b0   : > { %14320 = vst [vmem:[#allocation96_spill] sm:$0xff] %v12221_v43  ;;  %v4087_v14 = vsel %vm1154_vm4, %v14322_v6, %v14321_v44  ;;  %v4759_v2 = vadd.f32 %v4753_v45, %v4579_v33  ;;  %v12227_v17 = vstv %s12163_s21  ;;  %v5226_v13 = vadd.f32 %v5220_v37, %v4992_v63  ;;  %v14326_v21 = vld [vmem:[#allocation728_spill] sm:$0xff]  ;;  %v14327_v25 = vld [vmem:[#allocation43_spill] sm:$0xff]  ;;  %v14329_v33 = vld [vmem:[#allocation625_spill] sm:$0xff] }
 0x7b1   : > { %5990 = vrot.lane.b32.xlu1 %v5973_v54, %s6611_s25  ;;  %5988 = vrot.lane.b32.xlu0 %v5972_v3, %s6611_s25  ;;  %v4124_v15 = vadd.f32 %v4118_v40, %v12051_v16  ;;  %v4352_v53 = vsel %vm1389_vm5, %v14324_v57, %v14323_v23  ;;  %v4754_v11 = vsel %vm214_vm0, %v14326_v21, %v14325_v56  ;;  %v14328_v46 = vld [vmem:[#allocation44_spill] sm:$0xff]  ;;  %v14330_v37 = vld [vmem:[#allocation626_spill] sm:$0xff]  ;;  %v14331_v44 = vld [vmem:[#allocation627_spill] sm:$0xff]  ;;  %s12553_s25 = sld [smem:[#allocation2 + $0x8c]] }
 0x7b2   : > { %v5221_v45 = vsel %vm684_vm2, %v14328_v46, %v14327_v25  ;;  %v4119_v54 = vsel %vm1154_vm4, %v14330_v37, %v14329_v33  ;;  %v4580_v63 = vadd.f32 %v4577_v24, %v4465_v47  ;;  %v4993_v3 = vadd.f32 %v4987_v38, %v4759_v2  ;;  %v5679_v40 = vpop.permute.xlu1 %5678  ;;  %v5677_v0 = vpop.permute.xlu0 %5676  ;;  %v14332_v6 = vld [vmem:[#allocation628_spill] sm:$0xff]  ;;  %v14333_v57 = vld [vmem:[#allocation629_spill] sm:$0xff]  ;;  %v14334_v56 = vld [vmem:[#allocation630_spill] sm:$0xff] }
 0x7b3   : > { %v5460_v16 = vadd.f32 %v11660_v8, %v5226_v13  ;;  %v4120_v23 = vsel %vm1154_vm4, %v14332_v6, %v14331_v44  ;;  %v4153_v21 = vsel %vm1154_vm4, %v14334_v56, %v14333_v57  ;;  %v14335_v25 = vld [vmem:[#allocation767_spill] sm:$0xff]  ;;  %v14336_v46 = vld [vmem:[#allocation768_spill] sm:$0xff]  ;;  %v5688_v24 = vsel %vm1154_vm4, %v5677_v0, %v5679_v40  ;;  %v14339_v57 = vld [vmem:[#allocation45_spill] sm:$0xff] }
 0x7b4   : > { %v4988_v43 = vsel %vm449_vm1, %v14336_v46, %v14335_v25  ;;  %v4358_v47 = vadd.f32 %v4352_v53, %v4124_v15  ;;  %v4760_v38 = vadd.f32 %v4754_v11, %v4580_v63  ;;  %v5227_v8 = vadd.f32 %v5221_v45, %v4993_v3  ;;  %v14337_v37 = vld [vmem:[#allocation667_spill] sm:$0xff]  ;;  %v14338_v44 = vld [vmem:[#allocation668_spill] sm:$0xff]  ;;  %v14340_v56 = vld [vmem:[#allocation46_spill] sm:$0xff] }
 0x7b5   : > { %v12255_v2 = vadd.f32 %v5688_v24, %v5460_v16  ;;  %v12258_v13 = vadd.f32 %v4086_v41, %v12031_v1  ;;  %v12261_v33 = vadd.f32 %v4087_v14, %v12033_v26  ;;  %v4353_v6 = vsel %vm1389_vm5, %v14338_v44, %v14337_v37  ;;  %v12271_v53 = vld [vmem:[%s6701_s5 + $0x90] sm:$0xff]  ;;  %v14342_v16 = vld [vmem:[#allocation705_spill] sm:$0xff] }
 0x7b6   : > { %v5222_v25 = vsel %vm684_vm2, %v14340_v56, %v14339_v57  ;;  %v4125_v15 = vadd.f32 %v4119_v54, %v12072_v12  ;;  %v12275_v11 = vmul.f32 %v12271_v53, %v12227_v17  ;;  %v4994_v41 = vadd.f32 %v4988_v43, %v4760_v38  ;;  %v14341_v1 = vld [vmem:[#allocation90_spill] sm:$0xff]  ;;  %v5683_v14 = vpop.permute.xlu1 %5682  ;;  %v5681_v45 = vpop.permute.xlu0 %5680  ;;  %v14344_v43 = vld [vmem:[#allocation631_spill] sm:$0xff]  ;;  %v14345_v38 = vld [vmem:[#allocation632_spill] sm:$0xff] }
 0x7b7   : > { %v5461_v26 = vadd.f32 %v14341_v1, %v5227_v8  ;;  %v4126_v63 = vadd.f32 %v4120_v23, %v12074_v30  ;;  %v4159_v3 = vadd.f32 %v4153_v21, %v12076_v59  ;;  %v14343_v40 = vld [vmem:[#allocation706_spill] sm:$0xff]  ;;  %v5689_v12 = vsel %vm1154_vm4, %v5681_v45, %v5683_v14  ;;  %v14346_v44 = vld [vmem:[#allocation633_spill] sm:$0xff] }
 0x7b8   : > { %v4647_v0 = vsel %vm214_vm0, %v14343_v40, %v14342_v16  ;;  %v4359_v54 = vadd.f32 %v4353_v6, %v4125_v15  ;;  %v4554_v46 = vadd.f32 %v12121_v36, %v4358_v47  ;;  %v5228_v24 = vadd.f32 %v5222_v25, %v4994_v41  ;;  %v14347_v30 = vld [vmem:[#allocation634_spill] sm:$0xff]  ;;  %v14348_v23 = vld [vmem:[#allocation669_spill] sm:$0xff]  ;;  %v14352_v36 = vld [vmem:[#allocation635_spill] sm:$0xff] }
 0x7b9   : > { %v12285_v37 = vadd.f32 %v5689_v12, %v5461_v26  ;;  %v4154_v8 = vsel %vm1154_vm4, %v14345_v38, %v14344_v43  ;;  %v4155_v59 = vsel %vm1154_vm4, %v14347_v30, %v14346_v44  ;;  %v14349_v21 = vld [vmem:[#allocation670_spill] sm:$0xff]  ;;  %v14350_v56 = vld [vmem:[#allocation745_spill] sm:$0xff]  ;;  %v14353_v47 = vld [vmem:[#allocation636_spill] sm:$0xff] }
 0x7ba   : > { %v4354_v57 = vsel %vm1389_vm5, %v14349_v21, %v14348_v23  ;;  %v14351_v1 = vld [vmem:[#allocation746_spill] sm:$0xff]  ;;  %v4188_v25 = vsel %vm1154_vm4, %v14353_v47, %v14352_v36  ;;  %v14354_v15 = vld [vmem:[#allocation637_spill] sm:$0xff]  ;;  %v4653_v14 = vadd.f32 %v4647_v0, %v4554_v46  ;;  %v5462_v45 = vadd.f32 %v11720_v39, %v5228_v24  ;;  %v5687_v16 = vpop.permute.xlu1 %5686  ;;  %v5685_v40 = vpop.permute.xlu0 %5684  ;;  %v14356_v12 = vld [vmem:[#allocation671_spill] sm:$0xff] }
 0x7bb   : > { %v4881_v6 = vsel %vm449_vm1, %v14351_v1, %v14350_v56  ;;  %v14355_v41 = vld [vmem:[#allocation638_spill] sm:$0xff]  ;;  %v14357_v43 = vld [vmem:[#allocation672_spill] sm:$0xff]  ;;  %v14358_v44 = vld [vmem:[#allocation707_spill] sm:$0xff]  ;;  %v5690_v36 = vsel %vm1154_vm4, %v5685_v40, %v5687_v16  ;;  %v4360_v47 = vadd.f32 %v4354_v57, %v4126_v63  ;;  %v4555_v0 = vadd.f32 %v12141_v60, %v4359_v54 }
 0x7bc   : > { %v4189_v26 = vsel %vm1154_vm4, %v14355_v41, %v14354_v15  ;;  %v4387_v38 = vsel %vm1389_vm5, %v14357_v43, %v14356_v12  ;;  %v14359_v30 = vld [vmem:[#allocation708_spill] sm:$0xff]  ;;  %v14360_v21 = vld [vmem:[#allocation14_spill] sm:$0xff]  ;;  %v14361_v56 = vld [vmem:[#allocation15_spill] sm:$0xff]  ;;  %v4887_v39 = vadd.f32 %v4881_v6, %v4653_v14  ;;  %v12317_v46 = vadd.f32 %v5690_v36, %v5462_v45 }
 0x7bd   : > { %v4648_v23 = vsel %vm214_vm0, %v14359_v30, %v14358_v44  ;;  %v5115_v1 = vsel %vm684_vm2, %v14361_v56, %v14360_v21  ;;  %v4160_v24 = vadd.f32 %v4154_v8, %v12078_v58  ;;  %v4161_v15 = vadd.f32 %v4155_v59, %v12080_v31  ;;  %v14362_v41 = vld [vmem:[#allocation747_spill] sm:$0xff]  ;;  %v14363_v12 = vld [vmem:[#allocation748_spill] sm:$0xff]  ;;  %v14364_v44 = vld [vmem:[#allocation65_spill] sm:$0xff] }
 0x7be   : > { %v4882_v43 = vsel %vm449_vm1, %v14363_v12, %v14362_v41  ;;  %v14365_v30 = vld [vmem:[#allocation66_spill] sm:$0xff]  ;;  %v14366_v56 = vld [vmem:[#allocation639_spill] sm:$0xff]  ;;  %v14367_v16 = vld [vmem:[#allocation640_spill] sm:$0xff]  ;;  %v4393_v60 = vadd.f32 %v4387_v38, %v4159_v3  ;;  %v4654_v54 = vadd.f32 %v4648_v23, %v4555_v0  ;;  %v5121_v57 = vadd.f32 %v5115_v1, %v4887_v39  ;;  %v5806_v6 = vpop.permute.xlu1 %5805  ;;  %v12330_v14 = vpop.permute.xlu0 %5711 }
 0x7bf   : > { %v5349_v21 = vsel %vm919_vm3, %v14365_v30, %v14364_v44  ;;  %v4190_v63 = vsel %vm1154_vm4, %v14367_v16, %v14366_v56  ;;  %v12333_v58 = vadd.f32 %v4188_v25, %v12082_v18  ;;  %v12336_v31 = vadd.f32 %v4189_v26, %v12090_v5  ;;  %v14368_v8 = vld [vmem:[#allocation709_spill] sm:$0xff]  ;;  %v14369_v59 = vld [vmem:[#allocation710_spill] sm:$0xff]  ;;  %v14370_v40 = vld [vmem:[#allocation16_spill] sm:$0xff] }
 0x7c0   : > { %v4649_v45 = vsel %vm214_vm0, %v14369_v59, %v14368_v8  ;;  %v14371_v36 = vld [vmem:[#allocation17_spill] sm:$0xff]  ;;  %v14373_v38 = vld [vmem:[#allocation674_spill] sm:$0xff]  ;;  %v4556_v1 = vadd.f32 %v12144_v29, %v4360_v47  ;;  %v4888_v0 = vadd.f32 %v4882_v43, %v4654_v54  ;;  %v5355_v18 = vadd.f32 %v5349_v21, %v5121_v57  ;;  %v14378_v56 = vld [vmem:[#allocation67_spill] sm:$0xff] }
 0x7c1   : > { %v5116_v41 = vsel %vm684_vm2, %v14371_v36, %v14370_v40  ;;  %v14372_v3 = vld [vmem:[#allocation673_spill] sm:$0xff]  ;;  %v12349_v25 = vadd.f32 %v4190_v63, %v12108_v42  ;;  %v14375_v26 = vld [vmem:[#allocation662_spill] sm:$0xff]  ;;  %v14379_v16 = vld [vmem:[#allocation68_spill] sm:$0xff]  ;;  %v4562_v29 = vadd.f32 %v12150_v50, %v4393_v60 }
 0x7c2   : > { %v4388_v23 = vsel %vm1389_vm5, %v14373_v38, %v14372_v3  ;;  %v14374_v5 = vld [vmem:[#allocation661_spill] sm:$0xff]  ;;  %v14377_v44 = vld [vmem:[#allocation750_spill] sm:$0xff]  ;;  %v5350_v8 = vsel %vm919_vm3, %v14379_v16, %v14378_v56  ;;  %v4655_v59 = vadd.f32 %v4649_v45, %v4556_v1  ;;  %v5122_v47 = vadd.f32 %v5116_v41, %v4888_v0  ;;  %v5810_v42 = vpop.permute.xlu1 %5809  ;;  %v5808_v21 = vpop.permute.xlu0 %5807  ;;  %v14380_v54 = vld [vmem:[#allocation711_spill] sm:$0xff] }
 0x7c3   : > { %v4320_v39 = vsel %vm1389_vm5, %v14375_v26, %v14374_v5  ;;  %v14376_v12 = vld [vmem:[#allocation749_spill] sm:$0xff]  ;;  %v5589_v43 = vadd.f32 %v11964_v35, %v5355_v18  ;;  %v4394_v63 = vadd.f32 %v4388_v23, %v4160_v24  ;;  %v14381_v57 = vld [vmem:[#allocation712_spill] sm:$0xff]  ;;  %v14382_v36 = vld [vmem:[#allocation18_spill] sm:$0xff]  ;;  %v5817_v5 = vsel %vm1389_vm5, %v5806_v6, %v5808_v21 }
 0x7c4   : > { %v4883_v30 = vsel %vm449_vm1, %v14377_v44, %v14376_v12  ;;  %v4682_v40 = vsel %vm214_vm0, %v14381_v57, %v14380_v54  ;;  %v14383_v3 = vld [vmem:[#allocation19_spill] sm:$0xff]  ;;  %v14385_v45 = vld [vmem:[#allocation676_spill] sm:$0xff]  ;;  %v5356_v41 = vadd.f32 %v5350_v8, %v5122_v47  ;;  %v14386_v1 = vld [vmem:[#allocation649_spill] sm:$0xff]  ;;  %v4324_v23 = vadd.f32 %v4320_v39, %v12258_v13 }
 0x7c5   : > { %v5117_v38 = vsel %vm684_vm2, %v14383_v3, %v14382_v36  ;;  %v14384_v26 = vld [vmem:[#allocation675_spill] sm:$0xff]  ;;  %v4889_v60 = vadd.f32 %v4883_v30, %v4655_v59  ;;  %v5823_v35 = vadd.f32 %v5817_v5, %v5589_v43  ;;  %v14387_v0 = vld [vmem:[#allocation650_spill] sm:$0xff]  ;;  %v14389_v12 = vld [vmem:[#allocation752_spill] sm:$0xff]  ;;  %v4688_v21 = vadd.f32 %v4682_v40, %v4562_v29 }
 0x7c6   : > { %v4389_v50 = vsel %vm1389_vm5, %v14385_v45, %v14384_v26  ;;  %v4258_v24 = vsel %vm1154_vm4, %v14387_v0, %v14386_v1  ;;  %v14388_v18 = vld [vmem:[#allocation751_spill] sm:$0xff]  ;;  %v14390_v56 = vld [vmem:[#allocation70_spill] sm:$0xff]  ;;  %v14392_v54 = vld [vmem:[#allocation713_spill] sm:$0xff]  ;;  %v5590_v59 = vadd.f32 %v11989_v9, %v5356_v41  ;;  %v5814_v47 = vpop.permute.xlu1 %5813  ;;  %v5812_v43 = vpop.permute.xlu0 %5811  ;;  %v4563_v13 = vadd.f32 %v12173_v48, %v4394_v63 }
 0x7c7   : > { %v4916_v44 = vsel %vm449_vm1, %v14389_v12, %v14388_v18  ;;  %v14391_v16 = vld [vmem:[#allocation71_spill] sm:$0xff]  ;;  %v14393_v57 = vld [vmem:[#allocation714_spill] sm:$0xff]  ;;  %v5123_v8 = vadd.f32 %v5117_v38, %v4889_v60  ;;  %v4395_v36 = vadd.f32 %v4389_v50, %v4161_v15  ;;  %v14394_v39 = vld [vmem:[#allocation20_spill] sm:$0xff]  ;;  %v5818_v26 = vsel %vm1389_vm5, %v5810_v42, %v5812_v43 }
 0x7c8   : > { %v5351_v6 = vsel %vm919_vm3, %v14391_v16, %v14390_v56  ;;  %v4683_v30 = vsel %vm214_vm0, %v14393_v57, %v14392_v54  ;;  %v14395_v3 = vld [vmem:[#allocation21_spill] sm:$0xff]  ;;  %v14396_v45 = vld [vmem:[#allocation663_spill] sm:$0xff]  ;;  %v14397_v29 = vld [vmem:[#allocation664_spill] sm:$0xff]  ;;  %v4922_v1 = vadd.f32 %v4916_v44, %v4688_v21  ;;  %v5824_v38 = vadd.f32 %v5818_v26, %v5590_v59 }
 0x7c9   : > { %v5150_v5 = vsel %vm684_vm2, %v14395_v3, %v14394_v39  ;;  %v4321_v40 = vsel %vm1389_vm5, %v14397_v29, %v14396_v45  ;;  %v5357_v0 = vadd.f32 %v5351_v6, %v5123_v8  ;;  %v4689_v60 = vadd.f32 %v4683_v30, %v4563_v13  ;;  %v14398_v9 = vld [vmem:[#allocation753_spill] sm:$0xff]  ;;  %v14399_v41 = vld [vmem:[#allocation754_spill] sm:$0xff]  ;;  %v14400_v50 = vld [vmem:[#allocation76_spill] sm:$0xff] }
 0x7ca   : > { %v4917_v15 = vsel %vm449_vm1, %v14399_v41, %v14398_v9  ;;  %v14401_v48 = vld [vmem:[#allocation77_spill] sm:$0xff]  ;;  %v5156_v18 = vadd.f32 %v5150_v5, %v4922_v1  ;;  %v6005_v12 = vrot.slane %v5823_v35, 1  ;;  %v6006_v56 = vrot.slane %v5824_v38, 1  ;;  %v5841_v16 = vpop.permute.xlu1 %5840  ;;  %v14402_v6 = vld [vmem:[#allocation715_spill] sm:$0xff]  ;;  %v14403_v21 = vld [vmem:[#allocation716_spill] sm:$0xff] }
 0x7cb   : > { %v5384_v63 = vsel %vm919_vm3, %v14401_v48, %v14400_v50  ;;  %v5591_v42 = vadd.f32 %v12018_v28, %v5357_v0  ;;  %v5816_v54 = vpop.permute.xlu0 %5815  ;;  %v4564_v44 = vadd.f32 %v12176_v49, %v4395_v36  ;;  %v4684_v57 = vsel %vm214_vm0, %v14403_v21, %v14402_v6  ;;  %v14404_v30 = vld [vmem:[#allocation22_spill] sm:$0xff]  ;;  %v14405_v8 = vld [vmem:[#allocation23_spill] sm:$0xff]  ;;  %v14407_v5 = vld [vmem:[#allocation756_spill] sm:$0xff] }
 0x7cc   : > { %v5151_v59 = vsel %vm684_vm2, %v14405_v8, %v14404_v30  ;;  %v5819_v43 = vsel %vm1389_vm5, %v5814_v47, %v5816_v54  ;;  %v4923_v13 = vadd.f32 %v4917_v15, %v4689_v60  ;;  %v5390_v39 = vadd.f32 %v5384_v63, %v5156_v18  ;;  %v14406_v36 = vld [vmem:[#allocation755_spill] sm:$0xff]  ;;  %v14408_v45 = vld [vmem:[#allocation78_spill] sm:$0xff]  ;;  %v14410_v15 = vld [vmem:[#allocation677_spill] sm:$0xff] }
 0x7cd   : > { %v5825_v3 = vadd.f32 %v5819_v43, %v5591_v42  ;;  %v12410_v28 = vsel %vm6004_vm6, %v6005_v12, %v6006_v56  ;;  %v4325_v35 = vadd.f32 %v4321_v40, %v12261_v33  ;;  %v4547_v49 = vadd.f32 %v12093_v27, %v4324_v23  ;;  %v14409_v29 = vld [vmem:[#allocation79_spill] sm:$0xff]  ;;  %v14411_v50 = vld [vmem:[#allocation678_spill] sm:$0xff]  ;;  %v14412_v27 = vld [vmem:[#allocation701_spill] sm:$0xff] }
 0x7ce   : > { %v4918_v26 = vsel %vm449_vm1, %v14407_v5, %v14406_v36  ;;  %v5385_v1 = vsel %vm919_vm3, %v14409_v29, %v14408_v45  ;;  %v4690_v0 = vadd.f32 %v4684_v57, %v4564_v44  ;;  %v5157_v47 = vadd.f32 %v5151_v59, %v4923_v13  ;;  %v5845_v9 = vpop.permute.xlu1 %5844  ;;  %v14413_v23 = vld [vmem:[#allocation702_spill] sm:$0xff]  ;;  %v14414_v48 = vld [vmem:[#allocation24_spill] sm:$0xff]  ;;  %v14415_v63 = vld [vmem:[#allocation25_spill] sm:$0xff] }
 0x7cf   : > { %v5624_v38 = vadd.f32 %v12062_v20, %v5390_v39  ;;  %v6008_v60 = vrot.slane %v5825_v3, 1  ;;  %v5843_v41 = vpop.permute.xlu0 %5842  ;;  %v4422_v33 = vsel %vm1389_vm5, %v14411_v50, %v14410_v15  ;;  %v4615_v40 = vsel %vm214_vm0, %v14413_v23, %v14412_v27  ;;  %v14416_v57 = vld [vmem:[#allocation741_spill] sm:$0xff]  ;;  %v14417_v30 = vld [vmem:[#allocation742_spill] sm:$0xff]  ;;  %v14421_v3 = vld [vmem:[#allocation704_spill] sm:$0xff] }
 0x7d0   : > { %v5152_v18 = vsel %vm684_vm2, %v14415_v63, %v14414_v48  ;;  %v5852_v42 = vsel %vm1389_vm5, %v5841_v16, %v5843_v41  ;;  %v4924_v12 = vadd.f32 %v4918_v26, %v4690_v0  ;;  %v5391_v54 = vadd.f32 %v5385_v1, %v5157_v47  ;;  %v14418_v59 = vld [vmem:[#allocation81_spill] sm:$0xff]  ;;  %v14419_v43 = vld [vmem:[#allocation82_spill] sm:$0xff]  ;;  %v14420_v16 = vld [vmem:[#allocation703_spill] sm:$0xff] }
 0x7d1   : > { %v5858_v20 = vadd.f32 %v5852_v42, %v5624_v38  ;;  %v12432_v44 = vsel %vm6004_vm6, %v6006_v56, %v6008_v60  ;;  %v4264_v6 = vadd.f32 %v4258_v24, %v12170_v4  ;;  %v4548_v21 = vadd.f32 %v12111_v7, %v4325_v35  ;;  %v14422_v24 = vld [vmem:[#allocation679_spill] sm:$0xff]  ;;  %v14423_v35 = vld [vmem:[#allocation680_spill] sm:$0xff]  ;;  %v14426_v47 = vld [vmem:[#allocation681_spill] sm:$0xff] }
 0x7d2   : > { %v4849_v8 = vsel %vm449_vm1, %v14417_v30, %v14416_v57  ;;  %v5386_v13 = vsel %vm919_vm3, %v14419_v43, %v14418_v59  ;;  %v4619_v39 = vadd.f32 %v4615_v40, %v4547_v49  ;;  %v4616_v36 = vsel %vm214_vm0, %v14421_v3, %v14420_v16  ;;  %v14424_v29 = vld [vmem:[#allocation12_spill] sm:$0xff]  ;;  %v14425_v1 = vld [vmem:[#allocation647_spill] sm:$0xff]  ;;  %v14427_v38 = vld [vmem:[#allocation682_spill] sm:$0xff] }
 0x7d3   : > { %v5158_v5 = vadd.f32 %v5152_v18, %v4924_v12  ;;  %v5625_v56 = vadd.f32 %v12099_v10, %v5391_v54  ;;  %v5849_v26 = vpop.permute.xlu1 %5848  ;;  %v5847_v4 = vpop.permute.xlu0 %5846  ;;  %v4428_v7 = vadd.f32 %v4422_v33, %v12333_v58  ;;  %v4423_v45 = vsel %vm1389_vm5, %v14423_v35, %v14422_v24  ;;  %v14428_v27 = vld [vmem:[#allocation743_spill] sm:$0xff]  ;;  %v14429_v58 = vld [vmem:[#allocation744_spill] sm:$0xff]  ;;  %v14439_v24 = vld [vmem:[#allocation62_spill] sm:$0xff] }
 0x7d4   : > { %v5083_v0 = vsel %vm684_vm2, %v14425_v1, %v14424_v29  ;;  %v5853_v49 = vsel %vm1389_vm5, %v5845_v9, %v5847_v4  ;;  %v4424_v60 = vsel %vm1389_vm5, %v14427_v38, %v14426_v47  ;;  %v4853_v41 = vadd.f32 %v4849_v8, %v4619_v39  ;;  %v14430_v23 = vld [vmem:[#allocation59_spill] sm:$0xff]  ;;  %v14431_v40 = vld [vmem:[#allocation60_spill] sm:$0xff]  ;;  %v14433_v8 = vld [vmem:[#allocation13_spill] sm:$0xff] }
 0x7d5   : > { %v5392_v10 = vadd.f32 %v5386_v13, %v5158_v5  ;;  %v5859_v15 = vadd.f32 %v5853_v49, %v5625_v56  ;;  %v4620_v50 = vadd.f32 %v4616_v36, %v4548_v21  ;;  %v4850_v33 = vsel %vm449_vm1, %v14429_v58, %v14428_v27  ;;  %v14432_v30 = vld [vmem:[#allocation648_spill] sm:$0xff]  ;;  %v14437_v56 = vld [vmem:[#allocation718_spill] sm:$0xff]  ;;  %v14438_v4 = vld [vmem:[#allocation61_spill] sm:$0xff] }
 0x7d6   : > { %v5317_v48 = vsel %vm919_vm3, %v14431_v40, %v14430_v23  ;;  %v5087_v63 = vadd.f32 %v5083_v0, %v4853_v41  ;;  %v6018_v18 = vrot.slane %v5858_v20, 2  ;;  %v4429_v57 = vadd.f32 %v4423_v45, %v12336_v31  ;;  %v14435_v20 = vld [vmem:[#allocation690_spill] sm:$0xff]  ;;  %v14436_v31 = vld [vmem:[#allocation717_spill] sm:$0xff]  ;;  %v14441_v45 = vld [vmem:[#allocation720_spill] sm:$0xff] }
 0x7d7   : > { %v5626_v9 = vadd.f32 %v12129_v62, %v5392_v10  ;;  %v6019_v42 = vrot.slane %v5859_v15, 2  ;;  %v5778_v12 = vpop.permute.xlu1 %5777  ;;  %v5851_v54 = vpop.permute.xlu0 %5850  ;;  %v4430_v21 = vadd.f32 %v4424_v60, %v12349_v25  ;;  %v5084_v59 = vsel %vm684_vm2, %v14433_v8, %v14432_v30  ;;  %v14434_v62 = vld [vmem:[#allocation689_spill] sm:$0xff]  ;;  %v14443_v41 = vld [vmem:[#allocation758_spill] sm:$0xff]  ;;  %v14444_v40 = vld [vmem:[#allocation759_spill] sm:$0xff] }
 0x7d8   : > { %v5854_v43 = vsel %vm1389_vm5, %v5849_v26, %v5851_v54  ;;  %v4854_v13 = vadd.f32 %v4850_v33, %v4620_v50  ;;  %v5321_v39 = vadd.f32 %v5317_v48, %v5087_v63  ;;  %v4492_v36 = vsel %vm1389_vm5, %v14435_v20, %v14434_v62  ;;  %v14440_v26 = vld [vmem:[#allocation719_spill] sm:$0xff]  ;;  %v14442_v60 = vld [vmem:[#allocation757_spill] sm:$0xff]  ;;  %v14445_v48 = vld [vmem:[#allocation760_spill] sm:$0xff] }
 0x7d9   : > { %v5860_v16 = vadd.f32 %v5854_v43, %v5626_v9  ;;  %v6020_v3 = vsel %vm6017_vm7, %v6018_v18, %v6019_v42  ;;  %v4570_v5 = vadd.f32 %v12182_v19, %v4428_v7  ;;  %v4717_v25 = vsel %vm214_vm0, %v14437_v56, %v14436_v31  ;;  %v14447_v9 = vld [vmem:[#allocation27_spill] sm:$0xff]  ;;  %v14448_v18 = vld [vmem:[#allocation721_spill] sm:$0xff]  ;;  %v14449_v54 = vld [vmem:[#allocation722_spill] sm:$0xff] }
 0x7da   : > { %v5318_v35 = vsel %vm919_vm3, %v14439_v24, %v14438_v4  ;;  %v4718_v29 = vsel %vm214_vm0, %v14441_v45, %v14440_v26  ;;  %v5088_v1 = vadd.f32 %v5084_v59, %v4854_v13  ;;  %v5555_v0 = vadd.f32 %v11911_v51, %v5321_v39  ;;  %v14450_v8 = vld [vmem:[#allocation729_spill] sm:$0xff]  ;;  %v14451_v59 = vld [vmem:[#allocation730_spill] sm:$0xff]  ;;  %v14452_v13 = vld [vmem:[#allocation28_spill] sm:$0xff] }
 0x7db   : > { %v6021_v49 = vrot.slane %v5860_v16, 2  ;;  %v5782_v47 = vpop.permute.xlu1 %5781  ;;  %v5780_v38 = vpop.permute.xlu0 %5779  ;;  %v4571_v19 = vadd.f32 %v12199_v52, %v4429_v57  ;;  %v4572_v7 = vadd.f32 %v12215_v32, %v4430_v21  ;;  %v4951_v10 = vsel %vm449_vm1, %v14443_v41, %v14442_v60  ;;  %v14446_v52 = vld [vmem:[#allocation26_spill] sm:$0xff]  ;;  %v14453_v39 = vld [vmem:[#allocation29_spill] sm:$0xff]  ;;  %v14454_v62 = vld [vmem:[#allocation83_spill] sm:$0xff] }
 0x7dc   : > { %v5785_v15 = vsel %vm1389_vm5, %v5778_v12, %v5780_v38  ;;  %v4723_v50 = vadd.f32 %v4717_v25, %v4570_v5  ;;  %v5322_v27 = vadd.f32 %v5318_v35, %v5088_v1  ;;  %v4498_v23 = vadd.f32 %v4492_v36, %v4264_v6  ;;  %v14455_v20 = vld [vmem:[#allocation84_spill] sm:$0xff]  ;;  %v14456_v25 = vld [vmem:[#allocation331_spill] sm:$0xff]  ;;  %v14458_v26 = vld [vmem:[#allocation761_spill] sm:$0xff] }
 0x7dd   : > { %v5789_v58 = vadd.f32 %v5785_v15, %v5555_v0  ;;  %v6022_v33 = vsel %vm6017_vm7, %v6019_v42, %v6021_v49  ;;  %v4724_v51 = vadd.f32 %v4718_v29, %v4571_v19  ;;  %v4952_v63 = vsel %vm449_vm1, %v14445_v48, %v14444_v40  ;;  %v14457_v4 = vld [vmem:[#allocation332_spill] sm:$0xff]  ;;  %v14459_v45 = vld [vmem:[#allocation762_spill] sm:$0xff]  ;;  %v14460_v1 = vld [vmem:[#allocation85_spill] sm:$0xff] }
 0x7de   : > { %v5185_v32 = vsel %vm684_vm2, %v14447_v9, %v14446_v52  ;;  %v4719_v57 = vsel %vm214_vm0, %v14449_v54, %v14448_v18  ;;  %v4957_v12 = vadd.f32 %v4951_v10, %v4723_v50  ;;  %v5556_v21 = vadd.f32 %v11937_v34, %v5322_v27  ;;  %v14461_v0 = vld [vmem:[#allocation86_spill] sm:$0xff]  ;;  %v14462_v15 = vld [vmem:[#allocation769_spill] sm:$0xff]  ;;  %v14466_v52 = vld [vmem:[#allocation63_spill] sm:$0xff] }
 0x7df   : > { %v6012_v30 = vadd.f32 %v12410_v28, %v5789_v58  ;;  %v5876_v42 = vpop.permute.xlu1 %5875  ;;  %v5784_v6 = vpop.permute.xlu0 %5783  ;;  %v4787_v43 = vsel %vm214_vm0, %v14451_v59, %v14450_v8  ;;  %v5186_v16 = vsel %vm684_vm2, %v14453_v39, %v14452_v13  ;;  %v5419_v36 = vsel %vm919_vm3, %v14455_v20, %v14454_v62  ;;  %v14463_v50 = vld [vmem:[#allocation770_spill] sm:$0xff]  ;;  %v14464_v27 = vld [vmem:[#allocation33_spill] sm:$0xff]  ;;  %v14469_v18 = vld [vmem:[#allocation75_spill] sm:$0xff] }
 0x7e0   : > { %v5786_v5 = vsel %vm1389_vm5, %v5782_v47, %v5784_v6  ;;  %v4958_v31 = vadd.f32 %v4952_v63, %v4724_v51  ;;  %v5191_v34 = vadd.f32 %v5185_v32, %v4957_v12  ;;  %v2327_v24 = vsel %vm684_vm2, %v14457_v4, %v14456_v25  ;;  %v14465_v58 = vld [vmem:[#allocation34_spill] sm:$0xff]  ;;  %v14468_v32 = vld [vmem:[#allocation64_spill] sm:$0xff]  ;;  %v14474_v39 = vld [vmem:[#allocation69_spill] sm:$0xff] }
 0x7e1   : > { %v6025_v56 = vadd.f32 %v6020_v3, %v6012_v30  ;;  %v5790_v28 = vadd.f32 %v5786_v5, %v5556_v21  ;;  %v4586_v35 = vadd.f32 %v12275_v11, %v4498_v23  ;;  %v4953_v29 = vsel %vm449_vm1, %v14459_v45, %v14458_v26  ;;  %v14471_v12 = vld [vmem:[#allocation48_spill] sm:$0xff]  ;;  %v14472_v30 = vld [vmem:[#allocation87_spill] sm:$0xff]  ;;  %v14477_v5 = vld [vmem:[#allocation333_spill] sm:$0xff] }
 0x7e2   : > { %v5420_v49 = vsel %vm919_vm3, %v14461_v0, %v14460_v1  ;;  %v4725_v38 = vadd.f32 %v4719_v57, %v4572_v7  ;;  %v5192_v47 = vadd.f32 %v5186_v16, %v4958_v31  ;;  %v5425_v19 = vadd.f32 %v5419_v36, %v5191_v34  ;;  %v14470_v57 = vld [vmem:[#allocation47_spill] sm:$0xff]  ;;  %v14473_v6 = vld [vmem:[#allocation88_spill] sm:$0xff]  ;;  %v14478_v31 = vld [vmem:[#allocation334_spill] sm:$0xff] }
 0x7e3   : > { %v6013_v3 = vadd.f32 %v12432_v44, %v5790_v28  ;;  %v5880_v60 = vpop.permute.xlu1 %5879  ;;  %v5878_v41 = vpop.permute.xlu0 %5877  ;;  %v4793_v10 = vadd.f32 %v4787_v43, %v4586_v35  ;;  %v5021_v11 = vsel %vm449_vm1, %v14463_v50, %v14462_v15  ;;  %v5187_v23 = vsel %vm684_vm2, %v14465_v58, %v14464_v27  ;;  %v14467_v44 = vld [vmem:[#allocation74_spill] sm:$0xff]  ;;  %v14475_v16 = vld [vmem:[#allocation80_spill] sm:$0xff]  ;;  %v14479_v25 = vld [vmem:[#allocation335_spill] sm:$0xff] }
 0x7e4   : > { %v5887_v51 = vsel %vm1389_vm5, %v5876_v42, %v5878_v41  ;;  %v4959_v40 = vadd.f32 %v4953_v29, %v4725_v38  ;;  %v5426_v48 = vadd.f32 %v5420_v49, %v5192_v47  ;;  %v5659_v7 = vadd.f32 %v12158_v61, %v5425_v19  ;;  %v14476_v20 = vld [vmem:[#allocation72_spill] sm:$0xff]  ;;  %v14481_v29 = vld [vmem:[#allocation337_spill] sm:$0xff]  ;;  %v14482_v1 = vld [vmem:[#allocation338_spill] sm:$0xff] }
 0x7e5   : > { %v6026_v63 = vadd.f32 %v6022_v33, %v6013_v3  ;;  %v2133_v9 = vadd.f32 %v14467_v44, %v14466_v52  ;;  %v2134_v54 = vadd.f32 %v14469_v18, %v14468_v32  ;;  %v5255_v21 = vsel %vm684_vm2, %v14471_v12, %v14470_v57  ;;  %v14480_v4 = vld [vmem:[#allocation336_spill] sm:$0xff]  ;;  %v14484_v49 = vld [vmem:[#allocation370_spill] sm:$0xff]  ;;  %v14485_v47 = vld [vmem:[#allocation371_spill] sm:$0xff] }
 0x7e6   : > { %v5421_v8 = vsel %vm919_vm3, %v14473_v6, %v14472_v30  ;;  %v5027_v42 = vadd.f32 %v5021_v11, %v4793_v10  ;;  %v5193_v59 = vadd.f32 %v5187_v23, %v4959_v40  ;;  %v5660_v43 = vadd.f32 %v12192_v55, %v5426_v48  ;;  %v14486_v19 = vld [vmem:[#allocation372_spill] sm:$0xff]  ;;  %v14488_v58 = vld [vmem:[#allocation373_spill] sm:$0xff]  ;;  %v14489_v23 = vld [vmem:[#allocation374_spill] sm:$0xff] }
 0x7e7   : > { %v5893_v61 = vadd.f32 %v5887_v51, %v5659_v7  ;;  %v5884_v33 = vpop.permute.xlu1 %5883  ;;  %v5882_v13 = vpop.permute.xlu0 %5881  ;;  %v2332_v62 = vadd.f32 %v14475_v16, %v14474_v39  ;;  %v2333_v36 = vadd.f32 %v2327_v24, %v14476_v20  ;;  %v2360_v34 = vsel %vm684_vm2, %v14478_v31, %v14477_v5  ;;  %v14483_v24 = vld [vmem:[#allocation369_spill] sm:$0xff]  ;;  %v14487_v41 = vld [vmem:[#allocation96_spill] sm:$0xff]  ;;  %v14490_v40 = vld [vmem:[#allocation375_spill] sm:$0xff] }
 0x7e8   : > { %v5888_v28 = vsel %vm1389_vm5, %v5880_v60, %v5882_v13  ;;  %v2361_v35 = vsel %vm684_vm2, %v14480_v4, %v14479_v25  ;;  %v5261_v55 = vadd.f32 %v5255_v21, %v5027_v42  ;;  %v5427_v26 = vadd.f32 %v5421_v8, %v5193_v59  ;;  %v14491_v48 = vld [vmem:[#allocation376_spill] sm:$0xff]  ;;  %v14493_v32 = vld [vmem:[#allocation378_spill] sm:$0xff]  ;;  %v14494_v30 = vld [vmem:[#allocation73_spill] sm:$0xff] }
 0x7e9   : > { %v5894_v45 = vadd.f32 %v5888_v28, %v5660_v43  ;;  %v2362_v0 = vsel %vm684_vm2, %v14482_v1, %v14481_v29  ;;  %v2560_v38 = vsel %vm919_vm3, %v14484_v49, %v14483_v24  ;;  %v2561_v3 = vsel %vm919_vm3, %v14486_v19, %v14485_v47  ;;  %v14498_v25 = vld [vmem:[#allocation412_spill] sm:$0xff]  ;;  %v14503_v29 = vld [vmem:[#allocation449_spill] sm:$0xff]  ;;  %v14504_v1 = vld [vmem:[#allocation450_spill] sm:$0xff] }
 0x7ea   : > { %v5495_v60 = vadd.f32 %v11755_v22, %v5261_v55  ;;  %v5661_v10 = vadd.f32 %v14487_v41, %v5427_v26  ;;  %v6031_v15 = vrot.slane %v5893_v61, 3  ;;  %v2594_v51 = vsel %vm919_vm3, %v14489_v23, %v14488_v58  ;;  %v14492_v22 = vld [vmem:[#allocation377_spill] sm:$0xff]  ;;  %v14502_v4 = vld [vmem:[#allocation416_spill] sm:$0xff]  ;;  %v14505_v24 = vld [vmem:[#allocation451_spill] sm:$0xff] }
 0x7eb   : > { %v6032_v50 = vrot.slane %v5894_v45, 3  ;;  %v5714_v11 = vpop.permute.xlu1 %5713  ;;  %v5886_v27 = vpop.permute.xlu0 %5885  ;;  %v2595_v7 = vsel %vm919_vm3, %v14491_v48, %v14490_v40  ;;  %v2596_v18 = vsel %vm919_vm3, %v14493_v32, %v14492_v22  ;;  %v2366_v6 = vadd.f32 %v2360_v34, %v14494_v30  ;;  %v14495_v61 = vld [vmem:[#allocation409_spill] sm:$0xff]  ;;  %v14497_v34 = vld [vmem:[#allocation411_spill] sm:$0xff]  ;;  %v14506_v49 = vld [vmem:[#allocation452_spill] sm:$0xff] }
 0x7ec   : > { %v5723_v52 = vsel %vm1154_vm4, %v12330_v14, %v5714_v11  ;;  %v5889_v44 = vsel %vm1389_vm5, %v5884_v33, %v5886_v27  ;;  %v2367_v8 = vadd.f32 %v2361_v35, %v2133_v9  ;;  %v2368_v42 = vadd.f32 %v2362_v0, %v2134_v54  ;;  %v14496_v33 = vld [vmem:[#allocation410_spill] sm:$0xff]  ;;  %v14511_v11 = vld [vmem:[#allocation455_spill] sm:$0xff]  ;;  %v14512_v27 = vld [vmem:[#allocation456_spill] sm:$0xff] }
 0x7ed   : > { %v6033_v57 = vsel %vm6030_vm8, %v6031_v15, %v6032_v50  ;;  %v12579_v12 = vadd.f32 %v5723_v52, %v5495_v60  ;;  %v5895_v21 = vadd.f32 %v5889_v44, %v5661_v10  ;;  %v2566_v43 = vadd.f32 %v2560_v38, %v2332_v62  ;;  %v14500_v54 = vld [vmem:[#allocation414_spill] sm:$0xff]  ;;  %v14509_v10 = vld [vmem:[#allocation453_spill] sm:$0xff]  ;;  %v6518_v44 = vld [vmem:[%s6701_s5 + $0x80] sm:$0x3f] }
 0x7ee   : > { %v12582_v59 = vadd.f32 %v6033_v57, %v6025_v56  ;;  %v2567_v14 = vadd.f32 %v2561_v3, %v2333_v36  ;;  %v2794_v13 = vsel %vm1154_vm4, %v14496_v33, %v14495_v61  ;;  %v2600_v5 = vadd.f32 %v2594_v51, %v2366_v6  ;;  %v14499_v56 = vld [vmem:[#allocation413_spill] sm:$0xff]  ;;  %v14501_v36 = vld [vmem:[#allocation415_spill] sm:$0xff]  ;;  %v14508_v60 = vld [vmem:[#allocation418_spill] sm:$0xff] }
 0x7ef   : > { %v6034_v39 = vrot.slane %v5895_v21, 3  ;;  %v12587_v16 = vpop.permute.xlu1 %5717  ;;  %v12589_v20 = vpop.permute.xlu0 %5715  ;;  %v2601_v31 = vadd.f32 %v2595_v7, %v2367_v8  ;;  %v2602_v28 = vadd.f32 %v2596_v18, %v2368_v42  ;;  %v2795_v9 = vsel %vm1154_vm4, %v14498_v25, %v14497_v34  ;;  %v14507_v3 = vld [vmem:[#allocation417_spill] sm:$0xff]  ;;  %v14510_v15 = vld [vmem:[#allocation454_spill] sm:$0xff]  ;;  %v6519_v6 = vld [vmem:[%s6701_s5 + $0x60] sm:$0xff] }
 0x7f0   : > { %v2828_v62 = vsel %vm1154_vm4, %v14500_v54, %v14499_v56  ;;  %v2829_v35 = vsel %vm1154_vm4, %v14502_v4, %v14501_v36  ;;  %v3125_v55 = vstv %s12553_s25  ;;  %v2800_v45 = vadd.f32 %v2794_v13, %v2566_v43  ;;  %v6517_v48 = vld [vmem:[%s6701_s5 + $0x70] sm:$0xff]  ;;  %v14513_v7 = vld [vmem:[#allocation89_spill] sm:$0xff]  ;;  %v14519_v36 = vld [vmem:[#allocation492_spill] sm:$0xff] }
 0x7f1   : > { %v6035_v26 = vsel %vm6030_vm8, %v6032_v50, %v6034_v39  ;;  %v3028_v0 = vsel %vm1389_vm5, %v14504_v1, %v14503_v29  ;;  %v3029_v38 = vsel %vm1389_vm5, %v14506_v49, %v14505_v24  ;;  %v2801_v19 = vadd.f32 %v2795_v9, %v2567_v14  ;;  %v14514_v57 = vld [vmem:[#allocation457_spill] sm:$0xff]  ;;  %v14515_v21 = vld [vmem:[#allocation458_spill] sm:$0xff] }
 0x7f2   : > { %v12608_v47 = vadd.f32 %v6035_v26, %v6026_v63  ;;  %v2830_v41 = vsel %vm1154_vm4, %v14508_v60, %v14507_v3  ;;  %v3062_v50 = vsel %vm1389_vm5, %v14510_v15, %v14509_v10  ;;  %v3063_v58 = vsel %vm1389_vm5, %v14512_v27, %v14511_v11  ;;  %v14520_v26 = vld [vmem:[#allocation529_spill] sm:$0xff]  ;;  %v14523_v24 = vld [vmem:[#allocation494_spill] sm:$0xff] }
 0x7f3   : > { %v12619_v23 = vpop.permute.xlu1 %5721  ;;  %v12621_v51 = vpop.permute.xlu0 %5719  ;;  %v2834_v63 = vadd.f32 %v2828_v62, %v2600_v5  ;;  %v2835_v40 = vadd.f32 %v2829_v35, %v2601_v31  ;;  %v3119_v52 = vmul.f32 %v6517_v48, %v14513_v7  ;;  %v3120_v22 = vmul.f32 %v6518_v44, %v14513_v7  ;;  %v14516_v5 = vld [vmem:[#allocation489_spill] sm:$0xff]  ;;  %v14517_v31 = vld [vmem:[#allocation490_spill] sm:$0xff]  ;;  %v14518_v62 = vld [vmem:[#allocation491_spill] sm:$0xff] }
 0x7f4   : > { %v3034_v32 = vadd.f32 %v3028_v0, %v2800_v45  ;;  %v3035_v18 = vadd.f32 %v3029_v38, %v2801_v19  ;;  %v3064_v30 = vsel %vm1389_vm5, %v14515_v21, %v14514_v57  ;;  %v3126_v8 = vmul.f32 %v6519_v6, %v3125_v55  ;;  %v14521_v45 = vld [vmem:[#allocation530_spill] sm:$0xff]  ;;  %v14522_v0 = vld [vmem:[#allocation493_spill] sm:$0xff]  ;;  %v14525_v38 = vld [vmem:[#allocation496_spill] sm:$0xff] }
 0x7f5   : > { %v2836_v42 = vadd.f32 %v2830_v41, %v2602_v28  ;;  %v3068_v43 = vadd.f32 %v3062_v50, %v2834_v63  ;;  %v3069_v14 = vadd.f32 %v3063_v58, %v2835_v40  ;;  %v3127_v61 = vmul.f32 %v6517_v48, %v3125_v55  ;;  %v14526_v15 = vld [vmem:[#allocation497_spill] sm:$0xff]  ;;  %v14527_v50 = vld [vmem:[#allocation498_spill] sm:$0xff] }
 0x7f6   : > { %v3323_v34 = vsel %vm214_vm0, %v14517_v31, %v14516_v5  ;;  %v3128_v25 = vmul.f32 %v6518_v44, %v3125_v55  ;;  %v3122_v56 = vadd.f32 %v3119_v52, %v3034_v32  ;;  %v3123_v54 = vadd.f32 %v3120_v22, %v3035_v18  ;;  %v14524_v55 = vld [vmem:[#allocation495_spill] sm:$0xff]  ;;  %v14528_v27 = vld [vmem:[#allocation569_spill] sm:$0xff]  ;;  %v14529_v58 = vld [vmem:[#allocation570_spill] sm:$0xff] }
 0x7f7   : > { %v5913_v33 = vpop.permute.xlu1 %5912  ;;  %v5911_v13 = vpop.permute.xlu0 %5910  ;;  %v3070_v39 = vadd.f32 %v3064_v30, %v2836_v42  ;;  %v3324_v4 = vsel %vm214_vm0, %v14519_v36, %v14518_v62  ;;  %v3129_v28 = vadd.f32 %v3126_v8, %v3068_v43  ;;  %v3130_v35 = vadd.f32 %v3127_v61, %v3069_v14  ;;  %v14530_v52 = vld [vmem:[#allocation531_spill] sm:$0xff]  ;;  %v14531_v44 = vld [vmem:[#allocation532_spill] sm:$0xff]  ;;  %v14532_v57 = vld [vmem:[#allocation609_spill] sm:$0xff] }
 0x7f8   : > { %v5922_v9 = vsel %vm1389_vm5, %v5911_v13, %v5913_v33  ;;  %v3557_v29 = vsel %vm449_vm1, %v14521_v45, %v14520_v26  ;;  %v3329_v1 = vadd.f32 %v3323_v34, %v3122_v56  ;;  %v3357_v49 = vsel %vm214_vm0, %v14523_v24, %v14522_v0  ;;  %v14533_v21 = vld [vmem:[#allocation610_spill] sm:$0xff]  ;;  %v14534_v13 = vld [vmem:[#allocation571_spill] sm:$0xff]  ;;  %v14545_v24 = vld [vmem:[#allocation692_spill] sm:$0xff] }
 0x7f9   : > { %v3358_v19 = vsel %vm214_vm0, %v14525_v38, %v14524_v55  ;;  %v5928_v3 = vadd.f32 %v5922_v9, %v12255_v2  ;;  %v3131_v10 = vadd.f32 %v3128_v25, %v3070_v39  ;;  %v3359_v11 = vsel %vm214_vm0, %v14527_v50, %v14526_v15  ;;  %v14535_v39 = vld [vmem:[#allocation572_spill] sm:$0xff]  ;;  %v14536_v31 = vld [vmem:[#allocation651_spill] sm:$0xff]  ;;  %v14538_v9 = vld [vmem:[#allocation533_spill] sm:$0xff] }
 0x7fa   : > { %v3791_v63 = vsel %vm684_vm2, %v14529_v58, %v14528_v27  ;;  %v3330_v48 = vadd.f32 %v3324_v4, %v3123_v54  ;;  %v3563_v7 = vadd.f32 %v3557_v29, %v3329_v1  ;;  %v3558_v22 = vsel %vm449_vm1, %v14531_v44, %v14530_v52  ;;  %v14539_v56 = vld [vmem:[#allocation534_spill] sm:$0xff]  ;;  %v14542_v45 = vld [vmem:[#allocation611_spill] sm:$0xff]  ;;  %v14543_v29 = vld [vmem:[#allocation612_spill] sm:$0xff] }
 0x7fb   : > { %v5917_v60 = vpop.permute.xlu1 %5916  ;;  %v5915_v41 = vpop.permute.xlu0 %5914  ;;  %v3363_v32 = vadd.f32 %v3357_v49, %v3129_v28  ;;  %v3364_v18 = vadd.f32 %v3358_v19, %v3130_v35  ;;  %v4025_v30 = vsel %vm919_vm3, %v14533_v21, %v14532_v57  ;;  %v3365_v6 = vadd.f32 %v3359_v11, %v3131_v10  ;;  %v14540_v28 = vld [vmem:[#allocation535_spill] sm:$0xff]  ;;  %v14541_v35 = vld [vmem:[#allocation536_spill] sm:$0xff]  ;;  %v14546_v38 = vld [vmem:[#allocation537_spill] sm:$0xff] }
 0x7fc   : > { %v5923_v40 = vsel %vm1389_vm5, %v5915_v41, %v5917_v60  ;;  %v3797_v8 = vadd.f32 %v3791_v63, %v3563_v7  ;;  %v6044_v42 = vrot.slane %v5928_v3, 4  ;;  %v3564_v33 = vadd.f32 %v3558_v22, %v3330_v48  ;;  %v14544_v0 = vld [vmem:[#allocation691_spill] sm:$0xff]  ;;  %v14548_v11 = vld [vmem:[#allocation573_spill] sm:$0xff]  ;;  %v14549_v27 = vld [vmem:[#allocation574_spill] sm:$0xff] }
 0x7fd   : > { %v5929_v2 = vadd.f32 %v5923_v40, %v12285_v37  ;;  %v3792_v5 = vsel %vm684_vm2, %v14535_v39, %v14534_v13  ;;  %v14537_v37 = vld [vmem:[#allocation652_spill] sm:$0xff]  ;;  %v3591_v54 = vsel %vm449_vm1, %v14539_v56, %v14538_v9  ;;  %v3592_v26 = vsel %vm449_vm1, %v14541_v35, %v14540_v28  ;;  %v14550_v63 = vld [vmem:[#allocation575_spill] sm:$0xff]  ;;  %v14552_v48 = vld [vmem:[#allocation653_spill] sm:$0xff] }
 0x7fe   : > { %v4259_v34 = vsel %vm1154_vm4, %v14537_v37, %v14536_v31  ;;  %v4031_v62 = vadd.f32 %v4025_v30, %v3797_v8  ;;  %v4026_v1 = vsel %vm919_vm3, %v14543_v29, %v14542_v45  ;;  %v4493_v49 = vsel %vm1389_vm5, %v14545_v24, %v14544_v0  ;;  %v14551_v40 = vld [vmem:[#allocation576_spill] sm:$0xff]  ;;  %v14553_v7 = vld [vmem:[#allocation654_spill] sm:$0xff]  ;;  %v14554_v8 = vld [vmem:[#allocation693_spill] sm:$0xff] }
 0x7ff   : > { %v6045_v43 = vrot.slane %v5929_v2, 4  ;;  %v5921_v14 = vpop.permute.xlu1 %5920  ;;  %v5919_v61 = vpop.permute.xlu0 %5918  ;;  %v3798_v3 = vadd.f32 %v3792_v5, %v3564_v33  ;;  %v3597_v50 = vadd.f32 %v3591_v54, %v3363_v32  ;;  %v3825_v58 = vsel %vm684_vm2, %v14549_v27, %v14548_v11  ;;  %v6520_v2 = vld [vmem:[%s6701_s5 + $0xa0] sm:$0xff]  ;;  %v14556_v13 = vld [vmem:[#allocation613_spill] sm:$0xff]  ;;  %v14557_v39 = vld [vmem:[#allocation614_spill] sm:$0xff] }
 0x800   : > { %v5924_v25 = vsel %vm1389_vm5, %v5919_v61, %v5921_v14  ;;  %v4265_v60 = vadd.f32 %v4259_v34, %v4031_v62  ;;  %v4260_v52 = vsel %vm1154_vm4, %v14553_v7, %v14552_v48  ;;  %v4584_v57 = vmul.f32 %v6520_v2, %v12227_v17  ;;  %v14558_v31 = vld [vmem:[#allocation615_spill] sm:$0xff]  ;;  %v14559_v37 = vld [vmem:[#allocation616_spill] sm:$0xff]  ;;  %v14560_v9 = vld [vmem:[#allocation577_spill] sm:$0xff] }
 0x801   : > { %v6046_v36 = vsel %vm6043_vm9, %v6044_v42, %v6045_v43  ;;  %v5930_v4 = vadd.f32 %v5924_v25, %v12317_v46  ;;  %v14547_v46 = vld [vmem:[#allocation538_spill] sm:$0xff]  ;;  %v4032_v44 = vadd.f32 %v4026_v1, %v3798_v3  ;;  %v3598_v21 = vadd.f32 %v3592_v26, %v3364_v18  ;;  %v14562_v54 = vld [vmem:[#allocation731_spill] sm:$0xff]  ;;  %v14563_v62 = vld [vmem:[#allocation732_spill] sm:$0xff] }
 0x802   : > { %v12686_v55 = vadd.f32 %v6046_v36, %v12582_v59  ;;  %v3593_v19 = vsel %vm449_vm1, %v14547_v46, %v14546_v38  ;;  %v3826_v59 = vsel %vm684_vm2, %v14551_v40, %v14550_v63  ;;  %v4499_v22 = vadd.f32 %v4493_v49, %v4265_v60  ;;  %v14555_v42 = vld [vmem:[#allocation694_spill] sm:$0xff]  ;;  %v14564_v35 = vld [vmem:[#allocation655_spill] sm:$0xff]  ;;  %v14565_v26 = vld [vmem:[#allocation656_spill] sm:$0xff] }
 0x803   : > { %v6047_v41 = vrot.slane %v5930_v4, 4  ;;  %v12691_v10 = vpop.permute.xlu1 %5748  ;;  %v12693_v15 = vpop.permute.xlu0 %5746  ;;  %v3599_v30 = vadd.f32 %v3593_v19, %v3365_v6  ;;  %v4494_v14 = vsel %vm1389_vm5, %v14555_v42, %v14554_v8  ;;  %v3831_v33 = vadd.f32 %v3825_v58, %v3597_v50  ;;  %v14561_v56 = vld [vmem:[#allocation578_spill] sm:$0xff]  ;;  %v14566_v29 = vld [vmem:[#allocation657_spill] sm:$0xff]  ;;  %v14568_v3 = vld [vmem:[#allocation771_spill] sm:$0xff] }
 0x804   : > { %v4059_v5 = vsel %vm919_vm3, %v14557_v39, %v14556_v13  ;;  %v4060_v34 = vsel %vm919_vm3, %v14559_v37, %v14558_v31  ;;  %v3832_v25 = vadd.f32 %v3826_v59, %v3598_v21  ;;  %v4788_v36 = vsel %vm214_vm0, %v14563_v62, %v14562_v54  ;;  %v6521_v4 = vld [vmem:[%s6701_s5 + $0xb0] sm:$0x3f]  ;;  %v14569_v60 = vld [vmem:[#allocation772_spill] sm:$0xff]  ;;  %v14570_v11 = vld [vmem:[#allocation695_spill] sm:$0xff]  ;;  %s148_s5 = sand.u32 1, %s6595_s10  }
 0x805   : > { %v6048_v32 = vsel %vm6043_vm9, %v6045_v43, %v6047_v41  ;;  %v4266_v43 = vadd.f32 %v4260_v52, %v4032_v44  ;;  %v4585_v28 = vmul.f32 %v6521_v4, %v12227_v17  ;;  %v4293_v45 = vsel %vm1154_vm4, %v14565_v26, %v14564_v35  ;;  %v14567_v1 = vld [vmem:[#allocation658_spill] sm:$0xff]  ;;  %v14571_v17 = vld [vmem:[#allocation696_spill] sm:$0xff]  ;;  %v14572_v58 = vld [vmem:[#allocation697_spill] sm:$0xff]  ;;  %s6187_s26 = sshll.u32 %s148_s5, 4  ;;  %s12840_s7 = scalar_lea.sflag [#allocation3], %s148_s5 }
 0x806   : > { %v12711_v61 = vadd.f32 %v6048_v32, %v12608_v47  ;;  %v3827_v47 = vsel %vm684_vm2, %v14561_v56, %v14560_v9  ;;  %v4294_v0 = vsel %vm1154_vm4, %v14567_v1, %v14566_v29  ;;  %v4587_v49 = vadd.f32 %v4584_v57, %v4499_v22  ;;  %v14573_v63 = vld [vmem:[#allocation698_spill] sm:$0xff]  ;;  %v14574_v22 = vld [vmem:[#allocation733_spill] sm:$0xff]  ;;  %v14582_v56 = vld [vmem:[#allocation659_spill] sm:$0xff]  ;;  %s150_s6 = scalar_lea.vmem [#allocation5], %s6187_s26 }
 0x807   : > { %v12719_v18 = vpop.permute.xlu1 %5752  ;;  %v12721_v6 = vpop.permute.xlu0 %5750  ;;  %v4500_v24 = vadd.f32 %v4494_v14, %v4266_v43  ;;  %v4065_v38 = vadd.f32 %v4059_v5, %v3831_v33  ;;  %v4066_v46 = vadd.f32 %v4060_v34, %v3832_v25  ;;  %v4590_v19 = vstv %s12683_s24  ;;  %v14575_v57 = vld [vmem:[#allocation734_spill] sm:$0xff]  ;;  %v14576_v21 = vld [vmem:[#allocation49_spill] sm:$0xff]  ;;  %v14585_v29 = vld [vmem:[#allocation52_spill] sm:$0xff]  ;;  %s6107_s28 = sshll.u32 %s150_s6, 4  ;;  %s12838_s28 = int_to_ptr.vmem [resolvable:$true] %s6107_s28 }
 0x808   : > { %v5022_v41 = vsel %vm449_vm1, %v14569_v60, %v14568_v3  ;;  %v3833_v50 = vadd.f32 %v3827_v47, %v3599_v30  ;;  %v4527_v27 = vsel %vm1389_vm5, %v14571_v17, %v14570_v11  ;;  %v4528_v40 = vsel %vm1389_vm5, %v14573_v63, %v14572_v58  ;;  %v14577_v30 = vld [vmem:[#allocation50_spill] sm:$0xff]  ;;  %v14578_v42 = vld [vmem:[#allocation617_spill] sm:$0xff]  ;;  %v14583_v47 = vld [vmem:[#allocation660_spill] sm:$0xff]  ;;  %s6537_s22 = scalar_lea.vmem %s12838_s28, 256  ;;  %p6544_p13 = scmp.lt.s32.totalorder %s12838_s28, %s6542_s8 }
 0x809   : > { %v4794_v59 = vadd.f32 %v4788_v36, %v4587_v49  ;;  %v4299_v52 = vadd.f32 %v4293_v45, %v4065_v38  ;;  %v4300_v44 = vadd.f32 %v4294_v0, %v4066_v46  ;;  %v4789_v32 = vsel %vm214_vm0, %v14575_v57, %v14574_v22  ;;  %v14579_v14 = vld [vmem:[#allocation618_spill] sm:$0xff]  ;;  %v14580_v43 = vld [vmem:[#allocation773_spill] sm:$0xff]  ;;  %v14586_v0 = vld [vmem:[#allocation699_spill] sm:$0xff]  ;;  %p6538_p9 = scmp.ne.s32.totalorder %s12838_s28, %s6537_s22  ;;  %p6545_p0 = scmp.lt.s32.totalorder %s6543_s14, %s6537_s22 }
 0x80a   : > { %v5256_v8 = vsel %vm684_vm2, %v14577_v30, %v14576_v21  ;;  %v4061_v33 = vsel %vm919_vm3, %v14579_v14, %v14578_v42  ;;  %v4588_v13 = vadd.f32 %v4585_v28, %v4500_v24  ;;  %v4591_v39 = vmul.f32 %v12271_v53, %v4590_v19  ;;  %v14581_v25 = vld [vmem:[#allocation774_spill] sm:$0xff]  ;;  %v14584_v28 = vld [vmem:[#allocation51_spill] sm:$0xff]  ;;  %v14587_v24 = vld [vmem:[#allocation700_spill] sm:$0xff] }
 0x80b   : > { %v12747_v48 = vpop.permute.xlu1 %5756  ;;  %v12749_v7 = vpop.permute.xlu0 %5754  ;;  %v5028_v5 = vadd.f32 %v5022_v41, %v4794_v59  ;;  %v4533_v31 = vadd.f32 %v4527_v27, %v4299_v52  ;;  %v4534_v37 = vadd.f32 %v4528_v40, %v4300_v44  ;;  %v4592_v34 = vmul.f32 %v6520_v2, %v4590_v19  ;;  %v14588_v3 = vld [vmem:[#allocation91_spill] sm:$0xff]  ;;  %v14590_v17 = vld [vmem:[#allocation736_spill] sm:$0xff]  ;;  %v14591_v63 = vld [vmem:[#allocation737_spill] sm:$0xff]  ;;  %p6539_p10 = pnand %p6538_p9, %p6668_p5  ;;  %p6546_p1 = por %p6545_p0, %p6544_p13 }
 0x80c   : > { %v5023_v9 = vsel %vm449_vm1, %v14581_v25, %v14580_v43  ;;  %v4295_v54 = vsel %vm1154_vm4, %v14583_v47, %v14582_v56  ;;  %v4795_v62 = vadd.f32 %v4789_v32, %v4588_v13  ;;  %v4067_v45 = vadd.f32 %v4061_v33, %v3833_v50  ;;  %v14589_v11 = vld [vmem:[#allocation735_spill] sm:$0xff]  ;;  %v14592_v40 = vld [vmem:[#allocation738_spill] sm:$0xff]  ;;  %v14594_v57 = vld [vmem:[#allocation776_spill] sm:$0xff] }
 0x80d   : > { %v5262_v36 = vadd.f32 %v5256_v8, %v5028_v5  ;;  %v5257_v53 = vsel %vm684_vm2, %v14585_v29, %v14584_v28  ;;  %v5724_v2 = vsel %vm1154_vm4, %v12589_v20, %v12587_v16  ;;  %v4529_v49 = vsel %vm1389_vm5, %v14587_v24, %v14586_v0  ;;  %v14593_v22 = vld [vmem:[#allocation775_spill] sm:$0xff]  ;;  %v14595_v42 = vld [vmem:[#allocation92_spill] sm:$0xff]  ;;  %v14604_v0 = vld [vmem:[#allocation10_spill] sm:$0xff]  ;;  %p6540_p12 = pneg %p6539_p10 }
 0x80e   : > { %v4593_v38 = vmul.f32 %v6521_v4, %v4590_v19  ;;  %v5029_v46 = vadd.f32 %v5023_v9, %v4795_v62  ;;  %v4301_v41 = vadd.f32 %v4295_v54, %v4067_v45  ;;  %v4594_v50 = vadd.f32 %v4591_v39, %v4533_v31  ;;  %v14596_v39 = vld [vmem:[#allocation8_spill] sm:$0xff]  ;;  %v14598_v31 = vld [vmem:[#allocation53_spill] sm:$0xff]  ;;  %v14600_v54 = vld [vmem:[#allocation739_spill] sm:$0xff] }
 0x80f   : > { %v5948_v35 = vpop.permute.xlu1 %5947  ;;  %v5946_v26 = vpop.permute.xlu0 %5945  ;;  %v5496_v60 = vadd.f32 %v14588_v3, %v5262_v36  ;;  %v4822_v27 = vsel %vm214_vm0, %v14590_v17, %v14589_v11  ;;  %v4595_v58 = vadd.f32 %v4592_v34, %v4534_v37  ;;  %v4823_v16 = vsel %vm214_vm0, %v14592_v40, %v14591_v63  ;;  %v14599_v37 = vld [vmem:[#allocation54_spill] sm:$0xff]  ;;  %v14601_v62 = vld [vmem:[#allocation740_spill] sm:$0xff]  ;;  %v14605_v24 = vld [vmem:[#allocation11_spill] sm:$0xff]  ;;  %p6547_p2 = pnand %p6546_p1, %p6540_p12 }
 0x810   : > { %v5957_v1 = vsel %vm1389_vm5, %v5946_v26, %v5948_v35  ;;  %v5263_v20 = vadd.f32 %v5257_v53, %v5029_v46  ;;  %v4535_v19 = vadd.f32 %v4529_v49, %v4301_v41  ;;  %v5056_v32 = vsel %vm449_vm1, %v14594_v57, %v14593_v22  ;;  %v14602_v35 = vld [vmem:[#allocation55_spill] sm:$0xff]  ;;  %v14603_v26 = vld [vmem:[#allocation56_spill] sm:$0xff]  ;;  %v14606_v41 = vld [vmem:[#allocation93_spill] sm:$0xff] }
 0x811   : > { %v5730_v59 = vadd.f32 %v5724_v2, %v5496_v60  ;;  %v5963_v52 = vadd.f32 %v5957_v1, %v12579_v12  ;;  %v5725_v21 = vsel %vm1154_vm4, %v12621_v51, %v12619_v23  ;;  %v4828_v8 = vadd.f32 %v4822_v27, %v4594_v50  ;;  %v14597_v12 = vld [vmem:[#allocation9_spill] sm:$0xff]  ;;  %v14608_v63 = vld [vmem:[#allocation58_spill] sm:$0xff] }
 0x812   : > { %v5497_v14 = vadd.f32 %v14595_v42, %v5263_v20  ;;  %v4829_v13 = vadd.f32 %v4823_v16, %v4595_v58  ;;  %v5057_v5 = vsel %vm449_vm1, %v14597_v12, %v14596_v39  ;;  %v5290_v34 = vsel %vm684_vm2, %v14599_v37, %v14598_v31  ;;  %v14607_v58 = vld [vmem:[#allocation57_spill] sm:$0xff] }
 0x813   : > { %v5952_v44 = vpop.permute.xlu1 %5951  ;;  %v5950_v4 = vpop.permute.xlu0 %5949  ;;  %v5062_v43 = vadd.f32 %v5056_v32, %v4828_v8  ;;  %v6057_v9 = vrot.slane %v5963_v52, 5  ;;  %v4596_v47 = vadd.f32 %v4593_v38, %v4535_v19  ;;  %v4824_v36 = vsel %vm214_vm0, %v14601_v62, %v14600_v54 }
 0x814   : > { %v5958_v30 = vsel %vm1389_vm5, %v5950_v4, %v5952_v44  ;;  %v5731_v25 = vadd.f32 %v5725_v21, %v5497_v14  ;;  %v5291_v45 = vsel %vm684_vm2, %v14603_v26, %v14602_v35  ;;  %v5063_v29 = vadd.f32 %v5057_v5, %v4829_v13 }
 0x815   : > { %v5964_v33 = vadd.f32 %v5958_v30, %v5730_v59  ;;  %v5296_v53 = vadd.f32 %v5290_v34, %v5062_v43  ;;  %v5058_v49 = vsel %vm449_vm1, %v14605_v24, %v14604_v0  ;;  %v5758_v38 = vsel %vm1154_vm4, %v12693_v15, %v12691_v10  ;;  %v14609_v15 = vld [vmem:[#allocation94_spill] sm:$0xff] }
 0x816   : > { %v4830_v3 = vadd.f32 %v4824_v36, %v4596_v47  ;;  %v5297_v60 = vadd.f32 %v5291_v45, %v5063_v29  ;;  %v5292_v40 = vsel %vm684_vm2, %v14608_v63, %v14607_v58  ;;  %v5759_v16 = vsel %vm1154_vm4, %v12721_v6, %v12719_v18  ;;  %v14610_v6 = vld [vmem:[#allocation95_spill] sm:$0xff] }
 0x817   : > { %v6058_v23 = vrot.slane %v5964_v33, 5  ;;  %v5956_v51 = vpop.permute.xlu1 %5955  ;;  %v5954_v56 = vpop.permute.xlu0 %5953  ;;  %v5530_v50 = vadd.f32 %v14606_v41, %v5296_v53  ;;  %v5760_v21 = vsel %vm1154_vm4, %v12749_v7, %v12747_v48 }
 0x818   : > { %v5959_v28 = vsel %vm1389_vm5, %v5954_v56, %v5956_v51  ;;  %v5064_v10 = vadd.f32 %v5058_v49, %v4830_v3 }
 0x819   : > { %v6059_v2 = vsel %vm6056_vm10, %v6057_v9, %v6058_v23  ;;  %v5965_v1 = vadd.f32 %v5959_v28, %v5731_v25  ;;  %v5764_v59 = vadd.f32 %v5758_v38, %v5530_v50 }
 0x81a   : > { %v6064_v46 = vadd.f32 %v6059_v2, %v12686_v55  ;;  %v5531_v55 = vadd.f32 %v14609_v15, %v5297_v60  ;;  %v5298_v4 = vadd.f32 %v5292_v40, %v5064_v10 }
 0x81b   : > { %v6060_v11 = vrot.slane %v5965_v1, 5  ;;  %v5983_v17 = vpop.permute.xlu1 %5982  ;;  %v5981_v27 = vpop.permute.xlu0 %5980 }
 0x81c   : > { %v5992_v20 = vsel %vm1389_vm5, %v5981_v27, %v5983_v17  ;;  %v5765_v19 = vadd.f32 %v5759_v16, %v5531_v55  ;;  %v5532_v30 = vadd.f32 %v14610_v6, %v5298_v4 }
 0x81d   : > { %v6061_v52 = vsel %vm6056_vm10, %v6058_v23, %v6060_v11  ;;  %v5998_v22 = vadd.f32 %v5992_v20, %v5764_v59 }
 0x81e   : > { %v6065_v44 = vadd.f32 %v6061_v52, %v12711_v61  ;;  %v5766_v42 = vadd.f32 %v5760_v21, %v5532_v30 }
 0x81f   : > { %v5987_v57 = vpop.permute.xlu1 %5986  ;;  %v5985_v32 = vpop.permute.xlu0 %5984  ;;  %v6070_v14 = vrot.slane %v5998_v22, 6 }
 0x820   : > { %v5993_v18 = vsel %vm1389_vm5, %v5985_v32, %v5987_v57 }
 0x821   : > { %v5999_v8 = vadd.f32 %v5993_v18, %v5765_v19 }
 0x823   : > { %v6071_v33 = vrot.slane %v5999_v8, 6  ;;  %v5991_v13 = vpop.permute.xlu1 %5990  ;;  %v5989_v61 = vpop.permute.xlu0 %5988 }
 0x824   : > { %v5994_v39 = vsel %vm1389_vm5, %v5989_v61, %v5991_v13 }
 0x825   : > { %v6072_v12 = vsel %vm6069_vm11, %v6070_v14, %v6071_v33  ;;  %v6000_v5 = vadd.f32 %v5994_v39, %v5766_v42 }
 0x826   : > { %v6077_v31 = vadd.f32 %v6072_v12, %v6064_v46 }
 0x827   : > { %v6073_v37 = vrot.slane %v6000_v5, 6 }
 0x828   : > { %v6402_v48 = vmul.f32 -1.442695, %v6077_v31 }
 0x829   : > { %v6074_v7 = vsel %vm6069_vm11, %v6071_v33, %v6073_v37 }
 0x82a   : > { %6469 = vpow2.f32 %v6402_v48  ;;  %v6078_v34 = vadd.f32 %v6074_v7, %v6065_v44 }
 0x82c   : > { %v6403_v43 = vmul.f32 -1.442695, %v6078_v34 }
 0x82e   : > { %6471 = vpow2.f32 %v6403_v43 }
 0x834   : > { %v6470_v25 = vpop.eup %6469 }
 0x835   : > { %v6085_v9 = vadd.f32 1.0, %v6470_v25 }
 0x837   : > { %6473 = vrcp.f32 %v6085_v9 }
 0x838   : > { %v6472_v23 = vpop.eup %6471 }
 0x839   : > { %v6086_v51 = vadd.f32 1.0, %v6472_v23 }
 0x83b   : > { %6475 = vrcp.f32 %v6086_v51 }
 0x841   : > { %v6474_v56 = vpop.eup %6473 }
 0x842   : > { %6091 = vst [vmem:[%s150_s6] sm:$0xff] %v6474_v56 }
 0x845   : > { %v6476_v47 = vpop.eup %6475 }
 0x846   : > { %6092 = vst [vmem:[%s150_s6 + $0x8] sm:$0xff] %v6476_v47 }
 0x847   : > { %6550 = shalt.err (!%p6547_p2)
}
 0x848   : > { %s6551_s23 = scalar_lea.hbm %s12836_s3, 256  ;;  %s6555_s17 = scalar_lea.hbm %s12883_s2, 512 }
 0x849   : > { %p6552_p3 = scmp.ne.s32.totalorder %s12836_s3, %s6551_s23  ;;  %p6556_p8 = scmp.lt.u32.totalorder %s12836_s3, %s12883_s2 }
 0x84a   : > { %p6557_p11 = scmp.lt.u32.totalorder %s6555_s17, %s6551_s23  ;;  %p6559_p10 = scmp.lt.u32.totalorder %s6551_s23, %s12836_s3 }
 0x84b   : > { %p6553_p4 = pnand %p6552_p3, %p6668_p5 }
 0x84c   : > { %p6558_p9 = por %p6557_p11, %p6556_p8 }
 0x84d   : > { %p6554_p7 = pneg %p6553_p4 }
 0x84e   : > { %p6560_p12 = por %p6559_p10, %p6558_p9 }
 0x850   : > { %p6561_p13 = pnand %p6560_p12, %p6554_p7 }
 0x852   : > { %6564 = shalt.err (!%p6561_p13)
}
 0x853   : > { %s6613_s24 = smov 128   ;;  %s6614_s5 = smov 8  }
 0x854   : > { %6415 = dma.vmem_to_hbm [thread:$0]  (%p6668_p5), %s12838_s28, 256, %s12836_s3, %s12840_s7, %s6613_s24, %s6613_s24, %s6614_s5  }
 0x855 PF: > { %p6427_p0 = scmp.ge.s32.totalorder %s6603_s12, 2  ;;  %s6122_s26 = sand.u32 1, %s6591_s9  }
 0x856   : > { %s6123_s27 = scalar_lea.sflag [#allocation3], %s6122_s26 }
 0x857   : > { %p6422_p1 = pnand %p6427_p0, %p6672_p6 }
 0x859   : > { %6586 = dma.done.wait (!%p6422_p1), %s6123_s27, 256  }
 0x85a   : > { %6588 = vsyncadd (!%p6422_p1), %s6123_s27, 4294967040  ;;  %p13_p2 = scmp.ge.s32.totalorder %s6655_s15, 4   ;;  %s14611_s9 = smov %s6595_s10 }
 0x85b   : > { %s14612_s10 = smov %s6599_s11  ;;  %s14613_s11 = smov %s6666_s18 }
 0x85c   : > { %s14614_s12 = smov %s6655_s15  ;;  %15 = sbr.rel (!%p13_p2) target bundleno = 4 (0x4), region = 71 }
 0x863   :  { %6128 = vsyncpa [#allocation3], 1 }
 0x864   :  { %6130 = vsyncpa [#allocation3 + $0x1], 1 }
 0x865   :  { %6131 = vsyncpa [#allocation4], 1 }
 0x866   :  { %6133 = vsyncpa [#allocation4 + $0x1], 1 }

</bundles_post_ra>
